<compile_context>
chip_gen: v6e
topology: v6e:2x2x1
jax: 0.10.0
libtpu: 0.0.40
codegen_flags: <defaults>
</compile_context>

<pallas_src>
import functools

import jax
import jax.numpy as jnp
from jax.experimental import pallas as pl
from jax.experimental.pallas import tpu as pltpu

EPS = 1e-5  # PyTorch GroupNorm default


# ----------------------------- in-kernel helpers -----------------------------

def _group_norm(y, gmat, gamma, beta, inv_cnt):
    """GroupNorm on y: (Nb, HW, C) f32.

    gmat: (C, C) f32 block-diagonal ones (one block per channel group); a
    matmul with it broadcasts per-group sums back to every channel, so no
    lane-splitting reshapes are needed.  Variance is E[y^2] - mean^2 so both
    sublane reductions / both gmat matmuls are independent.
    """
    s1 = jnp.sum(y, axis=1)                                        # (Nb, C)
    s2 = jnp.sum(y * y, axis=1)                                    # (Nb, C)
    mean = jnp.dot(s1, gmat, preferred_element_type=jnp.float32) * inv_cnt
    ex2 = jnp.dot(s2, gmat, preferred_element_type=jnp.float32) * inv_cnt
    inv_std = jax.lax.rsqrt(ex2 - mean * mean + EPS)
    return (y - mean[:, None, :]) * inv_std[:, None, :] * gamma + beta


# ----------------------------- Pallas kernels ------------------------------

def _stem_kernel(p_ref, w_ref, g_ref, b_ref, gm_ref, o_ref, *, num_groups):
    """patches (Nb,HW,27) bf16 @ w (27,16) bf16 -> GroupNorm -> ReLU -> bf16."""
    nb, hw, kd = p_ref.shape
    c = w_ref.shape[1]
    cpg = c // num_groups
    y = jnp.dot(p_ref[...].reshape(nb * hw, kd), w_ref[...],
                preferred_element_type=jnp.float32).reshape(nb, hw, c)
    y = _group_norm(y, gm_ref[...], g_ref[...], b_ref[...], 1.0 / (hw * cpg))
    o_ref[...] = jnp.maximum(y, 0.0).astype(o_ref.dtype)


def _block_kernel(*refs, planes, cin, wo, num_groups, has_sc, with_head):
    """Fused BasicBlock:
       conv1(+merged 1x1 shortcut) -> GN -> ReLU -> conv2 (9 shifted matmuls,
       in VMEM) -> GN -> +residual -> ReLU -> (store bf16 | pooled linear head).
    """
    if with_head:
        (p_ref, w1_ref, g1_ref, b1_ref, gm1_ref,
         w2_ref, g2_ref, b2_ref, gm2_ref, lw_ref, lb_ref, o_ref) = refs
    else:
        (p_ref, w1_ref, g1_ref, b1_ref, gm1_ref,
         w2_ref, g2_ref, b2_ref, gm2_ref, o_ref) = refs

    nb, hw, kd = p_ref.shape
    c1 = w1_ref.shape[1]                       # planes or 2*planes (merged sc)
    cpg = planes // num_groups
    inv_cnt = 1.0 / (hw * cpg)

    patches = p_ref[...]                                           # bf16

    # conv1 (+ merged 1x1 shortcut occupying the center 3x3 tap) -> GroupNorm.
    y1 = jnp.dot(patches.reshape(nb * hw, kd), w1_ref[...],
                 preferred_element_type=jnp.float32).reshape(nb, hw, c1)
    y1 = _group_norm(y1, gm1_ref[...], g1_ref[...], b1_ref[...], inv_cnt)

    if has_sc:
        main = jnp.maximum(y1[:, :, :planes], 0.0)                 # ReLU main only
        shortcut = y1[:, :, planes:]                               # GN'd 1x1 conv
    else:
        main = jnp.maximum(y1, 0.0)
        # Identity residual == block input == center tap of the 3x3 patches.
        shortcut = patches[:, :, 4 * cin:5 * cin].astype(jnp.float32)

    # conv2 (3x3, stride 1, pad 1) entirely in VMEM: 9 accumulated matmuls
    # over row-shifted views of `main`.  Shifting the flattened (HW, C) rows by
    # s = oi*wo + oj places spatial tap (oi, oj) under every output pixel;
    # zero end-padding handles the top/bottom border and a per-column mask
    # handles the left/right wrap-around.
    pad_len = wo + 1
    zpad = jnp.zeros((nb, pad_len, planes), jnp.float32)
    padded = jnp.concatenate([zpad, main, zpad], axis=1)           # (nb, hw+2p, C)
    xcol = jax.lax.broadcasted_iota(jnp.int32, (1, hw, 1), 1) % wo

    acc = jnp.zeros((nb * hw, planes), jnp.float32)
    for di in range(3):
        for dj in range(3):
            oi, oj = di - 1, dj - 1
            s = oi * wo + oj
            win = padded[:, pad_len + s: pad_len + s + hw, :]
            if oj == -1:
                win = jnp.where(xcol >= 1, win, 0.0)
            elif oj == 1:
                win = jnp.where(xcol < wo - 1, win, 0.0)
            acc = acc + jnp.dot(
                win.astype(jnp.bfloat16).reshape(nb * hw, planes),
                w2_ref[di * 3 + dj],
                preferred_element_type=jnp.float32)

    y2 = _group_norm(acc.reshape(nb, hw, planes), gm2_ref[...],
                     g2_ref[...], b2_ref[...], inv_cnt)
    out = jnp.maximum(y2 + shortcut, 0.0)

    if with_head:
        pooled = jnp.mean(out, axis=1)                             # (nb, planes)
        logits = jnp.dot(pooled, lw_ref[...],
                         preferred_element_type=jnp.float32) + lb_ref[...]
        o_ref[...] = logits.reshape(nb, 1, -1)
    else:
        o_ref[...] = out.astype(o_ref.dtype)


# ------------------------------ pallas wrappers ------------------------------

def _batch_blocks(n):
    """Split batch into <=2 'parallel' grid blocks (dual-TC friendly)."""
    return 2 if (n % 2 == 0 and n >= 2) else 1


def stem_call(patches, sp, *, num_groups, out_dtype=jnp.bfloat16):
    n, hw, kd = patches.shape
    c = sp["w"].shape[1]
    nbb = _batch_blocks(n)
    nb = n // nbb
    kern = functools.partial(_stem_kernel, num_groups=num_groups)
    return pl.pallas_call(
        kern,
        out_shape=jax.ShapeDtypeStruct((n, hw, c), out_dtype),
        grid=(nbb,),
        in_specs=[
            pl.BlockSpec((nb, hw, kd), lambda i: (i, 0, 0)),
            pl.BlockSpec((kd, c), lambda i: (0, 0)),
            pl.BlockSpec((1, 1, c), lambda i: (0, 0, 0)),
            pl.BlockSpec((1, 1, c), lambda i: (0, 0, 0)),
            pl.BlockSpec((c, c), lambda i: (0, 0)),
        ],
        out_specs=pl.BlockSpec((nb, hw, c), lambda i: (i, 0, 0)),
        compiler_params=pltpu.CompilerParams(
            dimension_semantics=("parallel",)),
    )(patches, sp["w"], sp["g"], sp["b"], sp["gm"])


def block_call(patches, bp, *, planes, cin, wo, num_groups, has_sc,
               head_w=None, head_b=None, out_dtype=jnp.bfloat16):
    n, hw, kd = patches.shape
    nbb = _batch_blocks(n)
    nb = n // nbb
    c1 = bp["w1"].shape[1]
    with_head = head_w is not None

    inputs = [patches, bp["w1"], bp["g1"], bp["b1"], bp["gm1"],
              bp["w2"], bp["g2"], bp["b2"], bp["gm2"]]
    in_specs = [
        pl.BlockSpec((nb, hw, kd), lambda i: (i, 0, 0)),
        pl.BlockSpec((kd, c1), lambda i: (0, 0)),
        pl.BlockSpec((1, 1, c1), lambda i: (0, 0, 0)),
        pl.BlockSpec((1, 1, c1), lambda i: (0, 0, 0)),
        pl.BlockSpec((c1, c1), lambda i: (0, 0)),
        pl.BlockSpec((9, planes, planes), lambda i: (0, 0, 0)),
        pl.BlockSpec((1, 1, planes), lambda i: (0, 0, 0)),
        pl.BlockSpec((1, 1, planes), lambda i: (0, 0, 0)),
        pl.BlockSpec((planes, planes), lambda i: (0, 0)),
    ]
    if with_head:
        nc = head_w.shape[1]
        inputs += [head_w, head_b]
        in_specs += [pl.BlockSpec((planes, nc), lambda i: (0, 0)),
                     pl.BlockSpec((1, nc), lambda i: (0, 0))]
        out_shape = jax.ShapeDtypeStruct((n, 1, nc), jnp.float32)
        out_specs = pl.BlockSpec((nb, 1, nc), lambda i: (i, 0, 0))
    else:
        out_shape = jax.ShapeDtypeStruct((n, hw, planes), out_dtype)
        out_specs = pl.BlockSpec((nb, hw, planes), lambda i: (i, 0, 0))

    kern = functools.partial(_block_kernel, planes=planes, cin=cin, wo=wo,
                             num_groups=num_groups, has_sc=has_sc,
                             with_head=with_head)
    return pl.pallas_call(
        kern,
        out_shape=out_shape,
        grid=(nbb,),
        in_specs=in_specs,
        out_specs=out_specs,
        compiler_params=pltpu.CompilerParams(
            dimension_semantics=("parallel",)),
    )(*inputs)


# ------------------------------ XLA glue (im2col) ----------------------------

def _im2col(x, ksize, stride, padding):
    """x: (N,H,W,Cin) -> patches (N, Ho*Wo, K*K*Cin) bf16, (di,dj,cin) order."""
    n, h, w, cin = x.shape
    ho = (h + 2 * padding - ksize) // stride + 1
    wo = (w + 2 * padding - ksize) // stride + 1
    xp = jnp.pad(x, ((0, 0), (padding, padding), (padding, padding), (0, 0)))
    cols = []
    for di in range(ksize):
        for dj in range(ksize):
            cols.append(jax.lax.slice(
                xp,
                (0, di, dj, 0),
                (n, di + (ho - 1) * stride + 1, dj + (wo - 1) * stride + 1, cin),
                (1, stride, stride, 1)))
    patches = jnp.concatenate(cols, axis=-1)            # (N, Ho, Wo, K*K*Cin)
    patches = patches.reshape(n, ho * wo, ksize * ksize * cin)
    return patches.astype(jnp.bfloat16), ho, wo


# ------------------------------ static architecture --------------------------

def _block_configs(num_blocks):
    """Static (in_planes, planes, stride) per block, per layer."""
    cfgs = []
    in_planes = 16
    for planes, nb, first_stride in zip((16, 32, 64), num_blocks, (1, 2, 2)):
        layer = []
        for s in [first_stride] + [1] * (nb - 1):
            layer.append((in_planes, planes, s))
            in_planes = planes
        cfgs.append(layer)
    return cfgs


# ------------------------------ parameter init ------------------------------

def _kaiming_conv(key, k, cin, cout):
    fan_in = cin * k * k
    std = (2.0 / fan_in) ** 0.5          # kaiming_normal_, fan_in, gain sqrt(2)
    return jax.random.normal(key, (k, k, cin, cout), jnp.float32) * std


def _init_block(key, in_planes, planes, stride):
    k1, k2, k3 = jax.random.split(key, 3)
    p = {
        "conv1": _kaiming_conv(k1, 3, in_planes, planes),
        "gn1_g": jnp.ones((planes,), jnp.float32),
        "gn1_b": jnp.zeros((planes,), jnp.float32),
        "conv2": _kaiming_conv(k2, 3, planes, planes),
        "gn2_g": jnp.ones((planes,), jnp.float32),
        "gn2_b": jnp.zeros((planes,), jnp.float32),
    }
    if stride != 1 or in_planes != planes:
        p["sc_conv"] = _kaiming_conv(k3, 1, in_planes, planes)
        p["sc_gn_g"] = jnp.ones((planes,), jnp.float32)
        p["sc_gn_b"] = jnp.zeros((planes,), jnp.float32)
    return p


def init_resnet(key, num_blocks=(1, 1, 1), num_classes=10):
    cfgs = _block_configs(num_blocks)
    n_total = sum(num_blocks)
    keys = jax.random.split(key, 4 + n_total)
    params = {
        "conv1": _kaiming_conv(keys[0], 3, 3, 16),
        "gn1_g": jnp.ones((16,), jnp.float32),
        "gn1_b": jnp.zeros((16,), jnp.float32),
        "lin_w": jax.random.normal(keys[1], (64, num_classes),
                                   jnp.float32) * (2.0 / 64) ** 0.5,
        "lin_b": jax.random.uniform(keys[2], (num_classes,), jnp.float32,
                                    -1.0 / 8.0, 1.0 / 8.0),
    }
    ki = 4
    for li, layer_cfgs in enumerate(cfgs):
        blocks = []
        for (cin, planes, stride) in layer_cfgs:
            blocks.append(_init_block(keys[ki], cin, planes, stride))
            ki += 1
        params[f"layer{li + 1}"] = blocks
    return params


# --------------------------- one-time weight prep ----------------------------

def _make_gmat(c, cpg):
    idx = jnp.arange(c, dtype=jnp.int32) // cpg
    return (idx[:, None] == idx[None, :]).astype(jnp.float32)


def prepare_params(params, *, num_groups, num_blocks):
    """Precompute kernel-ready weights once: bf16 casts, merged conv1+shortcut
    weight, concatenated gamma/beta, and the GroupNorm group-sum matrices."""
    cfgs = _block_configs(num_blocks)
    prep = {
        "stem": {
            "w": params["conv1"].reshape(27, 16).astype(jnp.bfloat16),
            "g": params["gn1_g"].reshape(1, 1, 16),
            "b": params["gn1_b"].reshape(1, 1, 16),
            "gm": _make_gmat(16, 16 // num_groups),
        },
        "lin_w": params["lin_w"],
        "lin_b": params["lin_b"].reshape(1, -1),
    }
    for li, layer_cfgs in enumerate(cfgs):
        blocks = []
        for bi, (cin, planes, stride) in enumerate(layer_cfgs):
            p = params[f"layer{li + 1}"][bi]
            has_sc = (stride != 1) or (cin != planes)
            # groups must not straddle the main/shortcut halves of the merged GN
            assert planes % num_groups == 0
            cpg = planes // num_groups
            w_main = p["conv1"].reshape(9 * cin, planes)
            if has_sc:
                # 1x1 shortcut conv == center tap (di=1, dj=1) of the 3x3 patch.
                w_sc = jnp.zeros((9 * cin, planes), jnp.float32)
                w_sc = w_sc.at[4 * cin:5 * cin, :].set(
                    p["sc_conv"].reshape(cin, planes))
                w1 = jnp.concatenate([w_main, w_sc], axis=1)
                g1 = jnp.concatenate([p["gn1_g"], p["sc_gn_g"]])
                b1 = jnp.concatenate([p["gn1_b"], p["sc_gn_b"]])
                c1 = 2 * planes
            else:
                w1, g1, b1, c1 = w_main, p["gn1_g"], p["gn1_b"], planes
            blocks.append({
                "w1": w1.astype(jnp.bfloat16),
                "g1": g1.reshape(1, 1, c1),
                "b1": b1.reshape(1, 1, c1),
                "gm1": _make_gmat(c1, cpg),
                "w2": p["conv2"].reshape(9, planes, planes).astype(jnp.bfloat16),
                "g2": p["gn2_g"].reshape(1, 1, planes),
                "b2": p["gn2_b"].reshape(1, 1, planes),
                "gm2": _make_gmat(planes, cpg),
            })
        prep[f"layer{li + 1}"] = blocks
    return prep


# -------------------------------- forward -----------------------------------

def resnet_forward(prep, x_nchw, *, num_groups, num_blocks):
    cfgs = _block_configs(num_blocks)
    x = jnp.transpose(x_nchw, (0, 2, 3, 1)).astype(jnp.float32)   # NCHW -> NHWC
    n = x.shape[0]

    # Stem: conv1 + GN + ReLU (one fused kernel, bf16 out).
    patches, ho, wo = _im2col(x, 3, 1, 1)
    out = stem_call(patches, prep["stem"], num_groups=num_groups)
    out = out.reshape(n, ho, wo, 16)

    flat = [(li, cfg) for li, layer in enumerate(cfgs) for cfg in layer]
    for idx, (li, cfg) in enumerate(flat):
        cin, planes, stride = cfg
        has_sc = (stride != 1) or (cin != planes)
        is_last = idx == len(flat) - 1
        bi = sum(1 for j, (lj, _) in enumerate(flat[:idx]) if lj == li)
        bp = prep[f"layer{li + 1}"][bi]

        patches, ho, wo = _im2col(out, 3, stride, 1)
        if is_last:
            logits = block_call(patches, bp, planes=planes, cin=cin, wo=wo,
                                num_groups=num_groups, has_sc=has_sc,
                                head_w=prep["lin_w"], head_b=prep["lin_b"])
            return logits.reshape(n, -1)
        out = block_call(patches, bp, planes=planes, cin=cin, wo=wo,
                         num_groups=num_groups, has_sc=has_sc
                         ).reshape(n, ho, wo, planes)
    raise ValueError("network must contain at least one block")


# ---------------------------------- main -------------------------------------

if __name__ == "__main__":
    key = jax.random.PRNGKey(0)
    pkey, xkey = jax.random.split(key)
    params = init_resnet(pkey, num_blocks=(1, 1, 1), num_classes=10)
    prep = prepare_params(params, num_groups=4, num_blocks=(1, 1, 1))
    x = jax.random.normal(xkey, (2, 3, 16, 16), jnp.float32)  # NCHW like torch

    fwd = jax.jit(functools.partial(resnet_forward,
                                    num_groups=4, num_blocks=(1, 1, 1)))
    out = jax.block_until_ready(fwd(prep, x))
    assert out.shape == (2, 10) and out.dtype == jnp.float32
    print("KERNEL_OK")
</pallas_src>

<mosaic_0001>
module attributes {stable_mosaic.version = 11 : i64} {
  func.func @_stem_kernel(%arg0: i32, %arg1: memref<1x256x27xbf16, #tpu.memory_space<vmem>>, %arg2: memref<27x16xbf16, #tpu.memory_space<vmem>>, %arg3: memref<1x1x16xf32, #tpu.memory_space<vmem>>, %arg4: memref<1x1x16xf32, #tpu.memory_space<vmem>>, %arg5: memref<16x16xf32, #tpu.memory_space<vmem>>, %arg6: memref<1x256x16xbf16, #tpu.memory_space<vmem>>) attributes {dimension_semantics = [#tpu.dimension_semantics<parallel>], iteration_bounds = array<i64: 2>, scalar_prefetch = 0 : i64, scratch_operands = 0 : i64, tpu.core_type = #tpu.core_type<tc>, window_params = [{transform_indices = @transform_0, window_bounds = array<i64: 1, 256, 27>}, {pipeline_mode = #tpu.pipeline_mode<synchronous>, transform_indices = @transform_1, window_bounds = array<i64: 27, 16>}, {pipeline_mode = #tpu.pipeline_mode<synchronous>, transform_indices = @transform_2, window_bounds = array<i64: 1, 1, 16>}, {pipeline_mode = #tpu.pipeline_mode<synchronous>, transform_indices = @transform_3, window_bounds = array<i64: 1, 1, 16>}, {pipeline_mode = #tpu.pipeline_mode<synchronous>, transform_indices = @transform_4, window_bounds = array<i64: 16, 16>}, {transform_indices = @transform_5, window_bounds = array<i64: 1, 256, 16>}]} {
    %c0 = arith.constant 0 : index
    %c0_0 = arith.constant 0 : index
    %c0_1 = arith.constant 0 : index
    %0 = vector.load %arg1[%c0, %c0_0, %c0_1] : memref<1x256x27xbf16, #tpu.memory_space<vmem>>, vector<1x256x27xbf16>
    %1 = vector.shape_cast %0 : vector<1x256x27xbf16> to vector<256x27xbf16>
    %c0_2 = arith.constant 0 : index
    %c0_3 = arith.constant 0 : index
    %2 = vector.load %arg2[%c0_2, %c0_3] : memref<27x16xbf16, #tpu.memory_space<vmem>>, vector<27x16xbf16>
    %cst = arith.constant dense<0.000000e+00> : vector<256x16xf32>
    %3 = tpu.matmul %1, %2, %cst {dimension_numbers = #tpu.dot_dimension_numbers<[1], [0], [0], [1], [0, 0, 1, 1], [], []>} : vector<256x27xbf16>, vector<27x16xbf16>, vector<256x16xf32> -> vector<256x16xf32>
    %4 = vector.shape_cast %3 : vector<256x16xf32> to vector<1x256x16xf32>
    %c0_4 = arith.constant 0 : index
    %c0_5 = arith.constant 0 : index
    %5 = vector.load %arg5[%c0_4, %c0_5] : memref<16x16xf32, #tpu.memory_space<vmem>>, vector<16x16xf32>
    %c0_6 = arith.constant 0 : index
    %c0_7 = arith.constant 0 : index
    %c0_8 = arith.constant 0 : index
    %6 = vector.load %arg3[%c0_6, %c0_7, %c0_8] : memref<1x1x16xf32, #tpu.memory_space<vmem>>, vector<1x1x16xf32>
    %c0_9 = arith.constant 0 : index
    %c0_10 = arith.constant 0 : index
    %c0_11 = arith.constant 0 : index
    %7 = vector.load %arg4[%c0_9, %c0_10, %c0_11] : memref<1x1x16xf32, #tpu.memory_space<vmem>>, vector<1x1x16xf32>
    %cst_12 = arith.constant dense<0.000000e+00> : vector<1x16xf32>
    %8 = vector.multi_reduction <add>, %4, %cst_12 [1] : vector<1x256x16xf32> to vector<1x16xf32>
    %9 = arith.mulf %4, %4 : vector<1x256x16xf32>
    %cst_13 = arith.constant dense<0.000000e+00> : vector<1x16xf32>
    %10 = vector.multi_reduction <add>, %9, %cst_13 [1] : vector<1x256x16xf32> to vector<1x16xf32>
    %cst_14 = arith.constant dense<0.000000e+00> : vector<1x16xf32>
    %11 = tpu.matmul %8, %5, %cst_14 {dimension_numbers = #tpu.dot_dimension_numbers<[1], [0], [0], [1], [0, 0, 1, 1], [], []>} : vector<1x16xf32>, vector<16x16xf32>, vector<1x16xf32> -> vector<1x16xf32>
    %cst_15 = arith.constant 9.765625E-4 : f32
    %12 = vector.broadcast %cst_15 : f32 to vector<1x16xf32>
    %13 = arith.mulf %11, %12 : vector<1x16xf32>
    %cst_16 = arith.constant dense<0.000000e+00> : vector<1x16xf32>
    %14 = tpu.matmul %10, %5, %cst_16 {dimension_numbers = #tpu.dot_dimension_numbers<[1], [0], [0], [1], [0, 0, 1, 1], [], []>} : vector<1x16xf32>, vector<16x16xf32>, vector<1x16xf32> -> vector<1x16xf32>
    %cst_17 = arith.constant 9.765625E-4 : f32
    %15 = vector.broadcast %cst_17 : f32 to vector<1x16xf32>
    %16 = arith.mulf %14, %15 : vector<1x16xf32>
    %17 = arith.mulf %13, %13 : vector<1x16xf32>
    %18 = arith.subf %16, %17 : vector<1x16xf32>
    %cst_18 = arith.constant 9.99999974E-6 : f32
    %19 = vector.broadcast %cst_18 : f32 to vector<1x16xf32>
    %20 = arith.addf %18, %19 : vector<1x16xf32>
    %21 = math.rsqrt %20 : vector<1x16xf32>
    %22 = vector.shape_cast %13 : vector<1x16xf32> to vector<1x1x16xf32>
    %23 = vector.broadcast %22 : vector<1x1x16xf32> to vector<1x256x16xf32>
    %24 = arith.subf %4, %23 : vector<1x256x16xf32>
    %25 = vector.shape_cast %21 : vector<1x16xf32> to vector<1x1x16xf32>
    %26 = vector.broadcast %25 : vector<1x1x16xf32> to vector<1x256x16xf32>
    %27 = arith.mulf %24, %26 : vector<1x256x16xf32>
    %28 = vector.broadcast %6 : vector<1x1x16xf32> to vector<1x256x16xf32>
    %29 = arith.mulf %27, %28 : vector<1x256x16xf32>
    %30 = vector.broadcast %7 : vector<1x1x16xf32> to vector<1x256x16xf32>
    %31 = arith.addf %29, %30 : vector<1x256x16xf32>
    %cst_19 = arith.constant 0.000000e+00 : f32
    %32 = vector.broadcast %cst_19 : f32 to vector<1x256x16xf32>
    %33 = arith.maximumf %31, %32 : vector<1x256x16xf32>
    %34 = arith.truncf %33 : vector<1x256x16xf32> to vector<1x256x16xbf16>
    %c0_20 = arith.constant 0 : index
    %c0_21 = arith.constant 0 : index
    %c0_22 = arith.constant 0 : index
    %35 = vector.load %arg6[%c0_20, %c0_21, %c0_22] : memref<1x256x16xbf16, #tpu.memory_space<vmem>>, vector<1x256x16xbf16>
    tpu.vector_store %arg6[%c0_20, %c0_21, %c0_22], %34 {strides = array<i32>} : memref<1x256x16xbf16, #tpu.memory_space<vmem>>, vector<1x256x16xbf16>,
    return
  }
  func.func @transform_0(%arg0: i32) -> (i32, i32, i32) {
    %c0_i32 = arith.constant 0 : i32
    %c0_i32_0 = arith.constant 0 : i32
    %c0_i32_1 = arith.constant 0 : i32
    return %arg0, %c0_i32, %c0_i32_0 : i32, i32, i32
  }
  func.func @transform_1(%arg0: i32) -> (i32, i32) {
    %c0_i32 = arith.constant 0 : i32
    %c0_i32_0 = arith.constant 0 : i32
    %c0_i32_1 = arith.constant 0 : i32
    return %c0_i32, %c0_i32_0 : i32, i32
  }
  func.func @transform_2(%arg0: i32) -> (i32, i32, i32) {
    %c0_i32 = arith.constant 0 : i32
    %c0_i32_0 = arith.constant 0 : i32
    %c0_i32_1 = arith.constant 0 : i32
    %c0_i32_2 = arith.constant 0 : i32
    return %c0_i32, %c0_i32_0, %c0_i32_1 : i32, i32, i32
  }
  func.func @transform_3(%arg0: i32) -> (i32, i32, i32) {
    %c0_i32 = arith.constant 0 : i32
    %c0_i32_0 = arith.constant 0 : i32
    %c0_i32_1 = arith.constant 0 : i32
    %c0_i32_2 = arith.constant 0 : i32
    return %c0_i32, %c0_i32_0, %c0_i32_1 : i32, i32, i32
  }
  func.func @transform_4(%arg0: i32) -> (i32, i32) {
    %c0_i32 = arith.constant 0 : i32
    %c0_i32_0 = arith.constant 0 : i32
    %c0_i32_1 = arith.constant 0 : i32
    return %c0_i32, %c0_i32_0 : i32, i32
  }
  func.func @transform_5(%arg0: i32) -> (i32, i32, i32) {
    %c0_i32 = arith.constant 0 : i32
    %c0_i32_0 = arith.constant 0 : i32
    %c0_i32_1 = arith.constant 0 : i32
    return %arg0, %c0_i32, %c0_i32_0 : i32, i32, i32
  }
}

module attributes {stable_mosaic.version = 11 : i64} {
  func.func @_block_kernel(%arg0: i32, %arg1: memref<1x256x144xbf16, #tpu.memory_space<vmem>>, %arg2: memref<144x16xbf16, #tpu.memory_space<vmem>>, %arg3: memref<1x1x16xf32, #tpu.memory_space<vmem>>, %arg4: memref<1x1x16xf32, #tpu.memory_space<vmem>>, %arg5: memref<16x16xf32, #tpu.memory_space<vmem>>, %arg6: memref<9x16x16xbf16, #tpu.memory_space<vmem>>, %arg7: memref<1x1x16xf32, #tpu.memory_space<vmem>>, %arg8: memref<1x1x16xf32, #tpu.memory_space<vmem>>, %arg9: memref<16x16xf32, #tpu.memory_space<vmem>>, %arg10: memref<1x256x16xbf16, #tpu.memory_space<vmem>>) attributes {dimension_semantics = [#tpu.dimension_semantics<parallel>], iteration_bounds = array<i64: 2>, scalar_prefetch = 0 : i64, scratch_operands = 0 : i64, tpu.core_type = #tpu.core_type<tc>, window_params = [{transform_indices = @transform_0, window_bounds = array<i64: 1, 256, 144>}, {pipeline_mode = #tpu.pipeline_mode<synchronous>, transform_indices = @transform_1, window_bounds = array<i64: 144, 16>}, {pipeline_mode = #tpu.pipeline_mode<synchronous>, transform_indices = @transform_2, window_bounds = array<i64: 1, 1, 16>}, {pipeline_mode = #tpu.pipeline_mode<synchronous>, transform_indices = @transform_3, window_bounds = array<i64: 1, 1, 16>}, {pipeline_mode = #tpu.pipeline_mode<synchronous>, transform_indices = @transform_4, window_bounds = array<i64: 16, 16>}, {pipeline_mode = #tpu.pipeline_mode<synchronous>, transform_indices = @transform_5, window_bounds = array<i64: 9, 16, 16>}, {pipeline_mode = #tpu.pipeline_mode<synchronous>, transform_indices = @transform_6, window_bounds = array<i64: 1, 1, 16>}, {pipeline_mode = #tpu.pipeline_mode<synchronous>, transform_indices = @transform_7, window_bounds = array<i64: 1, 1, 16>}, {pipeline_mode = #tpu.pipeline_mode<synchronous>, transform_indices = @transform_8, window_bounds = array<i64: 16, 16>}, {transform_indices = @transform_9, window_bounds = array<i64: 1, 256, 16>}]} {
    %c0 = arith.constant 0 : index
    %c0_0 = arith.constant 0 : index
    %c0_1 = arith.constant 0 : index
    %0 = vector.load %arg1[%c0, %c0_0, %c0_1] : memref<1x256x144xbf16, #tpu.memory_space<vmem>>, vector<1x256x144xbf16>
    %1 = vector.shape_cast %0 : vector<1x256x144xbf16> to vector<256x144xbf16>
    %c0_2 = arith.constant 0 : index
    %c0_3 = arith.constant 0 : index
    %2 = vector.load %arg2[%c0_2, %c0_3] : memref<144x16xbf16, #tpu.memory_space<vmem>>, vector<144x16xbf16>
    %cst = arith.constant dense<0.000000e+00> : vector<256x16xf32>
    %3 = tpu.matmul %1, %2, %cst {dimension_numbers = #tpu.dot_dimension_numbers<[1], [0], [0], [1], [0, 0, 1, 1], [], []>} : vector<256x144xbf16>, vector<144x16xbf16>, vector<256x16xf32> -> vector<256x16xf32>
    %4 = vector.shape_cast %3 : vector<256x16xf32> to vector<1x256x16xf32>
    %c0_4 = arith.constant 0 : index
    %c0_5 = arith.constant 0 : index
    %5 = vector.load %arg5[%c0_4, %c0_5] : memref<16x16xf32, #tpu.memory_space<vmem>>, vector<16x16xf32>
    %c0_6 = arith.constant 0 : index
    %c0_7 = arith.constant 0 : index
    %c0_8 = arith.constant 0 : index
    %6 = vector.load %arg3[%c0_6, %c0_7, %c0_8] : memref<1x1x16xf32, #tpu.memory_space<vmem>>, vector<1x1x16xf32>
    %c0_9 = arith.constant 0 : index
    %c0_10 = arith.constant 0 : index
    %c0_11 = arith.constant 0 : index
    %7 = vector.load %arg4[%c0_9, %c0_10, %c0_11] : memref<1x1x16xf32, #tpu.memory_space<vmem>>, vector<1x1x16xf32>
    %cst_12 = arith.constant dense<0.000000e+00> : vector<1x16xf32>
    %8 = vector.multi_reduction <add>, %4, %cst_12 [1] : vector<1x256x16xf32> to vector<1x16xf32>
    %9 = arith.mulf %4, %4 : vector<1x256x16xf32>
    %cst_13 = arith.constant dense<0.000000e+00> : vector<1x16xf32>
    %10 = vector.multi_reduction <add>, %9, %cst_13 [1] : vector<1x256x16xf32> to vector<1x16xf32>
    %cst_14 = arith.constant dense<0.000000e+00> : vector<1x16xf32>
    %11 = tpu.matmul %8, %5, %cst_14 {dimension_numbers = #tpu.dot_dimension_numbers<[1], [0], [0], [1], [0, 0, 1, 1], [], []>} : vector<1x16xf32>, vector<16x16xf32>, vector<1x16xf32> -> vector<1x16xf32>
    %cst_15 = arith.constant 9.765625E-4 : f32
    %12 = vector.broadcast %cst_15 : f32 to vector<1x16xf32>
    %13 = arith.mulf %11, %12 : vector<1x16xf32>
    %cst_16 = arith.constant dense<0.000000e+00> : vector<1x16xf32>
    %14 = tpu.matmul %10, %5, %cst_16 {dimension_numbers = #tpu.dot_dimension_numbers<[1], [0], [0], [1], [0, 0, 1, 1], [], []>} : vector<1x16xf32>, vector<16x16xf32>, vector<1x16xf32> -> vector<1x16xf32>
    %cst_17 = arith.constant 9.765625E-4 : f32
    %15 = vector.broadcast %cst_17 : f32 to vector<1x16xf32>
    %16 = arith.mulf %14, %15 : vector<1x16xf32>
    %17 = arith.mulf %13, %13 : vector<1x16xf32>
    %18 = arith.subf %16, %17 : vector<1x16xf32>
    %cst_18 = arith.constant 9.99999974E-6 : f32
    %19 = vector.broadcast %cst_18 : f32 to vector<1x16xf32>
    %20 = arith.addf %18, %19 : vector<1x16xf32>
    %21 = math.rsqrt %20 : vector<1x16xf32>
    %22 = vector.shape_cast %13 : vector<1x16xf32> to vector<1x1x16xf32>
    %23 = vector.broadcast %22 : vector<1x1x16xf32> to vector<1x256x16xf32>
    %24 = arith.subf %4, %23 : vector<1x256x16xf32>
    %25 = vector.shape_cast %21 : vector<1x16xf32> to vector<1x1x16xf32>
    %26 = vector.broadcast %25 : vector<1x1x16xf32> to vector<1x256x16xf32>
    %27 = arith.mulf %24, %26 : vector<1x256x16xf32>
    %28 = vector.broadcast %6 : vector<1x1x16xf32> to vector<1x256x16xf32>
    %29 = arith.mulf %27, %28 : vector<1x256x16xf32>
    %30 = vector.broadcast %7 : vector<1x1x16xf32> to vector<1x256x16xf32>
    %31 = arith.addf %29, %30 : vector<1x256x16xf32>
    %cst_19 = arith.constant 0.000000e+00 : f32
    %32 = vector.broadcast %cst_19 : f32 to vector<1x256x16xf32>
    %33 = arith.maximumf %31, %32 : vector<1x256x16xf32>
    %34 = vector.extract_strided_slice %0 {offsets = [0, 0, 64], sizes = [1, 256, 16], strides = [1, 1, 1]} : vector<1x256x144xbf16> to vector<1x256x16xbf16>
    %35 = arith.extf %34 : vector<1x256x16xbf16> to vector<1x256x16xf32>
    %cst_20 = arith.constant 0.000000e+00 : f32
    %36 = vector.broadcast %cst_20 : f32 to vector<1x17x16xf32>
    %37 = tpu.concatenate %36, %33, %36 in 1 : vector<1x17x16xf32>, vector<1x256x16xf32>, vector<1x17x16xf32> -> vector<1x290x16xf32>
    %38 = tpu.iota {dimensions = array<i32: 1>} : vector<1x256x1xi32>
    %c16_i32 = arith.constant 16 : i32
    %c0_i32 = arith.constant 0 : i32
    %39 = arith.cmpi eq, %c16_i32, %c0_i32 : i32
    %c1_i32 = arith.constant 1 : i32
    %40 = arith.select %39, %c1_i32, %c16_i32 : i32
    %41 = vector.broadcast %40 : i32 to vector<1x256x1xi32>
    %42 = arith.remsi %38, %41 : vector<1x256x1xi32>
    %c0_i32_21 = arith.constant 0 : i32
    %43 = vector.broadcast %c0_i32_21 : i32 to vector<1x256x1xi32>
    %44 = arith.cmpi ne, %42, %43 : vector<1x256x1xi32>
    %c0_i32_22 = arith.constant 0 : i32
    %45 = vector.broadcast %c0_i32_22 : i32 to vector<1x256x1xi32>
    %46 = arith.cmpi slt, %42, %45 : vector<1x256x1xi32>
    %c0_i32_23 = arith.constant 0 : i32
    %47 = arith.cmpi slt, %40, %c0_i32_23 : i32
    %48 = vector.broadcast %47 : i1 to vector<1x256x1xi1>
    %49 = vector.broadcast %48 : vector<1x256x1xi1> to vector<1x256x1xi1>
    %50 = arith.xori %46, %49 : vector<1x256x1xi1>
    %51 = arith.andi %50, %44 : vector<1x256x1xi1>
    %52 = vector.broadcast %40 : i32 to vector<1x256x1xi32>
    %53 = arith.addi %42, %52 : vector<1x256x1xi32>
    %54 = arith.select %51, %53, %42 : vector<1x256x1xi1>, vector<1x256x1xi32>
    %cst_24 = arith.constant 0.000000e+00 : f32
    %55 = vector.broadcast %cst_24 : f32 to vector<256x16xf32>
    %56 = vector.extract_strided_slice %37 {offsets = [0, 0, 0], sizes = [1, 256, 16], strides = [1, 1, 1]} : vector<1x290x16xf32> to vector<1x256x16xf32>
    %c1_i32_25 = arith.constant 1 : i32
    %57 = vector.broadcast %c1_i32_25 : i32 to vector<1x256x1xi32>
    %58 = arith.cmpi sge, %54, %57 : vector<1x256x1xi32>
    %cst_26 = arith.constant 0.000000e+00 : f32
    %59 = vector.shape_cast %58 : vector<1x256x1xi1> to vector<1x256x1xi1>
    %60 = vector.broadcast %59 : vector<1x256x1xi1> to vector<1x256x16xi1>
    %61 = vector.broadcast %cst_26 : f32 to vector<1x256x16xf32>
    %62 = arith.select %60, %56, %61 : vector<1x256x16xi1>, vector<1x256x16xf32>
    %63 = arith.truncf %62 : vector<1x256x16xf32> to vector<1x256x16xbf16>
    %64 = vector.shape_cast %63 : vector<1x256x16xbf16> to vector<256x16xbf16>
    %c0_27 = arith.constant 0 : index
    %c0_28 = arith.constant 0 : index
    %c0_29 = arith.constant 0 : index
    %65 = vector.load %arg6[%c0_27, %c0_28, %c0_29] : memref<9x16x16xbf16, #tpu.memory_space<vmem>>, vector<1x16x16xbf16>
    %66 = vector.shape_cast %65 : vector<1x16x16xbf16> to vector<16x16xbf16>
    %cst_30 = arith.constant dense<0.000000e+00> : vector<256x16xf32>
    %67 = tpu.matmul %64, %66, %cst_30 {dimension_numbers = #tpu.dot_dimension_numbers<[1], [0], [0], [1], [0, 0, 1, 1], [], []>} : vector<256x16xbf16>, vector<16x16xbf16>, vector<256x16xf32> -> vector<256x16xf32>
    %68 = arith.addf %55, %67 : vector<256x16xf32>
    %69 = vector.extract_strided_slice %37 {offsets = [0, 1, 0], sizes = [1, 256, 16], strides = [1, 1, 1]} : vector<1x290x16xf32> to vector<1x256x16xf32>
    %70 = arith.truncf %69 : vector<1x256x16xf32> to vector<1x256x16xbf16>
    %71 = vector.shape_cast %70 : vector<1x256x16xbf16> to vector<256x16xbf16>
    %c1 = arith.constant 1 : index
    %c0_31 = arith.constant 0 : index
    %c0_32 = arith.constant 0 : index
    %72 = vector.load %arg6[%c1, %c0_31, %c0_32] : memref<9x16x16xbf16, #tpu.memory_space<vmem>>, vector<1x16x16xbf16>
    %73 = vector.shape_cast %72 : vector<1x16x16xbf16> to vector<16x16xbf16>
    %cst_33 = arith.constant dense<0.000000e+00> : vector<256x16xf32>
    %74 = tpu.matmul %71, %73, %cst_33 {dimension_numbers = #tpu.dot_dimension_numbers<[1], [0], [0], [1], [0, 0, 1, 1], [], []>} : vector<256x16xbf16>, vector<16x16xbf16>, vector<256x16xf32> -> vector<256x16xf32>
    %75 = arith.addf %68, %74 : vector<256x16xf32>
    %76 = vector.extract_strided_slice %37 {offsets = [0, 2, 0], sizes = [1, 256, 16], strides = [1, 1, 1]} : vector<1x290x16xf32> to vector<1x256x16xf32>
    %c15_i32 = arith.constant 15 : i32
    %77 = vector.broadcast %c15_i32 : i32 to vector<1x256x1xi32>
    %78 = arith.cmpi slt, %54, %77 : vector<1x256x1xi32>
    %cst_34 = arith.constant 0.000000e+00 : f32
    %79 = vector.shape_cast %78 : vector<1x256x1xi1> to vector<1x256x1xi1>
    %80 = vector.broadcast %79 : vector<1x256x1xi1> to vector<1x256x16xi1>
    %81 = vector.broadcast %cst_34 : f32 to vector<1x256x16xf32>
    %82 = arith.select %80, %76, %81 : vector<1x256x16xi1>, vector<1x256x16xf32>
    %83 = arith.truncf %82 : vector<1x256x16xf32> to vector<1x256x16xbf16>
    %84 = vector.shape_cast %83 : vector<1x256x16xbf16> to vector<256x16xbf16>
    %c2 = arith.constant 2 : index
    %c0_35 = arith.constant 0 : index
    %c0_36 = arith.constant 0 : index
    %85 = vector.load %arg6[%c2, %c0_35, %c0_36] : memref<9x16x16xbf16, #tpu.memory_space<vmem>>, vector<1x16x16xbf16>
    %86 = vector.shape_cast %85 : vector<1x16x16xbf16> to vector<16x16xbf16>
    %cst_37 = arith.constant dense<0.000000e+00> : vector<256x16xf32>
    %87 = tpu.matmul %84, %86, %cst_37 {dimension_numbers = #tpu.dot_dimension_numbers<[1], [0], [0], [1], [0, 0, 1, 1], [], []>} : vector<256x16xbf16>, vector<16x16xbf16>, vector<256x16xf32> -> vector<256x16xf32>
    %88 = arith.addf %75, %87 : vector<256x16xf32>
    %89 = vector.extract_strided_slice %37 {offsets = [0, 16, 0], sizes = [1, 256, 16], strides = [1, 1, 1]} : vector<1x290x16xf32> to vector<1x256x16xf32>
    %c1_i32_38 = arith.constant 1 : i32
    %90 = vector.broadcast %c1_i32_38 : i32 to vector<1x256x1xi32>
    %91 = arith.cmpi sge, %54, %90 : vector<1x256x1xi32>
    %cst_39 = arith.constant 0.000000e+00 : f32
    %92 = vector.shape_cast %91 : vector<1x256x1xi1> to vector<1x256x1xi1>
    %93 = vector.broadcast %92 : vector<1x256x1xi1> to vector<1x256x16xi1>
    %94 = vector.broadcast %cst_39 : f32 to vector<1x256x16xf32>
    %95 = arith.select %93, %89, %94 : vector<1x256x16xi1>, vector<1x256x16xf32>
    %96 = arith.truncf %95 : vector<1x256x16xf32> to vector<1x256x16xbf16>
    %97 = vector.shape_cast %96 : vector<1x256x16xbf16> to vector<256x16xbf16>
    %c3 = arith.constant 3 : index
    %c0_40 = arith.constant 0 : index
    %c0_41 = arith.constant 0 : index
    %98 = vector.load %arg6[%c3, %c0_40, %c0_41] : memref<9x16x16xbf16, #tpu.memory_space<vmem>>, vector<1x16x16xbf16>
    %99 = vector.shape_cast %98 : vector<1x16x16xbf16> to vector<16x16xbf16>
    %cst_42 = arith.constant dense<0.000000e+00> : vector<256x16xf32>
    %100 = tpu.matmul %97, %99, %cst_42 {dimension_numbers = #tpu.dot_dimension_numbers<[1], [0], [0], [1], [0, 0, 1, 1], [], []>} : vector<256x16xbf16>, vector<16x16xbf16>, vector<256x16xf32> -> vector<256x16xf32>
    %101 = arith.addf %88, %100 : vector<256x16xf32>
    %102 = vector.extract_strided_slice %37 {offsets = [0, 17, 0], sizes = [1, 256, 16], strides = [1, 1, 1]} : vector<1x290x16xf32> to vector<1x256x16xf32>
    %103 = arith.truncf %102 : vector<1x256x16xf32> to vector<1x256x16xbf16>
    %104 = vector.shape_cast %103 : vector<1x256x16xbf16> to vector<256x16xbf16>
    %c4 = arith.constant 4 : index
    %c0_43 = arith.constant 0 : index
    %c0_44 = arith.constant 0 : index
    %105 = vector.load %arg6[%c4, %c0_43, %c0_44] : memref<9x16x16xbf16, #tpu.memory_space<vmem>>, vector<1x16x16xbf16>
    %106 = vector.shape_cast %105 : vector<1x16x16xbf16> to vector<16x16xbf16>
    %cst_45 = arith.constant dense<0.000000e+00> : vector<256x16xf32>
    %107 = tpu.matmul %104, %106, %cst_45 {dimension_numbers = #tpu.dot_dimension_numbers<[1], [0], [0], [1], [0, 0, 1, 1], [], []>} : vector<256x16xbf16>, vector<16x16xbf16>, vector<256x16xf32> -> vector<256x16xf32>
    %108 = arith.addf %101, %107 : vector<256x16xf32>
    %109 = vector.extract_strided_slice %37 {offsets = [0, 18, 0], sizes = [1, 256, 16], strides = [1, 1, 1]} : vector<1x290x16xf32> to vector<1x256x16xf32>
    %c15_i32_46 = arith.constant 15 : i32
    %110 = vector.broadcast %c15_i32_46 : i32 to vector<1x256x1xi32>
    %111 = arith.cmpi slt, %54, %110 : vector<1x256x1xi32>
    %cst_47 = arith.constant 0.000000e+00 : f32
    %112 = vector.shape_cast %111 : vector<1x256x1xi1> to vector<1x256x1xi1>
    %113 = vector.broadcast %112 : vector<1x256x1xi1> to vector<1x256x16xi1>
    %114 = vector.broadcast %cst_47 : f32 to vector<1x256x16xf32>
    %115 = arith.select %113, %109, %114 : vector<1x256x16xi1>, vector<1x256x16xf32>
    %116 = arith.truncf %115 : vector<1x256x16xf32> to vector<1x256x16xbf16>
    %117 = vector.shape_cast %116 : vector<1x256x16xbf16> to vector<256x16xbf16>
    %c5 = arith.constant 5 : index
    %c0_48 = arith.constant 0 : index
    %c0_49 = arith.constant 0 : index
    %118 = vector.load %arg6[%c5, %c0_48, %c0_49] : memref<9x16x16xbf16, #tpu.memory_space<vmem>>, vector<1x16x16xbf16>
    %119 = vector.shape_cast %118 : vector<1x16x16xbf16> to vector<16x16xbf16>
    %cst_50 = arith.constant dense<0.000000e+00> : vector<256x16xf32>
    %120 = tpu.matmul %117, %119, %cst_50 {dimension_numbers = #tpu.dot_dimension_numbers<[1], [0], [0], [1], [0, 0, 1, 1], [], []>} : vector<256x16xbf16>, vector<16x16xbf16>, vector<256x16xf32> -> vector<256x16xf32>
    %121 = arith.addf %108, %120 : vector<256x16xf32>
    %122 = vector.extract_strided_slice %37 {offsets = [0, 32, 0], sizes = [1, 256, 16], strides = [1, 1, 1]} : vector<1x290x16xf32> to vector<1x256x16xf32>
    %c1_i32_51 = arith.constant 1 : i32
    %123 = vector.broadcast %c1_i32_51 : i32 to vector<1x256x1xi32>
    %124 = arith.cmpi sge, %54, %123 : vector<1x256x1xi32>
    %cst_52 = arith.constant 0.000000e+00 : f32
    %125 = vector.shape_cast %124 : vector<1x256x1xi1> to vector<1x256x1xi1>
    %126 = vector.broadcast %125 : vector<1x256x1xi1> to vector<1x256x16xi1>
    %127 = vector.broadcast %cst_52 : f32 to vector<1x256x16xf32>
    %128 = arith.select %126, %122, %127 : vector<1x256x16xi1>, vector<1x256x16xf32>
    %129 = arith.truncf %128 : vector<1x256x16xf32> to vector<1x256x16xbf16>
    %130 = vector.shape_cast %129 : vector<1x256x16xbf16> to vector<256x16xbf16>
    %c6 = arith.constant 6 : index
    %c0_53 = arith.constant 0 : index
    %c0_54 = arith.constant 0 : index
    %131 = vector.load %arg6[%c6, %c0_53, %c0_54] : memref<9x16x16xbf16, #tpu.memory_space<vmem>>, vector<1x16x16xbf16>
    %132 = vector.shape_cast %131 : vector<1x16x16xbf16> to vector<16x16xbf16>
    %cst_55 = arith.constant dense<0.000000e+00> : vector<256x16xf32>
    %133 = tpu.matmul %130, %132, %cst_55 {dimension_numbers = #tpu.dot_dimension_numbers<[1], [0], [0], [1], [0, 0, 1, 1], [], []>} : vector<256x16xbf16>, vector<16x16xbf16>, vector<256x16xf32> -> vector<256x16xf32>
    %134 = arith.addf %121, %133 : vector<256x16xf32>
    %135 = vector.extract_strided_slice %37 {offsets = [0, 33, 0], sizes = [1, 256, 16], strides = [1, 1, 1]} : vector<1x290x16xf32> to vector<1x256x16xf32>
    %136 = arith.truncf %135 : vector<1x256x16xf32> to vector<1x256x16xbf16>
    %137 = vector.shape_cast %136 : vector<1x256x16xbf16> to vector<256x16xbf16>
    %c7 = arith.constant 7 : index
    %c0_56 = arith.constant 0 : index
    %c0_57 = arith.constant 0 : index
    %138 = vector.load %arg6[%c7, %c0_56, %c0_57] : memref<9x16x16xbf16, #tpu.memory_space<vmem>>, vector<1x16x16xbf16>
    %139 = vector.shape_cast %138 : vector<1x16x16xbf16> to vector<16x16xbf16>
    %cst_58 = arith.constant dense<0.000000e+00> : vector<256x16xf32>
    %140 = tpu.matmul %137, %139, %cst_58 {dimension_numbers = #tpu.dot_dimension_numbers<[1], [0], [0], [1], [0, 0, 1, 1], [], []>} : vector<256x16xbf16>, vector<16x16xbf16>, vector<256x16xf32> -> vector<256x16xf32>
    %141 = arith.addf %134, %140 : vector<256x16xf32>
    %142 = vector.extract_strided_slice %37 {offsets = [0, 34, 0], sizes = [1, 256, 16], strides = [1, 1, 1]} : vector<1x290x16xf32> to vector<1x256x16xf32>
    %c15_i32_59 = arith.constant 15 : i32
    %143 = vector.broadcast %c15_i32_59 : i32 to vector<1x256x1xi32>
    %144 = arith.cmpi slt, %54, %143 : vector<1x256x1xi32>
    %cst_60 = arith.constant 0.000000e+00 : f32
    %145 = vector.shape_cast %144 : vector<1x256x1xi1> to vector<1x256x1xi1>
    %146 = vector.broadcast %145 : vector<1x256x1xi1> to vector<1x256x16xi1>
    %147 = vector.broadcast %cst_60 : f32 to vector<1x256x16xf32>
    %148 = arith.select %146, %142, %147 : vector<1x256x16xi1>, vector<1x256x16xf32>
    %149 = arith.truncf %148 : vector<1x256x16xf32> to vector<1x256x16xbf16>
    %150 = vector.shape_cast %149 : vector<1x256x16xbf16> to vector<256x16xbf16>
    %c8 = arith.constant 8 : index
    %c0_61 = arith.constant 0 : index
    %c0_62 = arith.constant 0 : index
    %151 = vector.load %arg6[%c8, %c0_61, %c0_62] : memref<9x16x16xbf16, #tpu.memory_space<vmem>>, vector<1x16x16xbf16>
    %152 = vector.shape_cast %151 : vector<1x16x16xbf16> to vector<16x16xbf16>
    %cst_63 = arith.constant dense<0.000000e+00> : vector<256x16xf32>
    %153 = tpu.matmul %150, %152, %cst_63 {dimension_numbers = #tpu.dot_dimension_numbers<[1], [0], [0], [1], [0, 0, 1, 1], [], []>} : vector<256x16xbf16>, vector<16x16xbf16>, vector<256x16xf32> -> vector<256x16xf32>
    %154 = arith.addf %141, %153 : vector<256x16xf32>
    %155 = vector.shape_cast %154 : vector<256x16xf32> to vector<1x256x16xf32>
    %c0_64 = arith.constant 0 : index
    %c0_65 = arith.constant 0 : index
    %156 = vector.load %arg9[%c0_64, %c0_65] : memref<16x16xf32, #tpu.memory_space<vmem>>, vector<16x16xf32>
    %c0_66 = arith.constant 0 : index
    %c0_67 = arith.constant 0 : index
    %c0_68 = arith.constant 0 : index
    %157 = vector.load %arg7[%c0_66, %c0_67, %c0_68] : memref<1x1x16xf32, #tpu.memory_space<vmem>>, vector<1x1x16xf32>
    %c0_69 = arith.constant 0 : index
    %c0_70 = arith.constant 0 : index
    %c0_71 = arith.constant 0 : index
    %158 = vector.load %arg8[%c0_69, %c0_70, %c0_71] : memref<1x1x16xf32, #tpu.memory_space<vmem>>, vector<1x1x16xf32>
    %cst_72 = arith.constant dense<0.000000e+00> : vector<1x16xf32>
    %159 = vector.multi_reduction <add>, %155, %cst_72 [1] : vector<1x256x16xf32> to vector<1x16xf32>
    %160 = arith.mulf %155, %155 : vector<1x256x16xf32>
    %cst_73 = arith.constant dense<0.000000e+00> : vector<1x16xf32>
    %161 = vector.multi_reduction <add>, %160, %cst_73 [1] : vector<1x256x16xf32> to vector<1x16xf32>
    %cst_74 = arith.constant dense<0.000000e+00> : vector<1x16xf32>
    %162 = tpu.matmul %159, %156, %cst_74 {dimension_numbers = #tpu.dot_dimension_numbers<[1], [0], [0], [1], [0, 0, 1, 1], [], []>} : vector<1x16xf32>, vector<16x16xf32>, vector<1x16xf32> -> vector<1x16xf32>
    %cst_75 = arith.constant 9.765625E-4 : f32
    %163 = vector.broadcast %cst_75 : f32 to vector<1x16xf32>
    %164 = arith.mulf %162, %163 : vector<1x16xf32>
    %cst_76 = arith.constant dense<0.000000e+00> : vector<1x16xf32>
    %165 = tpu.matmul %161, %156, %cst_76 {dimension_numbers = #tpu.dot_dimension_numbers<[1], [0], [0], [1], [0, 0, 1, 1], [], []>} : vector<1x16xf32>, vector<16x16xf32>, vector<1x16xf32> -> vector<1x16xf32>
    %cst_77 = arith.constant 9.765625E-4 : f32
    %166 = vector.broadcast %cst_77 : f32 to vector<1x16xf32>
    %167 = arith.mulf %165, %166 : vector<1x16xf32>
    %168 = arith.mulf %164, %164 : vector<1x16xf32>
    %169 = arith.subf %167, %168 : vector<1x16xf32>
    %cst_78 = arith.constant 9.99999974E-6 : f32
    %170 = vector.broadcast %cst_78 : f32 to vector<1x16xf32>
    %171 = arith.addf %169, %170 : vector<1x16xf32>
    %172 = math.rsqrt %171 : vector<1x16xf32>
    %173 = vector.shape_cast %164 : vector<1x16xf32> to vector<1x1x16xf32>
    %174 = vector.broadcast %173 : vector<1x1x16xf32> to vector<1x256x16xf32>
    %175 = arith.subf %155, %174 : vector<1x256x16xf32>
    %176 = vector.shape_cast %172 : vector<1x16xf32> to vector<1x1x16xf32>
    %177 = vector.broadcast %176 : vector<1x1x16xf32> to vector<1x256x16xf32>
    %178 = arith.mulf %175, %177 : vector<1x256x16xf32>
    %179 = vector.broadcast %157 : vector<1x1x16xf32> to vector<1x256x16xf32>
    %180 = arith.mulf %178, %179 : vector<1x256x16xf32>
    %181 = vector.broadcast %158 : vector<1x1x16xf32> to vector<1x256x16xf32>
    %182 = arith.addf %180, %181 : vector<1x256x16xf32>
    %183 = arith.addf %182, %35 : vector<1x256x16xf32>
    %cst_79 = arith.constant 0.000000e+00 : f32
    %184 = vector.broadcast %cst_79 : f32 to vector<1x256x16xf32>
    %185 = arith.maximumf %183, %184 : vector<1x256x16xf32>
    %186 = arith.truncf %185 : vector<1x256x16xf32> to vector<1x256x16xbf16>
    %c0_80 = arith.constant 0 : index
    %c0_81 = arith.constant 0 : index
    %c0_82 = arith.constant 0 : index
    %187 = vector.load %arg10[%c0_80, %c0_81, %c0_82] : memref<1x256x16xbf16, #tpu.memory_space<vmem>>, vector<1x256x16xbf16>
    tpu.vector_store %arg10[%c0_80, %c0_81, %c0_82], %186 {strides = array<i32>} : memref<1x256x16xbf16, #tpu.memory_space<vmem>>, vector<1x256x16xbf16>,
    return
  }
  func.func @transform_0(%arg0: i32) -> (i32, i32, i32) {
    %c0_i32 = arith.constant 0 : i32
    %c0_i32_0 = arith.constant 0 : i32
    %c0_i32_1 = arith.constant 0 : i32
    return %arg0, %c0_i32, %c0_i32_0 : i32, i32, i32
  }
  func.func @transform_1(%arg0: i32) -> (i32, i32) {
    %c0_i32 = arith.constant 0 : i32
    %c0_i32_0 = arith.constant 0 : i32
    %c0_i32_1 = arith.constant 0 : i32
    return %c0_i32, %c0_i32_0 : i32, i32
  }
  func.func @transform_2(%arg0: i32) -> (i32, i32, i32) {
    %c0_i32 = arith.constant 0 : i32
    %c0_i32_0 = arith.constant 0 : i32
    %c0_i32_1 = arith.constant 0 : i32
    %c0_i32_2 = arith.constant 0 : i32
    return %c0_i32, %c0_i32_0, %c0_i32_1 : i32, i32, i32
  }
  func.func @transform_3(%arg0: i32) -> (i32, i32, i32) {
    %c0_i32 = arith.constant 0 : i32
    %c0_i32_0 = arith.constant 0 : i32
    %c0_i32_1 = arith.constant 0 : i32
    %c0_i32_2 = arith.constant 0 : i32
    return %c0_i32, %c0_i32_0, %c0_i32_1 : i32, i32, i32
  }
  func.func @transform_4(%arg0: i32) -> (i32, i32) {
    %c0_i32 = arith.constant 0 : i32
    %c0_i32_0 = arith.constant 0 : i32
    %c0_i32_1 = arith.constant 0 : i32
    return %c0_i32, %c0_i32_0 : i32, i32
  }
  func.func @transform_5(%arg0: i32) -> (i32, i32, i32) {
    %c0_i32 = arith.constant 0 : i32
    %c0_i32_0 = arith.constant 0 : i32
    %c0_i32_1 = arith.constant 0 : i32
    %c0_i32_2 = arith.constant 0 : i32
    return %c0_i32, %c0_i32_0, %c0_i32_1 : i32, i32, i32
  }
  func.func @transform_6(%arg0: i32) -> (i32, i32, i32) {
    %c0_i32 = arith.constant 0 : i32
    %c0_i32_0 = arith.constant 0 : i32
    %c0_i32_1 = arith.constant 0 : i32
    %c0_i32_2 = arith.constant 0 : i32
    return %c0_i32, %c0_i32_0, %c0_i32_1 : i32, i32, i32
  }
  func.func @transform_7(%arg0: i32) -> (i32, i32, i32) {
    %c0_i32 = arith.constant 0 : i32
    %c0_i32_0 = arith.constant 0 : i32
    %c0_i32_1 = arith.constant 0 : i32
    %c0_i32_2 = arith.constant 0 : i32
    return %c0_i32, %c0_i32_0, %c0_i32_1 : i32, i32, i32
  }
  func.func @transform_8(%arg0: i32) -> (i32, i32) {
    %c0_i32 = arith.constant 0 : i32
    %c0_i32_0 = arith.constant 0 : i32
    %c0_i32_1 = arith.constant 0 : i32
    return %c0_i32, %c0_i32_0 : i32, i32
  }
  func.func @transform_9(%arg0: i32) -> (i32, i32, i32) {
    %c0_i32 = arith.constant 0 : i32
    %c0_i32_0 = arith.constant 0 : i32
    %c0_i32_1 = arith.constant 0 : i32
    return %arg0, %c0_i32, %c0_i32_0 : i32, i32, i32
  }
}

module attributes {stable_mosaic.version = 11 : i64} {
  func.func @_block_kernel(%arg0: i32, %arg1: memref<1x64x144xbf16, #tpu.memory_space<vmem>>, %arg2: memref<144x64xbf16, #tpu.memory_space<vmem>>, %arg3: memref<1x1x64xf32, #tpu.memory_space<vmem>>, %arg4: memref<1x1x64xf32, #tpu.memory_space<vmem>>, %arg5: memref<64x64xf32, #tpu.memory_space<vmem>>, %arg6: memref<9x32x32xbf16, #tpu.memory_space<vmem>>, %arg7: memref<1x1x32xf32, #tpu.memory_space<vmem>>, %arg8: memref<1x1x32xf32, #tpu.memory_space<vmem>>, %arg9: memref<32x32xf32, #tpu.memory_space<vmem>>, %arg10: memref<1x64x32xbf16, #tpu.memory_space<vmem>>) attributes {dimension_semantics = [#tpu.dimension_semantics<parallel>], iteration_bounds = array<i64: 2>, scalar_prefetch = 0 : i64, scratch_operands = 0 : i64, tpu.core_type = #tpu.core_type<tc>, window_params = [{transform_indices = @transform_0, window_bounds = array<i64: 1, 64, 144>}, {pipeline_mode = #tpu.pipeline_mode<synchronous>, transform_indices = @transform_1, window_bounds = array<i64: 144, 64>}, {pipeline_mode = #tpu.pipeline_mode<synchronous>, transform_indices = @transform_2, window_bounds = array<i64: 1, 1, 64>}, {pipeline_mode = #tpu.pipeline_mode<synchronous>, transform_indices = @transform_3, window_bounds = array<i64: 1, 1, 64>}, {pipeline_mode = #tpu.pipeline_mode<synchronous>, transform_indices = @transform_4, window_bounds = array<i64: 64, 64>}, {pipeline_mode = #tpu.pipeline_mode<synchronous>, transform_indices = @transform_5, window_bounds = array<i64: 9, 32, 32>}, {pipeline_mode = #tpu.pipeline_mode<synchronous>, transform_indices = @transform_6, window_bounds = array<i64: 1, 1, 32>}, {pipeline_mode = #tpu.pipeline_mode<synchronous>, transform_indices = @transform_7, window_bounds = array<i64: 1, 1, 32>}, {pipeline_mode = #tpu.pipeline_mode<synchronous>, transform_indices = @transform_8, window_bounds = array<i64: 32, 32>}, {transform_indices = @transform_9, window_bounds = array<i64: 1, 64, 32>}]} {
    %c0 = arith.constant 0 : index
    %c0_0 = arith.constant 0 : index
    %c0_1 = arith.constant 0 : index
    %0 = vector.load %arg1[%c0, %c0_0, %c0_1] : memref<1x64x144xbf16, #tpu.memory_space<vmem>>, vector<1x64x144xbf16>
    %1 = vector.shape_cast %0 : vector<1x64x144xbf16> to vector<64x144xbf16>
    %c0_2 = arith.constant 0 : index
    %c0_3 = arith.constant 0 : index
    %2 = vector.load %arg2[%c0_2, %c0_3] : memref<144x64xbf16, #tpu.memory_space<vmem>>, vector<144x64xbf16>
    %cst = arith.constant dense<0.000000e+00> : vector<64x64xf32>
    %3 = tpu.matmul %1, %2, %cst {dimension_numbers = #tpu.dot_dimension_numbers<[1], [0], [0], [1], [0, 0, 1, 1], [], []>} : vector<64x144xbf16>, vector<144x64xbf16>, vector<64x64xf32> -> vector<64x64xf32>
    %4 = vector.shape_cast %3 : vector<64x64xf32> to vector<1x64x64xf32>
    %c0_4 = arith.constant 0 : index
    %c0_5 = arith.constant 0 : index
    %5 = vector.load %arg5[%c0_4, %c0_5] : memref<64x64xf32, #tpu.memory_space<vmem>>, vector<64x64xf32>
    %c0_6 = arith.constant 0 : index
    %c0_7 = arith.constant 0 : index
    %c0_8 = arith.constant 0 : index
    %6 = vector.load %arg3[%c0_6, %c0_7, %c0_8] : memref<1x1x64xf32, #tpu.memory_space<vmem>>, vector<1x1x64xf32>
    %c0_9 = arith.constant 0 : index
    %c0_10 = arith.constant 0 : index
    %c0_11 = arith.constant 0 : index
    %7 = vector.load %arg4[%c0_9, %c0_10, %c0_11] : memref<1x1x64xf32, #tpu.memory_space<vmem>>, vector<1x1x64xf32>
    %cst_12 = arith.constant dense<0.000000e+00> : vector<1x64xf32>
    %8 = vector.multi_reduction <add>, %4, %cst_12 [1] : vector<1x64x64xf32> to vector<1x64xf32>
    %9 = arith.mulf %4, %4 : vector<1x64x64xf32>
    %cst_13 = arith.constant dense<0.000000e+00> : vector<1x64xf32>
    %10 = vector.multi_reduction <add>, %9, %cst_13 [1] : vector<1x64x64xf32> to vector<1x64xf32>
    %cst_14 = arith.constant dense<0.000000e+00> : vector<1x64xf32>
    %11 = tpu.matmul %8, %5, %cst_14 {dimension_numbers = #tpu.dot_dimension_numbers<[1], [0], [0], [1], [0, 0, 1, 1], [], []>} : vector<1x64xf32>, vector<64x64xf32>, vector<1x64xf32> -> vector<1x64xf32>
    %cst_15 = arith.constant 0.001953125 : f32
    %12 = vector.broadcast %cst_15 : f32 to vector<1x64xf32>
    %13 = arith.mulf %11, %12 : vector<1x64xf32>
    %cst_16 = arith.constant dense<0.000000e+00> : vector<1x64xf32>
    %14 = tpu.matmul %10, %5, %cst_16 {dimension_numbers = #tpu.dot_dimension_numbers<[1], [0], [0], [1], [0, 0, 1, 1], [], []>} : vector<1x64xf32>, vector<64x64xf32>, vector<1x64xf32> -> vector<1x64xf32>
    %cst_17 = arith.constant 0.001953125 : f32
    %15 = vector.broadcast %cst_17 : f32 to vector<1x64xf32>
    %16 = arith.mulf %14, %15 : vector<1x64xf32>
    %17 = arith.mulf %13, %13 : vector<1x64xf32>
    %18 = arith.subf %16, %17 : vector<1x64xf32>
    %cst_18 = arith.constant 9.99999974E-6 : f32
    %19 = vector.broadcast %cst_18 : f32 to vector<1x64xf32>
    %20 = arith.addf %18, %19 : vector<1x64xf32>
    %21 = math.rsqrt %20 : vector<1x64xf32>
    %22 = vector.shape_cast %13 : vector<1x64xf32> to vector<1x1x64xf32>
    %23 = vector.broadcast %22 : vector<1x1x64xf32> to vector<1x64x64xf32>
    %24 = arith.subf %4, %23 : vector<1x64x64xf32>
    %25 = vector.shape_cast %21 : vector<1x64xf32> to vector<1x1x64xf32>
    %26 = vector.broadcast %25 : vector<1x1x64xf32> to vector<1x64x64xf32>
    %27 = arith.mulf %24, %26 : vector<1x64x64xf32>
    %28 = vector.broadcast %6 : vector<1x1x64xf32> to vector<1x64x64xf32>
    %29 = arith.mulf %27, %28 : vector<1x64x64xf32>
    %30 = vector.broadcast %7 : vector<1x1x64xf32> to vector<1x64x64xf32>
    %31 = arith.addf %29, %30 : vector<1x64x64xf32>
    %32 = vector.extract_strided_slice %31 {offsets = [0, 0, 0], sizes = [1, 64, 32], strides = [1, 1, 1]} : vector<1x64x64xf32> to vector<1x64x32xf32>
    %cst_19 = arith.constant 0.000000e+00 : f32
    %33 = vector.broadcast %cst_19 : f32 to vector<1x64x32xf32>
    %34 = arith.maximumf %32, %33 : vector<1x64x32xf32>
    %35 = vector.extract_strided_slice %31 {offsets = [0, 0, 32], sizes = [1, 64, 32], strides = [1, 1, 1]} : vector<1x64x64xf32> to vector<1x64x32xf32>
    %cst_20 = arith.constant 0.000000e+00 : f32
    %36 = vector.broadcast %cst_20 : f32 to vector<1x9x32xf32>
    %37 = tpu.concatenate %36, %34, %36 in 1 : vector<1x9x32xf32>, vector<1x64x32xf32>, vector<1x9x32xf32> -> vector<1x82x32xf32>
    %38 = tpu.iota {dimensions = array<i32: 1>} : vector<1x64x1xi32>
    %c8_i32 = arith.constant 8 : i32
    %c0_i32 = arith.constant 0 : i32
    %39 = arith.cmpi eq, %c8_i32, %c0_i32 : i32
    %c1_i32 = arith.constant 1 : i32
    %40 = arith.select %39, %c1_i32, %c8_i32 : i32
    %41 = vector.broadcast %40 : i32 to vector<1x64x1xi32>
    %42 = arith.remsi %38, %41 : vector<1x64x1xi32>
    %c0_i32_21 = arith.constant 0 : i32
    %43 = vector.broadcast %c0_i32_21 : i32 to vector<1x64x1xi32>
    %44 = arith.cmpi ne, %42, %43 : vector<1x64x1xi32>
    %c0_i32_22 = arith.constant 0 : i32
    %45 = vector.broadcast %c0_i32_22 : i32 to vector<1x64x1xi32>
    %46 = arith.cmpi slt, %42, %45 : vector<1x64x1xi32>
    %c0_i32_23 = arith.constant 0 : i32
    %47 = arith.cmpi slt, %40, %c0_i32_23 : i32
    %48 = vector.broadcast %47 : i1 to vector<1x64x1xi1>
    %49 = vector.broadcast %48 : vector<1x64x1xi1> to vector<1x64x1xi1>
    %50 = arith.xori %46, %49 : vector<1x64x1xi1>
    %51 = arith.andi %50, %44 : vector<1x64x1xi1>
    %52 = vector.broadcast %40 : i32 to vector<1x64x1xi32>
    %53 = arith.addi %42, %52 : vector<1x64x1xi32>
    %54 = arith.select %51, %53, %42 : vector<1x64x1xi1>, vector<1x64x1xi32>
    %cst_24 = arith.constant 0.000000e+00 : f32
    %55 = vector.broadcast %cst_24 : f32 to vector<64x32xf32>
    %56 = vector.extract_strided_slice %37 {offsets = [0, 0, 0], sizes = [1, 64, 32], strides = [1, 1, 1]} : vector<1x82x32xf32> to vector<1x64x32xf32>
    %c1_i32_25 = arith.constant 1 : i32
    %57 = vector.broadcast %c1_i32_25 : i32 to vector<1x64x1xi32>
    %58 = arith.cmpi sge, %54, %57 : vector<1x64x1xi32>
    %cst_26 = arith.constant 0.000000e+00 : f32
    %59 = vector.shape_cast %58 : vector<1x64x1xi1> to vector<1x64x1xi1>
    %60 = vector.broadcast %59 : vector<1x64x1xi1> to vector<1x64x32xi1>
    %61 = vector.broadcast %cst_26 : f32 to vector<1x64x32xf32>
    %62 = arith.select %60, %56, %61 : vector<1x64x32xi1>, vector<1x64x32xf32>
    %63 = arith.truncf %62 : vector<1x64x32xf32> to vector<1x64x32xbf16>
    %64 = vector.shape_cast %63 : vector<1x64x32xbf16> to vector<64x32xbf16>
    %c0_27 = arith.constant 0 : index
    %c0_28 = arith.constant 0 : index
    %c0_29 = arith.constant 0 : index
    %65 = vector.load %arg6[%c0_27, %c0_28, %c0_29] : memref<9x32x32xbf16, #tpu.memory_space<vmem>>, vector<1x32x32xbf16>
    %66 = vector.shape_cast %65 : vector<1x32x32xbf16> to vector<32x32xbf16>
    %cst_30 = arith.constant dense<0.000000e+00> : vector<64x32xf32>
    %67 = tpu.matmul %64, %66, %cst_30 {dimension_numbers = #tpu.dot_dimension_numbers<[1], [0], [0], [1], [0, 0, 1, 1], [], []>} : vector<64x32xbf16>, vector<32x32xbf16>, vector<64x32xf32> -> vector<64x32xf32>
    %68 = arith.addf %55, %67 : vector<64x32xf32>
    %69 = vector.extract_strided_slice %37 {offsets = [0, 1, 0], sizes = [1, 64, 32], strides = [1, 1, 1]} : vector<1x82x32xf32> to vector<1x64x32xf32>
    %70 = arith.truncf %69 : vector<1x64x32xf32> to vector<1x64x32xbf16>
    %71 = vector.shape_cast %70 : vector<1x64x32xbf16> to vector<64x32xbf16>
    %c1 = arith.constant 1 : index
    %c0_31 = arith.constant 0 : index
    %c0_32 = arith.constant 0 : index
    %72 = vector.load %arg6[%c1, %c0_31, %c0_32] : memref<9x32x32xbf16, #tpu.memory_space<vmem>>, vector<1x32x32xbf16>
    %73 = vector.shape_cast %72 : vector<1x32x32xbf16> to vector<32x32xbf16>
    %cst_33 = arith.constant dense<0.000000e+00> : vector<64x32xf32>
    %74 = tpu.matmul %71, %73, %cst_33 {dimension_numbers = #tpu.dot_dimension_numbers<[1], [0], [0], [1], [0, 0, 1, 1], [], []>} : vector<64x32xbf16>, vector<32x32xbf16>, vector<64x32xf32> -> vector<64x32xf32>
    %75 = arith.addf %68, %74 : vector<64x32xf32>
    %76 = vector.extract_strided_slice %37 {offsets = [0, 2, 0], sizes = [1, 64, 32], strides = [1, 1, 1]} : vector<1x82x32xf32> to vector<1x64x32xf32>
    %c7_i32 = arith.constant 7 : i32
    %77 = vector.broadcast %c7_i32 : i32 to vector<1x64x1xi32>
    %78 = arith.cmpi slt, %54, %77 : vector<1x64x1xi32>
    %cst_34 = arith.constant 0.000000e+00 : f32
    %79 = vector.shape_cast %78 : vector<1x64x1xi1> to vector<1x64x1xi1>
    %80 = vector.broadcast %79 : vector<1x64x1xi1> to vector<1x64x32xi1>
    %81 = vector.broadcast %cst_34 : f32 to vector<1x64x32xf32>
    %82 = arith.select %80, %76, %81 : vector<1x64x32xi1>, vector<1x64x32xf32>
    %83 = arith.truncf %82 : vector<1x64x32xf32> to vector<1x64x32xbf16>
    %84 = vector.shape_cast %83 : vector<1x64x32xbf16> to vector<64x32xbf16>
    %c2 = arith.constant 2 : index
    %c0_35 = arith.constant 0 : index
    %c0_36 = arith.constant 0 : index
    %85 = vector.load %arg6[%c2, %c0_35, %c0_36] : memref<9x32x32xbf16, #tpu.memory_space<vmem>>, vector<1x32x32xbf16>
    %86 = vector.shape_cast %85 : vector<1x32x32xbf16> to vector<32x32xbf16>
    %cst_37 = arith.constant dense<0.000000e+00> : vector<64x32xf32>
    %87 = tpu.matmul %84, %86, %cst_37 {dimension_numbers = #tpu.dot_dimension_numbers<[1], [0], [0], [1], [0, 0, 1, 1], [], []>} : vector<64x32xbf16>, vector<32x32xbf16>, vector<64x32xf32> -> vector<64x32xf32>
    %88 = arith.addf %75, %87 : vector<64x32xf32>
    %89 = vector.extract_strided_slice %37 {offsets = [0, 8, 0], sizes = [1, 64, 32], strides = [1, 1, 1]} : vector<1x82x32xf32> to vector<1x64x32xf32>
    %c1_i32_38 = arith.constant 1 : i32
    %90 = vector.broadcast %c1_i32_38 : i32 to vector<1x64x1xi32>
    %91 = arith.cmpi sge, %54, %90 : vector<1x64x1xi32>
    %cst_39 = arith.constant 0.000000e+00 : f32
    %92 = vector.shape_cast %91 : vector<1x64x1xi1> to vector<1x64x1xi1>
    %93 = vector.broadcast %92 : vector<1x64x1xi1> to vector<1x64x32xi1>
    %94 = vector.broadcast %cst_39 : f32 to vector<1x64x32xf32>
    %95 = arith.select %93, %89, %94 : vector<1x64x32xi1>, vector<1x64x32xf32>
    %96 = arith.truncf %95 : vector<1x64x32xf32> to vector<1x64x32xbf16>
    %97 = vector.shape_cast %96 : vector<1x64x32xbf16> to vector<64x32xbf16>
    %c3 = arith.constant 3 : index
    %c0_40 = arith.constant 0 : index
    %c0_41 = arith.constant 0 : index
    %98 = vector.load %arg6[%c3, %c0_40, %c0_41] : memref<9x32x32xbf16, #tpu.memory_space<vmem>>, vector<1x32x32xbf16>
    %99 = vector.shape_cast %98 : vector<1x32x32xbf16> to vector<32x32xbf16>
    %cst_42 = arith.constant dense<0.000000e+00> : vector<64x32xf32>
    %100 = tpu.matmul %97, %99, %cst_42 {dimension_numbers = #tpu.dot_dimension_numbers<[1], [0], [0], [1], [0, 0, 1, 1], [], []>} : vector<64x32xbf16>, vector<32x32xbf16>, vector<64x32xf32> -> vector<64x32xf32>
    %101 = arith.addf %88, %100 : vector<64x32xf32>
    %102 = vector.extract_strided_slice %37 {offsets = [0, 9, 0], sizes = [1, 64, 32], strides = [1, 1, 1]} : vector<1x82x32xf32> to vector<1x64x32xf32>
    %103 = arith.truncf %102 : vector<1x64x32xf32> to vector<1x64x32xbf16>
    %104 = vector.shape_cast %103 : vector<1x64x32xbf16> to vector<64x32xbf16>
    %c4 = arith.constant 4 : index
    %c0_43 = arith.constant 0 : index
    %c0_44 = arith.constant 0 : index
    %105 = vector.load %arg6[%c4, %c0_43, %c0_44] : memref<9x32x32xbf16, #tpu.memory_space<vmem>>, vector<1x32x32xbf16>
    %106 = vector.shape_cast %105 : vector<1x32x32xbf16> to vector<32x32xbf16>
    %cst_45 = arith.constant dense<0.000000e+00> : vector<64x32xf32>
    %107 = tpu.matmul %104, %106, %cst_45 {dimension_numbers = #tpu.dot_dimension_numbers<[1], [0], [0], [1], [0, 0, 1, 1], [], []>} : vector<64x32xbf16>, vector<32x32xbf16>, vector<64x32xf32> -> vector<64x32xf32>
    %108 = arith.addf %101, %107 : vector<64x32xf32>
    %109 = vector.extract_strided_slice %37 {offsets = [0, 10, 0], sizes = [1, 64, 32], strides = [1, 1, 1]} : vector<1x82x32xf32> to vector<1x64x32xf32>
    %c7_i32_46 = arith.constant 7 : i32
    %110 = vector.broadcast %c7_i32_46 : i32 to vector<1x64x1xi32>
    %111 = arith.cmpi slt, %54, %110 : vector<1x64x1xi32>
    %cst_47 = arith.constant 0.000000e+00 : f32
    %112 = vector.shape_cast %111 : vector<1x64x1xi1> to vector<1x64x1xi1>
    %113 = vector.broadcast %112 : vector<1x64x1xi1> to vector<1x64x32xi1>
    %114 = vector.broadcast %cst_47 : f32 to vector<1x64x32xf32>
    %115 = arith.select %113, %109, %114 : vector<1x64x32xi1>, vector<1x64x32xf32>
    %116 = arith.truncf %115 : vector<1x64x32xf32> to vector<1x64x32xbf16>
    %117 = vector.shape_cast %116 : vector<1x64x32xbf16> to vector<64x32xbf16>
    %c5 = arith.constant 5 : index
    %c0_48 = arith.constant 0 : index
    %c0_49 = arith.constant 0 : index
    %118 = vector.load %arg6[%c5, %c0_48, %c0_49] : memref<9x32x32xbf16, #tpu.memory_space<vmem>>, vector<1x32x32xbf16>
    %119 = vector.shape_cast %118 : vector<1x32x32xbf16> to vector<32x32xbf16>
    %cst_50 = arith.constant dense<0.000000e+00> : vector<64x32xf32>
    %120 = tpu.matmul %117, %119, %cst_50 {dimension_numbers = #tpu.dot_dimension_numbers<[1], [0], [0], [1], [0, 0, 1, 1], [], []>} : vector<64x32xbf16>, vector<32x32xbf16>, vector<64x32xf32> -> vector<64x32xf32>
    %121 = arith.addf %108, %120 : vector<64x32xf32>
    %122 = vector.extract_strided_slice %37 {offsets = [0, 16, 0], sizes = [1, 64, 32], strides = [1, 1, 1]} : vector<1x82x32xf32> to vector<1x64x32xf32>
    %c1_i32_51 = arith.constant 1 : i32
    %123 = vector.broadcast %c1_i32_51 : i32 to vector<1x64x1xi32>
    %124 = arith.cmpi sge, %54, %123 : vector<1x64x1xi32>
    %cst_52 = arith.constant 0.000000e+00 : f32
    %125 = vector.shape_cast %124 : vector<1x64x1xi1> to vector<1x64x1xi1>
    %126 = vector.broadcast %125 : vector<1x64x1xi1> to vector<1x64x32xi1>
    %127 = vector.broadcast %cst_52 : f32 to vector<1x64x32xf32>
    %128 = arith.select %126, %122, %127 : vector<1x64x32xi1>, vector<1x64x32xf32>
    %129 = arith.truncf %128 : vector<1x64x32xf32> to vector<1x64x32xbf16>
    %130 = vector.shape_cast %129 : vector<1x64x32xbf16> to vector<64x32xbf16>
    %c6 = arith.constant 6 : index
    %c0_53 = arith.constant 0 : index
    %c0_54 = arith.constant 0 : index
    %131 = vector.load %arg6[%c6, %c0_53, %c0_54] : memref<9x32x32xbf16, #tpu.memory_space<vmem>>, vector<1x32x32xbf16>
    %132 = vector.shape_cast %131 : vector<1x32x32xbf16> to vector<32x32xbf16>
    %cst_55 = arith.constant dense<0.000000e+00> : vector<64x32xf32>
    %133 = tpu.matmul %130, %132, %cst_55 {dimension_numbers = #tpu.dot_dimension_numbers<[1], [0], [0], [1], [0, 0, 1, 1], [], []>} : vector<64x32xbf16>, vector<32x32xbf16>, vector<64x32xf32> -> vector<64x32xf32>
    %134 = arith.addf %121, %133 : vector<64x32xf32>
    %135 = vector.extract_strided_slice %37 {offsets = [0, 17, 0], sizes = [1, 64, 32], strides = [1, 1, 1]} : vector<1x82x32xf32> to vector<1x64x32xf32>
    %136 = arith.truncf %135 : vector<1x64x32xf32> to vector<1x64x32xbf16>
    %137 = vector.shape_cast %136 : vector<1x64x32xbf16> to vector<64x32xbf16>
    %c7 = arith.constant 7 : index
    %c0_56 = arith.constant 0 : index
    %c0_57 = arith.constant 0 : index
    %138 = vector.load %arg6[%c7, %c0_56, %c0_57] : memref<9x32x32xbf16, #tpu.memory_space<vmem>>, vector<1x32x32xbf16>
    %139 = vector.shape_cast %138 : vector<1x32x32xbf16> to vector<32x32xbf16>
    %cst_58 = arith.constant dense<0.000000e+00> : vector<64x32xf32>
    %140 = tpu.matmul %137, %139, %cst_58 {dimension_numbers = #tpu.dot_dimension_numbers<[1], [0], [0], [1], [0, 0, 1, 1], [], []>} : vector<64x32xbf16>, vector<32x32xbf16>, vector<64x32xf32> -> vector<64x32xf32>
    %141 = arith.addf %134, %140 : vector<64x32xf32>
    %142 = vector.extract_strided_slice %37 {offsets = [0, 18, 0], sizes = [1, 64, 32], strides = [1, 1, 1]} : vector<1x82x32xf32> to vector<1x64x32xf32>
    %c7_i32_59 = arith.constant 7 : i32
    %143 = vector.broadcast %c7_i32_59 : i32 to vector<1x64x1xi32>
    %144 = arith.cmpi slt, %54, %143 : vector<1x64x1xi32>
    %cst_60 = arith.constant 0.000000e+00 : f32
    %145 = vector.shape_cast %144 : vector<1x64x1xi1> to vector<1x64x1xi1>
    %146 = vector.broadcast %145 : vector<1x64x1xi1> to vector<1x64x32xi1>
    %147 = vector.broadcast %cst_60 : f32 to vector<1x64x32xf32>
    %148 = arith.select %146, %142, %147 : vector<1x64x32xi1>, vector<1x64x32xf32>
    %149 = arith.truncf %148 : vector<1x64x32xf32> to vector<1x64x32xbf16>
    %150 = vector.shape_cast %149 : vector<1x64x32xbf16> to vector<64x32xbf16>
    %c8 = arith.constant 8 : index
    %c0_61 = arith.constant 0 : index
    %c0_62 = arith.constant 0 : index
    %151 = vector.load %arg6[%c8, %c0_61, %c0_62] : memref<9x32x32xbf16, #tpu.memory_space<vmem>>, vector<1x32x32xbf16>
    %152 = vector.shape_cast %151 : vector<1x32x32xbf16> to vector<32x32xbf16>
    %cst_63 = arith.constant dense<0.000000e+00> : vector<64x32xf32>
    %153 = tpu.matmul %150, %152, %cst_63 {dimension_numbers = #tpu.dot_dimension_numbers<[1], [0], [0], [1], [0, 0, 1, 1], [], []>} : vector<64x32xbf16>, vector<32x32xbf16>, vector<64x32xf32> -> vector<64x32xf32>
    %154 = arith.addf %141, %153 : vector<64x32xf32>
    %155 = vector.shape_cast %154 : vector<64x32xf32> to vector<1x64x32xf32>
    %c0_64 = arith.constant 0 : index
    %c0_65 = arith.constant 0 : index
    %156 = vector.load %arg9[%c0_64, %c0_65] : memref<32x32xf32, #tpu.memory_space<vmem>>, vector<32x32xf32>
    %c0_66 = arith.constant 0 : index
    %c0_67 = arith.constant 0 : index
    %c0_68 = arith.constant 0 : index
    %157 = vector.load %arg7[%c0_66, %c0_67, %c0_68] : memref<1x1x32xf32, #tpu.memory_space<vmem>>, vector<1x1x32xf32>
    %c0_69 = arith.constant 0 : index
    %c0_70 = arith.constant 0 : index
    %c0_71 = arith.constant 0 : index
    %158 = vector.load %arg8[%c0_69, %c0_70, %c0_71] : memref<1x1x32xf32, #tpu.memory_space<vmem>>, vector<1x1x32xf32>
    %cst_72 = arith.constant dense<0.000000e+00> : vector<1x32xf32>
    %159 = vector.multi_reduction <add>, %155, %cst_72 [1] : vector<1x64x32xf32> to vector<1x32xf32>
    %160 = arith.mulf %155, %155 : vector<1x64x32xf32>
    %cst_73 = arith.constant dense<0.000000e+00> : vector<1x32xf32>
    %161 = vector.multi_reduction <add>, %160, %cst_73 [1] : vector<1x64x32xf32> to vector<1x32xf32>
    %cst_74 = arith.constant dense<0.000000e+00> : vector<1x32xf32>
    %162 = tpu.matmul %159, %156, %cst_74 {dimension_numbers = #tpu.dot_dimension_numbers<[1], [0], [0], [1], [0, 0, 1, 1], [], []>} : vector<1x32xf32>, vector<32x32xf32>, vector<1x32xf32> -> vector<1x32xf32>
    %cst_75 = arith.constant 0.001953125 : f32
    %163 = vector.broadcast %cst_75 : f32 to vector<1x32xf32>
    %164 = arith.mulf %162, %163 : vector<1x32xf32>
    %cst_76 = arith.constant dense<0.000000e+00> : vector<1x32xf32>
    %165 = tpu.matmul %161, %156, %cst_76 {dimension_numbers = #tpu.dot_dimension_numbers<[1], [0], [0], [1], [0, 0, 1, 1], [], []>} : vector<1x32xf32>, vector<32x32xf32>, vector<1x32xf32> -> vector<1x32xf32>
    %cst_77 = arith.constant 0.001953125 : f32
    %166 = vector.broadcast %cst_77 : f32 to vector<1x32xf32>
    %167 = arith.mulf %165, %166 : vector<1x32xf32>
    %168 = arith.mulf %164, %164 : vector<1x32xf32>
    %169 = arith.subf %167, %168 : vector<1x32xf32>
    %cst_78 = arith.constant 9.99999974E-6 : f32
    %170 = vector.broadcast %cst_78 : f32 to vector<1x32xf32>
    %171 = arith.addf %169, %170 : vector<1x32xf32>
    %172 = math.rsqrt %171 : vector<1x32xf32>
    %173 = vector.shape_cast %164 : vector<1x32xf32> to vector<1x1x32xf32>
    %174 = vector.broadcast %173 : vector<1x1x32xf32> to vector<1x64x32xf32>
    %175 = arith.subf %155, %174 : vector<1x64x32xf32>
    %176 = vector.shape_cast %172 : vector<1x32xf32> to vector<1x1x32xf32>
    %177 = vector.broadcast %176 : vector<1x1x32xf32> to vector<1x64x32xf32>
    %178 = arith.mulf %175, %177 : vector<1x64x32xf32>
    %179 = vector.broadcast %157 : vector<1x1x32xf32> to vector<1x64x32xf32>
    %180 = arith.mulf %178, %179 : vector<1x64x32xf32>
    %181 = vector.broadcast %158 : vector<1x1x32xf32> to vector<1x64x32xf32>
    %182 = arith.addf %180, %181 : vector<1x64x32xf32>
    %183 = arith.addf %182, %35 : vector<1x64x32xf32>
    %cst_79 = arith.constant 0.000000e+00 : f32
    %184 = vector.broadcast %cst_79 : f32 to vector<1x64x32xf32>
    %185 = arith.maximumf %183, %184 : vector<1x64x32xf32>
    %186 = arith.truncf %185 : vector<1x64x32xf32> to vector<1x64x32xbf16>
    %c0_80 = arith.constant 0 : index
    %c0_81 = arith.constant 0 : index
    %c0_82 = arith.constant 0 : index
    %187 = vector.load %arg10[%c0_80, %c0_81, %c0_82] : memref<1x64x32xbf16, #tpu.memory_space<vmem>>, vector<1x64x32xbf16>
    tpu.vector_store %arg10[%c0_80, %c0_81, %c0_82], %186 {strides = array<i32>} : memref<1x64x32xbf16, #tpu.memory_space<vmem>>, vector<1x64x32xbf16>,
    return
  }
  func.func @transform_0(%arg0: i32) -> (i32, i32, i32) {
    %c0_i32 = arith.constant 0 : i32
    %c0_i32_0 = arith.constant 0 : i32
    %c0_i32_1 = arith.constant 0 : i32
    return %arg0, %c0_i32, %c0_i32_0 : i32, i32, i32
  }
  func.func @transform_1(%arg0: i32) -> (i32, i32) {
    %c0_i32 = arith.constant 0 : i32
    %c0_i32_0 = arith.constant 0 : i32
    %c0_i32_1 = arith.constant 0 : i32
    return %c0_i32, %c0_i32_0 : i32, i32
  }
  func.func @transform_2(%arg0: i32) -> (i32, i32, i32) {
    %c0_i32 = arith.constant 0 : i32
    %c0_i32_0 = arith.constant 0 : i32
    %c0_i32_1 = arith.constant 0 : i32
    %c0_i32_2 = arith.constant 0 : i32
    return %c0_i32, %c0_i32_0, %c0_i32_1 : i32, i32, i32
  }
  func.func @transform_3(%arg0: i32) -> (i32, i32, i32) {
    %c0_i32 = arith.constant 0 : i32
    %c0_i32_0 = arith.constant 0 : i32
    %c0_i32_1 = arith.constant 0 : i32
    %c0_i32_2 = arith.constant 0 : i32
    return %c0_i32, %c0_i32_0, %c0_i32_1 : i32, i32, i32
  }
  func.func @transform_4(%arg0: i32) -> (i32, i32) {
    %c0_i32 = arith.constant 0 : i32
    %c0_i32_0 = arith.constant 0 : i32
    %c0_i32_1 = arith.constant 0 : i32
    return %c0_i32, %c0_i32_0 : i32, i32
  }
  func.func @transform_5(%arg0: i32) -> (i32, i32, i32) {
    %c0_i32 = arith.constant 0 : i32
    %c0_i32_0 = arith.constant 0 : i32
    %c0_i32_1 = arith.constant 0 : i32
    %c0_i32_2 = arith.constant 0 : i32
    return %c0_i32, %c0_i32_0, %c0_i32_1 : i32, i32, i32
  }
  func.func @transform_6(%arg0: i32) -> (i32, i32, i32) {
    %c0_i32 = arith.constant 0 : i32
    %c0_i32_0 = arith.constant 0 : i32
    %c0_i32_1 = arith.constant 0 : i32
    %c0_i32_2 = arith.constant 0 : i32
    return %c0_i32, %c0_i32_0, %c0_i32_1 : i32, i32, i32
  }
  func.func @transform_7(%arg0: i32) -> (i32, i32, i32) {
    %c0_i32 = arith.constant 0 : i32
    %c0_i32_0 = arith.constant 0 : i32
    %c0_i32_1 = arith.constant 0 : i32
    %c0_i32_2 = arith.constant 0 : i32
    return %c0_i32, %c0_i32_0, %c0_i32_1 : i32, i32, i32
  }
  func.func @transform_8(%arg0: i32) -> (i32, i32) {
    %c0_i32 = arith.constant 0 : i32
    %c0_i32_0 = arith.constant 0 : i32
    %c0_i32_1 = arith.constant 0 : i32
    return %c0_i32, %c0_i32_0 : i32, i32
  }
  func.func @transform_9(%arg0: i32) -> (i32, i32, i32) {
    %c0_i32 = arith.constant 0 : i32
    %c0_i32_0 = arith.constant 0 : i32
    %c0_i32_1 = arith.constant 0 : i32
    return %arg0, %c0_i32, %c0_i32_0 : i32, i32, i32
  }
}

module attributes {stable_mosaic.version = 11 : i64} {
  func.func @_block_kernel(%arg0: i32, %arg1: memref<1x16x288xbf16, #tpu.memory_space<vmem>>, %arg2: memref<288x128xbf16, #tpu.memory_space<vmem>>, %arg3: memref<1x1x128xf32, #tpu.memory_space<vmem>>, %arg4: memref<1x1x128xf32, #tpu.memory_space<vmem>>, %arg5: memref<128x128xf32, #tpu.memory_space<vmem>>, %arg6: memref<9x64x64xbf16, #tpu.memory_space<vmem>>, %arg7: memref<1x1x64xf32, #tpu.memory_space<vmem>>, %arg8: memref<1x1x64xf32, #tpu.memory_space<vmem>>, %arg9: memref<64x64xf32, #tpu.memory_space<vmem>>, %arg10: memref<64x10xf32, #tpu.memory_space<vmem>>, %arg11: memref<1x10xf32, #tpu.memory_space<vmem>>, %arg12: memref<1x1x10xf32, #tpu.memory_space<vmem>>) attributes {dimension_semantics = [#tpu.dimension_semantics<parallel>], iteration_bounds = array<i64: 2>, scalar_prefetch = 0 : i64, scratch_operands = 0 : i64, tpu.core_type = #tpu.core_type<tc>, window_params = [{transform_indices = @transform_0, window_bounds = array<i64: 1, 16, 288>}, {pipeline_mode = #tpu.pipeline_mode<synchronous>, transform_indices = @transform_1, window_bounds = array<i64: 288, 128>}, {pipeline_mode = #tpu.pipeline_mode<synchronous>, transform_indices = @transform_2, window_bounds = array<i64: 1, 1, 128>}, {pipeline_mode = #tpu.pipeline_mode<synchronous>, transform_indices = @transform_3, window_bounds = array<i64: 1, 1, 128>}, {pipeline_mode = #tpu.pipeline_mode<synchronous>, transform_indices = @transform_4, window_bounds = array<i64: 128, 128>}, {pipeline_mode = #tpu.pipeline_mode<synchronous>, transform_indices = @transform_5, window_bounds = array<i64: 9, 64, 64>}, {pipeline_mode = #tpu.pipeline_mode<synchronous>, transform_indices = @transform_6, window_bounds = array<i64: 1, 1, 64>}, {pipeline_mode = #tpu.pipeline_mode<synchronous>, transform_indices = @transform_7, window_bounds = array<i64: 1, 1, 64>}, {pipeline_mode = #tpu.pipeline_mode<synchronous>, transform_indices = @transform_8, window_bounds = array<i64: 64, 64>}, {pipeline_mode = #tpu.pipeline_mode<synchronous>, transform_indices = @transform_9, window_bounds = array<i64: 64, 10>}, {pipeline_mode = #tpu.pipeline_mode<synchronous>, transform_indices = @transform_10, window_bounds = array<i64: 1, 10>}, {transform_indices = @transform_11, window_bounds = array<i64: 1, 1, 10>}]} {
    %c0 = arith.constant 0 : index
    %c0_0 = arith.constant 0 : index
    %c0_1 = arith.constant 0 : index
    %0 = vector.load %arg1[%c0, %c0_0, %c0_1] : memref<1x16x288xbf16, #tpu.memory_space<vmem>>, vector<1x16x288xbf16>
    %1 = vector.shape_cast %0 : vector<1x16x288xbf16> to vector<16x288xbf16>
    %c0_2 = arith.constant 0 : index
    %c0_3 = arith.constant 0 : index
    %2 = vector.load %arg2[%c0_2, %c0_3] : memref<288x128xbf16, #tpu.memory_space<vmem>>, vector<288x128xbf16>
    %cst = arith.constant dense<0.000000e+00> : vector<16x128xf32>
    %3 = tpu.matmul %1, %2, %cst {dimension_numbers = #tpu.dot_dimension_numbers<[1], [0], [0], [1], [0, 0, 1, 1], [], []>} : vector<16x288xbf16>, vector<288x128xbf16>, vector<16x128xf32> -> vector<16x128xf32>
    %4 = vector.shape_cast %3 : vector<16x128xf32> to vector<1x16x128xf32>
    %c0_4 = arith.constant 0 : index
    %c0_5 = arith.constant 0 : index
    %5 = vector.load %arg5[%c0_4, %c0_5] : memref<128x128xf32, #tpu.memory_space<vmem>>, vector<128x128xf32>
    %c0_6 = arith.constant 0 : index
    %c0_7 = arith.constant 0 : index
    %c0_8 = arith.constant 0 : index
    %6 = vector.load %arg3[%c0_6, %c0_7, %c0_8] : memref<1x1x128xf32, #tpu.memory_space<vmem>>, vector<1x1x128xf32>
    %c0_9 = arith.constant 0 : index
    %c0_10 = arith.constant 0 : index
    %c0_11 = arith.constant 0 : index
    %7 = vector.load %arg4[%c0_9, %c0_10, %c0_11] : memref<1x1x128xf32, #tpu.memory_space<vmem>>, vector<1x1x128xf32>
    %cst_12 = arith.constant dense<0.000000e+00> : vector<1x128xf32>
    %8 = vector.multi_reduction <add>, %4, %cst_12 [1] : vector<1x16x128xf32> to vector<1x128xf32>
    %9 = arith.mulf %4, %4 : vector<1x16x128xf32>
    %cst_13 = arith.constant dense<0.000000e+00> : vector<1x128xf32>
    %10 = vector.multi_reduction <add>, %9, %cst_13 [1] : vector<1x16x128xf32> to vector<1x128xf32>
    %cst_14 = arith.constant dense<0.000000e+00> : vector<1x128xf32>
    %11 = tpu.matmul %8, %5, %cst_14 {dimension_numbers = #tpu.dot_dimension_numbers<[1], [0], [0], [1], [0, 0, 1, 1], [], []>} : vector<1x128xf32>, vector<128x128xf32>, vector<1x128xf32> -> vector<1x128xf32>
    %cst_15 = arith.constant 3.906250e-03 : f32
    %12 = vector.broadcast %cst_15 : f32 to vector<1x128xf32>
    %13 = arith.mulf %11, %12 : vector<1x128xf32>
    %cst_16 = arith.constant dense<0.000000e+00> : vector<1x128xf32>
    %14 = tpu.matmul %10, %5, %cst_16 {dimension_numbers = #tpu.dot_dimension_numbers<[1], [0], [0], [1], [0, 0, 1, 1], [], []>} : vector<1x128xf32>, vector<128x128xf32>, vector<1x128xf32> -> vector<1x128xf32>
    %cst_17 = arith.constant 3.906250e-03 : f32
    %15 = vector.broadcast %cst_17 : f32 to vector<1x128xf32>
    %16 = arith.mulf %14, %15 : vector<1x128xf32>
    %17 = arith.mulf %13, %13 : vector<1x128xf32>
    %18 = arith.subf %16, %17 : vector<1x128xf32>
    %cst_18 = arith.constant 9.99999974E-6 : f32
    %19 = vector.broadcast %cst_18 : f32 to vector<1x128xf32>
    %20 = arith.addf %18, %19 : vector<1x128xf32>
    %21 = math.rsqrt %20 : vector<1x128xf32>
    %22 = vector.shape_cast %13 : vector<1x128xf32> to vector<1x1x128xf32>
    %23 = vector.broadcast %22 : vector<1x1x128xf32> to vector<1x16x128xf32>
    %24 = arith.subf %4, %23 : vector<1x16x128xf32>
    %25 = vector.shape_cast %21 : vector<1x128xf32> to vector<1x1x128xf32>
    %26 = vector.broadcast %25 : vector<1x1x128xf32> to vector<1x16x128xf32>
    %27 = arith.mulf %24, %26 : vector<1x16x128xf32>
    %28 = vector.broadcast %6 : vector<1x1x128xf32> to vector<1x16x128xf32>
    %29 = arith.mulf %27, %28 : vector<1x16x128xf32>
    %30 = vector.broadcast %7 : vector<1x1x128xf32> to vector<1x16x128xf32>
    %31 = arith.addf %29, %30 : vector<1x16x128xf32>
    %32 = vector.extract_strided_slice %31 {offsets = [0, 0, 0], sizes = [1, 16, 64], strides = [1, 1, 1]} : vector<1x16x128xf32> to vector<1x16x64xf32>
    %cst_19 = arith.constant 0.000000e+00 : f32
    %33 = vector.broadcast %cst_19 : f32 to vector<1x16x64xf32>
    %34 = arith.maximumf %32, %33 : vector<1x16x64xf32>
    %35 = vector.extract_strided_slice %31 {offsets = [0, 0, 64], sizes = [1, 16, 64], strides = [1, 1, 1]} : vector<1x16x128xf32> to vector<1x16x64xf32>
    %cst_20 = arith.constant 0.000000e+00 : f32
    %36 = vector.broadcast %cst_20 : f32 to vector<1x5x64xf32>
    %37 = tpu.concatenate %36, %34, %36 in 1 : vector<1x5x64xf32>, vector<1x16x64xf32>, vector<1x5x64xf32> -> vector<1x26x64xf32>
    %38 = tpu.iota {dimensions = array<i32: 1>} : vector<1x16x1xi32>
    %c4_i32 = arith.constant 4 : i32
    %c0_i32 = arith.constant 0 : i32
    %39 = arith.cmpi eq, %c4_i32, %c0_i32 : i32
    %c1_i32 = arith.constant 1 : i32
    %40 = arith.select %39, %c1_i32, %c4_i32 : i32
    %41 = vector.broadcast %40 : i32 to vector<1x16x1xi32>
    %42 = arith.remsi %38, %41 : vector<1x16x1xi32>
    %c0_i32_21 = arith.constant 0 : i32
    %43 = vector.broadcast %c0_i32_21 : i32 to vector<1x16x1xi32>
    %44 = arith.cmpi ne, %42, %43 : vector<1x16x1xi32>
    %c0_i32_22 = arith.constant 0 : i32
    %45 = vector.broadcast %c0_i32_22 : i32 to vector<1x16x1xi32>
    %46 = arith.cmpi slt, %42, %45 : vector<1x16x1xi32>
    %c0_i32_23 = arith.constant 0 : i32
    %47 = arith.cmpi slt, %40, %c0_i32_23 : i32
    %48 = vector.broadcast %47 : i1 to vector<1x16x1xi1>
    %49 = vector.broadcast %48 : vector<1x16x1xi1> to vector<1x16x1xi1>
    %50 = arith.xori %46, %49 : vector<1x16x1xi1>
    %51 = arith.andi %50, %44 : vector<1x16x1xi1>
    %52 = vector.broadcast %40 : i32 to vector<1x16x1xi32>
    %53 = arith.addi %42, %52 : vector<1x16x1xi32>
    %54 = arith.select %51, %53, %42 : vector<1x16x1xi1>, vector<1x16x1xi32>
    %cst_24 = arith.constant 0.000000e+00 : f32
    %55 = vector.broadcast %cst_24 : f32 to vector<16x64xf32>
    %56 = vector.extract_strided_slice %37 {offsets = [0, 0, 0], sizes = [1, 16, 64], strides = [1, 1, 1]} : vector<1x26x64xf32> to vector<1x16x64xf32>
    %c1_i32_25 = arith.constant 1 : i32
    %57 = vector.broadcast %c1_i32_25 : i32 to vector<1x16x1xi32>
    %58 = arith.cmpi sge, %54, %57 : vector<1x16x1xi32>
    %cst_26 = arith.constant 0.000000e+00 : f32
    %59 = vector.shape_cast %58 : vector<1x16x1xi1> to vector<1x16x1xi1>
    %60 = vector.broadcast %59 : vector<1x16x1xi1> to vector<1x16x64xi1>
    %61 = vector.broadcast %cst_26 : f32 to vector<1x16x64xf32>
    %62 = arith.select %60, %56, %61 : vector<1x16x64xi1>, vector<1x16x64xf32>
    %63 = arith.truncf %62 : vector<1x16x64xf32> to vector<1x16x64xbf16>
    %64 = vector.shape_cast %63 : vector<1x16x64xbf16> to vector<16x64xbf16>
    %c0_27 = arith.constant 0 : index
    %c0_28 = arith.constant 0 : index
    %c0_29 = arith.constant 0 : index
    %65 = vector.load %arg6[%c0_27, %c0_28, %c0_29] : memref<9x64x64xbf16, #tpu.memory_space<vmem>>, vector<1x64x64xbf16>
    %66 = vector.shape_cast %65 : vector<1x64x64xbf16> to vector<64x64xbf16>
    %cst_30 = arith.constant dense<0.000000e+00> : vector<16x64xf32>
    %67 = tpu.matmul %64, %66, %cst_30 {dimension_numbers = #tpu.dot_dimension_numbers<[1], [0], [0], [1], [0, 0, 1, 1], [], []>} : vector<16x64xbf16>, vector<64x64xbf16>, vector<16x64xf32> -> vector<16x64xf32>
    %68 = arith.addf %55, %67 : vector<16x64xf32>
    %69 = vector.extract_strided_slice %37 {offsets = [0, 1, 0], sizes = [1, 16, 64], strides = [1, 1, 1]} : vector<1x26x64xf32> to vector<1x16x64xf32>
    %70 = arith.truncf %69 : vector<1x16x64xf32> to vector<1x16x64xbf16>
    %71 = vector.shape_cast %70 : vector<1x16x64xbf16> to vector<16x64xbf16>
    %c1 = arith.constant 1 : index
    %c0_31 = arith.constant 0 : index
    %c0_32 = arith.constant 0 : index
    %72 = vector.load %arg6[%c1, %c0_31, %c0_32] : memref<9x64x64xbf16, #tpu.memory_space<vmem>>, vector<1x64x64xbf16>
    %73 = vector.shape_cast %72 : vector<1x64x64xbf16> to vector<64x64xbf16>
    %cst_33 = arith.constant dense<0.000000e+00> : vector<16x64xf32>
    %74 = tpu.matmul %71, %73, %cst_33 {dimension_numbers = #tpu.dot_dimension_numbers<[1], [0], [0], [1], [0, 0, 1, 1], [], []>} : vector<16x64xbf16>, vector<64x64xbf16>, vector<16x64xf32> -> vector<16x64xf32>
    %75 = arith.addf %68, %74 : vector<16x64xf32>
    %76 = vector.extract_strided_slice %37 {offsets = [0, 2, 0], sizes = [1, 16, 64], strides = [1, 1, 1]} : vector<1x26x64xf32> to vector<1x16x64xf32>
    %c3_i32 = arith.constant 3 : i32
    %77 = vector.broadcast %c3_i32 : i32 to vector<1x16x1xi32>
    %78 = arith.cmpi slt, %54, %77 : vector<1x16x1xi32>
    %cst_34 = arith.constant 0.000000e+00 : f32
    %79 = vector.shape_cast %78 : vector<1x16x1xi1> to vector<1x16x1xi1>
    %80 = vector.broadcast %79 : vector<1x16x1xi1> to vector<1x16x64xi1>
    %81 = vector.broadcast %cst_34 : f32 to vector<1x16x64xf32>
    %82 = arith.select %80, %76, %81 : vector<1x16x64xi1>, vector<1x16x64xf32>
    %83 = arith.truncf %82 : vector<1x16x64xf32> to vector<1x16x64xbf16>
    %84 = vector.shape_cast %83 : vector<1x16x64xbf16> to vector<16x64xbf16>
    %c2 = arith.constant 2 : index
    %c0_35 = arith.constant 0 : index
    %c0_36 = arith.constant 0 : index
    %85 = vector.load %arg6[%c2, %c0_35, %c0_36] : memref<9x64x64xbf16, #tpu.memory_space<vmem>>, vector<1x64x64xbf16>
    %86 = vector.shape_cast %85 : vector<1x64x64xbf16> to vector<64x64xbf16>
    %cst_37 = arith.constant dense<0.000000e+00> : vector<16x64xf32>
    %87 = tpu.matmul %84, %86, %cst_37 {dimension_numbers = #tpu.dot_dimension_numbers<[1], [0], [0], [1], [0, 0, 1, 1], [], []>} : vector<16x64xbf16>, vector<64x64xbf16>, vector<16x64xf32> -> vector<16x64xf32>
    %88 = arith.addf %75, %87 : vector<16x64xf32>
    %89 = vector.extract_strided_slice %37 {offsets = [0, 4, 0], sizes = [1, 16, 64], strides = [1, 1, 1]} : vector<1x26x64xf32> to vector<1x16x64xf32>
    %c1_i32_38 = arith.constant 1 : i32
    %90 = vector.broadcast %c1_i32_38 : i32 to vector<1x16x1xi32>
    %91 = arith.cmpi sge, %54, %90 : vector<1x16x1xi32>
    %cst_39 = arith.constant 0.000000e+00 : f32
    %92 = vector.shape_cast %91 : vector<1x16x1xi1> to vector<1x16x1xi1>
    %93 = vector.broadcast %92 : vector<1x16x1xi1> to vector<1x16x64xi1>
    %94 = vector.broadcast %cst_39 : f32 to vector<1x16x64xf32>
    %95 = arith.select %93, %89, %94 : vector<1x16x64xi1>, vector<1x16x64xf32>
    %96 = arith.truncf %95 : vector<1x16x64xf32> to vector<1x16x64xbf16>
    %97 = vector.shape_cast %96 : vector<1x16x64xbf16> to vector<16x64xbf16>
    %c3 = arith.constant 3 : index
    %c0_40 = arith.constant 0 : index
    %c0_41 = arith.constant 0 : index
    %98 = vector.load %arg6[%c3, %c0_40, %c0_41] : memref<9x64x64xbf16, #tpu.memory_space<vmem>>, vector<1x64x64xbf16>
    %99 = vector.shape_cast %98 : vector<1x64x64xbf16> to vector<64x64xbf16>
    %cst_42 = arith.constant dense<0.000000e+00> : vector<16x64xf32>
    %100 = tpu.matmul %97, %99, %cst_42 {dimension_numbers = #tpu.dot_dimension_numbers<[1], [0], [0], [1], [0, 0, 1, 1], [], []>} : vector<16x64xbf16>, vector<64x64xbf16>, vector<16x64xf32> -> vector<16x64xf32>
    %101 = arith.addf %88, %100 : vector<16x64xf32>
    %102 = vector.extract_strided_slice %37 {offsets = [0, 5, 0], sizes = [1, 16, 64], strides = [1, 1, 1]} : vector<1x26x64xf32> to vector<1x16x64xf32>
    %103 = arith.truncf %102 : vector<1x16x64xf32> to vector<1x16x64xbf16>
    %104 = vector.shape_cast %103 : vector<1x16x64xbf16> to vector<16x64xbf16>
    %c4 = arith.constant 4 : index
    %c0_43 = arith.constant 0 : index
    %c0_44 = arith.constant 0 : index
    %105 = vector.load %arg6[%c4, %c0_43, %c0_44] : memref<9x64x64xbf16, #tpu.memory_space<vmem>>, vector<1x64x64xbf16>
    %106 = vector.shape_cast %105 : vector<1x64x64xbf16> to vector<64x64xbf16>
    %cst_45 = arith.constant dense<0.000000e+00> : vector<16x64xf32>
    %107 = tpu.matmul %104, %106, %cst_45 {dimension_numbers = #tpu.dot_dimension_numbers<[1], [0], [0], [1], [0, 0, 1, 1], [], []>} : vector<16x64xbf16>, vector<64x64xbf16>, vector<16x64xf32> -> vector<16x64xf32>
    %108 = arith.addf %101, %107 : vector<16x64xf32>
    %109 = vector.extract_strided_slice %37 {offsets = [0, 6, 0], sizes = [1, 16, 64], strides = [1, 1, 1]} : vector<1x26x64xf32> to vector<1x16x64xf32>
    %c3_i32_46 = arith.constant 3 : i32
    %110 = vector.broadcast %c3_i32_46 : i32 to vector<1x16x1xi32>
    %111 = arith.cmpi slt, %54, %110 : vector<1x16x1xi32>
    %cst_47 = arith.constant 0.000000e+00 : f32
    %112 = vector.shape_cast %111 : vector<1x16x1xi1> to vector<1x16x1xi1>
    %113 = vector.broadcast %112 : vector<1x16x1xi1> to vector<1x16x64xi1>
    %114 = vector.broadcast %cst_47 : f32 to vector<1x16x64xf32>
    %115 = arith.select %113, %109, %114 : vector<1x16x64xi1>, vector<1x16x64xf32>
    %116 = arith.truncf %115 : vector<1x16x64xf32> to vector<1x16x64xbf16>
    %117 = vector.shape_cast %116 : vector<1x16x64xbf16> to vector<16x64xbf16>
    %c5 = arith.constant 5 : index
    %c0_48 = arith.constant 0 : index
    %c0_49 = arith.constant 0 : index
    %118 = vector.load %arg6[%c5, %c0_48, %c0_49] : memref<9x64x64xbf16, #tpu.memory_space<vmem>>, vector<1x64x64xbf16>
    %119 = vector.shape_cast %118 : vector<1x64x64xbf16> to vector<64x64xbf16>
    %cst_50 = arith.constant dense<0.000000e+00> : vector<16x64xf32>
    %120 = tpu.matmul %117, %119, %cst_50 {dimension_numbers = #tpu.dot_dimension_numbers<[1], [0], [0], [1], [0, 0, 1, 1], [], []>} : vector<16x64xbf16>, vector<64x64xbf16>, vector<16x64xf32> -> vector<16x64xf32>
    %121 = arith.addf %108, %120 : vector<16x64xf32>
    %122 = vector.extract_strided_slice %37 {offsets = [0, 8, 0], sizes = [1, 16, 64], strides = [1, 1, 1]} : vector<1x26x64xf32> to vector<1x16x64xf32>
    %c1_i32_51 = arith.constant 1 : i32
    %123 = vector.broadcast %c1_i32_51 : i32 to vector<1x16x1xi32>
    %124 = arith.cmpi sge, %54, %123 : vector<1x16x1xi32>
    %cst_52 = arith.constant 0.000000e+00 : f32
    %125 = vector.shape_cast %124 : vector<1x16x1xi1> to vector<1x16x1xi1>
    %126 = vector.broadcast %125 : vector<1x16x1xi1> to vector<1x16x64xi1>
    %127 = vector.broadcast %cst_52 : f32 to vector<1x16x64xf32>
    %128 = arith.select %126, %122, %127 : vector<1x16x64xi1>, vector<1x16x64xf32>
    %129 = arith.truncf %128 : vector<1x16x64xf32> to vector<1x16x64xbf16>
    %130 = vector.shape_cast %129 : vector<1x16x64xbf16> to vector<16x64xbf16>
    %c6 = arith.constant 6 : index
    %c0_53 = arith.constant 0 : index
    %c0_54 = arith.constant 0 : index
    %131 = vector.load %arg6[%c6, %c0_53, %c0_54] : memref<9x64x64xbf16, #tpu.memory_space<vmem>>, vector<1x64x64xbf16>
    %132 = vector.shape_cast %131 : vector<1x64x64xbf16> to vector<64x64xbf16>
    %cst_55 = arith.constant dense<0.000000e+00> : vector<16x64xf32>
    %133 = tpu.matmul %130, %132, %cst_55 {dimension_numbers = #tpu.dot_dimension_numbers<[1], [0], [0], [1], [0, 0, 1, 1], [], []>} : vector<16x64xbf16>, vector<64x64xbf16>, vector<16x64xf32> -> vector<16x64xf32>
    %134 = arith.addf %121, %133 : vector<16x64xf32>
    %135 = vector.extract_strided_slice %37 {offsets = [0, 9, 0], sizes = [1, 16, 64], strides = [1, 1, 1]} : vector<1x26x64xf32> to vector<1x16x64xf32>
    %136 = arith.truncf %135 : vector<1x16x64xf32> to vector<1x16x64xbf16>
    %137 = vector.shape_cast %136 : vector<1x16x64xbf16> to vector<16x64xbf16>
    %c7 = arith.constant 7 : index
    %c0_56 = arith.constant 0 : index
    %c0_57 = arith.constant 0 : index
    %138 = vector.load %arg6[%c7, %c0_56, %c0_57] : memref<9x64x64xbf16, #tpu.memory_space<vmem>>, vector<1x64x64xbf16>
    %139 = vector.shape_cast %138 : vector<1x64x64xbf16> to vector<64x64xbf16>
    %cst_58 = arith.constant dense<0.000000e+00> : vector<16x64xf32>
    %140 = tpu.matmul %137, %139, %cst_58 {dimension_numbers = #tpu.dot_dimension_numbers<[1], [0], [0], [1], [0, 0, 1, 1], [], []>} : vector<16x64xbf16>, vector<64x64xbf16>, vector<16x64xf32> -> vector<16x64xf32>
    %141 = arith.addf %134, %140 : vector<16x64xf32>
    %142 = vector.extract_strided_slice %37 {offsets = [0, 10, 0], sizes = [1, 16, 64], strides = [1, 1, 1]} : vector<1x26x64xf32> to vector<1x16x64xf32>
    %c3_i32_59 = arith.constant 3 : i32
    %143 = vector.broadcast %c3_i32_59 : i32 to vector<1x16x1xi32>
    %144 = arith.cmpi slt, %54, %143 : vector<1x16x1xi32>
    %cst_60 = arith.constant 0.000000e+00 : f32
    %145 = vector.shape_cast %144 : vector<1x16x1xi1> to vector<1x16x1xi1>
    %146 = vector.broadcast %145 : vector<1x16x1xi1> to vector<1x16x64xi1>
    %147 = vector.broadcast %cst_60 : f32 to vector<1x16x64xf32>
    %148 = arith.select %146, %142, %147 : vector<1x16x64xi1>, vector<1x16x64xf32>
    %149 = arith.truncf %148 : vector<1x16x64xf32> to vector<1x16x64xbf16>
    %150 = vector.shape_cast %149 : vector<1x16x64xbf16> to vector<16x64xbf16>
    %c8 = arith.constant 8 : index
    %c0_61 = arith.constant 0 : index
    %c0_62 = arith.constant 0 : index
    %151 = vector.load %arg6[%c8, %c0_61, %c0_62] : memref<9x64x64xbf16, #tpu.memory_space<vmem>>, vector<1x64x64xbf16>
    %152 = vector.shape_cast %151 : vector<1x64x64xbf16> to vector<64x64xbf16>
    %cst_63 = arith.constant dense<0.000000e+00> : vector<16x64xf32>
    %153 = tpu.matmul %150, %152, %cst_63 {dimension_numbers = #tpu.dot_dimension_numbers<[1], [0], [0], [1], [0, 0, 1, 1], [], []>} : vector<16x64xbf16>, vector<64x64xbf16>, vector<16x64xf32> -> vector<16x64xf32>
    %154 = arith.addf %141, %153 : vector<16x64xf32>
    %155 = vector.shape_cast %154 : vector<16x64xf32> to vector<1x16x64xf32>
    %c0_64 = arith.constant 0 : index
    %c0_65 = arith.constant 0 : index
    %156 = vector.load %arg9[%c0_64, %c0_65] : memref<64x64xf32, #tpu.memory_space<vmem>>, vector<64x64xf32>
    %c0_66 = arith.constant 0 : index
    %c0_67 = arith.constant 0 : index
    %c0_68 = arith.constant 0 : index
    %157 = vector.load %arg7[%c0_66, %c0_67, %c0_68] : memref<1x1x64xf32, #tpu.memory_space<vmem>>, vector<1x1x64xf32>
    %c0_69 = arith.constant 0 : index
    %c0_70 = arith.constant 0 : index
    %c0_71 = arith.constant 0 : index
    %158 = vector.load %arg8[%c0_69, %c0_70, %c0_71] : memref<1x1x64xf32, #tpu.memory_space<vmem>>, vector<1x1x64xf32>
    %cst_72 = arith.constant dense<0.000000e+00> : vector<1x64xf32>
    %159 = vector.multi_reduction <add>, %155, %cst_72 [1] : vector<1x16x64xf32> to vector<1x64xf32>
    %160 = arith.mulf %155, %155 : vector<1x16x64xf32>
    %cst_73 = arith.constant dense<0.000000e+00> : vector<1x64xf32>
    %161 = vector.multi_reduction <add>, %160, %cst_73 [1] : vector<1x16x64xf32> to vector<1x64xf32>
    %cst_74 = arith.constant dense<0.000000e+00> : vector<1x64xf32>
    %162 = tpu.matmul %159, %156, %cst_74 {dimension_numbers = #tpu.dot_dimension_numbers<[1], [0], [0], [1], [0, 0, 1, 1], [], []>} : vector<1x64xf32>, vector<64x64xf32>, vector<1x64xf32> -> vector<1x64xf32>
    %cst_75 = arith.constant 3.906250e-03 : f32
    %163 = vector.broadcast %cst_75 : f32 to vector<1x64xf32>
    %164 = arith.mulf %162, %163 : vector<1x64xf32>
    %cst_76 = arith.constant dense<0.000000e+00> : vector<1x64xf32>
    %165 = tpu.matmul %161, %156, %cst_76 {dimension_numbers = #tpu.dot_dimension_numbers<[1], [0], [0], [1], [0, 0, 1, 1], [], []>} : vector<1x64xf32>, vector<64x64xf32>, vector<1x64xf32> -> vector<1x64xf32>
    %cst_77 = arith.constant 3.906250e-03 : f32
    %166 = vector.broadcast %cst_77 : f32 to vector<1x64xf32>
    %167 = arith.mulf %165, %166 : vector<1x64xf32>
    %168 = arith.mulf %164, %164 : vector<1x64xf32>
    %169 = arith.subf %167, %168 : vector<1x64xf32>
    %cst_78 = arith.constant 9.99999974E-6 : f32
    %170 = vector.broadcast %cst_78 : f32 to vector<1x64xf32>
    %171 = arith.addf %169, %170 : vector<1x64xf32>
    %172 = math.rsqrt %171 : vector<1x64xf32>
    %173 = vector.shape_cast %164 : vector<1x64xf32> to vector<1x1x64xf32>
    %174 = vector.broadcast %173 : vector<1x1x64xf32> to vector<1x16x64xf32>
    %175 = arith.subf %155, %174 : vector<1x16x64xf32>
    %176 = vector.shape_cast %172 : vector<1x64xf32> to vector<1x1x64xf32>
    %177 = vector.broadcast %176 : vector<1x1x64xf32> to vector<1x16x64xf32>
    %178 = arith.mulf %175, %177 : vector<1x16x64xf32>
    %179 = vector.broadcast %157 : vector<1x1x64xf32> to vector<1x16x64xf32>
    %180 = arith.mulf %178, %179 : vector<1x16x64xf32>
    %181 = vector.broadcast %158 : vector<1x1x64xf32> to vector<1x16x64xf32>
    %182 = arith.addf %180, %181 : vector<1x16x64xf32>
    %183 = arith.addf %182, %35 : vector<1x16x64xf32>
    %cst_79 = arith.constant 0.000000e+00 : f32
    %184 = vector.broadcast %cst_79 : f32 to vector<1x16x64xf32>
    %185 = arith.maximumf %183, %184 : vector<1x16x64xf32>
    %cst_80 = arith.constant dense<0.000000e+00> : vector<1x64xf32>
    %186 = vector.multi_reduction <add>, %185, %cst_80 [1] : vector<1x16x64xf32> to vector<1x64xf32>
    %cst_81 = arith.constant 1.600000e+01 : f32
    %187 = vector.broadcast %cst_81 : f32 to vector<1x64xf32>
    %188 = arith.divf %186, %187 : vector<1x64xf32>
    %c0_82 = arith.constant 0 : index
    %c0_83 = arith.constant 0 : index
    %189 = vector.load %arg10[%c0_82, %c0_83] : memref<64x10xf32, #tpu.memory_space<vmem>>, vector<64x10xf32>
    %cst_84 = arith.constant dense<0.000000e+00> : vector<1x10xf32>
    %190 = tpu.matmul %188, %189, %cst_84 {dimension_numbers = #tpu.dot_dimension_numbers<[1], [0], [0], [1], [0, 0, 1, 1], [], []>} : vector<1x64xf32>, vector<64x10xf32>, vector<1x10xf32> -> vector<1x10xf32>
    %c0_85 = arith.constant 0 : index
    %c0_86 = arith.constant 0 : index
    %191 = vector.load %arg11[%c0_85, %c0_86] : memref<1x10xf32, #tpu.memory_space<vmem>>, vector<1x10xf32>
    %192 = arith.addf %190, %191 : vector<1x10xf32>
    %193 = vector.shape_cast %192 : vector<1x10xf32> to vector<1x1x10xf32>
    %c0_87 = arith.constant 0 : index
    %c0_88 = arith.constant 0 : index
    %c0_89 = arith.constant 0 : index
    %194 = vector.load %arg12[%c0_87, %c0_88, %c0_89] : memref<1x1x10xf32, #tpu.memory_space<vmem>>, vector<1x1x10xf32>
    tpu.vector_store %arg12[%c0_87, %c0_88, %c0_89], %193 {strides = array<i32>} : memref<1x1x10xf32, #tpu.memory_space<vmem>>, vector<1x1x10xf32>,
    return
  }
  func.func @transform_0(%arg0: i32) -> (i32, i32, i32) {
    %c0_i32 = arith.constant 0 : i32
    %c0_i32_0 = arith.constant 0 : i32
    %c0_i32_1 = arith.constant 0 : i32
    return %arg0, %c0_i32, %c0_i32_0 : i32, i32, i32
  }
  func.func @transform_1(%arg0: i32) -> (i32, i32) {
    %c0_i32 = arith.constant 0 : i32
    %c0_i32_0 = arith.constant 0 : i32
    %c0_i32_1 = arith.constant 0 : i32
    return %c0_i32, %c0_i32_0 : i32, i32
  }
  func.func @transform_2(%arg0: i32) -> (i32, i32, i32) {
    %c0_i32 = arith.constant 0 : i32
    %c0_i32_0 = arith.constant 0 : i32
    %c0_i32_1 = arith.constant 0 : i32
    %c0_i32_2 = arith.constant 0 : i32
    return %c0_i32, %c0_i32_0, %c0_i32_1 : i32, i32, i32
  }
  func.func @transform_3(%arg0: i32) -> (i32, i32, i32) {
    %c0_i32 = arith.constant 0 : i32
    %c0_i32_0 = arith.constant 0 : i32
    %c0_i32_1 = arith.constant 0 : i32
    %c0_i32_2 = arith.constant 0 : i32
    return %c0_i32, %c0_i32_0, %c0_i32_1 : i32, i32, i32
  }
  func.func @transform_4(%arg0: i32) -> (i32, i32) {
    %c0_i32 = arith.constant 0 : i32
    %c0_i32_0 = arith.constant 0 : i32
    %c0_i32_1 = arith.constant 0 : i32
    return %c0_i32, %c0_i32_0 : i32, i32
  }
  func.func @transform_5(%arg0: i32) -> (i32, i32, i32) {
    %c0_i32 = arith.constant 0 : i32
    %c0_i32_0 = arith.constant 0 : i32
    %c0_i32_1 = arith.constant 0 : i32
    %c0_i32_2 = arith.constant 0 : i32
    return %c0_i32, %c0_i32_0, %c0_i32_1 : i32, i32, i32
  }
  func.func @transform_6(%arg0: i32) -> (i32, i32, i32) {
    %c0_i32 = arith.constant 0 : i32
    %c0_i32_0 = arith.constant 0 : i32
    %c0_i32_1 = arith.constant 0 : i32
    %c0_i32_2 = arith.constant 0 : i32
    return %c0_i32, %c0_i32_0, %c0_i32_1 : i32, i32, i32
  }
  func.func @transform_7(%arg0: i32) -> (i32, i32, i32) {
    %c0_i32 = arith.constant 0 : i32
    %c0_i32_0 = arith.constant 0 : i32
    %c0_i32_1 = arith.constant 0 : i32
    %c0_i32_2 = arith.constant 0 : i32
    return %c0_i32, %c0_i32_0, %c0_i32_1 : i32, i32, i32
  }
  func.func @transform_8(%arg0: i32) -> (i32, i32) {
    %c0_i32 = arith.constant 0 : i32
    %c0_i32_0 = arith.constant 0 : i32
    %c0_i32_1 = arith.constant 0 : i32
    return %c0_i32, %c0_i32_0 : i32, i32
  }
  func.func @transform_9(%arg0: i32) -> (i32, i32) {
    %c0_i32 = arith.constant 0 : i32
    %c0_i32_0 = arith.constant 0 : i32
    %c0_i32_1 = arith.constant 0 : i32
    return %c0_i32, %c0_i32_0 : i32, i32
  }
  func.func @transform_10(%arg0: i32) -> (i32, i32) {
    %c0_i32 = arith.constant 0 : i32
    %c0_i32_0 = arith.constant 0 : i32
    %c0_i32_1 = arith.constant 0 : i32
    return %c0_i32, %c0_i32_0 : i32, i32
  }
  func.func @transform_11(%arg0: i32) -> (i32, i32, i32) {
    %c0_i32 = arith.constant 0 : i32
    %c0_i32_0 = arith.constant 0 : i32
    %c0_i32_1 = arith.constant 0 : i32
    return %arg0, %c0_i32, %c0_i32_0 : i32, i32, i32
  }
}

</mosaic_0001>

<bundles_post_ra>
// kernel: resnet_forward.4
= control target key start
LH: loop header
LB: loop body
LE: loop exit
PB: predicated region body
PF: predicated region fallthrough
CT: control target
= control target key end

     0   :  { %s1558_s18 = smov 0   ;;  %s2104_s0 = inlined_call_operand.vmem [shape: bf16[2,256,27], index: 0, kind: input, shape index: {}]   ;;  %s2105_s1 = inlined_call_operand.vmem [shape: bf16[27,16], index: 1, kind: input, shape index: {}]   ;;  %s2106_s2 = inlined_call_operand.vmem [shape: f32[1,1,16], index: 2, kind: input, shape index: {}]   ;;  %s2107_s3 = inlined_call_operand.vmem [shape: f32[1,1,16], index: 3, kind: input, shape index: {}]   ;;  %s2108_s4 = inlined_call_operand.vmem [shape: f32[16,16], index: 4, kind: input, shape index: {}]   ;;  %s2109_s5 = inlined_call_operand.vmem [shape: bf16[2,256,16], index: 5, kind: output, shape index: {}]  }
   0x1 LB: > { %s1293_s19 = sadd.s32 4294967295, %s1523_s18   ;;  %p1297_p0 = scmp.ge.s32.totalorder %s1523_s18, 1  ;;  %s1523_s18 = sphi %s1558_s18, %s15_s18  }
   0x2   : > { %p187_p1 = scmp.lt.s32.totalorder %s1523_s18, 3 }
   0x4   : > { %p188_p2 = pnand %p1297_p0, %p187_p1 }
   0x5   : > { %p215_p3 = scmp.lt.s32.totalorder (!%p188_p2), %s1293_s19, 1 }
   0x6   : > { %191 = sbr.rel (%p188_p2) target bundleno = 568 (0x238), region = 40 }
   0xb   : > { %v1497_v0 = vld [vmem:[%s2105_s1 + $0x8] sm:$0x3f]   ;;  %vm402_vm0 = vcmask 1044480   ;;  %vm403_vm1 = vcmask 1045504   ;;  %v1525_v1 = vmov 65535   ;;  %v1498_v5 = vld [vmem:[%s2105_s1] sm:$0xff]  }
   0xc   : > { %v404_v2 = vsel %vm402_vm0, 4294967295, %v1525_v1  ;;  %s2111_s19 = smov (!%p215_p3, %s1293_s19), 1  ;;  %vm353_vm2 = vcmask 220160   ;;  %v1526_v22 = vmov 0.0   ;;  %v1618_v23 = vld [vmem:[%s2108_s4 + $0x8] sm:$0xff]  ;;  %v1625_v24 = vld [vmem:[%s2108_s4] sm:$0xff] }
   0xd   : > { %v405_v3 = vsel %vm403_vm1, %v404_v2, 0  ;;  %s1374_s24 = sshll.u32 %s2111_s19, 7  ;;  %vm1527_vm3 = vmmov 0   ;;  %vm574_vm4 = vcmask 130048   ;;  %vm1205_vm5 = vcmask 125952  }
   0xe   : > { %v407_v4 = vand.u32 %v1497_v0, %v405_v3  ;;  %s1580_s27 = scalar_lea.vmem %s2104_s0, %s1374_s24  ;;  %s2031_s13 = scalar_lea.vmem %s2109_s5, %s1374_s24 }
   0xf   : > { %v1499_v6 = vld [vmem:[%s1580_s27] sm:$0xff]   ;;  %v1500_v7 = vld [vmem:[%s1580_s27 + $0x8] sm:$0xff]   ;;  %v1501_v8 = vld [vmem:[%s1580_s27 + $0x10] sm:$0xff]  }
  0x10   : > { %1432 = vmatprep.subr.bf16.mxu0 %v407_v4  ;;  %1482 = vmatprep.subr.bf16.mxu1 %v407_v4  ;;  %v1502_v9 = vld [vmem:[%s1580_s27 + $0x18] sm:$0xff]   ;;  %v1503_v10 = vld [vmem:[%s1580_s27 + $0x20] sm:$0xff]   ;;  %v1509_v11 = vld [vmem:[%s1580_s27 + $0x50] sm:$0xff]  }
  0x11   : > { %1433 = vmatpush3.bf16.msra.mxu0 %v407_v4  ;;  %1484 = vmatpush3.bf16.msra.mxu1 %v407_v4  ;;  %v1510_v12 = vld [vmem:[%s1580_s27 + $0x58] sm:$0xff]   ;;  %v1511_v13 = vld [vmem:[%s1580_s27 + $0x60] sm:$0xff]   ;;  %v1512_v14 = vld [vmem:[%s1580_s27 + $0x68] sm:$0xff]  }
  0x12   : > { %1434 = vmatprep.subr.bf16.mxu0 %v1498_v5  ;;  %1483 = vmatprep.subr.bf16.mxu1 %v1498_v5  ;;  %v1504_v15 = vld [vmem:[%s1580_s27 + $0x28] sm:$0xff]   ;;  %v1513_v16 = vld [vmem:[%s1580_s27 + $0x70] sm:$0xff]   ;;  %v1514_v18 = vld [vmem:[%s1580_s27 + $0x78] sm:$0xff]  }
  0x13   : > { %1436 = vmatprep.mubr.msk.bf16.mxu0 %vm353_vm2, %v1499_v6  ;;  %1456 = vmatprep.mubr.msk.bf16.mxu1 %vm353_vm2, %v1509_v11  ;;  %v1505_v17 = vld [vmem:[%s1580_s27 + $0x30] sm:$0xff]   ;;  %v1506_v19 = vld [vmem:[%s1580_s27 + $0x38] sm:$0xff]   ;;  %v1507_v20 = vld [vmem:[%s1580_s27 + $0x40] sm:$0xff]  }
  0x14   : > { %v1508_v21 = vld [vmem:[%s1580_s27 + $0x48] sm:$0xff]  }
  0x15   : > { %1435 = vmatpush3.bf16.msra.mxu0 %v1498_v5  ;;  %1485 = vmatpush3.bf16.msra.mxu1 %v1498_v5 }
  0x16   : > { %1468 = vmatprep.subr.mxu1 %v1526_v22 }
  0x18   : > { %1437 = vmatmul.mubr.msk.bf16.vlgmr.msra.gmra.mxu0 %vm353_vm2, %v1500_v7  ;;  %1457 = vmatmul.mubr.msk.bf16.vlgmr.msra.gmra.mxu1 %vm353_vm2, %v1510_v12 }
  0x19   : > { %1440 = vmatprep.mubr.msk.bf16.mxu0 %vm353_vm2, %v1501_v8  ;;  %1460 = vmatprep.mubr.msk.bf16.mxu1 %vm353_vm2, %v1511_v13 }
  0x1a   : > { %1469 = vmatpush3.msra.mxu1 %v1618_v23 }
  0x1b   : > { %1470 = vmatprep.subr.mxu1 %v1526_v22 }
  0x1c   : > { %1471 = vmatpush3.msra.mxu1 %v1625_v24 }
  0x1d   : > { %1475 = vmatprep.subr.mxu1 %v1526_v22 }
  0x20   : > { %1441 = vmatmul.mubr.msk.bf16.gmra.mxu0 %vm353_vm2, %v1502_v9  ;;  %1461 = vmatmul.mubr.msk.bf16.gmra.mxu1 %vm353_vm2, %v1512_v14 }
  0x21   : > { %1444 = vmatprep.mubr.msk.bf16.mxu0 %vm353_vm2, %v1503_v10  ;;  %1464 = vmatprep.mubr.msk.bf16.mxu1 %vm353_vm2, %v1513_v16 }
  0x28   : > { %1445 = vmatmul.mubr.msk.bf16.gmra.mxu0 %vm353_vm2, %v1504_v15  ;;  %1465 = vmatmul.mubr.msk.bf16.gmra.mxu1 %vm353_vm2, %v1514_v18 }
  0x29   : > { %1448 = vmatprep.mubr.msk.bf16.mxu0 %vm353_vm2, %v1505_v17  ;;  %1472 = vmatprep.mubr.msk.f32.mxu1 %vm1527_vm3, %v1526_v22 }
  0x30   : > { %1449 = vmatmul.mubr.msk.bf16.gmra.mxu0 %vm353_vm2, %v1506_v19 }
  0x31   : > { %1452 = vmatprep.mubr.msk.bf16.mxu0 %vm353_vm2, %v1507_v20 }
  0x38   : > { %1453 = vmatmul.mubr.msk.bf16.gmra.mxu0 %vm353_vm2, %v1508_v21 }
  0xd8   : > { %v1631_v25 = vpop.f32.mrf.mxu0  ;;  %v1671_v54 = vpop.f32.mrf.mxu1 }
  0xd9   : > { %v646_v30 = vmul.f32 %v1631_v25, %v1631_v25  ;;  %v578_v36 = vsel %vm574_vm4, %v1631_v25, 0.0 }
  0xda   : > { %v1633_v26 = vpop.f32.mrf.mxu0  ;;  %v1689_v4 = vpop.f32.mrf.mxu1 }
  0xdb   : > { %v644_v28 = vmul.f32 %v1633_v26, %v1633_v26  ;;  %v575_v31 = vsel %vm574_vm4, %v1633_v26, 0.0  ;;  %v679_v43 = vsel %vm574_vm4, %v646_v30, 0.0 }
  0xdc   : > { %v1635_v27 = vpop.f32.mrf.mxu0  ;;  %v1703_v16 = vpop.f32.mrf.mxu1 }
  0xdd   : > { %v676_v37 = vsel %vm574_vm4, %v644_v28, 0.0  ;;  %v647_v38 = vmul.f32 %v1635_v27, %v1635_v27  ;;  %v580_v44 = vsel %vm574_vm4, %v1635_v27, 0.0 }
  0xde   : > { %v1639_v29 = vpop.f32.mrf.mxu0 }
  0xdf   : > { %v576_v32 = vsel %vm574_vm4, %v1639_v29, 0.0  ;;  %v645_v33 = vmul.f32 %v1639_v29, %v1639_v29  ;;  %v681_v49 = vsel %vm574_vm4, %v647_v38, 0.0  ;;  %v1721_v38 = vpop.f32.mrf.mxu1 }
  0xe0   : > { %v577_v34 = vadd.f32 %v576_v32, %v575_v31  ;;  %v1649_v35 = vpop.f32.mrf.mxu0 }
  0xe1   : > { %v677_v39 = vsel %vm574_vm4, %v645_v33, 0.0  ;;  %v650_v55 = vmul.f32 %v1649_v35, %v1649_v35  ;;  %v586_v62 = vsel %vm574_vm4, %v1649_v35, 0.0 }
  0xe2   : > { %v579_v40 = vadd.f32 %v578_v36, %v577_v34  ;;  %v678_v41 = vadd.f32 %v677_v39, %v676_v37  ;;  %v1657_v42 = vpop.f32.mrf.mxu0 }
  0xe3   : > { %v648_v45 = vmul.f32 %v1657_v42, %v1657_v42  ;;  %v582_v50 = vsel %vm574_vm4, %v1657_v42, 0.0  ;;  %v687_v5 = vsel %vm574_vm4, %v650_v55, 0.0 }
  0xe4   : > { %v680_v46 = vadd.f32 %v679_v43, %v678_v41  ;;  %v581_v47 = vadd.f32 %v580_v44, %v579_v40  ;;  %v1664_v48 = vpop.f32.mrf.mxu0 }
  0xe5   : > { %v683_v56 = vsel %vm574_vm4, %v648_v45, 0.0  ;;  %v651_v63 = vmul.f32 %v1664_v48, %v1664_v48  ;;  %v588_v6 = vsel %vm574_vm4, %v1664_v48, 0.0 }
  0xe6   : > { %v583_v51 = vadd.f32 %v582_v50, %v581_v47  ;;  %v682_v52 = vadd.f32 %v681_v49, %v680_v46  ;;  %v1669_v53 = vpop.f32.mrf.mxu0 }
  0xe7   : > { %v584_v57 = vsel %vm574_vm4, %v1669_v53, 0.0  ;;  %v649_v58 = vmul.f32 %v1669_v53, %v1669_v53  ;;  %v689_v11 = vsel %vm574_vm4, %v651_v63, 0.0 }
  0xe8   : > { %v684_v59 = vadd.f32 %v683_v56, %v682_v52  ;;  %v585_v60 = vadd.f32 %v584_v57, %v583_v51  ;;  %v1680_v61 = vpop.f32.mrf.mxu0  ;;  %v1735_v52 = vpop.f32.mrf.mxu1 }
  0xe9   : > { %v685_v0 = vsel %vm574_vm4, %v649_v58, 0.0  ;;  %v654_v17 = vmul.f32 %v1680_v61, %v1680_v61  ;;  %v594_v31 = vsel %vm574_vm4, %v1680_v61, 0.0 }
  0xea   : > { %v587_v1 = vadd.f32 %v586_v62, %v585_v60  ;;  %v686_v2 = vadd.f32 %v685_v0, %v684_v59  ;;  %v1687_v3 = vpop.f32.mrf.mxu0 }
  0xeb   : > { %v652_v7 = vmul.f32 %v1687_v3, %v1687_v3  ;;  %v590_v12 = vsel %vm574_vm4, %v1687_v3, 0.0  ;;  %v695_v39 = vsel %vm574_vm4, %v654_v17, 0.0 }
  0xec   : > { %v688_v8 = vadd.f32 %v687_v5, %v686_v2  ;;  %v589_v9 = vadd.f32 %v588_v6, %v587_v1  ;;  %v1696_v10 = vpop.f32.mrf.mxu0 }
  0xed   : > { %v691_v18 = vsel %vm574_vm4, %v652_v7, 0.0  ;;  %v655_v32 = vmul.f32 %v1696_v10, %v1696_v10  ;;  %v596_v40 = vsel %vm574_vm4, %v1696_v10, 0.0  ;;  %v1753_v7 = vpop.f32.mrf.mxu1 }
  0xee   : > { %v591_v13 = vadd.f32 %v590_v12, %v589_v9  ;;  %v690_v14 = vadd.f32 %v689_v11, %v688_v8  ;;  %v1701_v15 = vpop.f32.mrf.mxu0 }
  0xef   : > { %v592_v19 = vsel %vm574_vm4, %v1701_v15, 0.0  ;;  %v653_v20 = vmul.f32 %v1701_v15, %v1701_v15  ;;  %v697_v46 = vsel %vm574_vm4, %v655_v32, 0.0 }
  0xf0   : > { %v692_v21 = vadd.f32 %v691_v18, %v690_v14  ;;  %v593_v28 = vadd.f32 %v592_v19, %v591_v13  ;;  %v1712_v30 = vpop.f32.mrf.mxu0 }
  0xf1   : > { %v693_v33 = vsel %vm574_vm4, %v653_v20, 0.0  ;;  %v658_v55 = vmul.f32 %v1712_v30, %v1712_v30  ;;  %v602_v63 = vsel %vm574_vm4, %v1712_v30, 0.0 }
  0xf2   : > { %v595_v34 = vadd.f32 %v594_v31, %v593_v28  ;;  %v694_v36 = vadd.f32 %v693_v33, %v692_v21  ;;  %v1719_v37 = vpop.f32.mrf.mxu0  ;;  %v1767_v28 = vpop.f32.mrf.mxu1 }
  0xf3   : > { %v656_v41 = vmul.f32 %v1719_v37, %v1719_v37  ;;  %v598_v47 = vsel %vm574_vm4, %v1719_v37, 0.0  ;;  %v703_v8 = vsel %vm574_vm4, %v658_v55, 0.0  ;;  %v664_v55 = vmul.f32 %v1689_v4, %v1689_v4 }
  0xf4   : > { %v696_v43 = vadd.f32 %v695_v39, %v694_v36  ;;  %v597_v44 = vadd.f32 %v596_v40, %v595_v34  ;;  %v1728_v45 = vpop.f32.mrf.mxu0 }
  0xf5   : > { %v699_v56 = vsel %vm574_vm4, %v656_v41, 0.0  ;;  %v659_v0 = vmul.f32 %v1728_v45, %v1728_v45  ;;  %v604_v9 = vsel %vm574_vm4, %v1728_v45, 0.0 }
  0xf6   : > { %v599_v49 = vadd.f32 %v598_v47, %v597_v44  ;;  %v698_v50 = vadd.f32 %v697_v46, %v696_v43  ;;  %v1733_v51 = vpop.f32.mrf.mxu0  ;;  %v1781_v47 = vpop.f32.mrf.mxu1 }
  0xf7   : > { %v600_v57 = vsel %vm574_vm4, %v1733_v51, 0.0  ;;  %v657_v58 = vmul.f32 %v1733_v51, %v1733_v51  ;;  %v705_v17 = vsel %vm574_vm4, %v659_v0, 0.0 }
  0xf8   : > { %v700_v59 = vadd.f32 %v699_v56, %v698_v50  ;;  %v601_v60 = vadd.f32 %v600_v57, %v599_v49  ;;  %v1744_v62 = vpop.f32.mrf.mxu0 }
  0xf9   : > { %v701_v1 = vsel %vm574_vm4, %v657_v58, 0.0  ;;  %v662_v31 = vmul.f32 %v1744_v62, %v1744_v62  ;;  %v610_v40 = vsel %vm574_vm4, %v1744_v62, 0.0 }
  0xfa   : > { %v603_v2 = vadd.f32 %v602_v63, %v601_v60  ;;  %v702_v5 = vadd.f32 %v701_v1, %v700_v59  ;;  %v1751_v6 = vpop.f32.mrf.mxu0  ;;  %v614_v59 = vsel %vm574_vm4, %v1689_v4, 0.0  ;;  %v665_v60 = vmul.f32 %v1721_v38, %v1721_v38  ;;  %v1793_v1 = vpop.f32.mrf.mxu1 }
  0xfb   : > { %v660_v11 = vmul.f32 %v1751_v6, %v1751_v6  ;;  %v606_v18 = vsel %vm574_vm4, %v1751_v6, 0.0  ;;  %v711_v49 = vsel %vm574_vm4, %v662_v31, 0.0 }
  0xfc   : > { %v704_v12 = vadd.f32 %v703_v8, %v702_v5  ;;  %v605_v13 = vadd.f32 %v604_v9, %v603_v2  ;;  %v1760_v14 = vpop.f32.mrf.mxu0  ;;  %v666_v2 = vmul.f32 %v1671_v54, %v1671_v54  ;;  %v715_v5 = vsel %vm574_vm4, %v664_v55, 0.0 }
  0xfd   : > { %v707_v32 = vsel %vm574_vm4, %v660_v11, 0.0  ;;  %v663_v41 = vmul.f32 %v1760_v14, %v1760_v14  ;;  %v612_v50 = vsel %vm574_vm4, %v1760_v14, 0.0  ;;  %v616_v8 = vsel %vm574_vm4, %v1721_v38, 0.0 }
  0xfe   : > { %v607_v19 = vadd.f32 %v606_v18, %v605_v13  ;;  %v706_v20 = vadd.f32 %v705_v17, %v704_v12  ;;  %v1765_v21 = vpop.f32.mrf.mxu0  ;;  %v618_v12 = vsel %vm574_vm4, %v1671_v54, 0.0  ;;  %v667_v13 = vmul.f32 %v1703_v16, %v1703_v16 }
  0xff   : > { %v608_v33 = vsel %vm574_vm4, %v1765_v21, 0.0  ;;  %v661_v34 = vmul.f32 %v1765_v21, %v1765_v21  ;;  %v713_v58 = vsel %vm574_vm4, %v663_v41, 0.0  ;;  %v717_v17 = vsel %vm574_vm4, %v665_v60, 0.0 }
 0x100   : > { %v708_v36 = vadd.f32 %v707_v32, %v706_v20  ;;  %v609_v39 = vadd.f32 %v608_v33, %v607_v19  ;;  %v1805_v20 = vpop.f32.mrf.mxu1  ;;  %v719_v31 = vsel %vm574_vm4, %v666_v2, 0.0  ;;  %v620_v32 = vsel %vm574_vm4, %v1703_v16, 0.0 }
 0x101   : > { %v709_v43 = vsel %vm574_vm4, %v661_v34, 0.0  ;;  %v668_v33 = vmul.f32 %v1753_v7, %v1753_v7  ;;  %v669_v41 = vmul.f32 %v1781_v47, %v1781_v47  ;;  %v624_v55 = vsel %vm574_vm4, %v1781_v47, 0.0 }
 0x102   : > { %v611_v44 = vadd.f32 %v610_v40, %v609_v39  ;;  %v710_v46 = vadd.f32 %v709_v43, %v708_v36  ;;  %v721_v39 = vsel %vm574_vm4, %v667_v13, 0.0  ;;  %v622_v40 = vsel %vm574_vm4, %v1753_v7, 0.0 }
 0x103   : > { %v725_v60 = vsel %vm574_vm4, %v669_v41, 0.0 }
 0x104   : > { %v613_v56 = vadd.f32 %v612_v50, %v611_v44  ;;  %v712_v57 = vadd.f32 %v711_v49, %v710_v46  ;;  %v1817_v46 = vpop.f32.mrf.mxu1  ;;  %v670_v49 = vmul.f32 %v1735_v52, %v1735_v52  ;;  %v723_v50 = vsel %vm574_vm4, %v668_v33, 0.0 }
 0x105   : > { %v675_v41 = vmul.f32 %v1817_v46, %v1817_v46 }
 0x106   : > { %v714_v63 = vadd.f32 %v713_v58, %v712_v57  ;;  %v615_v0 = vadd.f32 %v614_v59, %v613_v56  ;;  %v626_v58 = vsel %vm574_vm4, %v1735_v52, 0.0  ;;  %v671_v59 = vmul.f32 %v1767_v28, %v1767_v28  ;;  %v1829_v2 = vpop.f32.mrf.mxu1 }
 0x108   : > { %v617_v9 = vadd.f32 %v616_v8, %v615_v0  ;;  %v716_v11 = vadd.f32 %v715_v5, %v714_v63  ;;  %v727_v5 = vsel %vm574_vm4, %v670_v49, 0.0  ;;  %v628_v8 = vsel %vm574_vm4, %v1767_v28, 0.0 }
 0x109   : > { %v729_v13 = vsel %vm574_vm4, %v671_v59, 0.0 }
 0x10a   : > { %v619_v18 = vadd.f32 %v618_v12, %v617_v9  ;;  %v718_v19 = vadd.f32 %v717_v17, %v716_v11  ;;  %v672_v9 = vmul.f32 %v1805_v20, %v1805_v20  ;;  %v630_v17 = vsel %vm574_vm4, %v1805_v20, 0.0 }
 0x10c   : > { %v720_v34 = vadd.f32 %v719_v31, %v718_v19  ;;  %v621_v36 = vadd.f32 %v620_v32, %v619_v18  ;;  %v673_v18 = vmul.f32 %v1829_v2, %v1829_v2  ;;  %v674_v32 = vmul.f32 %v1793_v1, %v1793_v1 }
 0x10d   : > { %v731_v33 = vsel %vm574_vm4, %v672_v9, 0.0 }
 0x10e   : > { %v623_v43 = vadd.f32 %v622_v40, %v621_v36  ;;  %v722_v44 = vadd.f32 %v721_v39, %v720_v34  ;;  %v632_v34 = vsel %vm574_vm4, %v1829_v2, 0.0  ;;  %v634_v40 = vsel %vm574_vm4, %v1793_v1, 0.0 }
 0x110   : > { %v724_v56 = vadd.f32 %v723_v50, %v722_v44  ;;  %v625_v57 = vadd.f32 %v624_v55, %v623_v43  ;;  %v733_v43 = vsel %vm574_vm4, %v673_v18, 0.0  ;;  %v735_v50 = vsel %vm574_vm4, %v674_v32, 0.0 }
 0x111   : > { %v636_v55 = vsel %vm574_vm4, %v1817_v46, 0.0 }
 0x112   : > { %v627_v63 = vadd.f32 %v626_v58, %v625_v57  ;;  %v726_v0 = vadd.f32 %v725_v60, %v724_v56  ;;  %v737_v58 = vsel %vm574_vm4, %v675_v41, 0.0 }
 0x114   : > { %v728_v11 = vadd.f32 %v727_v5, %v726_v0  ;;  %v629_v12 = vadd.f32 %v628_v8, %v627_v63 }
 0x116   : > { %v631_v19 = vadd.f32 %v630_v17, %v629_v12  ;;  %v730_v31 = vadd.f32 %v729_v13, %v728_v11 }
 0x118   : > { %v732_v36 = vadd.f32 %v731_v33, %v730_v31  ;;  %v633_v39 = vadd.f32 %v632_v34, %v631_v19 }
 0x11a   : > { %v635_v44 = vadd.f32 %v634_v40, %v633_v39  ;;  %v734_v49 = vadd.f32 %v733_v43, %v732_v36  ;;  %v897_v39 = vlaneseq }
 0x11c   : > { %v637_v56 = vadd.f32 %v636_v55, %v635_v44  ;;  %v736_v57 = vadd.f32 %v735_v50, %v734_v49  ;;  %v898_v43 = vshrl.u32 %v897_v39, 7 }
 0x11e   : > { %v638_v59 = vrot.slane %v637_v56, 4  ;;  %v738_v60 = vadd.f32 %v737_v58, %v736_v57  ;;  %v899_v49 = vsub.s32 0, %v898_v43 }
 0x120   : > { %v639_v63 = vadd.f32 %v638_v59, %v637_v56  ;;  %v739_v0 = vrot.slane %v738_v60, 4 }
 0x122   : > { %v640_v5 = vrot.slane %v639_v63, 2  ;;  %v740_v8 = vadd.f32 %v739_v0, %v738_v60 }
 0x124   : > { %v641_v9 = vadd.f32 %v640_v5, %v639_v63  ;;  %v741_v11 = vrot.slane %v740_v8, 2 }
 0x126   : > { %v642_v12 = vrot.slane %v641_v9, 1  ;;  %v742_v13 = vadd.f32 %v741_v11, %v740_v8 }
 0x128   : > { %v643_v17 = vadd.f32 %v642_v12, %v641_v9  ;;  %v743_v18 = vrot.slane %v742_v13, 1 }
 0x12a   : > { %1473 = vmatmul.mubr.msk.f32.vlgmr.msra.gmra.mxu1 %vm574_vm4, %v643_v17  ;;  %v744_v19 = vadd.f32 %v743_v18, %v742_v13 }
 0x12b   : > { %1476 = vmatpush3.msra.mxu1 %v1618_v23  ;;  %1479 = vmatprep.mubr.msk.f32.mxu1 %vm1527_vm3, %v1526_v22 }
 0x12c   : > { %1477 = vmatprep.subr.mxu1 %v1526_v22 }
 0x12d   : > { %1478 = vmatpush3.msra.mxu1 %v1625_v24 }
 0x12e   : > { %1480 = vmatmul.mubr.msk.f32.vlgmr.msra.gmra.mxu1 %vm574_vm4, %v744_v19 }
 0x1ea   : > { %v814_v31 = vpop.f32.mrf.mxu1 }
 0x1eb   : > { %v818_v36 = vmul.f32 0.0009765625, %v814_v31 }
 0x1ec   : > { %v1474_v32 = vpop.f32.mrf.mxu1 }
 0x1ed   : > { %v893_v40 = vmul.f32 %v818_v36, %v818_v36  ;;  %v1862_v50 = vrot.slane %v818_v36, %v899_v49 }
 0x1ee   : > { %v888_v33 = vpop.f32.mrf.mxu1 }
 0x1ef   : > { %v892_v41 = vmul.f32 0.0009765625, %v888_v33  ;;  %v901_v22 = vsub.f32 %v1633_v26, %v1862_v50  ;;  %v902_v24 = vsub.f32 %v1639_v29, %v1862_v50  ;;  %v903_v55 = vsub.f32 %v1631_v25, %v1862_v50 }
 0x1f0   : > { %v1481_v34 = vpop.f32.mrf.mxu1  ;;  %v904_v56 = vsub.f32 %v1635_v27, %v1862_v50  ;;  %v905_v57 = vsub.f32 %v1657_v42, %v1862_v50  ;;  %v906_v58 = vsub.f32 %v1669_v53, %v1862_v50  ;;  %v907_v59 = vsub.f32 %v1649_v35, %v1862_v50 }
 0x1f1   : > { %v894_v23 = vsub.f32 %v892_v41, %v893_v40  ;;  %v908_v26 = vsub.f32 %v1664_v48, %v1862_v50  ;;  %v909_v29 = vsub.f32 %v1687_v3, %v1862_v50  ;;  %v910_v25 = vsub.f32 %v1701_v15, %v1862_v50  ;;  %v1338_v34 = vld [vmem:[%s2106_s2] ss:$0 sm:$0xff] }
 0x1f2   : > { %v911_v27 = vsub.f32 %v1680_v61, %v1862_v50  ;;  %v912_v42 = vsub.f32 %v1696_v10, %v1862_v50  ;;  %v913_v53 = vsub.f32 %v1719_v37, %v1862_v50  ;;  %v914_v35 = vsub.f32 %v1733_v51, %v1862_v50 }
 0x1f3   : > { %v895_v44 = vadd.f32 1e-05, %v894_v23  ;;  %v915_v48 = vsub.f32 %v1712_v30, %v1862_v50  ;;  %v916_v3 = vsub.f32 %v1728_v45, %v1862_v50  ;;  %v917_v15 = vsub.f32 %v1751_v6, %v1862_v50 }
 0x1f4   : > { %v918_v61 = vsub.f32 %v1765_v21, %v1862_v50  ;;  %v919_v10 = vsub.f32 %v1744_v62, %v1862_v50  ;;  %v920_v37 = vsub.f32 %v1760_v14, %v1862_v50  ;;  %v921_v51 = vsub.f32 %v1689_v4, %v1862_v50 }
 0x1f5   : > { %1515 = vrsqrt.f32 %v895_v44  ;;  %v922_v30 = vsub.f32 %v1721_v38, %v1862_v50  ;;  %v923_v45 = vsub.f32 %v1671_v54, %v1862_v50  ;;  %v924_v6 = vsub.f32 %v1703_v16, %v1862_v50 }
 0x1f6   : > { %v925_v21 = vsub.f32 %v1753_v7, %v1862_v50  ;;  %v926_v62 = vsub.f32 %v1781_v47, %v1862_v50  ;;  %v927_v14 = vsub.f32 %v1735_v52, %v1862_v50  ;;  %v928_v4 = vsub.f32 %v1767_v28, %v1862_v50 }
 0x1f7   : > { %v929_v38 = vsub.f32 %v1805_v20, %v1862_v50  ;;  %v930_v54 = vsub.f32 %v1829_v2, %v1862_v50  ;;  %v931_v16 = vsub.f32 %v1793_v1, %v1862_v50  ;;  %v932_v7 = vsub.f32 %v1817_v46, %v1862_v50 }
 0x202   : > { %v1516_v60 = vpop.eup %1515 }
 0x203   : > { %v936_v63 = vrot.slane %v1516_v60, %v899_v49 }
 0x205   : > { %v937_v47 = vmul.f32 %v936_v63, %v901_v22  ;;  %v938_v0 = vmul.f32 %v936_v63, %v902_v24  ;;  %v939_v5 = vmul.f32 %v936_v63, %v903_v55  ;;  %v940_v52 = vmul.f32 %v936_v63, %v904_v56 }
 0x206   : > { %v941_v8 = vmul.f32 %v936_v63, %v905_v57  ;;  %v942_v9 = vmul.f32 %v936_v63, %v906_v58  ;;  %v943_v28 = vmul.f32 %v936_v63, %v907_v59  ;;  %v944_v11 = vmul.f32 %v936_v63, %v908_v26 }
 0x207   : > { %v945_v12 = vmul.f32 %v936_v63, %v909_v29  ;;  %v946_v13 = vmul.f32 %v936_v63, %v910_v25  ;;  %v947_v20 = vmul.f32 %v936_v63, %v911_v27  ;;  %v948_v17 = vmul.f32 %v936_v63, %v912_v42 }
 0x208   : > { %v949_v18 = vmul.f32 %v936_v63, %v913_v53  ;;  %v950_v2 = vmul.f32 %v936_v63, %v914_v35  ;;  %v951_v19 = vmul.f32 %v936_v63, %v915_v48  ;;  %v952_v31 = vmul.f32 %v936_v63, %v916_v3 }
 0x209   : > { %v953_v1 = vmul.f32 %v936_v63, %v917_v15  ;;  %v954_v32 = vmul.f32 %v936_v63, %v918_v61  ;;  %v955_v33 = vmul.f32 %v936_v63, %v919_v10  ;;  %v956_v46 = vmul.f32 %v936_v63, %v920_v37 }
 0x20a   : > { %v957_v36 = vmul.f32 %v936_v63, %v921_v51  ;;  %v958_v39 = vmul.f32 %v936_v63, %v922_v30  ;;  %v959_v40 = vmul.f32 %v936_v63, %v923_v45  ;;  %v960_v41 = vmul.f32 %v936_v63, %v924_v6  ;;  %v1339_v45 = vld [vmem:[%s2107_s3] ss:$0 sm:$0xff] }
 0x20b   : > { %v961_v43 = vmul.f32 %v936_v63, %v925_v21  ;;  %v962_v23 = vmul.f32 %v936_v63, %v926_v62  ;;  %v963_v44 = vmul.f32 %v936_v63, %v927_v14  ;;  %v964_v49 = vmul.f32 %v936_v63, %v928_v4 }
 0x20c   : > { %v965_v50 = vmul.f32 %v936_v63, %v929_v38  ;;  %v966_v22 = vmul.f32 %v936_v63, %v930_v54  ;;  %v967_v24 = vmul.f32 %v936_v63, %v931_v16  ;;  %v968_v55 = vmul.f32 %v936_v63, %v932_v7 }
 0x20d   : > { %v975_v56 = vmul.f32 %v1338_v34, %v937_v47  ;;  %v976_v57 = vmul.f32 %v1338_v34, %v938_v0  ;;  %v977_v58 = vmul.f32 %v1338_v34, %v939_v5  ;;  %v978_v59 = vmul.f32 %v1338_v34, %v940_v52 }
 0x20e   : > { %v979_v26 = vmul.f32 %v1338_v34, %v941_v8  ;;  %v980_v29 = vmul.f32 %v1338_v34, %v942_v9  ;;  %v981_v25 = vmul.f32 %v1338_v34, %v943_v28  ;;  %v982_v27 = vmul.f32 %v1338_v34, %v944_v11 }
 0x20f   : > { %v983_v42 = vmul.f32 %v1338_v34, %v945_v12  ;;  %v984_v53 = vmul.f32 %v1338_v34, %v946_v13  ;;  %v985_v35 = vmul.f32 %v1338_v34, %v947_v20  ;;  %v986_v48 = vmul.f32 %v1338_v34, %v948_v17 }
 0x210   : > { %v987_v3 = vmul.f32 %v1338_v34, %v949_v18  ;;  %v988_v15 = vmul.f32 %v1338_v34, %v950_v2  ;;  %v989_v61 = vmul.f32 %v1338_v34, %v951_v19  ;;  %v990_v10 = vmul.f32 %v1338_v34, %v952_v31 }
 0x211   : > { %v991_v37 = vmul.f32 %v1338_v34, %v953_v1  ;;  %v992_v51 = vmul.f32 %v1338_v34, %v954_v32  ;;  %v993_v60 = vmul.f32 %v1338_v34, %v955_v33  ;;  %v994_v30 = vmul.f32 %v1338_v34, %v956_v46 }
 0x212   : > { %v995_v6 = vmul.f32 %v1338_v34, %v957_v36  ;;  %v996_v21 = vmul.f32 %v1338_v34, %v958_v39  ;;  %v997_v62 = vmul.f32 %v1338_v34, %v959_v40  ;;  %v998_v14 = vmul.f32 %v1338_v34, %v960_v41 }
 0x213   : > { %v999_v4 = vmul.f32 %v1338_v34, %v961_v43  ;;  %v1000_v63 = vmul.f32 %v1338_v34, %v962_v23  ;;  %v1001_v38 = vmul.f32 %v1338_v34, %v963_v44  ;;  %v1002_v54 = vmul.f32 %v1338_v34, %v964_v49 }
 0x214   : > { %v1003_v16 = vmul.f32 %v1338_v34, %v965_v50  ;;  %v1004_v7 = vmul.f32 %v1338_v34, %v966_v22  ;;  %v1005_v47 = vmul.f32 %v1338_v34, %v967_v24  ;;  %v1006_v0 = vmul.f32 %v1338_v34, %v968_v55 }
 0x215   : > { %v1934_v5 = vadd.f32 %v1339_v45, %v975_v56  ;;  %v1936_v52 = vadd.f32 %v1339_v45, %v976_v57  ;;  %v1938_v8 = vadd.f32 %v1339_v45, %v977_v58  ;;  %v1940_v9 = vadd.f32 %v1339_v45, %v978_v59 }
 0x216   : > { %v1942_v28 = vadd.f32 %v1339_v45, %v979_v26  ;;  %v1944_v11 = vadd.f32 %v1339_v45, %v980_v29  ;;  %v1946_v12 = vadd.f32 %v1339_v45, %v981_v25  ;;  %v1948_v13 = vadd.f32 %v1339_v45, %v982_v27 }
 0x217   : > { %v1950_v20 = vadd.f32 %v1339_v45, %v983_v42  ;;  %v1952_v17 = vadd.f32 %v1339_v45, %v984_v53  ;;  %v1954_v18 = vadd.f32 %v1339_v45, %v985_v35  ;;  %v1956_v2 = vadd.f32 %v1339_v45, %v986_v48 }
 0x218   : > { %v1958_v19 = vadd.f32 %v1339_v45, %v987_v3  ;;  %v1960_v31 = vadd.f32 %v1339_v45, %v988_v15  ;;  %v1962_v1 = vadd.f32 %v1339_v45, %v989_v61  ;;  %v1964_v32 = vadd.f32 %v1339_v45, %v990_v10 }
 0x219   : > { %v1966_v33 = vadd.f32 %v1339_v45, %v991_v37  ;;  %v1968_v46 = vadd.f32 %v1339_v45, %v992_v51  ;;  %v1970_v34 = vadd.f32 %v1339_v45, %v993_v60  ;;  %v1972_v36 = vadd.f32 %v1339_v45, %v994_v30 }
 0x21a   : > { %v1974_v39 = vadd.f32 %v1339_v45, %v995_v6  ;;  %v1976_v40 = vadd.f32 %v1339_v45, %v996_v21  ;;  %v1978_v41 = vadd.f32 %v1339_v45, %v997_v62  ;;  %v1980_v43 = vadd.f32 %v1339_v45, %v998_v14 }
 0x21b   : > { %v1982_v23 = vadd.f32 %v1339_v45, %v999_v4  ;;  %v1984_v44 = vadd.f32 %v1339_v45, %v1000_v63  ;;  %v1986_v49 = vadd.f32 %v1339_v45, %v1001_v38  ;;  %v1988_v50 = vadd.f32 %v1339_v45, %v1002_v54 }
 0x21c   : > { %v1990_v22 = vadd.f32 %v1339_v45, %v1003_v16  ;;  %v1992_v24 = vadd.f32 %v1339_v45, %v1004_v7  ;;  %v1994_v55 = vadd.f32 %v1339_v45, %v1005_v47  ;;  %v1996_v56 = vadd.f32 %v1339_v45, %v1006_v0 }
 0x21d   : > { %v1045_v57 = vmax.f32 %v1934_v5, 0.0  ;;  %v1046_v58 = vmax.f32 %v1936_v52, 0.0  ;;  %v1047_v59 = vmax.f32 %v1938_v8, 0.0  ;;  %v1048_v26 = vmax.f32 %v1940_v9, 0.0 }
 0x21e   : > { %v1049_v29 = vmax.f32 %v1942_v28, 0.0  ;;  %v1050_v25 = vmax.f32 %v1944_v11, 0.0  ;;  %v1051_v27 = vmax.f32 %v1946_v12, 0.0  ;;  %v1052_v42 = vmax.f32 %v1948_v13, 0.0 }
 0x21f   : > { %v1053_v53 = vmax.f32 %v1950_v20, 0.0  ;;  %v1054_v35 = vmax.f32 %v1952_v17, 0.0  ;;  %v1055_v48 = vmax.f32 %v1954_v18, 0.0  ;;  %v1056_v3 = vmax.f32 %v1956_v2, 0.0 }
 0x220   : > { %v1057_v15 = vmax.f32 %v1958_v19, 0.0  ;;  %v1058_v61 = vmax.f32 %v1960_v31, 0.0  ;;  %v1059_v10 = vmax.f32 %v1962_v1, 0.0  ;;  %v1060_v37 = vmax.f32 %v1964_v32, 0.0 }
 0x221   : > { %v1061_v51 = vmax.f32 %v1966_v33, 0.0  ;;  %v1062_v60 = vmax.f32 %v1968_v46, 0.0  ;;  %v1063_v30 = vmax.f32 %v1970_v34, 0.0  ;;  %v1064_v45 = vmax.f32 %v1972_v36, 0.0 }
 0x222   : > { %v1065_v6 = vmax.f32 %v1974_v39, 0.0  ;;  %v1066_v21 = vmax.f32 %v1976_v40, 0.0  ;;  %v1067_v62 = vmax.f32 %v1978_v41, 0.0  ;;  %v1068_v14 = vmax.f32 %v1980_v43, 0.0 }
 0x223   : > { %v1069_v4 = vmax.f32 %v1982_v23, 0.0  ;;  %v1070_v63 = vmax.f32 %v1984_v44, 0.0  ;;  %v1071_v38 = vmax.f32 %v1986_v49, 0.0  ;;  %v1072_v54 = vmax.f32 %v1988_v50, 0.0 }
 0x224   : > { %v1073_v16 = vmax.f32 %v1990_v22, 0.0  ;;  %v1074_v7 = vmax.f32 %v1992_v24, 0.0  ;;  %v1075_v47 = vmax.f32 %v1994_v55, 0.0  ;;  %v1076_v0 = vmax.f32 %v1996_v56, 0.0 }
 0x225   : > { %v1376_v5 = vpack.c.bf16 %v1045_v57, %v1045_v57  ;;  %v1377_v52 = vpack.c.bf16 %v1046_v58, %v1046_v58  ;;  %v1378_v8 = vpack.c.bf16 %v1047_v59, %v1047_v59  ;;  %v1379_v9 = vpack.c.bf16 %v1048_v26, %v1048_v26 }
 0x226   : > { %v1380_v28 = vpack.c.bf16 %v1049_v29, %v1049_v29  ;;  %v1381_v11 = vpack.c.bf16 %v1050_v25, %v1050_v25  ;;  %v1382_v12 = vpack.c.bf16 %v1051_v27, %v1051_v27  ;;  %v1383_v13 = vpack.c.bf16 %v1052_v42, %v1052_v42 }
 0x227   : > { %v1384_v20 = vpack.c.bf16 %v1053_v53, %v1053_v53  ;;  %v1385_v17 = vpack.c.bf16 %v1054_v35, %v1054_v35  ;;  %v1386_v18 = vpack.c.bf16 %v1055_v48, %v1055_v48  ;;  %v1387_v2 = vpack.c.bf16 %v1056_v3, %v1056_v3  ;;  %1206 = vst.msk [vmem:[%s2031_s13] sm:$0xf] %vm1205_vm5, %v1376_v5 }
 0x228   : > { %1207 = vst.msk [vmem:[%s2031_s13 + $0x4] sm:$0xf] %vm1205_vm5, %v1377_v52  ;;  %1208 = vst.msk [vmem:[%s2031_s13 + $0x8] sm:$0xf] %vm1205_vm5, %v1378_v8  ;;  %v1388_v19 = vpack.c.bf16 %v1057_v15, %v1057_v15  ;;  %v1389_v31 = vpack.c.bf16 %v1058_v61, %v1058_v61  ;;  %v1390_v1 = vpack.c.bf16 %v1059_v10, %v1059_v10 }
 0x229   : > { %1209 = vst.msk [vmem:[%s2031_s13 + $0xc] sm:$0xf] %vm1205_vm5, %v1379_v9  ;;  %v1391_v32 = vpack.c.bf16 %v1060_v37, %v1060_v37  ;;  %1210 = vst.msk [vmem:[%s2031_s13 + $0x10] sm:$0xf] %vm1205_vm5, %v1380_v28  ;;  %v1392_v33 = vpack.c.bf16 %v1061_v51, %v1061_v51  ;;  %v1393_v46 = vpack.c.bf16 %v1062_v60, %v1062_v60 }
 0x22a   : > { %1211 = vst.msk [vmem:[%s2031_s13 + $0x14] sm:$0xf] %vm1205_vm5, %v1381_v11  ;;  %1212 = vst.msk [vmem:[%s2031_s13 + $0x18] sm:$0xf] %vm1205_vm5, %v1382_v12  ;;  %v1394_v34 = vpack.c.bf16 %v1063_v30, %v1063_v30  ;;  %v1395_v36 = vpack.c.bf16 %v1064_v45, %v1064_v45  ;;  %v1396_v39 = vpack.c.bf16 %v1065_v6, %v1065_v6 }
 0x22b   : > { %1213 = vst.msk [vmem:[%s2031_s13 + $0x1c] sm:$0xf] %vm1205_vm5, %v1383_v13  ;;  %1214 = vst.msk [vmem:[%s2031_s13 + $0x20] sm:$0xf] %vm1205_vm5, %v1384_v20  ;;  %v1397_v40 = vpack.c.bf16 %v1066_v21, %v1066_v21  ;;  %v1398_v41 = vpack.c.bf16 %v1067_v62, %v1067_v62  ;;  %v1399_v43 = vpack.c.bf16 %v1068_v14, %v1068_v14 }
 0x22c   : > { %1215 = vst.msk [vmem:[%s2031_s13 + $0x24] sm:$0xf] %vm1205_vm5, %v1385_v17  ;;  %1216 = vst.msk [vmem:[%s2031_s13 + $0x28] sm:$0xf] %vm1205_vm5, %v1386_v18  ;;  %v1400_v23 = vpack.c.bf16 %v1069_v4, %v1069_v4  ;;  %v1401_v44 = vpack.c.bf16 %v1070_v63, %v1070_v63  ;;  %v1402_v49 = vpack.c.bf16 %v1071_v38, %v1071_v38 }
 0x22d   : > { %1217 = vst.msk [vmem:[%s2031_s13 + $0x2c] sm:$0xf] %vm1205_vm5, %v1387_v2  ;;  %1218 = vst.msk [vmem:[%s2031_s13 + $0x30] sm:$0xf] %vm1205_vm5, %v1388_v19  ;;  %v1403_v50 = vpack.c.bf16 %v1072_v54, %v1072_v54  ;;  %v1404_v22 = vpack.c.bf16 %v1073_v16, %v1073_v16  ;;  %v1405_v24 = vpack.c.bf16 %v1074_v7, %v1074_v7 }
 0x22e   : > { %1219 = vst.msk [vmem:[%s2031_s13 + $0x34] sm:$0xf] %vm1205_vm5, %v1389_v31  ;;  %1220 = vst.msk [vmem:[%s2031_s13 + $0x38] sm:$0xf] %vm1205_vm5, %v1390_v1  ;;  %v1406_v55 = vpack.c.bf16 %v1075_v47, %v1075_v47  ;;  %v1407_v56 = vpack.c.bf16 %v1076_v0, %v1076_v0 }
 0x22f   : > { %1221 = vst.msk [vmem:[%s2031_s13 + $0x3c] sm:$0xf] %vm1205_vm5, %v1391_v32  ;;  %1222 = vst.msk [vmem:[%s2031_s13 + $0x40] sm:$0xf] %vm1205_vm5, %v1392_v33 }
 0x230   : > { %1223 = vst.msk [vmem:[%s2031_s13 + $0x44] sm:$0xf] %vm1205_vm5, %v1393_v46  ;;  %1224 = vst.msk [vmem:[%s2031_s13 + $0x48] sm:$0xf] %vm1205_vm5, %v1394_v34 }
 0x231   : > { %1225 = vst.msk [vmem:[%s2031_s13 + $0x4c] sm:$0xf] %vm1205_vm5, %v1395_v36  ;;  %1226 = vst.msk [vmem:[%s2031_s13 + $0x50] sm:$0xf] %vm1205_vm5, %v1396_v39 }
 0x232   : > { %1227 = vst.msk [vmem:[%s2031_s13 + $0x54] sm:$0xf] %vm1205_vm5, %v1397_v40  ;;  %1228 = vst.msk [vmem:[%s2031_s13 + $0x58] sm:$0xf] %vm1205_vm5, %v1398_v41 }
 0x233   : > { %1229 = vst.msk [vmem:[%s2031_s13 + $0x5c] sm:$0xf] %vm1205_vm5, %v1399_v43  ;;  %1230 = vst.msk [vmem:[%s2031_s13 + $0x60] sm:$0xf] %vm1205_vm5, %v1400_v23 }
 0x234   : > { %1231 = vst.msk [vmem:[%s2031_s13 + $0x64] sm:$0xf] %vm1205_vm5, %v1401_v44  ;;  %1232 = vst.msk [vmem:[%s2031_s13 + $0x68] sm:$0xf] %vm1205_vm5, %v1402_v49 }
 0x235   : > { %1233 = vst.msk [vmem:[%s2031_s13 + $0x6c] sm:$0xf] %vm1205_vm5, %v1403_v50  ;;  %1234 = vst.msk [vmem:[%s2031_s13 + $0x70] sm:$0xf] %vm1205_vm5, %v1404_v22 }
 0x236   : > { %1235 = vst.msk [vmem:[%s2031_s13 + $0x74] sm:$0xf] %vm1205_vm5, %v1405_v24  ;;  %1236 = vst.msk [vmem:[%s2031_s13 + $0x78] sm:$0xf] %vm1205_vm5, %v1406_v55 }
 0x237   : > { %1237 = vst.msk [vmem:[%s2031_s13 + $0x7c] sm:$0xf] %vm1205_vm5, %v1407_v56 }
 0x238 PF: > { %s15_s18 = sadd.s32 1, %s1523_s18  }
 0x239   : > { %p12_p4 = scmp.ge.s32.totalorder %s15_s18, 4  }
 0x23b   :  { %14 = sbr.rel (!%p12_p4) target bundleno = 1 (0x1), region = 70 }

// kernel: resnet_forward.6
= control target key start
LH: loop header
LB: loop body
LE: loop exit
PB: predicated region body
PF: predicated region fallthrough
CT: control target
= control target key end

     0   :  { %s3003_s30 = smov 0   ;;  %s3903_s0 = inlined_call_operand.vmem [shape: bf16[2,64,144], index: 0, kind: input, shape index: {}]   ;;  %s3904_s1 = inlined_call_operand.vmem [shape: bf16[144,64], index: 1, kind: input, shape index: {}]   ;;  %s3905_s2 = inlined_call_operand.vmem [shape: f32[1,1,64], index: 2, kind: input, shape index: {}]   ;;  %s3906_s3 = inlined_call_operand.vmem [shape: f32[1,1,64], index: 3, kind: input, shape index: {}]   ;;  %s3907_s4 = inlined_call_operand.vmem [shape: f32[64,64], index: 4, kind: input, shape index: {}]   ;;  %s3908_s5 = inlined_call_operand.vmem [shape: bf16[9,32,32], index: 5, kind: input, shape index: {}]   ;;  %s3909_s6 = inlined_call_operand.vmem [shape: f32[1,1,32], index: 6, kind: input, shape index: {}]   ;;  %s3910_s7 = inlined_call_operand.vmem [shape: f32[1,1,32], index: 7, kind: input, shape index: {}]   ;;  %s3911_s8 = inlined_call_operand.vmem [shape: f32[32,32], index: 8, kind: input, shape index: {}]   ;;  %s3912_s9 = inlined_call_operand.vmem [shape: bf16[2,64,32], index: 9, kind: output, shape index: {}]  }
   0x1 LB: > { %s2492_s10 = sadd.s32 4294967295, %s2947_s30   ;;  %p2496_p0 = scmp.ge.s32.totalorder %s2947_s30, 1  ;;  %s2947_s30 = sphi %s3003_s30, %s19_s30  }
   0x2   : > { %p287_p1 = scmp.lt.s32.totalorder %s2947_s30, 3 }
   0x4   : > { %p288_p2 = pnand %p2496_p0, %p287_p1 }
   0x6   : > { %291 = sbr.rel (%p288_p2) target bundleno = 1077 (0x435), region = 56 }
   0xb   : > { %v2898_v0 = vld [vmem:[%s3904_s1 + $0x38] sm:$0xff]   ;;  %v3913_v1 = vmov 0   ;;  %p323_p3 = scmp.lt.s32.totalorder %s2492_s10, 1  ;;  %v2899_v2 = vld [vmem:[%s3904_s1 + $0x30] sm:$0xff]   ;;  %v2900_v3 = vld [vmem:[%s3904_s1 + $0x28] sm:$0xff]   ;;  %vm450_vm0 = vcmask 130048  }
   0xc   : > { %463 = vmatprep.subr.bf16.mxu0 %v3913_v1  ;;  %v2901_v4 = vld [vmem:[%s3904_s1 + $0x20] sm:$0xff]   ;;  %v2902_v6 = vld [vmem:[%s3904_s1 + $0x18] sm:$0xff]   ;;  %v2903_v7 = vld [vmem:[%s3904_s1 + $0x10] sm:$0xff]   ;;  %v3931_v18 = vmov 0.0   ;;  %vm3918_vm1 = vmmov 0   ;;  %vm538_vm2 = vcmask 523264  }
   0xd   : > { %464 = vmatpush1.bf16.msra.mxu0 %v2898_v0  ;;  %s4043_s10 = smov (!%p323_p3, %s2492_s10), 1  ;;  %v2904_v8 = vld [vmem:[%s3904_s1 + $0x8] sm:$0xff]   ;;  %v2905_v9 = vld [vmem:[%s3904_s1] sm:$0xff]   ;;  %2718 = vmatprep.subr.mxu1 %v3931_v18  ;;  %v3071_v19 = vld [vmem:[%s3907_s4 + $0x38] sm:$0xff]  ;;  %vm809_vm3 = vcmask 1040384   ;;  %vm3920_vm4 = vcmask 1045504  }
   0xe   : > { %465 = vmatprep.subr.bf16.mxu0 %v3913_v1  ;;  %s2626_s15 = sshll.u32 %s4043_s10, 6  ;;  %v2906_v10 = vld [vmem:[%s3904_s1 + $0x40] sm:$0xff]   ;;  %2719 = vmatpush3.msra.mxu1 %v3071_v19  ;;  %v3078_v20 = vld [vmem:[%s3907_s4 + $0x30] sm:$0xff]  ;;  %v3085_v21 = vld [vmem:[%s3907_s4 + $0x28] sm:$0xff]  ;;  %s2952_s27 = smov 96   ;;  %vm3921_vm9 = vcmask 261120  }
   0xf   : > { %s3029_s20 = scalar_lea.vmem %s3903_s0, %s2626_s15  ;;  %2720 = vmatprep.subr.mxu1 %v3931_v18  ;;  %v3092_v22 = vld [vmem:[%s3907_s4 + $0x20] sm:$0xff]  ;;  %v3099_v23 = vld [vmem:[%s3907_s4 + $0x18] sm:$0xff]  ;;  %v3106_v24 = vld [vmem:[%s3907_s4 + $0x10] sm:$0xff]  ;;  %2734 = vmatprep.mubr.msk.f32.mxu1 %vm3918_vm1, %v3931_v18  ;;  %vm3928_vm12 = vsmask.f32 7424  ;;  %s2627_s26 = sshll.u32 %s4043_s10, 5 }
  0x10   : > { %v2909_v5 = vld [vmem:[%s3029_s20 + $0x4] ss:$8 sps:$4 sm:$0xff]   ;;  %v2907_v11 = vld [vmem:[%s3029_s20] ss:$8 sps:$4 sm:$0xff]   ;;  %v2910_v12 = vld [vmem:[%s3029_s20 + $0x14] ss:$8 sps:$4 sm:$0xff]   ;;  %2721 = vmatpush3.msra.mxu1 %v3078_v20  ;;  %s332_s29 = scalar_lea.vmem %s3912_s9, %s2627_s26 }
  0x11   : > { %466 = vmatpush1.bf16.msra.mxu0 %v2899_v2  ;;  %2518 = vmatprep.mubr.msk.bf16.mxu0 %vm450_vm0, %v2909_v5  ;;  %v2912_v13 = vld [vmem:[%s3029_s20 + $0x10] ss:$8 sps:$4 sm:$0xff]   ;;  %v2913_v14 = vld [vmem:[%s3029_s20 + $0x24] ss:$8 sps:$4 sm:$0xff]   ;;  %v2915_v15 = vld [vmem:[%s3029_s20 + $0x20] ss:$8 sps:$4 sm:$0xff]  }
  0x12   : > { %467 = vmatprep.subr.bf16.mxu0 %v3913_v1  ;;  %v2916_v16 = vld [vmem:[%s3029_s20 + $0x34] ss:$8 sps:$4 sm:$0xff]   ;;  %v2918_v17 = vld [vmem:[%s3029_s20 + $0x30] ss:$8 sps:$4 sm:$0xff]   ;;  %2722 = vmatprep.subr.mxu1 %v3931_v18  ;;  %v3113_v25 = vld [vmem:[%s3907_s4 + $0x8] sm:$0xff] }
  0x13   : > { %2723 = vmatpush3.msra.mxu1 %v3085_v21  ;;  %v3120_v26 = vld [vmem:[%s3907_s4] sm:$0xff] }
  0x14   : > { %2724 = vmatprep.subr.mxu1 %v3931_v18 }
  0x15   : > { %468 = vmatpush1.bf16.msra.mxu0 %v2900_v3  ;;  %2725 = vmatpush3.msra.mxu1 %v3092_v22 }
  0x16   : > { %469 = vmatprep.subr.bf16.mxu0 %v3913_v1  ;;  %2726 = vmatprep.subr.mxu1 %v3931_v18 }
  0x17   : > { %2727 = vmatpush3.msra.mxu1 %v3099_v23 }
  0x18   : > { %2728 = vmatprep.subr.mxu1 %v3931_v18 }
  0x19   : > { %470 = vmatpush1.bf16.msra.mxu0 %v2901_v4  ;;  %2729 = vmatpush3.msra.mxu1 %v3106_v24 }
  0x1a   : > { %471 = vmatprep.subr.bf16.mxu0 %v3913_v1  ;;  %2730 = vmatprep.subr.mxu1 %v3931_v18 }
  0x1b   : > { %2731 = vmatpush3.msra.mxu1 %v3113_v25 }
  0x1c   : > { %2732 = vmatprep.subr.mxu1 %v3931_v18 }
  0x1d   : > { %472 = vmatpush1.bf16.msra.mxu0 %v2902_v6  ;;  %2733 = vmatpush3.msra.mxu1 %v3120_v26 }
  0x1e   : > { %473 = vmatprep.subr.bf16.mxu0 %v3913_v1  ;;  %2737 = vmatprep.subr.mxu1 %v3931_v18 }
  0x21   : > { %474 = vmatpush1.bf16.msra.mxu0 %v2903_v7 }
  0x22   : > { %475 = vmatprep.subr.bf16.mxu0 %v3913_v1 }
  0x25   : > { %476 = vmatpush1.bf16.msra.mxu0 %v2904_v8 }
  0x26   : > { %477 = vmatprep.subr.bf16.mxu0 %v3913_v1 }
  0x29   : > { %478 = vmatpush1.bf16.msra.mxu0 %v2905_v9 }
  0x2a   : > { %493 = vmatprep.subr.bf16.mxu0 %v3913_v1 }
  0x2d   : > { %494 = vmatpush2.bf16.msra.mxu0 %v2906_v10 }
  0x30   : > { %496 = vmatmul.mubr.bf16.vlgmr.msra.gmra.mxu0 %v2907_v11 }
  0x31   : > { %2519 = vmatprep.mubr.msk.bf16.mxu0 %vm450_vm0, %v2910_v12 }
  0x38   : > { %504 = vmatmul.mubr.bf16.gmra.mxu0 %v2912_v13 }
  0x39   : > { %2520 = vmatprep.mubr.msk.bf16.mxu0 %vm450_vm0, %v2913_v14 }
  0x40   : > { %512 = vmatmul.mubr.bf16.gmra.mxu0 %v2915_v15 }
  0x41   : > { %2521 = vmatprep.mubr.msk.bf16.mxu0 %vm450_vm0, %v2916_v16 }
  0x48   : > { %520 = vmatmul.mubr.bf16.gmra.mxu0 %v2918_v17 }
  0xf0   : > { %v3126_v27 = vpop.f32.mrf.mxu0 }
  0xf1   : > { %v539_v38 = vsel %vm538_vm2, %v3126_v27, 0.0  ;;  %v560_v39 = vmul.f32 %v3126_v27, %v3126_v27 }
  0xf2   : > { %v499_v28 = vpop.f32.mrf.mxu0 }
  0xf3   : > { %v568_v49 = vsel %vm538_vm2, %v560_v39, 0.0 }
  0xf4   : > { %v3128_v29 = vpop.f32.mrf.mxu0 }
  0xf5   : > { %v540_v35 = vsel %vm538_vm2, %v3128_v29, 0.0  ;;  %v561_v36 = vmul.f32 %v3128_v29, %v3128_v29 }
  0xf6   : > { %v502_v30 = vpop.f32.mrf.mxu0  ;;  %v541_v42 = vadd.f32 %v540_v35, %v539_v38 }
  0xf7   : > { %v569_v44 = vsel %vm538_vm2, %v561_v36, 0.0 }
  0xf8   : > { %v3130_v31 = vpop.f32.mrf.mxu0  ;;  %v570_v53 = vadd.f32 %v569_v44, %v568_v49 }
  0xf9   : > { %v542_v40 = vsel %vm538_vm2, %v3130_v31, 0.0  ;;  %v562_v41 = vmul.f32 %v3130_v31, %v3130_v31 }
  0xfa   : > { %v507_v32 = vpop.f32.mrf.mxu0  ;;  %v543_v47 = vadd.f32 %v542_v40, %v541_v42 }
  0xfb   : > { %v571_v50 = vsel %vm538_vm2, %v562_v41, 0.0 }
  0xfc   : > { %v3132_v33 = vpop.f32.mrf.mxu0  ;;  %v572_v59 = vadd.f32 %v571_v50, %v570_v53 }
  0xfd   : > { %v544_v45 = vsel %vm538_vm2, %v3132_v33, 0.0  ;;  %v563_v46 = vmul.f32 %v3132_v33, %v3132_v33 }
  0xfe   : > { %v510_v34 = vpop.f32.mrf.mxu0  ;;  %v545_v54 = vadd.f32 %v544_v45, %v543_v47 }
  0xff   : > { %v573_v56 = vsel %vm538_vm2, %v563_v46, 0.0 }
 0x100   : > { %v3138_v37 = vpop.f32.mrf.mxu0  ;;  %v574_v2 = vadd.f32 %v573_v56, %v572_v59 }
 0x101   : > { %v546_v51 = vsel %vm538_vm2, %v3138_v37, 0.0  ;;  %v564_v52 = vmul.f32 %v3138_v37, %v3138_v37 }
 0x102   : > { %v515_v43 = vpop.f32.mrf.mxu0  ;;  %v547_v60 = vadd.f32 %v546_v51, %v545_v54  ;;  %v741_v51 = vlaneseq }
 0x103   : > { %v575_v62 = vsel %vm538_vm2, %v564_v52, 0.0 }
 0x104   : > { %v3153_v48 = vpop.f32.mrf.mxu0  ;;  %v576_v6 = vadd.f32 %v575_v62, %v574_v2  ;;  %v3225_v53 = vshrl.u32 %v741_v51, 7 }
 0x105   : > { %v548_v57 = vsel %vm538_vm2, %v3153_v48, 0.0  ;;  %v565_v58 = vmul.f32 %v3153_v48, %v3153_v48 }
 0x106   : > { %v518_v55 = vpop.f32.mrf.mxu0  ;;  %v549_v3 = vadd.f32 %v548_v57, %v547_v60  ;;  %v3228_v54 = vsub.s32 0, %v3225_v53  ;;  %v3234_v56 = vadd.s32 16, %v3225_v53  ;;  %v3237_v57 = vadd.s32 24, %v3225_v53 }
 0x107   : > { %v577_v5 = vsel %vm538_vm2, %v565_v58, 0.0  ;;  %v3231_v55 = vadd.s32 8, %v3225_v53  ;;  %v3241_v59 = vadd.s32 32, %v3225_v53  ;;  %v3244_v60 = vadd.s32 40, %v3225_v53 }
 0x108   : > { %v3166_v61 = vpop.f32.mrf.mxu0  ;;  %v578_v12 = vadd.f32 %v577_v5, %v576_v6  ;;  %3939 = vst [vmem:[#allocation2_spill] sm:$0xff] %v3228_v54  ;;  %v3917_v62 = vand.u32 7, %v3225_v53  ;;  %v870_v2 = vand.u32 7, %v3237_v57  ;;  %v3252_v5 = vrot.slane %v3931_v18, 2 }
 0x109   : > { %v550_v63 = vsel %vm538_vm2, %v3166_v61, 0.0  ;;  %v566_v0 = vmul.f32 %v3166_v61, %v3166_v61  ;;  %v877_v6 = vand.u32 7, %v3241_v59 }
 0x10a   : > { %v523_v4 = vpop.f32.mrf.mxu0  ;;  %v551_v7 = vadd.f32 %v550_v63, %v549_v3  ;;  %v856_v63 = vand.u32 7, %v3231_v55  ;;  %vm3272_vm5 = vcmp.lt.s32.totalorder %v3917_v62, 7  ;;  %vm3278_vm6 = vcmp.lt.s32.totalorder %v870_v2, 7 }
 0x10b   : > { %v579_v9 = vsel %vm538_vm2, %v566_v0, 0.0  ;;  %v863_v0 = vand.u32 7, %v3234_v56  ;;  %vm3300_vm10 = vcmp.lt.s32.totalorder %v877_v6, 7  ;;  %v2935_v56 = vld [vmem:[%s3908_s5 + $0x78] sm:$0xff]  }
 0x10c   : > { %v3174_v8 = vpop.f32.mrf.mxu0  ;;  %v580_v16 = vadd.f32 %v579_v9, %v578_v12  ;;  %vm3284_vm7 = vcmp.lt.s32.totalorder %v856_v63, 7  ;;  %vm3458_vm15 = vcmp.ge.s32.totalorder %v856_v63, 1 }
 0x10d   : > { %v552_v10 = vsel %vm538_vm2, %v3174_v8, 0.0  ;;  %v567_v11 = vmul.f32 %v3174_v8, %v3174_v8  ;;  %vm3290_vm8 = vcmp.lt.s32.totalorder %v863_v0, 7  ;;  %vm3503_vm0 = vcmp.ge.s32.totalorder %v863_v0, 1 }
 0x10e   : > { %v553_v13 = vadd.f32 %v552_v10, %v551_v7  ;;  %v526_v14 = vpop.f32.mrf.mxu0  ;;  %v884_v7 = vand.u32 7, %v3244_v60 }
 0x10f   : > { %v581_v15 = vsel %vm538_vm2, %v567_v11, 0.0 }
 0x110   : > { %v554_v17 = vrot.slane %v553_v13, 4  ;;  %v582_v30 = vadd.f32 %v581_v15, %v580_v16  ;;  %vm3306_vm11 = vcmp.lt.s32.totalorder %v884_v7, 7 }
 0x112   : > { %v555_v28 = vadd.f32 %v554_v17, %v553_v13  ;;  %v583_v35 = vrot.slane %v582_v30, 4  ;;  %v2524_v13 = vld [vmem:[%s3905_s2] ss:$0 sm:$0xff] }
 0x114   : > { %v556_v32 = vrot.slane %v555_v28, 2  ;;  %v584_v38 = vadd.f32 %v583_v35, %v582_v30 }
 0x116   : > { %v557_v34 = vadd.f32 %v556_v32, %v555_v28  ;;  %v585_v40 = vrot.slane %v584_v38, 2 }
 0x118   : > { %v558_v36 = vrot.slane %v557_v34, 1  ;;  %v586_v41 = vadd.f32 %v585_v40, %v584_v38 }
 0x11a   : > { %v559_v39 = vadd.f32 %v558_v36, %v557_v34 }
 0x11c   : > { %2735 = vmatmul.mubr.msk.f32.vlgmr.msra.gmra.mxu1 %vm538_vm2, %v559_v39 }
 0x11d   : > { %2738 = vmatpush3.msra.mxu1 %v3071_v19  ;;  %2753 = vmatprep.mubr.msk.f32.mxu1 %vm3918_vm1, %v3931_v18  ;;  %v587_v19 = vrot.slane %v586_v41, 1  ;;  %vm3523_vm1 = vcmp.ge.s32.totalorder %v884_v7, 1  ;;  %v2932_v7 = vld [vmem:[%s3908_s5 + $0x88] sm:$0xff]  }
 0x11e   : > { %2739 = vmatprep.subr.mxu1 %v3931_v18 }
 0x11f   : > { %2740 = vmatpush3.msra.mxu1 %v3078_v20  ;;  %v588_v20 = vadd.f32 %v587_v19, %v586_v41  ;;  %v2936_v19 = vld [vmem:[%s3908_s5 + $0x70] sm:$0xff]  }
 0x120   : > { %2741 = vmatprep.subr.mxu1 %v3931_v18 }
 0x121   : > { %2742 = vmatpush3.msra.mxu1 %v3085_v21  ;;  %v2919_v21 = vld [vmem:[%s3908_s5 + $0x28] sm:$0xff]  }
 0x122   : > { %2743 = vmatprep.subr.mxu1 %v3931_v18  ;;  %2780 = vmatprep.subr.bf16.mxu0 %v2919_v21 }
 0x123   : > { %2744 = vmatpush3.msra.mxu1 %v3092_v22  ;;  %2781 = vmatpush3.bf16.msra.mxu0 %v2919_v21  ;;  %v2920_v22 = vld [vmem:[%s3908_s5 + $0x18] sm:$0xff]  }
 0x124   : > { %2745 = vmatprep.subr.mxu1 %v3931_v18 }
 0x125   : > { %2746 = vmatpush3.msra.mxu1 %v3099_v23  ;;  %v2921_v23 = vld [vmem:[%s3908_s5 + $0x20] sm:$0xff]  }
 0x126   : > { %2747 = vmatprep.subr.mxu1 %v3931_v18  ;;  %2782 = vmatprep.subr.bf16.mxu0 %v2921_v23 }
 0x127   : > { %2748 = vmatpush3.msra.mxu1 %v3106_v24  ;;  %2783 = vmatpush3.bf16.msra.mxu0 %v2921_v23  ;;  %v2922_v24 = vld [vmem:[%s3908_s5 + $0x10] sm:$0xff]  }
 0x128   : > { %2749 = vmatprep.subr.mxu1 %v3931_v18 }
 0x129   : > { %2750 = vmatpush3.msra.mxu1 %v3113_v25  ;;  %v3216_v25 = vld [vmem:[%s3908_s5 + $0x8] sm:$0xff]  }
 0x12a   : > { %2751 = vmatprep.subr.mxu1 %v3931_v18 }
 0x12b   : > { %2752 = vmatpush3.msra.mxu1 %v3120_v26  ;;  %v3222_v26 = vld [vmem:[%s3908_s5 + $0x48] sm:$0xff]  }
 0x12c   : > { %2754 = vmatmul.mubr.msk.f32.vlgmr.msra.gmra.mxu1 %vm538_vm2, %v588_v20  ;;  %2756 = vmatprep.subr.bf16.mxu1 %v2920_v22  ;;  %vm3509_vm2 = vcmp.ge.s32.totalorder %v870_v2, 1  ;;  %v3966_v2 = vand.u32 7, %v3225_v53 }
 0x12d   : > { %2757 = vmatpush3.bf16.msra.mxu1 %v2920_v22  ;;  %2804 = vmatprep.subr.bf16.mxu0 %v3222_v26 }
 0x12e   : > { %2758 = vmatprep.subr.bf16.mxu1 %v2922_v24 }
 0x131   : > { %2759 = vmatpush3.bf16.msra.mxu1 %v2922_v24 }
 0x132   : > { %2768 = vmatprep.subr.bf16.mxu1 %v3216_v25 }
 0x1dc   : > { %v658_v42 = vpop.f32.mrf.mxu1 }
 0x1dd   : > { %v662_v44 = vmul.f32 0.001953125, %v658_v42 }
 0x1de   : > { %v2736_v43 = vpop.f32.mrf.mxu1 }
 0x1df   : > { %v737_v46 = vmul.f32 %v662_v44, %v662_v44  ;;  %v744_v58 = vrot.slane %v662_v44, %v3228_v54 }
 0x1e1   : > { %v747_v4 = vsub.f32 %v3130_v31, %v744_v58  ;;  %v745_v10 = vsub.f32 %v3126_v27, %v744_v58  ;;  %v748_v11 = vsub.f32 %v3132_v33, %v744_v58  ;;  %v746_v12 = vsub.f32 %v3128_v29, %v744_v58  ;;  %v2525_v29 = vld [vmem:[%s3906_s3] ss:$0 sm:$0xff] }
 0x1e2   : > { %v750_v31 = vsub.f32 %v3153_v48, %v744_v58  ;;  %v749_v14 = vsub.f32 %v3138_v37, %v744_v58  ;;  %v752_v15 = vsub.f32 %v3174_v8, %v744_v58  ;;  %v751_v16 = vsub.f32 %v3166_v61, %v744_v58 }
 0x1ec   : > { %v732_v45 = vpop.f32.mrf.mxu1 }
 0x1ed   : > { %v736_v47 = vmul.f32 0.001953125, %v732_v45 }
 0x1ee   : > { %v2755_v49 = vpop.f32.mrf.mxu1 }
 0x1ef   : > { %v738_v50 = vsub.f32 %v736_v47, %v737_v46 }
 0x1f1   : > { %v739_v52 = vadd.f32 1e-05, %v738_v50 }
 0x1f3   : > { %2937 = vrsqrt.f32 %v739_v52 }
 0x200   : > { %v2938_v3 = vpop.eup %2937 }
 0x201   : > { %v756_v9 = vrot.slane %v2938_v3, %v3228_v54  ;;  %v3948_v3 = vmov 0 }
 0x202   : > { %v3949_v3 = vsel %vm3300_vm10, 4294967295, %v3948_v3 }
 0x203   : > { %v759_v17 = vmul.f32 %v756_v9, %v747_v4  ;;  %v757_v28 = vmul.f32 %v756_v9, %v745_v10  ;;  %v760_v27 = vmul.f32 %v756_v9, %v748_v11  ;;  %v758_v30 = vmul.f32 %v756_v9, %v746_v12 }
 0x204   : > { %v762_v33 = vmul.f32 %v756_v9, %v750_v31  ;;  %v761_v32 = vmul.f32 %v756_v9, %v749_v14  ;;  %v764_v34 = vmul.f32 %v756_v9, %v752_v15  ;;  %v763_v35 = vmul.f32 %v756_v9, %v751_v16 }
 0x205   : > { %v773_v36 = vmul.f32 %v2524_v13, %v759_v17  ;;  %v771_v48 = vmul.f32 %v2524_v13, %v757_v28  ;;  %v774_v38 = vmul.f32 %v2524_v13, %v760_v27  ;;  %v772_v37 = vmul.f32 %v2524_v13, %v758_v30 }
 0x206   : > { %v776_v8 = vmul.f32 %v2524_v13, %v762_v33  ;;  %v775_v39 = vmul.f32 %v2524_v13, %v761_v32  ;;  %v778_v40 = vmul.f32 %v2524_v13, %v764_v34  ;;  %v777_v41 = vmul.f32 %v2524_v13, %v763_v35 }
 0x207   : > { %v787_v20 = vadd.f32 %v2525_v29, %v773_v36  ;;  %v785_v21 = vadd.f32 %v2525_v29, %v771_v48  ;;  %v788_v22 = vadd.f32 %v2525_v29, %v774_v38  ;;  %v786_v23 = vadd.f32 %v2525_v29, %v772_v37 }
 0x208   : > { %v790_v43 = vadd.f32 %v2525_v29, %v776_v8  ;;  %v789_v44 = vadd.f32 %v2525_v29, %v775_v39  ;;  %v792_v45 = vadd.f32 %v2525_v29, %v778_v40  ;;  %v3294_v46 = vadd.f32 %v2525_v29, %v777_v41 }
 0x209   : > { %2360 = vrot.lane.b32.xlu1 %v787_v20, %s2952_s27  ;;  %v795_v47 = vmax.f32 %v787_v20, 0.0  ;;  %2356 = vrot.lane.b32.xlu0 %v785_v21, %s2952_s27  ;;  %v793_v49 = vmax.f32 %v785_v21, 0.0  ;;  %v796_v50 = vmax.f32 %v788_v22, 0.0  ;;  %v794_v51 = vmax.f32 %v786_v23, 0.0 }
 0x20a   : > { %v798_v52 = vmax.f32 %v790_v43, 0.0  ;;  %v797_v58 = vmax.f32 %v789_v44, 0.0  ;;  %v3950_v4 = vmov 0  ;;  %v3311_v9 = vadd.s32 48, %v3225_v53 }
 0x20b   : > { %v3951_v4 = vsel %vm3306_vm11, 4294967295, %v3950_v4  ;;  %v813_v10 = vrot.slane %v795_v47, 7  ;;  %v810_v11 = vrot.slane %v793_v49, 7  ;;  %v815_v12 = vrot.slane %v796_v50, 7 }
 0x20c   : > { %v811_v13 = vrot.slane %v794_v51, 7  ;;  %v819_v31 = vrot.slane %v798_v52, 7  ;;  %v817_v14 = vrot.slane %v797_v58, 7  ;;  %v800_v15 = vmax.f32 %v792_v45, 0.0 }
 0x20d   : > { %v799_v16 = vmax.f32 %v3294_v46, 0.0  ;;  %v3315_v17 = vsel %vm809_vm3, 0.0, %v810_v11  ;;  %2362 = vrot.lane.b32.xlu1 %v788_v22, %s2952_s27  ;;  %v3319_v28 = vsel %vm809_vm3, %v813_v10, %v815_v12  ;;  %2358 = vrot.lane.b32.xlu0 %v786_v23, %s2952_s27  ;;  %v3332_v34 = vadd.s32 56, %v3225_v53 }
 0x20e   : > { %v3322_v27 = vsel %vm809_vm3, %v811_v13, %v813_v10  ;;  %v3326_v30 = vsel %vm809_vm3, %v810_v11, %v811_v13  ;;  %v1234_v29 = vrot.slane %v3315_v17, 2  ;;  %v1240_v33 = vrot.slane %v3319_v28, 2  ;;  %v2926_v13 = vld [vmem:[%s3908_s5 + $0x40] sm:$0xff]  }
 0x20f   : > { %v1238_v32 = vrot.slane %v3322_v27, 2  ;;  %v3335_v35 = vsel %vm809_vm3, %v815_v12, %v817_v14  ;;  %v3338_v36 = vsel %vm809_vm3, %v817_v14, %v819_v31  ;;  %v1236_v48 = vrot.slane %v3326_v30, 2 }
 0x210   : > { %v3916_v38 = vand.u32 7, %v3311_v9  ;;  %v1235_v37 = vsel %vm3920_vm4, %v3252_v5, %v1234_v29  ;;  %v3344_v8 = vrot.slane %v800_v15, 7  ;;  %v821_v39 = vrot.slane %v799_v16, 7 }
 0x211   : > { %v3347_v40 = vsel %vm3920_vm4, %v1238_v32, %v1240_v33  ;;  %2366 = vrot.lane.b32.xlu1 %v790_v43, %s2952_s27  ;;  %2364 = vrot.lane.b32.xlu0 %v789_v44, %s2952_s27  ;;  %v3352_v41 = vsel %vm3920_vm4, %v1234_v29, %v1236_v48  ;;  %v3355_v20 = vsel %vm3920_vm4, %v1236_v48, %v1238_v32  ;;  %v1258_v21 = vsel %vm3272_vm5, %v1235_v37, 0.0 }
 0x212   : > { %v1261_v22 = vsel %vm3278_vm6, %v3347_v40, 0.0  ;;  %v1259_v23 = vsel %vm3284_vm7, %v3352_v41, 0.0  ;;  %v1260_v43 = vsel %vm3290_vm8, %v3355_v20, 0.0  ;;  %v1242_v44 = vrot.slane %v3335_v35, 2 }
 0x213   : > { %v1244_v47 = vrot.slane %v3338_v36, 2  ;;  %v1266_v49 = vpack.c.bf16 %v1259_v23, %v1258_v21  ;;  %v1267_v50 = vpack.c.bf16 %v1261_v22, %v1260_v43  ;;  %v980_v51 = vpack.c.bf16 %v3315_v17, %v3931_v18  ;;  %v3424_v43 = vld [vmem:[%s3908_s5 + $0x68] sm:$0xff]  }
 0x214   : > { %v3915_v52 = vand.u32 7, %v3332_v34  ;;  %v3374_v58 = vsel %vm3920_vm4, %v1240_v33, %v1242_v44  ;;  %v981_v11 = vpack.c.bf16 %v3322_v27, %v3326_v30  ;;  %v982_v12 = vpack.c.bf16 %v3335_v35, %v3319_v28 }
 0x215   : > { %v3377_v10 = vsel %vm3920_vm4, %v1242_v44, %v1244_v47  ;;  %2784 = vmatprep.mubr.msk.bf16.mxu0 %vm3921_vm9, %v1266_v49  ;;  %2370 = vrot.lane.b32.xlu1 %v792_v45, %s2952_s27  ;;  %v3389_v14 = vsel %vm809_vm3, %v819_v31, %v821_v39  ;;  %v1262_v15 = vsel %vm3300_vm10, %v3374_v58, 0.0  ;;  %v3399_v29 = vsel %vm809_vm3, %v821_v39, %v3344_v8 }
 0x216   : > { %v1263_v16 = vsel %vm3306_vm11, %v3377_v10, 0.0  ;;  %2368 = vrot.lane.b32.xlu0 %v3294_v46, %s2952_s27  ;;  %2785 = vmatmul.mubr.msk.bf16.vlgmr.msra.gmra.mxu0 %vm3921_vm9, %v1267_v50  ;;  %vm3406_vm13 = vcmp.lt.s32.totalorder %v3916_v38, 7  ;;  %v3952_v31 = vmov 0  ;;  %vm3412_vm14 = vcmp.lt.s32.totalorder %v3915_v52, 7 }
 0x217   : > { %v1268_v45 = vpack.c.bf16 %v1263_v16, %v1262_v15  ;;  %v3953_v31 = vsel %vm3406_vm13, 4294967295, %v3952_v31  ;;  %v3954_v33 = vmov 0  ;;  %v992_v32 = vshrl.u32 %v980_v51, 16  ;;  %2805 = vmatpush3.bf16.msra.mxu0 %v3222_v26 }
 0x218   : > { %v3955_v33 = vsel %vm3412_vm14, 4294967295, %v3954_v33  ;;  %v994_v48 = vshll.u32 %v980_v51, 16  ;;  %v999_v37 = vshll.u32 %v981_v11, 16  ;;  %v1003_v39 = vshrl.u32 %v981_v11, 16  ;;  %2806 = vmatprep.subr.bf16.mxu0 %v2926_v13 }
 0x219   : > { %2788 = vmatprep.mubr.msk.bf16.mxu0 %vm3921_vm9, %v1268_v45  ;;  %v1007_v46 = vshll.u32 %v982_v12, 16  ;;  %v983_v21 = vpack.c.bf16 %v3389_v14, %v3338_v36  ;;  %v1011_v22 = vshrl.u32 %v982_v12, 16  ;;  %v1246_v23 = vrot.slane %v3389_v14, 2 }
 0x21a   : > { %v996_v44 = vrot.slane %v994_v48, 1  ;;  %v1001_v49 = vrot.slane %v999_v37, 1  ;;  %v3914_v50 = vrot.slane %v3399_v29, 2  ;;  %v1486_v26 = vpack.c.bf16 %v3326_v30, %v3315_v17 }
 0x21b   : > { %v1009_v51 = vrot.slane %v1007_v46, 1  ;;  %v1015_v11 = vshll.u32 %v983_v21, 16  ;;  %v3430_v15 = vsel %vm3920_vm4, %v1244_v47, %v1246_v23  ;;  %v1487_v12 = vpack.c.bf16 %v3319_v28, %v3322_v27  ;;  %2807 = vmatpush3.bf16.msra.mxu0 %v2926_v13 }
 0x21c   : > { %v997_v16 = vor.u32 %v996_v44, %v992_v32  ;;  %v1005_v45 = vor.u32 %v1003_v39, %v1001_v49  ;;  %v3437_v48 = vsel %vm3920_vm4, %v1246_v23, %v3914_v50  ;;  %v1264_v37 = vsel %vm3406_vm13, %v3430_v15, 0.0  ;;  %2828 = vmatprep.subr.bf16.mxu0 %v3424_v43  ;;  %v2925_v50 = vld [vmem:[%s3908_s5] sm:$0xff]  }
 0x21d   : > { %v1013_v46 = vor.u32 %v1011_v22, %v1009_v51  ;;  %v1017_v1 = vrot.slane %v1015_v11, 1  ;;  %v1265_v47 = vsel %vm3412_vm14, %v3437_v48, 0.0  ;;  %v1499_v44 = vshll.u32 %v1486_v26, 16 }
 0x21e   : > { %v1002_v32 = vsel %vm3928_vm12, %v997_v16, %v1001_v49  ;;  %v3448_v39 = vsel %vm3928_vm12, %v1005_v45, %v1009_v51  ;;  %v1269_v23 = vpack.c.bf16 %v1265_v47, %v1264_v37  ;;  %v1497_v13 = vshrl.u32 %v1486_v26, 16 }
 0x21f   : > { %2760 = vmatprep.mubr.msk.bf16.mxu1 %vm3921_vm9, %v1002_v32  ;;  %v1504_v22 = vshll.u32 %v1487_v12, 16  ;;  %v984_v11 = vpack.c.bf16 %v3399_v29, %v3399_v29  ;;  %v3465_v51 = vsel %vm3928_vm12, %v1013_v46, %v1017_v1  ;;  %v1501_v16 = vrot.slane %v1499_v44, 1 }
 0x220   : > { %2761 = vmatmul.mubr.msk.bf16.vlgmr.msra.gmra.mxu1 %vm3921_vm9, %v3448_v39  ;;  %2789 = vmatmul.mubr.msk.bf16.gmra.mxu0 %vm3921_vm9, %v1269_v23  ;;  %v1508_v26 = vshrl.u32 %v1487_v12, 16  ;;  %v1488_v45 = vpack.c.bf16 %v3338_v36, %v3335_v35  ;;  %v1019_v63 = vshrl.u32 %v983_v21, 16  ;;  %v1489_v47 = vpack.c.bf16 %v3399_v29, %v3389_v14  ;;  %v2927_v12 = vld [vmem:[%s3908_s5 + $0x38] sm:$0xff]  }
 0x221   : > { %2769 = vmatpush3.bf16.msra.mxu1 %v3216_v25  ;;  %2764 = vmatprep.mubr.msk.bf16.mxu1 %vm3921_vm9, %v3465_v51  ;;  %v1506_v55 = vrot.slane %v1504_v22, 1  ;;  %v1023_v37 = vshll.u32 %v984_v11, 16  ;;  %v1502_v46 = vor.u32 %v1501_v16, %v1497_v13  ;;  %v3480_v23 = vsel %vm809_vm3, %v3344_v8, 0.0 }
 0x222   : > { %2770 = vmatprep.subr.bf16.mxu1 %v2925_v50  ;;  %v1512_v32 = vshll.u32 %v1488_v45, 16  ;;  %v3482_v44 = vor.u32 %v1019_v63, %v1017_v1  ;;  %v1520_v22 = vshll.u32 %v1489_v47, 16  ;;  %v965_v13 = vsel %vm3458_vm15, %v3315_v17, 0.0 }
 0x223   : > { %v1510_v25 = vor.u32 %v1508_v26, %v1506_v55  ;;  %v1507_v21 = vsel %vm3928_vm12, %v1502_v46, %v1506_v55  ;;  %v1516_v16 = vshrl.u32 %v1488_v45, 16  ;;  %v1025_v52 = vrot.slane %v1023_v37, 1  ;;  %v2930_v45 = vld [vmem:[%s3908_s5 + $0x60] sm:$0xff]  }
 0x224   : > { %v1514_v11 = vrot.slane %v1512_v32, 1  ;;  %2808 = vmatprep.mubr.msk.bf16.mxu0 %vm3921_vm9, %v1507_v21  ;;  %v1522_v62 = vrot.slane %v1520_v22, 1  ;;  %v1490_v1 = vpack.c.bf16 %v3480_v23, %v3480_v23  ;;  %v972_v26 = vpack.c.bf16 %v965_v13, %v3931_v18 }
 0x225   : > { %2771 = vmatpush3.bf16.msra.mxu1 %v2925_v50  ;;  %v1026_v8 = vsel %vm3928_vm12, %v3482_v44, %v1025_v52  ;;  %vm3517_vm3 = vcmp.ge.s32.totalorder %v877_v6, 1  ;;  %v1524_v57 = vshrl.u32 %v1489_v47, 16  ;;  %vm3530_vm4 = vcmp.ge.s32.totalorder %v3966_v2, 1 }
 0x226   : > { %v1518_v38 = vor.u32 %v1516_v16, %v1514_v11  ;;  %2792 = vmatprep.subr.bf16.mxu1 %v2927_v12  ;;  %v1515_v55 = vsel %vm3928_vm12, %v1510_v25, %v1514_v11  ;;  %v1528_v0 = vshll.u32 %v1490_v1, 16  ;;  %v966_v59 = vsel %vm3503_vm0, %v3326_v30, 0.0  ;;  %v2929_v25 = vld [vmem:[%s3908_s5 + $0x30] sm:$0xff]  }
 0x227   : > { %v967_v60 = vsel %vm3509_vm2, %v3322_v27, 0.0  ;;  %v1526_v6 = vor.u32 %v1524_v57, %v1522_v62  ;;  %v968_v53 = vsel %vm3517_vm3, %v3319_v28, 0.0  ;;  %v1747_v46 = vsel %vm3530_vm4, %v3326_v30, 0.0 }
 0x228   : > { %2765 = vmatmul.mubr.msk.bf16.gmra.mxu1 %vm3921_vm9, %v1026_v8  ;;  %2809 = vmatmul.mubr.msk.bf16.vlgmr.msra.gmra.mxu0 %vm3921_vm9, %v1515_v55  ;;  %v1523_v50 = vsel %vm3928_vm12, %v1518_v38, %v1522_v62  ;;  %v1530_v47 = vrot.slane %v1528_v0, 1  ;;  %v1748_v62 = vsel %vm3458_vm15, %v3322_v27, 0.0  ;;  %v973_v32 = vpack.c.bf16 %v967_v60, %v966_v59 }
 0x229   : > { %2772 = vmatprep.mubr.msk.bf16.mxu1 %vm3921_vm9, %v972_v26  ;;  %2812 = vmatprep.mubr.msk.bf16.mxu0 %vm3921_vm9, %v1523_v50  ;;  %v3969_v13 = vand.u32 7, %v3311_v9  ;;  %vm3972_vm14 = vcmask 261120   ;;  %v1755_v16 = vpack.c.bf16 %v1748_v62, %v1747_v46  ;;  %v3974_v1 = vand.u32 7, %v3332_v34  ;;  %v2931_v26 = vld [vmem:[%s3908_s5 + $0x58] sm:$0xff]  }
 0x22a   : > { %2829 = vmatpush3.bf16.msra.mxu0 %v3424_v43  ;;  %v969_v43 = vsel %vm3523_vm1, %v3335_v35, 0.0  ;;  %v1531_v21 = vsel %vm3928_vm12, %v1526_v6, %v1530_v47  ;;  %vm3973_vm13 = vmmov %vm3972_vm14  ;;  %v1750_v55 = vsel %vm3509_vm2, %v3335_v35, 0.0  ;;  %v1372_v50 = vsel %vm3530_vm4, %v3315_v17, 0.0 }
 0x22b   : > { %2830 = vmatprep.subr.bf16.mxu0 %v2930_v45  ;;  %v974_v22 = vpack.c.bf16 %v969_v43, %v968_v53  ;;  %vm3561_vm9 = vcmp.ge.s32.totalorder %v3969_v13, 1  ;;  %vm3569_vm11 = vcmp.ge.s32.totalorder %v3974_v1, 1  ;;  %vm3977_vm12 = vmmov %vm3973_vm13  ;;  %v1373_v57 = vsel %vm3458_vm15, %v3326_v30, 0.0  ;;  %v2934_v30 = vld [vmem:[%s3908_s5 + $0x80] sm:$0xff]  }
 0x22c   : > { %vm3978_vm10 = vmmov %vm3977_vm12  ;;  %v970_v9 = vsel %vm3561_vm9, %v3338_v36, 0.0  ;;  %v971_v34 = vsel %vm3569_vm11, %v3389_v14, 0.0  ;;  %v1751_v0 = vsel %vm3517_vm3, %v3338_v36, 0.0  ;;  %v1752_v2 = vsel %vm3523_vm1, %v3389_v14, 0.0 }
 0x22d   : > { %v975_v60 = vpack.c.bf16 %v971_v34, %v970_v9  ;;  %v3979_v53 = vmov 0   ;;  %v1380_v17 = vpack.c.bf16 %v1373_v57, %v1372_v50  ;;  %v1757_v43 = vpack.c.bf16 %v1752_v2, %v1751_v0  ;;  %vm3980_vm4 = vmmov %vm3978_vm10 }
 0x22e   : > { %2831 = vmatpush3.bf16.msra.mxu0 %v2930_v45  ;;  %v1861_v45 = vpack.c.bf16 %v3480_v23, %v3399_v29  ;;  %v1879_v37 = vrot.slane %v3979_v53, 1  ;;  %v1974_v63 = vsel %vm3272_vm5, %v3355_v20, 0.0  ;;  %v1975_v52 = vsel %vm3284_vm7, %v3347_v40, 0.0 }
 0x22f   : > { %2852 = vmatprep.subr.bf16.mxu0 %v2932_v7  ;;  %v1630_v38 = vrot.slane %v3480_v23, 2  ;;  %v1976_v1 = vsel %vm3290_vm8, %v3374_v58, 0.0  ;;  %v1977_v9 = vsel %vm3278_vm6, %v3377_v10, 0.0  ;;  %v1633_v34 = vsel %vm3272_vm5, %v3352_v41, 0.0 }
 0x230   : > { %2773 = vmatmul.mubr.msk.bf16.vlgmr.msra.gmra.mxu1 %vm3972_vm14, %v973_v32  ;;  %2813 = vmatmul.mubr.msk.bf16.gmra.mxu0 %vm3973_vm13, %v1531_v21  ;;  %v1869_v59 = vshll.u32 %v1861_v45, 16  ;;  %v1873_v47 = vshrl.u32 %v1861_v45, 16  ;;  %vm3983_vm13 = vmmov %vm3980_vm4  ;;  %vm3984_vm14 = vsmask.f32 7424  ;;  %v1374_v32 = vsel %vm3503_vm0, %v3322_v27, 0.0 }
 0x231   : > { %2793 = vmatpush3.bf16.msra.mxu1 %v2927_v12  ;;  %2776 = vmatprep.mubr.msk.bf16.mxu1 %vm3977_vm12, %v974_v22  ;;  %v1749_v12 = vsel %vm3503_vm0, %v3319_v28, 0.0  ;;  %vm3982_vm12 = vmmov %vm3980_vm4  ;;  %v1753_v22 = vsel %vm3561_vm9, %v3399_v29, 0.0  ;;  %v1754_v21 = vsel %vm3569_vm11, %v3480_v23, 0.0  ;;  %v1376_v27 = vsel %vm3517_vm3, %v3335_v35, 0.0 }
 0x232   : > { %2832 = vmatprep.mubr.msk.bf16.mxu0 %vm3978_vm10, %v1755_v16  ;;  %2794 = vmatprep.subr.bf16.mxu1 %v2929_v25  ;;  %v1756_v6 = vpack.c.bf16 %v1750_v55, %v1749_v12  ;;  %v1871_v49 = vrot.slane %v1869_v59, 1  ;;  %vm3981_vm10 = vmmov %vm3980_vm4  ;;  %v1758_v13 = vpack.c.bf16 %v1754_v21, %v1753_v22  ;;  %v2933_v16 = vld [vmem:[%s3908_s5 + $0x50] sm:$0xff]   ;;  %v1379_v23 = vsel %vm3569_vm11, %v3399_v29, 0.0 }
 0x233   : > { %vm3985_vm15 = vmmov %vm3984_vm14  ;;  %v1634_v12 = vsel %vm3284_vm7, %v3355_v20, 0.0  ;;  %v1983_v11 = vpack.c.bf16 %v1977_v9, %v1976_v1  ;;  %v3994_v61 = vrot.slane %v3399_v29, 2  ;;  %vm3995_vm7 = vcmask 1045504  }
 0x234   : > { %v3614_v46 = vsel %vm3984_vm14, %v3482_v44, %v1871_v49  ;;  %v1875_v62 = vor.u32 %v1873_v47, %v1871_v49  ;;  %vm3986_vm0 = vmmov %vm3980_vm4  ;;  %v1641_v45 = vpack.c.bf16 %v1634_v12, %v1633_v34  ;;  %v1635_v20 = vsel %vm3290_vm8, %v3347_v40, 0.0 }
 0x235   : > { %2795 = vmatpush3.bf16.msra.mxu1 %v2929_v25  ;;  %v1375_v25 = vsel %vm3509_vm2, %v3319_v28, 0.0  ;;  %v1377_v28 = vsel %vm3523_vm1, %v3338_v36, 0.0  ;;  %vm3987_vm2 = vmmov %vm3986_vm0  ;;  %v1982_v36 = vpack.c.bf16 %v1975_v52, %v1974_v63  ;;  %v1631_v24 = vsel %vm3995_vm7, %v3994_v61, %v1630_v38 }
 0x236   : > { %2816 = vmatprep.subr.bf16.mxu1 %v2931_v26  ;;  %v3629_v44 = vsel %vm3985_vm15, %v1875_v62, %v1879_v37  ;;  %v1382_v35 = vpack.c.bf16 %v1377_v28, %v1376_v27  ;;  %vm3988_vm1 = vmmov %vm3986_vm0  ;;  %v1636_v57 = vsel %vm3278_vm6, %v3374_v58, 0.0  ;;  %vm3999_vm14 = vnez %v3953_v31  ;;  %v3729_v31 = vld [vmem:[%s3911_s8 + $0x18] sm:$0xff] }
 0x237   : > { %vm3989_vm3 = vmmov %vm3986_vm0  ;;  %v1980_v29 = vsel %vm3999_vm14, %v1631_v24, 0.0  ;;  %vm4000_vm15 = vnez %v3955_v33  ;;  %v1642_v42 = vpack.c.bf16 %v1636_v57, %v1635_v20  ;;  %4009 = vst [vmem:[#allocation3_spill] sm:$0xff] %v3729_v31  ;;  %v3734_v33 = vld [vmem:[%s3911_s8 + $0x10] sm:$0xff] }
 0x238   : > { %2777 = vmatmul.mubr.msk.bf16.gmra.mxu1 %vm3980_vm4, %v975_v60  ;;  %2833 = vmatmul.mubr.msk.bf16.vlgmr.msra.gmra.mxu0 %vm3981_vm10, %v1756_v6  ;;  %vm3990_vm4 = vnez %v3949_v3  ;;  %vm3991_vm10 = vnez %v3951_v4  ;;  %vm3993_vm5 = vmmov %vm3986_vm0  ;;  %v1639_v3 = vsel %vm3999_vm14, %v3437_v48, 0.0  ;;  %v1640_v4 = vsel %vm4000_vm15, %v1631_v24, 0.0  ;;  %4010 = vst [vmem:[#allocation4_spill] sm:$0xff] %v3734_v33 }
 0x239   : > { %2796 = vmatprep.mubr.msk.bf16.mxu1 %vm3982_vm12, %v1380_v17  ;;  %2836 = vmatprep.mubr.msk.bf16.mxu0 %vm3983_vm13, %v1757_v43  ;;  %v1978_v55 = vsel %vm3990_vm4, %v3430_v15, 0.0  ;;  %vm3996_vm11 = vmmov %vm3995_vm7  ;;  %v1638_v2 = vsel %vm3991_vm10, %v3430_v15, 0.0  ;;  %v3741_v15 = vld [vmem:[%s3911_s8 + $0x8] sm:$0xff] }
 0x23a   : > { %2853 = vmatpush3.bf16.msra.mxu0 %v2932_v7  ;;  %v1381_v7 = vpack.c.bf16 %v1375_v25, %v1374_v32  ;;  %v1972_v41 = vsel %vm3996_vm11, %v1630_v38, %v3252_v5  ;;  %vm3997_vm12 = vmmov %vm3986_vm0  ;;  %v1637_v5 = vsel %vm3990_vm4, %v3377_v10, 0.0  ;;  %v1644_v10 = vpack.c.bf16 %v1640_v4, %v1639_v3  ;;  %4011 = vst [vmem:[#allocation5_spill] sm:$0xff] %v3741_v15 }
 0x23b   : > { %2854 = vmatprep.subr.bf16.mxu0 %v2934_v30  ;;  %vm3998_vm13 = vmmov %vm3986_vm0  ;;  %v1981_v0 = vsel %vm4000_vm15, %v1972_v41, 0.0  ;;  %v1643_v58 = vpack.c.bf16 %v1638_v2, %v1637_v5 }
 0x23c   : > { %v1985_v40 = vpack.c.bf16 %v1981_v0, %v1980_v29  ;;  %vm4001_vm6 = vmmov %vm3986_vm0 }
 0x23d   : > { %vm4002_vm8 = vmmov %vm3986_vm0 }
 0x23e   : > { %2855 = vmatpush3.bf16.msra.mxu0 %v2934_v30  ;;  %vm4006_vm4 = vmmov %vm3986_vm0 }
 0x23f   : > { %vm4020_vm7 = vmmov %vm3986_vm0 }
 0x240   : > { %2797 = vmatmul.mubr.msk.bf16.vlgmr.msra.gmra.mxu1 %vm3986_vm0, %v1381_v7  ;;  %2837 = vmatmul.mubr.msk.bf16.gmra.mxu0 %vm3987_vm2, %v1758_v13  ;;  %vm4003_vm2 = vmmov %vm3986_vm0 }
 0x241   : > { %2817 = vmatpush3.bf16.msra.mxu1 %v2931_v26  ;;  %2800 = vmatprep.mubr.msk.bf16.mxu1 %vm3988_vm1, %v1382_v35  ;;  %v1378_v26 = vsel %vm3561_vm9, %v3389_v14, 0.0  ;;  %v1979_v14 = vsel %vm3991_vm10, %v3437_v48, 0.0  ;;  %vm3992_vm9 = vmmov %vm3986_vm0  ;;  %v3748_v48 = vld [vmem:[%s3911_s8] sm:$0xff] }
 0x242   : > { %2856 = vmatprep.mubr.msk.bf16.mxu0 %vm3989_vm3, %v1982_v36  ;;  %2818 = vmatprep.subr.bf16.mxu1 %v2933_v16  ;;  %v1383_v8 = vpack.c.bf16 %v1379_v23, %v1378_v26  ;;  %v1984_v50 = vpack.c.bf16 %v1979_v14, %v1978_v55  ;;  %vm4004_vm1 = vmmov %vm3986_vm0  ;;  %4012 = vst [vmem:[#allocation6_spill] sm:$0xff] %v3748_v48 }
 0x243   : > { %vm4005_vm3 = vmmov %vm3986_vm0 }
 0x244   : > { %vm4007_vm10 = vmmov %vm3986_vm0 }
 0x245   : > { %2819 = vmatpush3.bf16.msra.mxu1 %v2933_v16  ;;  %vm4021_vm11 = vmmov %vm3986_vm0 }
 0x246   : > { %2840 = vmatprep.subr.bf16.mxu1 %v2935_v56  ;;  %vm4024_vm14 = vmmov %vm3986_vm0 }
 0x247   : > { %vm4025_vm15 = vmmov %vm3986_vm0 }
 0x248   : > { %2801 = vmatmul.mubr.msk.bf16.gmra.mxu1 %vm3992_vm9, %v1383_v8  ;;  %2857 = vmatmul.mubr.msk.bf16.vlgmr.msra.gmra.mxu0 %vm3993_vm5, %v1983_v11  ;;  %vm4008_vm9 = vmmov 0   ;;  %vm4019_vm5 = vmmov %vm3986_vm0 }
 0x249   : > { %2820 = vmatprep.mubr.msk.bf16.mxu1 %vm3997_vm12, %v1641_v45  ;;  %2860 = vmatprep.mubr.msk.bf16.mxu0 %vm3998_vm13, %v1984_v50  ;;  %vm4022_vm12 = vmmov %vm3986_vm0 }
 0x24a   : > { %vm4023_vm13 = vmmov %vm3986_vm0 }
 0x250   : > { %2821 = vmatmul.mubr.msk.bf16.vlgmr.msra.gmra.mxu1 %vm4001_vm6, %v1642_v42  ;;  %2861 = vmatmul.mubr.msk.bf16.gmra.mxu0 %vm4002_vm8, %v1985_v40  ;;  %vm4026_vm6 = vmmov %vm3986_vm0 }
 0x251   : > { %2841 = vmatpush3.bf16.msra.mxu1 %v2935_v56  ;;  %2824 = vmatprep.mubr.msk.bf16.mxu1 %vm3986_vm0, %v1643_v58  ;;  %vm4027_vm8 = vmmov %vm3986_vm0 }
 0x252   : > { %2842 = vmatprep.subr.bf16.mxu1 %v2936_v19 }
 0x255   : > { %2843 = vmatpush3.bf16.msra.mxu1 %v2936_v19 }
 0x256   : > { %2864 = vmatprep.subr.mxu1 %v3931_v18 }
 0x258   : > { %2825 = vmatmul.mubr.msk.bf16.gmra.mxu1 %vm4003_vm2, %v1644_v10  ;;  %vm4028_vm2 = vmmov %vm3986_vm0 }
 0x259   : > { %2844 = vmatprep.mubr.msk.bf16.mxu1 %vm4004_vm1, %v3448_v39  ;;  %vm4029_vm1 = vmmov %vm3986_vm0 }
 0x260   : > { %2845 = vmatmul.mubr.msk.bf16.vlgmr.msra.gmra.mxu1 %vm4005_vm3, %v3465_v51  ;;  %vm4030_vm3 = vmmov %vm3986_vm0 }
 0x261   : > { %2848 = vmatprep.mubr.msk.bf16.mxu1 %vm4006_vm4, %v3614_v46  ;;  %2865 = vmatpush3.msra.mxu1 %v3729_v31  ;;  %vm4031_vm4 = vmmov %vm3986_vm0 }
 0x262   : > { %2866 = vmatprep.subr.mxu1 %v3931_v18 }
 0x263   : > { %2867 = vmatpush3.msra.mxu1 %v3734_v33 }
 0x264   : > { %2868 = vmatprep.subr.mxu1 %v3931_v18 }
 0x265   : > { %2869 = vmatpush3.msra.mxu1 %v3741_v15 }
 0x266   : > { %2870 = vmatprep.subr.mxu1 %v3931_v18 }
 0x267   : > { %2871 = vmatpush3.msra.mxu1 %v3748_v48 }
 0x268   : > { %2849 = vmatmul.mubr.msk.bf16.gmra.mxu1 %vm4007_vm10, %v3629_v44  ;;  %2875 = vmatprep.subr.mxu1 %v3931_v18  ;;  %vm4032_vm10 = vmmov %vm3986_vm0 }
 0x269   : > { %2872 = vmatprep.mubr.msk.f32.mxu1 %vm4008_vm9, %v3931_v18 }
 0x2d6   : > { %v2786_v39 = vpop.f32.mrf.mxu0 }
 0x2d8   : > { %v1333_v51 = vpop.f32.mrf.mxu0 }
 0x2da   : > { %v2787_v59 = vpop.f32.mrf.mxu0 }
 0x2dc   : > { %v3754_v60 = vpop.f32.mrf.mxu0 }
 0x2e0   : > { %v2762_v6 = vpop.f32.mrf.mxu1  ;;  %v3756_v53 = vpop.f32.mrf.mxu0 }
 0x2e2   : > { %v1086_v37 = vpop.f32.mrf.mxu1  ;;  %v3758_v17 = vpop.f32.mrf.mxu0 }
 0x2e4   : > { %v2763_v43 = vpop.f32.mrf.mxu1  ;;  %v3760_v30 = vpop.f32.mrf.mxu0 }
 0x2e6   : > { %v1089_v49 = vpop.f32.mrf.mxu1  ;;  %v3762_v47 = vpop.f32.mrf.mxu0 }
 0x2e8   : > { %v2766_v46 = vpop.f32.mrf.mxu1  ;;  %v2810_v62 = vpop.f32.mrf.mxu0 }
 0x2ea   : > { %v1102_v32 = vpop.f32.mrf.mxu1  ;;  %v1590_v25 = vpop.f32.mrf.mxu0 }
 0x2ec   : > { %v2767_v22 = vpop.f32.mrf.mxu1  ;;  %v3764_v21 = vpop.f32.mrf.mxu0 }
 0x2ee   : > { %v1105_v44 = vpop.f32.mrf.mxu1  ;;  %v3766_v27 = vpop.f32.mrf.mxu0 }
 0x2f0   : > { %v2774_v28 = vpop.f32.mrf.mxu1  ;;  %v3768_v63 = vpop.f32.mrf.mxu0 }
 0x2f1   : > { %v1184_v0 = vadd.f32 %v2774_v28, %v2762_v6 }
 0x2f2   : > { %v1175_v52 = vpop.f32.mrf.mxu1  ;;  %v3770_v7 = vpop.f32.mrf.mxu0 }
 0x2f3   : > { %v1176_v5 = vadd.f32 %v1175_v52, %v1086_v37  ;;  %v1366_v58 = vadd.f32 %v2786_v39, %v1184_v0 }
 0x2f4   : > { %v2775_v13 = vpop.f32.mrf.mxu1  ;;  %v3772_v16 = vpop.f32.mrf.mxu0 }
 0x2f5   : > { %v1187_v40 = vadd.f32 %v2775_v13, %v2763_v43  ;;  %v1364_v3 = vadd.f32 %v1333_v51, %v1176_v5 }
 0x2f6   : > { %v1178_v35 = vpop.f32.mrf.mxu1  ;;  %v3774_v36 = vpop.f32.mrf.mxu0 }
 0x2f7   : > { %v1179_v10 = vadd.f32 %v1178_v35, %v1089_v49  ;;  %v1367_v15 = vadd.f32 %v2787_v59, %v1187_v40 }
 0x2f8   : > { %v2778_v38 = vpop.f32.mrf.mxu1  ;;  %v2834_v56 = vpop.f32.mrf.mxu0 }
 0x2f9   : > { %v1365_v6 = vadd.f32 %v3754_v60, %v1179_v10 }
 0x2fa   : > { %v1191_v1 = vpop.f32.mrf.mxu1  ;;  %v1822_v9 = vpop.f32.mrf.mxu0 }
 0x2fb   : > { %v1192_v31 = vadd.f32 %v1191_v1, %v1102_v32 }
 0x2fc   : > { %v2779_v26 = vpop.f32.mrf.mxu1  ;;  %v3776_v23 = vpop.f32.mrf.mxu0 }
 0x2fd   : > { %v1203_v28 = vadd.f32 %v2779_v26, %v2767_v22  ;;  %v1368_v49 = vadd.f32 %v3758_v17, %v1192_v31 }
 0x2fe   : > { %v1194_v34 = vpop.f32.mrf.mxu1  ;;  %v3778_v55 = vpop.f32.mrf.mxu0 }
 0x2ff   : > { %v1195_v51 = vadd.f32 %v1194_v34, %v1105_v44  ;;  %v1371_v60 = vadd.f32 %v3760_v30, %v1203_v28 }
 0x300   : > { %v2798_v12 = vpop.f32.mrf.mxu1  ;;  %v3780_v8 = vpop.f32.mrf.mxu0 }
 0x301   : > { %4013 = vst [vmem:[#allocation7_spill] sm:$0xff] %v3780_v8  ;;  %v1480_v54 = vadd.f32 %v2798_v12, %v1366_v58  ;;  %v1200_v8 = vadd.f32 %v2778_v38, %v2766_v46 }
 0x302   : > { %v1447_v14 = vpop.f32.mrf.mxu1  ;;  %v3782_v61 = vpop.f32.mrf.mxu0 }
 0x303   : > { %4014 = vst [vmem:[#allocation8_spill] sm:$0xff] %v3782_v61  ;;  %v1478_v48 = vadd.f32 %v1447_v14, %v1364_v3  ;;  %v1623_v52 = vadd.f32 %v2810_v62, %v1480_v54  ;;  %v1370_v59 = vadd.f32 %v3756_v53, %v1200_v8 }
 0x304   : > { %v2799_v11 = vpop.f32.mrf.mxu1  ;;  %v3784_v20 = vpop.f32.mrf.mxu0 }
 0x305   : > { %4015 = vst [vmem:[#allocation9_spill] sm:$0xff] %v3784_v20  ;;  %v1481_v61 = vadd.f32 %v2799_v11, %v1367_v15  ;;  %v1621_v43 = vadd.f32 %v1590_v25, %v1478_v48  ;;  %v1369_v25 = vadd.f32 %v3762_v47, %v1195_v51 }
 0x306   : > { %v1450_v45 = vpop.f32.mrf.mxu1  ;;  %v3786_v2 = vpop.f32.mrf.mxu0 }
 0x307   : > { %v1479_v13 = vadd.f32 %v1450_v45, %v1365_v6  ;;  %v1624_v32 = vadd.f32 %v3764_v21, %v1481_v61 }
 0x308   : > { %v2802_v50 = vpop.f32.mrf.mxu1  ;;  %v2858_v4 = vpop.f32.mrf.mxu0 }
 0x309   : > { %v1484_v38 = vadd.f32 %v2802_v50, %v1370_v59  ;;  %v1622_v54 = vadd.f32 %v3766_v27, %v1479_v13 }
 0x30a   : > { %v1463_v24 = vpop.f32.mrf.mxu1  ;;  %v2049_v20 = vpop.f32.mrf.mxu0  ;;  %v4016_v5 = vld [vmem:[#allocation8_spill] sm:$0xff] }
 0x30b   : > { %v1482_v15 = vadd.f32 %v1463_v24, %v1368_v49  ;;  %v1627_v30 = vadd.f32 %v3768_v63, %v1484_v38 }
 0x30c   : > { %v2803_v41 = vpop.f32.mrf.mxu1  ;;  %v2859_v12 = vpop.f32.mrf.mxu0  ;;  %v4018_v3 = vld [vmem:[#allocation9_spill] sm:$0xff] }
 0x30d   : > { %v1485_v62 = vadd.f32 %v2803_v41, %v1371_v60  ;;  %v1625_v21 = vadd.f32 %v3770_v7, %v1482_v15 }
 0x30e   : > { %v1466_v57 = vpop.f32.mrf.mxu1  ;;  %v2052_v31 = vpop.f32.mrf.mxu0 }
 0x30f   : > { %v1483_v53 = vadd.f32 %v1466_v57, %v1369_v25  ;;  %v1628_v61 = vadd.f32 %v3772_v16, %v1485_v62 }
 0x310   : > { %v2822_v29 = vpop.f32.mrf.mxu1  ;;  %v2862_v27 = vpop.f32.mrf.mxu0 }
 0x311   : > { %v1741_v35 = vadd.f32 %v2822_v29, %v1623_v52  ;;  %v1626_v7 = vadd.f32 %v3774_v36, %v1483_v53 }
 0x312   : > { %v1708_v42 = vpop.f32.mrf.mxu1 }
 0x313   : > { %v1739_v14 = vadd.f32 %v1708_v42, %v1621_v43  ;;  %v1855_v17 = vadd.f32 %v2834_v56, %v1741_v35 }
 0x314   : > { %v2823_v19 = vpop.f32.mrf.mxu1 }
 0x315   : > { %v1742_v22 = vadd.f32 %v2823_v19, %v1624_v32  ;;  %v1853_v44 = vadd.f32 %v1822_v9, %v1739_v14 }
 0x316   : > { %v1711_v18 = vpop.f32.mrf.mxu1 }
 0x317   : > { %v1740_v1 = vadd.f32 %v1711_v18, %v1622_v54  ;;  %v1856_v8 = vadd.f32 %v3776_v23, %v1742_v22  ;;  %v2065_v23 = vpop.f32.mrf.mxu0 }
 0x318   : > { %v2826_v33 = vpop.f32.mrf.mxu1 }
 0x319   : > { %v1745_v47 = vadd.f32 %v2826_v33, %v1627_v30  ;;  %v1854_v18 = vadd.f32 %v3778_v55, %v1740_v1  ;;  %v4017_v55 = vld [vmem:[#allocation7_spill] sm:$0xff]  ;;  %v2863_v43 = vpop.f32.mrf.mxu0 }
 0x31a   : > { %v1724_v37 = vpop.f32.mrf.mxu1 }
 0x31b   : > { %v1743_v50 = vadd.f32 %v1724_v37, %v1625_v21  ;;  %v1859_v40 = vadd.f32 %v4017_v55, %v1745_v47 }
 0x31c   : > { %v2827_v39 = vpop.f32.mrf.mxu1 }
 0x31d   : > { %v1746_v41 = vadd.f32 %v2827_v39, %v1628_v61  ;;  %v1857_v42 = vadd.f32 %v4016_v5, %v1743_v50 }
 0x31e   : > { %v1727_v46 = vpop.f32.mrf.mxu1 }
 0x31f   : > { %v1744_v0 = vadd.f32 %v1727_v46, %v1626_v7 }
 0x320   : > { %v2846_v48 = vpop.f32.mrf.mxu1 }
 0x321   : > { %v1966_v34 = vadd.f32 %v2846_v48, %v1855_v17  ;;  %v1858_v49 = vadd.f32 %v3786_v2, %v1744_v0  ;;  %v2068_v48 = vpop.f32.mrf.mxu0 }
 0x322   : > { %v1933_v26 = vpop.f32.mrf.mxu1 }
 0x323   : > { %v1964_v11 = vadd.f32 %v1933_v26, %v1853_v44  ;;  %v3803_v57 = vadd.f32 %v2858_v4, %v1966_v34  ;;  %v1860_v4 = vadd.f32 %v4018_v3, %v1746_v41  ;;  %v4035_v3 = vld [vmem:[#allocation3_spill] sm:$0xff] }
 0x324   : > { %v2847_v45 = vpop.f32.mrf.mxu1 }
 0x325   : > { %v3799_v24 = vadd.f32 %v2049_v20, %v1964_v11  ;;  %v1967_v56 = vadd.f32 %v2847_v45, %v1856_v8  ;;  %v2117_v36 = vmul.f32 %v3803_v57, %v3803_v57  ;;  %v2097_v13 = vsel %vm4021_vm11, %v3803_v57, 0.0  ;;  %vm4040_vm11 = vmmov %vm3986_vm0 }
 0x326   : > { %v1936_v9 = vpop.f32.mrf.mxu1 }
 0x327   : > { %v1965_v63 = vadd.f32 %v1936_v9, %v1854_v18  ;;  %v2115_v33 = vmul.f32 %v3799_v24, %v3799_v24  ;;  %v3808_v16 = vadd.f32 %v2859_v12, %v1967_v56  ;;  %v2094_v10 = vsel %vm4019_vm5, %v3799_v24, 0.0  ;;  %vm4033_vm5 = vmmov %vm3986_vm0 }
 0x328   : > { %v2850_v29 = vpop.f32.mrf.mxu1  ;;  %v2126_v46 = vsel %vm4024_vm14, %v2117_v36, 0.0 }
 0x329   : > { %v3810_v20 = vadd.f32 %v2052_v31, %v1965_v63  ;;  %v1970_v28 = vadd.f32 %v2850_v29, %v1859_v40  ;;  %v2123_v35 = vsel %vm4022_vm12, %v2115_v33, 0.0  ;;  %v2118_v12 = vmul.f32 %v3808_v16, %v3808_v16 }
 0x32a   : > { %v1949_v19 = vpop.f32.mrf.mxu1  ;;  %v2099_v38 = vsel %vm4025_vm15, %v3808_v16, 0.0 }
 0x32b   : > { %v1968_v58 = vadd.f32 %v1949_v19, %v1857_v42  ;;  %v2095_v6 = vsel %vm4020_vm7, %v3810_v20, 0.0  ;;  %v2116_v37 = vmul.f32 %v3810_v20, %v3810_v20  ;;  %v3834_v22 = vadd.f32 %v2862_v27, %v1970_v28  ;;  %vm4034_vm7 = vmmov %vm3986_vm0 }
 0x32c   : > { %v2851_v52 = vpop.f32.mrf.mxu1  ;;  %v2096_v39 = vadd.f32 %v2095_v6, %v2094_v10  ;;  %v2128_v31 = vsel %vm4026_vm6, %v2118_v12, 0.0  ;;  %v4037_v6 = vld [vmem:[#allocation4_spill] sm:$0xff] }
 0x32d   : > { %v3824_v51 = vadd.f32 %v2065_v23, %v1968_v58  ;;  %v2124_v14 = vsel %vm4023_vm13, %v2116_v37, 0.0  ;;  %v1971_v59 = vadd.f32 %v2851_v52, %v1860_v4  ;;  %v2121_v21 = vmul.f32 %v3834_v22, %v3834_v22  ;;  %v4038_v37 = vld [vmem:[#allocation5_spill] sm:$0xff]  ;;  %v4039_v52 = vld [vmem:[#allocation6_spill] sm:$0xff] }
 0x32e   : > { %v1952_v32 = vpop.f32.mrf.mxu1  ;;  %v2098_v15 = vadd.f32 %v2097_v13, %v2096_v39  ;;  %v2125_v60 = vadd.f32 %v2124_v14, %v2123_v35  ;;  %v2105_v27 = vsel %vm4029_vm1, %v3834_v22, 0.0  ;;  %v4036_v4 = vmov 0.0  }
 0x32f   : > { %v2119_v2 = vmul.f32 %v3824_v51, %v3824_v51  ;;  %v1969_v54 = vadd.f32 %v1952_v32, %v1858_v49  ;;  %v2101_v17 = vsel %vm4027_vm8, %v3824_v51, 0.0  ;;  %v3841_v44 = vadd.f32 %v2863_v43, %v1971_v59 }
 0x330   : > { %v2127_v62 = vadd.f32 %v2126_v46, %v2125_v60  ;;  %v2100_v25 = vadd.f32 %v2099_v38, %v2098_v15  ;;  %v2134_v18 = vsel %vm4031_vm4, %v2121_v21, 0.0  ;;  %v2361_v46 = vpop.permute.xlu1 %2360  ;;  %v2357_v15 = vpop.permute.xlu0 %2356  ;;  %v4041_v60 = vld [vmem:[#allocation2_spill] sm:$0xff] }
 0x331   : > { %v3843_v1 = vadd.f32 %v2068_v48, %v1969_v54  ;;  %v2130_v34 = vsel %vm3986_vm0, %v2119_v2, 0.0  ;;  %v2122_v50 = vmul.f32 %v3841_v44, %v3841_v44  ;;  %v2107_v9 = vsel %vm4032_vm10, %v3841_v44, 0.0 }
 0x332   : > { %v2102_v26 = vadd.f32 %v2101_v17, %v2100_v25  ;;  %v2129_v53 = vadd.f32 %v2128_v31, %v2127_v62 }
 0x333   : > { %v2103_v11 = vsel %vm4028_vm2, %v3843_v1, 0.0  ;;  %v2120_v30 = vmul.f32 %v3843_v1, %v3843_v1  ;;  %v2136_v63 = vsel %vm4033_vm5, %v2122_v50, 0.0 }
 0x334   : > { %v2131_v8 = vadd.f32 %v2130_v34, %v2129_v53  ;;  %v2104_v45 = vadd.f32 %v2103_v11, %v2102_v26  ;;  %v2363_v2 = vpop.permute.xlu1 %2362  ;;  %v2359_v54 = vpop.permute.xlu0 %2358 }
 0x335   : > { %v2132_v61 = vsel %vm4030_vm3, %v2120_v30, 0.0 }
 0x336   : > { %v2106_v47 = vadd.f32 %v2105_v27, %v2104_v45  ;;  %v2133_v56 = vadd.f32 %v2132_v61, %v2131_v8 }
 0x338   : > { %v2108_v41 = vadd.f32 %v2107_v9, %v2106_v47  ;;  %v2135_v7 = vadd.f32 %v2134_v18, %v2133_v56  ;;  %v2367_v30 = vpop.permute.xlu1 %2366 }
 0x33a   : > { %v2109_v29 = vrot.slane %v2108_v41, 4  ;;  %v2137_v23 = vadd.f32 %v2136_v63, %v2135_v7 }
 0x33c   : > { %v2110_v0 = vadd.f32 %v2109_v29, %v2108_v41  ;;  %v2138_v5 = vrot.slane %v2137_v23, 4 }
 0x33e   : > { %v2111_v42 = vrot.slane %v2110_v0, 2  ;;  %v2139_v33 = vadd.f32 %v2138_v5, %v2137_v23 }
 0x340   : > { %v2112_v55 = vadd.f32 %v2111_v42, %v2110_v0  ;;  %v2140_v40 = vrot.slane %v2139_v33, 2 }
 0x342   : > { %v2113_v19 = vrot.slane %v2112_v55, 1  ;;  %v2141_v58 = vadd.f32 %v2140_v40, %v2139_v33  ;;  %v2371_v40 = vpop.permute.xlu1 %2370 }
 0x344   : > { %v2114_v36 = vadd.f32 %v2113_v19, %v2112_v55  ;;  %v2142_v10 = vrot.slane %v2141_v58, 1 }
 0x346   : > { %2873 = vmatmul.mubr.msk.f32.vlgmr.msra.gmra.mxu1 %vm4034_vm7, %v2114_v36  ;;  %v2143_v28 = vadd.f32 %v2142_v10, %v2141_v58 }
 0x347   : > { %2876 = vmatpush3.msra.mxu1 %v4035_v3  ;;  %2883 = vmatprep.mubr.msk.f32.mxu1 %vm4008_vm9, %v4036_v4  ;;  %vm2428_vm9 = vcmask 257024  }
 0x348   : > { %2877 = vmatprep.subr.mxu1 %v4036_v4 }
 0x349   : > { %2878 = vmatpush3.msra.mxu1 %v4037_v6 }
 0x34a   : > { %2879 = vmatprep.subr.mxu1 %v4036_v4 }
 0x34b   : > { %2880 = vmatpush3.msra.mxu1 %v4038_v37 }
 0x34c   : > { %2881 = vmatprep.subr.mxu1 %v4036_v4 }
 0x34d   : > { %2882 = vmatpush3.msra.mxu1 %v4039_v52 }
 0x34e   : > { %2884 = vmatmul.mubr.msk.f32.vlgmr.msra.gmra.mxu1 %vm4040_vm11, %v2143_v28 }
 0x406   : > { %v2213_v43 = vpop.f32.mrf.mxu1 }
 0x407   : > { %v2217_v39 = vmul.f32 0.001953125, %v2213_v43 }
 0x408   : > { %v2874_v13 = vpop.f32.mrf.mxu1 }
 0x409   : > { %v2292_v35 = vmul.f32 %v2217_v39, %v2217_v39  ;;  %v2299_v38 = vrot.slane %v2217_v39, %v4041_v60 }
 0x40b   : > { %v2300_v62 = vsub.f32 %v3799_v24, %v2299_v38  ;;  %v2301_v25 = vsub.f32 %v3810_v20, %v2299_v38  ;;  %v2302_v31 = vsub.f32 %v3803_v57, %v2299_v38  ;;  %v2303_v17 = vsub.f32 %v3808_v16, %v2299_v38  ;;  %v2614_v24 = vld [vmem:[%s3909_s6] ss:$0 sm:$0xff]  ;;  %v2365_v20 = vpop.permute.xlu0 %2364 }
 0x40c   : > { %v2304_v53 = vsub.f32 %v3824_v51, %v2299_v38  ;;  %v2305_v21 = vsub.f32 %v3843_v1, %v2299_v38  ;;  %v2306_v34 = vsub.f32 %v3834_v22, %v2299_v38  ;;  %v2307_v11 = vsub.f32 %v3841_v44, %v2299_v38  ;;  %v2615_v51 = vld [vmem:[%s3910_s7] ss:$0 sm:$0xff] }
 0x40e   : > { %v2287_v49 = vpop.f32.mrf.mxu1 }
 0x40f   : > { %v2291_v12 = vmul.f32 0.001953125, %v2287_v49  ;;  %v2369_v19 = vpop.permute.xlu0 %2368 }
 0x410   : > { %v2885_v14 = vpop.f32.mrf.mxu1 }
 0x411   : > { %v2293_v59 = vsub.f32 %v2291_v12, %v2292_v35 }
 0x413   : > { %v2294_v32 = vadd.f32 1e-05, %v2293_v59 }
 0x415   : > { %2939 = vrsqrt.f32 %v2294_v32 }
 0x422   : > { %v2940_v48 = vpop.eup %2939 }
 0x423   : > { %v2311_v26 = vrot.slane %v2940_v48, %v4041_v60 }
 0x425   : > { %v2312_v8 = vmul.f32 %v2311_v26, %v2300_v62  ;;  %v2313_v57 = vmul.f32 %v2311_v26, %v2301_v25  ;;  %v2314_v45 = vmul.f32 %v2311_v26, %v2302_v31  ;;  %v2315_v16 = vmul.f32 %v2311_v26, %v2303_v17 }
 0x426   : > { %v2316_v27 = vmul.f32 %v2311_v26, %v2304_v53  ;;  %v2317_v1 = vmul.f32 %v2311_v26, %v2305_v21  ;;  %v2318_v50 = vmul.f32 %v2311_v26, %v2306_v34  ;;  %v2319_v22 = vmul.f32 %v2311_v26, %v2307_v11 }
 0x427   : > { %v2326_v44 = vmul.f32 %v2614_v24, %v2312_v8  ;;  %v2327_v61 = vmul.f32 %v2614_v24, %v2313_v57  ;;  %v2328_v47 = vmul.f32 %v2614_v24, %v2314_v45  ;;  %v2329_v56 = vmul.f32 %v2614_v24, %v2315_v16 }
 0x428   : > { %v2330_v18 = vmul.f32 %v2614_v24, %v2316_v27  ;;  %v2331_v9 = vmul.f32 %v2614_v24, %v2317_v1  ;;  %v2332_v41 = vmul.f32 %v2614_v24, %v2318_v50  ;;  %v2333_v7 = vmul.f32 %v2614_v24, %v2319_v22 }
 0x429   : > { %v2340_v63 = vadd.f32 %v2615_v51, %v2326_v44  ;;  %v2341_v29 = vadd.f32 %v2615_v51, %v2327_v61  ;;  %v2342_v23 = vadd.f32 %v2615_v51, %v2328_v47  ;;  %v2343_v0 = vadd.f32 %v2615_v51, %v2329_v56 }
 0x42a   : > { %v2344_v5 = vadd.f32 %v2615_v51, %v2330_v18  ;;  %v2345_v42 = vadd.f32 %v2615_v51, %v2331_v9  ;;  %v2346_v33 = vadd.f32 %v2615_v51, %v2332_v41  ;;  %v2347_v55 = vadd.f32 %v2615_v51, %v2333_v7 }
 0x42b   : > { %v2380_v36 = vadd.f32 %v2357_v15, %v2340_v63  ;;  %v2381_v58 = vadd.f32 %v2359_v54, %v2341_v29  ;;  %v2382_v3 = vadd.f32 %v2361_v46, %v2342_v23  ;;  %v2383_v4 = vadd.f32 %v2363_v2, %v2343_v0 }
 0x42c   : > { %v2384_v10 = vadd.f32 %v2365_v20, %v2344_v5  ;;  %v2385_v6 = vadd.f32 %v2367_v30, %v2345_v42  ;;  %v2386_v37 = vadd.f32 %v2369_v19, %v2346_v33  ;;  %v2387_v28 = vadd.f32 %v2371_v40, %v2347_v55 }
 0x42d   : > { %v2388_v52 = vmax.f32 %v2380_v36, 0.0  ;;  %v2389_v43 = vmax.f32 %v2381_v58, 0.0  ;;  %v2390_v13 = vmax.f32 %v2382_v3, 0.0  ;;  %v2391_v39 = vmax.f32 %v2383_v4, 0.0 }
 0x42e   : > { %v2392_v49 = vmax.f32 %v2384_v10, 0.0  ;;  %v2393_v35 = vmax.f32 %v2385_v6, 0.0  ;;  %v2394_v12 = vmax.f32 %v2386_v37, 0.0  ;;  %v2395_v14 = vmax.f32 %v2387_v28, 0.0 }
 0x42f   : > { %v2628_v59 = vpack.c.bf16 %v2388_v52, %v2388_v52  ;;  %v2629_v32 = vpack.c.bf16 %v2389_v43, %v2389_v43  ;;  %v2630_v46 = vpack.c.bf16 %v2390_v13, %v2390_v13  ;;  %v2631_v15 = vpack.c.bf16 %v2391_v39, %v2391_v39 }
 0x430   : > { %v2632_v60 = vpack.c.bf16 %v2392_v49, %v2392_v49  ;;  %v2633_v38 = vpack.c.bf16 %v2393_v35, %v2393_v35  ;;  %v2634_v2 = vpack.c.bf16 %v2394_v12, %v2394_v12  ;;  %v2635_v54 = vpack.c.bf16 %v2395_v14, %v2395_v14 }
 0x431   : > { %2429 = vst.msk [vmem:[%s332_s29] sm:$0xf] %vm2428_vm9, %v2628_v59  ;;  %2430 = vst.msk [vmem:[%s332_s29 + $0x4] sm:$0xf] %vm2428_vm9, %v2629_v32 }
 0x432   : > { %2431 = vst.msk [vmem:[%s332_s29 + $0x8] sm:$0xf] %vm2428_vm9, %v2630_v46  ;;  %2432 = vst.msk [vmem:[%s332_s29 + $0xc] sm:$0xf] %vm2428_vm9, %v2631_v15 }
 0x433   : > { %2433 = vst.msk [vmem:[%s332_s29 + $0x10] sm:$0xf] %vm2428_vm9, %v2632_v60  ;;  %2434 = vst.msk [vmem:[%s332_s29 + $0x14] sm:$0xf] %vm2428_vm9, %v2633_v38 }
 0x434   : > { %2435 = vst.msk [vmem:[%s332_s29 + $0x18] sm:$0xf] %vm2428_vm9, %v2634_v2  ;;  %2436 = vst.msk [vmem:[%s332_s29 + $0x1c] sm:$0xf] %vm2428_vm9, %v2635_v54 }
 0x435 PF: > { %s19_s30 = sadd.s32 1, %s2947_s30  }
 0x436   : > { %p16_p4 = scmp.ge.s32.totalorder %s19_s30, 4  }
 0x438   :  { %18 = sbr.rel (!%p16_p4) target bundleno = 1 (0x1), region = 94 }

// kernel: resnet_forward.5
= control target key start
LH: loop header
LB: loop body
LE: loop exit
PB: predicated region body
PF: predicated region fallthrough
CT: control target
= control target key end

     0   :  { %s6705_s30 = smov 0   ;;  %s10125_s0 = inlined_call_operand.vmem [shape: bf16[2,256,144], index: 0, kind: input, shape index: {}]   ;;  %s10126_s1 = inlined_call_operand.vmem [shape: bf16[144,16], index: 1, kind: input, shape index: {}]   ;;  %s10127_s2 = inlined_call_operand.vmem [shape: f32[1,1,16], index: 2, kind: input, shape index: {}]   ;;  %s10128_s3 = inlined_call_operand.vmem [shape: f32[1,1,16], index: 3, kind: input, shape index: {}]   ;;  %s10129_s4 = inlined_call_operand.vmem [shape: f32[16,16], index: 4, kind: input, shape index: {}]   ;;  %s10130_s5 = inlined_call_operand.vmem [shape: bf16[9,16,16], index: 5, kind: input, shape index: {}]   ;;  %s10131_s6 = inlined_call_operand.vmem [shape: f32[1,1,16], index: 6, kind: input, shape index: {}]   ;;  %s10132_s7 = inlined_call_operand.vmem [shape: f32[1,1,16], index: 7, kind: input, shape index: {}]   ;;  %s10133_s8 = inlined_call_operand.vmem [shape: f32[16,16], index: 8, kind: input, shape index: {}]   ;;  %s10134_s9 = inlined_call_operand.vmem [shape: bf16[2,256,16], index: 9, kind: output, shape index: {}]  }
   0x1 LB: > { %s5619_s10 = sadd.s32 4294967295, %s6648_s30   ;;  %p5623_p0 = scmp.ge.s32.totalorder %s6648_s30, 1  ;;  %s6648_s30 = sphi %s6705_s30, %s19_s30  }
   0x2   : > { %p287_p1 = scmp.lt.s32.totalorder %s6648_s30, 3 }
   0x4   : > { %p288_p2 = pnand %p5623_p0, %p287_p1 }
   0x6   : > { %291 = sbr.rel (%p288_p2) target bundleno = 1546 (0x60a), region = 56 }
   0xb   : > { %v6523_v0 = vld [vmem:[%s10126_s1 + $0x38] sm:$0xff]   ;;  %v6650_v1 = vmov 0   ;;  %p323_p3 = scmp.lt.s32.totalorder %s5619_s10, 1  ;;  %v6524_v2 = vld [vmem:[%s10126_s1 + $0x30] sm:$0xff]   ;;  %v6525_v3 = vld [vmem:[%s10126_s1 + $0x28] sm:$0xff]   ;;  %vm10199_vm0 = vcmask 130048  }
   0xc   : > { %631 = vmatprep.subr.bf16.mxu0 %v6650_v1  ;;  %v6526_v6 = vld [vmem:[%s10126_s1 + $0x20] sm:$0xff]   ;;  %v6527_v8 = vld [vmem:[%s10126_s1 + $0x18] sm:$0xff]   ;;  %v6528_v9 = vld [vmem:[%s10126_s1 + $0x10] sm:$0xff]   ;;  %vm10187_vm1 = vmmov 0   ;;  %vm1362_vm2 = vcmask 1040384   ;;  %s6654_s27 = smov 64  }
   0xd   : > { %632 = vmatpush1.bf16.msra.mxu0 %v6523_v0  ;;  %s11020_s10 = smov (!%p323_p3, %s5619_s10), 1  ;;  %v6529_v10 = vld [vmem:[%s10126_s1 + $0x8] sm:$0xff]   ;;  %v6530_v11 = vld [vmem:[%s10126_s1] sm:$0xff]   ;;  %vm10192_vm4 = vsmask.f32 7424 }
   0xe   : > { %633 = vmatprep.subr.bf16.mxu0 %v6650_v1  ;;  %s5895_s15 = sshll.u32 %s11020_s10, 8  ;;  %v6531_v12 = vld [vmem:[%s10126_s1 + $0x40] sm:$0xff]   ;;  %s5896_s14 = sshll.u32 %s11020_s10, 7 }
   0xf   : > { %s6730_s20 = scalar_lea.vmem %s10125_s0, %s5895_s15  ;;  %s9888_s16 = scalar_lea.vmem %s10134_s9, %s5896_s14 }
  0x10   : > { %v334_v4 = vld [vmem:[%s6730_s20] sm:$0xff]  ;;  %v335_v5 = vld [vmem:[%s6730_s20 + $0x8] sm:$0xff]  ;;  %v336_v13 = vld [vmem:[%s6730_s20 + $0x10] sm:$0xff] }
  0x11   : > { %634 = vmatpush1.bf16.msra.mxu0 %v6524_v2  ;;  %v5629_v7 = vcombine.high %v334_v4, %v335_v5  ;;  %v337_v14 = vld [vmem:[%s6730_s20 + $0x18] sm:$0xff]  ;;  %v5628_v15 = vcombine.low %v334_v4, %v335_v5  ;;  %v338_v17 = vld [vmem:[%s6730_s20 + $0x20] sm:$0xff]  ;;  %v339_v18 = vld [vmem:[%s6730_s20 + $0x28] sm:$0xff] }
  0x12   : > { %635 = vmatprep.subr.bf16.mxu0 %v6650_v1  ;;  %v5631_v16 = vcombine.high %v336_v13, %v337_v14  ;;  %v5630_v19 = vcombine.low %v336_v13, %v337_v14  ;;  %v5633_v20 = vcombine.high %v338_v17, %v339_v18  ;;  %v340_v21 = vld [vmem:[%s6730_s20 + $0x30] sm:$0xff]  ;;  %v341_v22 = vld [vmem:[%s6730_s20 + $0x38] sm:$0xff]  ;;  %v5632_v23 = vcombine.low %v338_v17, %v339_v18  ;;  %v342_v25 = vld [vmem:[%s6730_s20 + $0x40] sm:$0xff] }
  0x13   : > { %5669 = vmatprep.mubr.msk.bf16.mxu0 %vm10199_vm0, %v5629_v7  ;;  %v5635_v24 = vcombine.high %v340_v21, %v341_v22  ;;  %v343_v26 = vld [vmem:[%s6730_s20 + $0x48] sm:$0xff]  ;;  %v5634_v27 = vcombine.low %v340_v21, %v341_v22  ;;  %v344_v29 = vld [vmem:[%s6730_s20 + $0x50] sm:$0xff]  ;;  %v345_v30 = vld [vmem:[%s6730_s20 + $0x58] sm:$0xff] }
  0x14   : > { %v5637_v28 = vcombine.high %v342_v25, %v343_v26  ;;  %v5636_v31 = vcombine.low %v342_v25, %v343_v26  ;;  %v5639_v32 = vcombine.high %v344_v29, %v345_v30  ;;  %v346_v33 = vld [vmem:[%s6730_s20 + $0x60] sm:$0xff]  ;;  %v347_v34 = vld [vmem:[%s6730_s20 + $0x68] sm:$0xff]  ;;  %v5638_v35 = vcombine.low %v344_v29, %v345_v30  ;;  %v348_v37 = vld [vmem:[%s6730_s20 + $0x70] sm:$0xff] }
  0x15   : > { %636 = vmatpush1.bf16.msra.mxu0 %v6525_v3  ;;  %v5641_v36 = vcombine.high %v346_v33, %v347_v34  ;;  %v349_v38 = vld [vmem:[%s6730_s20 + $0x78] sm:$0xff]  ;;  %v5640_v39 = vcombine.low %v346_v33, %v347_v34  ;;  %v350_v41 = vld [vmem:[%s6730_s20 + $0x80] sm:$0xff]  ;;  %v351_v42 = vld [vmem:[%s6730_s20 + $0x88] sm:$0xff] }
  0x16   : > { %637 = vmatprep.subr.bf16.mxu0 %v6650_v1  ;;  %v5643_v40 = vcombine.high %v348_v37, %v349_v38  ;;  %v5642_v43 = vcombine.low %v348_v37, %v349_v38  ;;  %v5645_v44 = vcombine.high %v350_v41, %v351_v42  ;;  %v352_v45 = vld [vmem:[%s6730_s20 + $0x90] sm:$0xff]  ;;  %v353_v46 = vld [vmem:[%s6730_s20 + $0x98] sm:$0xff]  ;;  %v5644_v47 = vcombine.low %v350_v41, %v351_v42  ;;  %v354_v49 = vld [vmem:[%s6730_s20 + $0xa0] sm:$0xff] }
  0x17   : > { %v5647_v48 = vcombine.high %v352_v45, %v353_v46  ;;  %v355_v50 = vld [vmem:[%s6730_s20 + $0xa8] sm:$0xff]  ;;  %v5646_v51 = vcombine.low %v352_v45, %v353_v46  ;;  %v356_v53 = vld [vmem:[%s6730_s20 + $0xb0] sm:$0xff]  ;;  %v357_v54 = vld [vmem:[%s6730_s20 + $0xb8] sm:$0xff] }
  0x18   : > { %v5649_v52 = vcombine.high %v354_v49, %v355_v50  ;;  %v5648_v55 = vcombine.low %v354_v49, %v355_v50  ;;  %v5651_v56 = vcombine.high %v356_v53, %v357_v54  ;;  %v358_v57 = vld [vmem:[%s6730_s20 + $0xc0] sm:$0xff]  ;;  %v359_v58 = vld [vmem:[%s6730_s20 + $0xc8] sm:$0xff]  ;;  %v5650_v59 = vcombine.low %v356_v53, %v357_v54  ;;  %v360_v61 = vld [vmem:[%s6730_s20 + $0xd0] sm:$0xff] }
  0x19   : > { %638 = vmatpush1.bf16.msra.mxu0 %v6526_v6  ;;  %v5653_v60 = vcombine.high %v358_v57, %v359_v58  ;;  %v361_v62 = vld [vmem:[%s6730_s20 + $0xd8] sm:$0xff]  ;;  %v5652_v63 = vcombine.low %v358_v57, %v359_v58  ;;  %v362_v2 = vld [vmem:[%s6730_s20 + $0xe0] sm:$0xff]  ;;  %v363_v3 = vld [vmem:[%s6730_s20 + $0xe8] sm:$0xff] }
  0x1a   : > { %639 = vmatprep.subr.bf16.mxu0 %v6650_v1  ;;  %v5655_v0 = vcombine.high %v360_v61, %v361_v62  ;;  %v5654_v4 = vcombine.low %v360_v61, %v361_v62  ;;  %v5657_v5 = vcombine.high %v362_v2, %v363_v3  ;;  %v364_v6 = vld [vmem:[%s6730_s20 + $0xf0] sm:$0xff]  ;;  %v365_v7 = vld [vmem:[%s6730_s20 + $0xf8] sm:$0xff]  ;;  %v6815_v17 = vld [vmem:[%s10129_s4 + $0x8] sm:$0xff] }
  0x1d   : > { %640 = vmatpush1.bf16.msra.mxu0 %v6527_v8  ;;  %v5656_v8 = vcombine.low %v362_v2, %v363_v3 }
  0x1e   : > { %641 = vmatprep.subr.bf16.mxu0 %v6650_v1 }
  0x21   : > { %642 = vmatpush1.bf16.msra.mxu0 %v6528_v9  ;;  %v5659_v9 = vcombine.high %v364_v6, %v365_v7 }
  0x22   : > { %643 = vmatprep.subr.bf16.mxu0 %v6650_v1 }
  0x25   : > { %644 = vmatpush1.bf16.msra.mxu0 %v6529_v10  ;;  %v5658_v10 = vcombine.low %v364_v6, %v365_v7 }
  0x26   : > { %645 = vmatprep.subr.bf16.mxu0 %v6650_v1 }
  0x29   : > { %646 = vmatpush1.bf16.msra.mxu0 %v6530_v11 }
  0x2a   : > { %661 = vmatprep.subr.bf16.mxu0 %v6650_v1 }
  0x2d   : > { %662 = vmatpush2.bf16.msra.mxu0 %v6531_v12 }
  0x30   : > { %664 = vmatmul.mubr.bf16.vlgmr.msra.gmra.mxu0 %v5628_v15 }
  0x31   : > { %5670 = vmatprep.mubr.msk.bf16.mxu0 %vm10199_vm0, %v5631_v16  ;;  %v10135_v16 = vmov 0.0  }
  0x32   : > { %6094 = vmatprep.subr.mxu1 %v10135_v16  ;;  %6098 = vmatprep.mubr.msk.f32.mxu1 %vm10187_vm1, %v10135_v16 }
  0x33   : > { %6095 = vmatpush3.msra.mxu1 %v6815_v17 }
  0x34   : > { %6096 = vmatprep.subr.mxu1 %v10135_v16 }
  0x38   : > { %672 = vmatmul.mubr.bf16.gmra.mxu0 %v5630_v19  ;;  %v6822_v19 = vld [vmem:[%s10129_s4] sm:$0xff] }
  0x39   : > { %5671 = vmatprep.mubr.msk.bf16.mxu0 %vm10199_vm0, %v5633_v20  ;;  %6097 = vmatpush3.msra.mxu1 %v6822_v19 }
  0x3a   : > { %6101 = vmatprep.subr.mxu1 %v10135_v16 }
  0x40   : > { %680 = vmatmul.mubr.bf16.gmra.mxu0 %v5632_v23 }
  0x41   : > { %5672 = vmatprep.mubr.msk.bf16.mxu0 %vm10199_vm0, %v5635_v24 }
  0x48   : > { %688 = vmatmul.mubr.bf16.gmra.mxu0 %v5634_v27 }
  0x49   : > { %5673 = vmatprep.mubr.msk.bf16.mxu0 %vm10199_vm0, %v5637_v28 }
  0x50   : > { %696 = vmatmul.mubr.bf16.gmra.mxu0 %v5636_v31 }
  0x51   : > { %5674 = vmatprep.mubr.msk.bf16.mxu0 %vm10199_vm0, %v5639_v32 }
  0x58   : > { %704 = vmatmul.mubr.bf16.gmra.mxu0 %v5638_v35 }
  0x59   : > { %5675 = vmatprep.mubr.msk.bf16.mxu0 %vm10199_vm0, %v5641_v36 }
  0x60   : > { %712 = vmatmul.mubr.bf16.gmra.mxu0 %v5640_v39 }
  0x61   : > { %5676 = vmatprep.mubr.msk.bf16.mxu0 %vm10199_vm0, %v5643_v40 }
  0x68   : > { %720 = vmatmul.mubr.bf16.gmra.mxu0 %v5642_v43 }
  0x69   : > { %5677 = vmatprep.mubr.msk.bf16.mxu0 %vm10199_vm0, %v5645_v44 }
  0x70   : > { %728 = vmatmul.mubr.bf16.gmra.mxu0 %v5644_v47 }
  0x71   : > { %5678 = vmatprep.mubr.msk.bf16.mxu0 %vm10199_vm0, %v5647_v48 }
  0x78   : > { %736 = vmatmul.mubr.bf16.gmra.mxu0 %v5646_v51 }
  0x79   : > { %5679 = vmatprep.mubr.msk.bf16.mxu0 %vm10199_vm0, %v5649_v52 }
  0x80   : > { %744 = vmatmul.mubr.bf16.gmra.mxu0 %v5648_v55 }
  0x81   : > { %5680 = vmatprep.mubr.msk.bf16.mxu0 %vm10199_vm0, %v5651_v56 }
  0x88   : > { %752 = vmatmul.mubr.bf16.gmra.mxu0 %v5650_v59 }
  0x89   : > { %5681 = vmatprep.mubr.msk.bf16.mxu0 %vm10199_vm0, %v5653_v60 }
  0x90   : > { %760 = vmatmul.mubr.bf16.gmra.mxu0 %v5652_v63 }
  0x91   : > { %5682 = vmatprep.mubr.msk.bf16.mxu0 %vm10199_vm0, %v5655_v0 }
  0x98   : > { %768 = vmatmul.mubr.bf16.gmra.mxu0 %v5654_v4 }
  0x99   : > { %5683 = vmatprep.mubr.msk.bf16.mxu0 %vm10199_vm0, %v5657_v5 }
  0xa0   : > { %776 = vmatmul.mubr.bf16.gmra.mxu0 %v5656_v8 }
  0xa1   : > { %5684 = vmatprep.mubr.msk.bf16.mxu0 %vm10199_vm0, %v5659_v9 }
  0xa8   : > { %784 = vmatmul.mubr.bf16.gmra.mxu0 %v5658_v10 }
  0xf0   : > { %v6805_v11 = vpop.f32.mrf.mxu0 }
  0xf1   : > { %v865_v47 = vmul.f32 %v6805_v11, %v6805_v11  ;;  %v796_v51 = vsel %vm10199_vm0, %v6805_v11, 0.0 }
  0xf2   : > { %v667_v12 = vpop.f32.mrf.mxu0 }
  0xf3   : > { %v897_v57 = vsel %vm10199_vm0, %v865_v47, 0.0 }
  0xf4   : > { %v6807_v13 = vpop.f32.mrf.mxu0 }
  0xf5   : > { %v866_v45 = vmul.f32 %v6807_v13, %v6807_v13  ;;  %v797_v48 = vsel %vm10199_vm0, %v6807_v13, 0.0 }
  0xf6   : > { %v670_v14 = vpop.f32.mrf.mxu0  ;;  %v798_v55 = vadd.f32 %v797_v48, %v796_v51 }
  0xf7   : > { %v898_v52 = vsel %vm10199_vm0, %v866_v45, 0.0 }
  0xf8   : > { %v6809_v15 = vpop.f32.mrf.mxu0  ;;  %v899_v61 = vadd.f32 %v898_v52, %v897_v57 }
  0xf9   : > { %v867_v49 = vmul.f32 %v6809_v15, %v6809_v15  ;;  %v799_v53 = vsel %vm10199_vm0, %v6809_v15, 0.0 }
  0xfa   : > { %v675_v18 = vpop.f32.mrf.mxu0  ;;  %v800_v62 = vadd.f32 %v799_v53, %v798_v55 }
  0xfb   : > { %v900_v58 = vsel %vm10199_vm0, %v867_v49, 0.0 }
  0xfc   : > { %v6827_v20 = vpop.f32.mrf.mxu0  ;;  %v901_v4 = vadd.f32 %v900_v58, %v899_v61 }
  0xfd   : > { %v868_v54 = vmul.f32 %v6827_v20, %v6827_v20  ;;  %v801_v59 = vsel %vm10199_vm0, %v6827_v20, 0.0 }
  0xfe   : > { %v678_v21 = vpop.f32.mrf.mxu0  ;;  %v802_v5 = vadd.f32 %v801_v59, %v800_v62 }
  0xff   : > { %v902_v0 = vsel %vm10199_vm0, %v868_v54, 0.0 }
 0x100   : > { %v6830_v22 = vpop.f32.mrf.mxu0  ;;  %v903_v10 = vadd.f32 %v902_v0, %v901_v4 }
 0x101   : > { %v869_v60 = vmul.f32 %v6830_v22, %v6830_v22  ;;  %v803_v2 = vsel %vm10199_vm0, %v6830_v22, 0.0 }
 0x102   : > { %v683_v23 = vpop.f32.mrf.mxu0  ;;  %v804_v12 = vadd.f32 %v803_v2, %v802_v5 }
 0x103   : > { %v904_v7 = vsel %vm10199_vm0, %v869_v60, 0.0 }
 0x104   : > { %v6832_v24 = vpop.f32.mrf.mxu0 }
 0x105   : > { %v870_v3 = vmul.f32 %v6832_v24, %v6832_v24  ;;  %v805_v8 = vsel %vm10199_vm0, %v6832_v24, 0.0 }
 0x106   : > { %v686_v25 = vpop.f32.mrf.mxu0 }
 0x107   : > { %v906_v18 = vsel %vm10199_vm0, %v870_v3, 0.0  ;;  %v905_v25 = vadd.f32 %v904_v7, %v903_v10 }
 0x108   : > { %v6834_v26 = vpop.f32.mrf.mxu0 }
 0x109   : > { %v871_v9 = vmul.f32 %v6834_v26, %v6834_v26  ;;  %v807_v21 = vsel %vm10199_vm0, %v6834_v26, 0.0 }
 0x10a   : > { %v691_v27 = vpop.f32.mrf.mxu0 }
 0x10b   : > { %v806_v27 = vadd.f32 %v805_v8, %v804_v12 }
 0x10c   : > { %v6836_v28 = vpop.f32.mrf.mxu0 }
 0x10d   : > { %v872_v23 = vmul.f32 %v6836_v28, %v6836_v28 }
 0x10e   : > { %v694_v29 = vpop.f32.mrf.mxu0 }
 0x110   : > { %v6838_v30 = vpop.f32.mrf.mxu0 }
 0x111   : > { %v811_v45 = vsel %vm10199_vm0, %v6838_v30, 0.0 }
 0x112   : > { %v699_v31 = vpop.f32.mrf.mxu0 }
 0x113   : > { %v908_v31 = vsel %vm10199_vm0, %v871_v9, 0.0 }
 0x114   : > { %v6840_v32 = vpop.f32.mrf.mxu0 }
 0x115   : > { %v813_v52 = vsel %vm10199_vm0, %v6840_v32, 0.0 }
 0x116   : > { %v702_v33 = vpop.f32.mrf.mxu0 }
 0x117   : > { %v809_v33 = vsel %vm10199_vm0, %v6836_v28, 0.0 }
 0x118   : > { %v6842_v34 = vpop.f32.mrf.mxu0 }
 0x119   : > { %v875_v53 = vmul.f32 %v6842_v34, %v6842_v34  ;;  %v815_v58 = vsel %vm10199_vm0, %v6842_v34, 0.0 }
 0x11a   : > { %v707_v35 = vpop.f32.mrf.mxu0 }
 0x11b   : > { %v873_v35 = vmul.f32 %v6838_v30, %v6838_v30  ;;  %v916_v0 = vsel %vm10199_vm0, %v875_v53, 0.0 }
 0x11c   : > { %v6844_v36 = vpop.f32.mrf.mxu0 }
 0x11d   : > { %v912_v51 = vsel %vm10199_vm0, %v873_v35, 0.0  ;;  %v876_v59 = vmul.f32 %v6844_v36, %v6844_v36  ;;  %v817_v2 = vsel %vm10199_vm0, %v6844_v36, 0.0 }
 0x11e   : > { %v710_v37 = vpop.f32.mrf.mxu0 }
 0x11f   : > { %v907_v37 = vadd.f32 %v906_v18, %v905_v25  ;;  %v918_v7 = vsel %vm10199_vm0, %v876_v59, 0.0 }
 0x120   : > { %v6846_v38 = vpop.f32.mrf.mxu0 }
 0x121   : > { %v909_v47 = vadd.f32 %v908_v31, %v907_v37  ;;  %v877_v3 = vmul.f32 %v6846_v38, %v6846_v38  ;;  %v819_v8 = vsel %vm10199_vm0, %v6846_v38, 0.0 }
 0x122   : > { %v715_v39 = vpop.f32.mrf.mxu0 }
 0x123   : > { %v808_v39 = vadd.f32 %v807_v21, %v806_v27  ;;  %v920_v21 = vsel %vm10199_vm0, %v877_v3, 0.0 }
 0x124   : > { %v6848_v40 = vpop.f32.mrf.mxu0 }
 0x125   : > { %v810_v48 = vadd.f32 %v809_v33, %v808_v39  ;;  %v878_v9 = vmul.f32 %v6848_v40, %v6848_v40 }
 0x126   : > { %v718_v41 = vpop.f32.mrf.mxu0 }
 0x127   : > { %v812_v55 = vadd.f32 %v811_v45, %v810_v48  ;;  %v922_v33 = vsel %vm10199_vm0, %v878_v9, 0.0 }
 0x128   : > { %v6850_v42 = vpop.f32.mrf.mxu0 }
 0x129   : > { %v814_v61 = vadd.f32 %v813_v52, %v812_v55  ;;  %v879_v25 = vmul.f32 %v6850_v42, %v6850_v42  ;;  %v823_v35 = vsel %vm10199_vm0, %v6850_v42, 0.0 }
 0x12a   : > { %v723_v43 = vpop.f32.mrf.mxu0 }
 0x12b   : > { %v910_v43 = vsel %vm10199_vm0, %v872_v23, 0.0  ;;  %v816_v5 = vadd.f32 %v815_v58, %v814_v61  ;;  %v821_v23 = vsel %vm10199_vm0, %v6848_v40, 0.0 }
 0x12c   : > { %v6852_v44 = vpop.f32.mrf.mxu0  ;;  %v911_v54 = vadd.f32 %v910_v43, %v909_v47 }
 0x12d   : > { %v818_v12 = vadd.f32 %v817_v2, %v816_v5  ;;  %v880_v37 = vmul.f32 %v6852_v44, %v6852_v44  ;;  %v825_v47 = vsel %vm10199_vm0, %v6852_v44, 0.0 }
 0x12e   : > { %v726_v46 = vpop.f32.mrf.mxu0  ;;  %v913_v60 = vadd.f32 %v912_v51, %v911_v54 }
 0x12f   : > { %v874_v46 = vmul.f32 %v6840_v32, %v6840_v32  ;;  %v926_v53 = vsel %vm10199_vm0, %v880_v37, 0.0 }
 0x130   : > { %v6862_v50 = vpop.f32.mrf.mxu0 }
 0x131   : > { %v914_v57 = vsel %vm10199_vm0, %v874_v46, 0.0  ;;  %v924_v46 = vsel %vm10199_vm0, %v879_v25, 0.0  ;;  %v881_v48 = vmul.f32 %v6862_v50, %v6862_v50  ;;  %v827_v54 = vsel %vm10199_vm0, %v6862_v50, 0.0 }
 0x132   : > { %v731_v56 = vpop.f32.mrf.mxu0  ;;  %v915_v4 = vadd.f32 %v914_v57, %v913_v60 }
 0x133   : > { %v928_v60 = vsel %vm10199_vm0, %v881_v48, 0.0 }
 0x134   : > { %v6877_v63 = vpop.f32.mrf.mxu0  ;;  %v917_v10 = vadd.f32 %v916_v0, %v915_v4 }
 0x135   : > { %v882_v55 = vmul.f32 %v6877_v63, %v6877_v63  ;;  %v829_v61 = vsel %vm10199_vm0, %v6877_v63, 0.0 }
 0x136   : > { %v734_v6 = vpop.f32.mrf.mxu0  ;;  %v919_v27 = vadd.f32 %v918_v7, %v917_v10 }
 0x137   : > { %v930_v4 = vsel %vm10199_vm0, %v882_v55, 0.0 }
 0x138   : > { %v6889_v14 = vpop.f32.mrf.mxu0  ;;  %v921_v39 = vadd.f32 %v920_v21, %v919_v27 }
 0x139   : > { %v831_v5 = vsel %vm10199_vm0, %v6889_v14, 0.0 }
 0x13a   : > { %v739_v29 = vpop.f32.mrf.mxu0 }
 0x13b   : > { %v820_v29 = vadd.f32 %v819_v8, %v818_v12 }
 0x13c   : > { %v6901_v41 = vpop.f32.mrf.mxu0 }
 0x13d   : > { %v822_v43 = vadd.f32 %v821_v23, %v820_v29  ;;  %v884_v7 = vmul.f32 %v6901_v41, %v6901_v41 }
 0x13e   : > { %v742_v49 = vpop.f32.mrf.mxu0 }
 0x13f   : > { %v923_v49 = vadd.f32 %v922_v33, %v921_v39  ;;  %v824_v51 = vadd.f32 %v823_v35, %v822_v43  ;;  %v934_v29 = vsel %vm10199_vm0, %v884_v7, 0.0 }
 0x140   : > { %v6913_v56 = vpop.f32.mrf.mxu0 }
 0x141   : > { %v925_v57 = vadd.f32 %v924_v46, %v923_v49  ;;  %v826_v58 = vadd.f32 %v825_v47, %v824_v51  ;;  %v885_v21 = vmul.f32 %v6913_v56, %v6913_v56  ;;  %v835_v33 = vsel %vm10199_vm0, %v6913_v56, 0.0 }
 0x142   : > { %v747_v62 = vpop.f32.mrf.mxu0 }
 0x143   : > { %v883_v62 = vmul.f32 %v6889_v14, %v6889_v14  ;;  %v927_v0 = vadd.f32 %v926_v53, %v925_v57  ;;  %v828_v2 = vadd.f32 %v827_v54, %v826_v58 }
 0x144   : > { %v6925_v6 = vpop.f32.mrf.mxu0 }
 0x145   : > { %v929_v8 = vadd.f32 %v928_v60, %v927_v0  ;;  %v830_v9 = vadd.f32 %v829_v61, %v828_v2  ;;  %v932_v12 = vsel %vm10199_vm0, %v883_v62, 0.0  ;;  %v886_v35 = vmul.f32 %v6925_v6, %v6925_v6 }
 0x146   : > { %v750_v18 = vpop.f32.mrf.mxu0  ;;  %v837_v46 = vsel %vm10199_vm0, %v6925_v6, 0.0 }
 0x147   : > { %v833_v18 = vsel %vm10199_vm0, %v6901_v41, 0.0  ;;  %v931_v23 = vadd.f32 %v930_v4, %v929_v8  ;;  %v832_v25 = vadd.f32 %v831_v5, %v830_v9  ;;  %v938_v53 = vsel %vm10199_vm0, %v886_v35, 0.0 }
 0x148   : > { %v6937_v31 = vpop.f32.mrf.mxu0 }
 0x149   : > { %v933_v37 = vadd.f32 %v932_v12, %v931_v23  ;;  %v834_v39 = vadd.f32 %v833_v18, %v832_v25  ;;  %v887_v47 = vmul.f32 %v6937_v31, %v6937_v31  ;;  %v839_v54 = vsel %vm10199_vm0, %v6937_v31, 0.0 }
 0x14a   : > { %v755_v45 = vpop.f32.mrf.mxu0 }
 0x14b   : > { %v936_v45 = vsel %vm10199_vm0, %v885_v21, 0.0  ;;  %v935_v48 = vadd.f32 %v934_v29, %v933_v37  ;;  %v836_v49 = vadd.f32 %v835_v33, %v834_v39  ;;  %v940_v60 = vsel %vm10199_vm0, %v887_v47, 0.0 }
 0x14c   : > { %v6949_v52 = vpop.f32.mrf.mxu0 }
 0x14d   : > { %v888_v55 = vmul.f32 %v6949_v52, %v6949_v52  ;;  %v937_v57 = vadd.f32 %v936_v45, %v935_v48  ;;  %v838_v58 = vadd.f32 %v837_v46, %v836_v49  ;;  %v841_v61 = vsel %vm10199_vm0, %v6949_v52, 0.0 }
 0x14e   : > { %v758_v59 = vpop.f32.mrf.mxu0 }
 0x14f   : > { %v939_v0 = vadd.f32 %v938_v53, %v937_v57  ;;  %v840_v2 = vadd.f32 %v839_v54, %v838_v58  ;;  %v942_v5 = vsel %vm10199_vm0, %v888_v55, 0.0 }
 0x150   : > { %v6961_v3 = vpop.f32.mrf.mxu0 }
 0x151   : > { %v889_v62 = vmul.f32 %v6961_v3, %v6961_v3  ;;  %v843_v7 = vsel %vm10199_vm0, %v6961_v3, 0.0  ;;  %v941_v9 = vadd.f32 %v940_v60, %v939_v0 }
 0x152   : > { %v763_v10 = vpop.f32.mrf.mxu0 }
 0x153   : > { %v842_v10 = vadd.f32 %v841_v61, %v840_v2  ;;  %v944_v18 = vsel %vm10199_vm0, %v889_v62, 0.0  ;;  %v943_v25 = vadd.f32 %v942_v5, %v941_v9 }
 0x154   : > { %v6973_v27 = vpop.f32.mrf.mxu0 }
 0x155   : > { %v890_v8 = vmul.f32 %v6973_v27, %v6973_v27  ;;  %v845_v21 = vsel %vm10199_vm0, %v6973_v27, 0.0  ;;  %v844_v29 = vadd.f32 %v843_v7, %v842_v10 }
 0x156   : > { %v766_v43 = vpop.f32.mrf.mxu0 }
 0x157   : > { %v946_v35 = vsel %vm10199_vm0, %v890_v8, 0.0  ;;  %v945_v43 = vadd.f32 %v944_v18, %v943_v25  ;;  %v846_v45 = vadd.f32 %v845_v21, %v844_v29 }
 0x158   : > { %v6985_v51 = vpop.f32.mrf.mxu0 }
 0x159   : > { %v891_v23 = vmul.f32 %v6985_v51, %v6985_v51  ;;  %v847_v37 = vsel %vm10199_vm0, %v6985_v51, 0.0  ;;  %v947_v53 = vadd.f32 %v946_v35, %v945_v43 }
 0x15a   : > { %v771_v59 = vpop.f32.mrf.mxu0  ;;  %v848_v54 = vadd.f32 %v847_v37, %v846_v45 }
 0x15b   : > { %v948_v47 = vsel %vm10199_vm0, %v891_v23, 0.0 }
 0x15c   : > { %v6997_v4 = vpop.f32.mrf.mxu0  ;;  %v949_v60 = vadd.f32 %v948_v47, %v947_v53 }
 0x15d   : > { %v892_v39 = vmul.f32 %v6997_v4, %v6997_v4  ;;  %v849_v48 = vsel %vm10199_vm0, %v6997_v4, 0.0 }
 0x15e   : > { %v774_v12 = vpop.f32.mrf.mxu0  ;;  %v850_v61 = vadd.f32 %v849_v48, %v848_v54 }
 0x15f   : > { %v950_v57 = vsel %vm10199_vm0, %v892_v39, 0.0 }
 0x160   : > { %v7009_v33 = vpop.f32.mrf.mxu0  ;;  %v951_v5 = vadd.f32 %v950_v57, %v949_v60 }
 0x161   : > { %v893_v49 = vmul.f32 %v7009_v33, %v7009_v33  ;;  %v851_v58 = vsel %vm10199_vm0, %v7009_v33, 0.0 }
 0x162   : > { %v779_v46 = vpop.f32.mrf.mxu0  ;;  %v852_v7 = vadd.f32 %v851_v58, %v850_v61 }
 0x163   : > { %v952_v0 = vsel %vm10199_vm0, %v893_v49, 0.0 }
 0x164   : > { %v7021_v55 = vpop.f32.mrf.mxu0  ;;  %v953_v18 = vadd.f32 %v952_v0, %v951_v5 }
 0x165   : > { %v894_v59 = vmul.f32 %v7021_v55, %v7021_v55  ;;  %v853_v2 = vsel %vm10199_vm0, %v7021_v55, 0.0 }
 0x166   : > { %v782_v62 = vpop.f32.mrf.mxu0  ;;  %v854_v21 = vadd.f32 %v853_v2, %v852_v7 }
 0x167   : > { %v954_v9 = vsel %vm10199_vm0, %v894_v59, 0.0 }
 0x168   : > { %v7031_v8 = vpop.f32.mrf.mxu0  ;;  %v955_v29 = vadd.f32 %v954_v9, %v953_v18  ;;  %v6564_v9 = vld [vmem:[%s10130_s5 + $0x8] sm:$0xff]  }
 0x169   : > { %v855_v10 = vsel %vm10199_vm0, %v7031_v8, 0.0  ;;  %v895_v12 = vmul.f32 %v7031_v8, %v7031_v8  ;;  %6108 = vmatprep.subr.bf16.mxu0 %v6564_v9 }
 0x16a   : > { %v787_v23 = vpop.f32.mrf.mxu0  ;;  %v856_v35 = vadd.f32 %v855_v10, %v854_v21  ;;  %6109 = vmatpush3.bf16.msra.mxu0 %v6564_v9 }
 0x16b   : > { %v956_v25 = vsel %vm10199_vm0, %v895_v12, 0.0 }
 0x16c   : > { %v7039_v37 = vpop.f32.mrf.mxu0  ;;  %v957_v45 = vadd.f32 %v956_v25, %v955_v29 }
 0x16d   : > { %v857_v39 = vsel %vm10199_vm0, %v7039_v37, 0.0  ;;  %v896_v43 = vmul.f32 %v7039_v37, %v7039_v37 }
 0x16e   : > { %v858_v46 = vadd.f32 %v857_v39, %v856_v35  ;;  %v790_v47 = vpop.f32.mrf.mxu0  ;;  %v1118_v39 = vlaneseq }
 0x16f   : > { %v958_v48 = vsel %vm10199_vm0, %v896_v43, 0.0 }
 0x170   : > { %v859_v49 = vrot.slane %v858_v46, 4  ;;  %v959_v53 = vadd.f32 %v958_v48, %v957_v45  ;;  %v7068_v45 = vshrl.u32 %v1118_v39, 7 }
 0x172   : > { %v860_v54 = vadd.f32 %v859_v49, %v858_v46  ;;  %v960_v57 = vrot.slane %v959_v53, 4  ;;  %v7071_v46 = vadd.s32 16, %v7068_v45  ;;  %v7075_v48 = vsub.s32 0, %v7068_v45 }
 0x173   : > { %v7078_v49 = vrot.slane %v6650_v1, 1  ;;  %v7099_v1 = vadd.s32 128, %v7068_v45 }
 0x174   : > { %v861_v58 = vrot.slane %v860_v54, 2  ;;  %v961_v59 = vadd.f32 %v960_v57, %v959_v53  ;;  %10298 = vst [vmem:[#allocation2_spill] sm:$0xff] %v7075_v48  ;;  %v7081_v53 = vadd.s32 32, %v7068_v45  ;;  %v7087_v57 = vadd.s32 64, %v7068_v45 }
 0x175   : > { %10299 = vst [vmem:[#allocation3_spill] sm:$0xff] %v7078_v49  ;;  %10302 = vst [vmem:[#allocation6_spill] sm:$0xff] %v7099_v1 }
 0x176   : > { %v862_v60 = vadd.f32 %v861_v58, %v860_v54  ;;  %v962_v61 = vrot.slane %v961_v59, 2  ;;  %v7084_v54 = vadd.s32 48, %v7068_v45  ;;  %v7090_v58 = vadd.s32 80, %v7068_v45 }
 0x178   : > { %v963_v62 = vadd.f32 %v962_v61, %v961_v59  ;;  %v863_v0 = vrot.slane %v862_v60, 1  ;;  %v7093_v59 = vadd.s32 96, %v7068_v45  ;;  %v7102_v61 = vadd.s32 144, %v7068_v45 }
 0x17a   : > { %v964_v2 = vrot.slane %v963_v62, 1  ;;  %v864_v5 = vadd.f32 %v863_v0, %v862_v60  ;;  %10300 = vst [vmem:[#allocation4_spill] sm:$0xff] %v7093_v59  ;;  %v7096_v60 = vadd.s32 112, %v7068_v45  ;;  %10303 = vst [vmem:[#allocation7_spill] sm:$0xff] %v7102_v61  ;;  %v7108_v0 = vadd.s32 176, %v7068_v45 }
 0x17c   : > { %6099 = vmatmul.mubr.msk.f32.vlgmr.msra.gmra.mxu1 %vm10199_vm0, %v864_v5  ;;  %v965_v7 = vadd.f32 %v964_v2, %v963_v62  ;;  %10301 = vst [vmem:[#allocation5_spill] sm:$0xff] %v7096_v60  ;;  %v7105_v62 = vadd.s32 160, %v7068_v45  ;;  %10305 = vst [vmem:[#allocation9_spill] sm:$0xff] %v7108_v0  ;;  %v7111_v2 = vadd.s32 192, %v7068_v45  ;;  %v7114_v5 = vadd.s32 208, %v7068_v45 }
 0x17d   : > { %6102 = vmatpush3.msra.mxu1 %v6815_v17  ;;  %6105 = vmatprep.mubr.msk.f32.mxu1 %vm10187_vm1, %v10135_v16  ;;  %v7059_v17 = vld [vmem:[%s10130_s5] sm:$0xff]  }
 0x17e   : > { %6103 = vmatprep.subr.mxu1 %v10135_v16  ;;  %10304 = vst [vmem:[#allocation8_spill] sm:$0xff] %v7105_v62  ;;  %10306 = vst [vmem:[#allocation10_spill] sm:$0xff] %v7111_v2 }
 0x17f   : > { %6104 = vmatpush3.msra.mxu1 %v6822_v19  ;;  %v7065_v19 = vld [vmem:[%s10130_s5 + $0x18] sm:$0xff]   ;;  %10307 = vst [vmem:[#allocation11_spill] sm:$0xff] %v7114_v5 }
 0x180   : > { %6106 = vmatmul.mubr.msk.f32.vlgmr.msra.gmra.mxu1 %vm10199_vm0, %v965_v7  ;;  %6428 = vmatprep.subr.bf16.mxu1 %v6564_v9  ;;  %v7117_v7 = vadd.s32 224, %v7068_v45 }
 0x181   : > { %6429 = vmatpush3.bf16.msra.mxu1 %v6564_v9  ;;  %6210 = vmatprep.subr.bf16.mxu0 %v7065_v19 }
 0x182   : > { %6142 = vmatprep.subr.bf16.mxu1 %v7059_v17  ;;  %10308 = vst [vmem:[#allocation12_spill] sm:$0xff] %v7117_v7 }
 0x23c   : > { %v1035_v10 = vpop.f32.mrf.mxu1 }
 0x23d   : > { %v1039_v23 = vmul.f32 0.0009765625, %v1035_v10 }
 0x23e   : > { %v6100_v12 = vpop.f32.mrf.mxu1 }
 0x23f   : > { %v1114_v25 = vmul.f32 %v1039_v23, %v1039_v23  ;;  %v7120_v9 = vrot.slane %v1039_v23, %v7075_v48 }
 0x240   : > { %v1109_v18 = vpop.f32.mrf.mxu1 }
 0x241   : > { %v1113_v29 = vmul.f32 0.0009765625, %v1109_v18  ;;  %v7125_v18 = vadd.s32 240, %v7068_v45  ;;  %v1123_v39 = vsub.f32 %v6807_v13, %v7120_v9  ;;  %v1124_v12 = vsub.f32 %v6809_v15, %v7120_v9 }
 0x242   : > { %v6107_v21 = vpop.f32.mrf.mxu1  ;;  %v1125_v16 = vsub.f32 %v6827_v20, %v7120_v9  ;;  %v1128_v13 = vsub.f32 %v6834_v26, %v7120_v9  ;;  %v1129_v23 = vsub.f32 %v6836_v28, %v7120_v9  ;;  %v1131_v15 = vsub.f32 %v6840_v32, %v7120_v9 }
 0x243   : > { %v1115_v35 = vsub.f32 %v1113_v29, %v1114_v25  ;;  %10309 = vst [vmem:[#allocation13_spill] sm:$0xff] %v7125_v18  ;;  %v1126_v25 = vsub.f32 %v6830_v22, %v7120_v9  ;;  %v1130_v21 = vsub.f32 %v6838_v30, %v7120_v9  ;;  %v1132_v20 = vsub.f32 %v6842_v34, %v7120_v9 }
 0x244   : > { %v1133_v22 = vsub.f32 %v6844_v36, %v7120_v9  ;;  %v1135_v28 = vsub.f32 %v6848_v40, %v7120_v9  ;;  %v1136_v30 = vsub.f32 %v6850_v42, %v7120_v9  ;;  %v1137_v32 = vsub.f32 %v6852_v44, %v7120_v9 }
 0x245   : > { %v1116_v43 = vadd.f32 1e-05, %v1115_v35  ;;  %v1122_v35 = vsub.f32 %v6805_v11, %v7120_v9  ;;  %v1127_v11 = vsub.f32 %v6832_v24, %v7120_v9  ;;  %v1134_v24 = vsub.f32 %v6846_v38, %v7120_v9 }
 0x246   : > { %v1138_v34 = vsub.f32 %v6862_v50, %v7120_v9  ;;  %v1139_v36 = vsub.f32 %v6877_v63, %v7120_v9  ;;  %v1140_v38 = vsub.f32 %v6889_v14, %v7120_v9  ;;  %v1153_v40 = vsub.f32 %v7039_v37, %v7120_v9 }
 0x247   : > { %6573 = vrsqrt.f32 %v1116_v43  ;;  %v7145_v43 = vadd.s32 8, %v7068_v45  ;;  %v1142_v42 = vsub.f32 %v6913_v56, %v7120_v9  ;;  %v1143_v44 = vsub.f32 %v6925_v6, %v7120_v9 }
 0x248   : > { %v1144_v50 = vsub.f32 %v6937_v31, %v7120_v9  ;;  %v1145_v63 = vsub.f32 %v6949_v52, %v7120_v9  ;;  %v1146_v14 = vsub.f32 %v6961_v3, %v7120_v9  ;;  %v1148_v37 = vsub.f32 %v6985_v51, %v7120_v9 }
 0x249   : > { %v1149_v56 = vsub.f32 %v6997_v4, %v7120_v9  ;;  %v1150_v6 = vsub.f32 %v7009_v33, %v7120_v9  ;;  %v1151_v31 = vsub.f32 %v7021_v55, %v7120_v9  ;;  %v1152_v52 = vsub.f32 %v7031_v8, %v7120_v9  ;;  %v7211_v33 = vld [vmem:[%s10127_s2] ss:$0 sm:$0xff] }
 0x254   : > { %v6574_v47 = vpop.eup %6573 }
 0x255   : > { %v1157_v26 = vrot.slane %v6574_v47, %v7075_v48  ;;  %v1141_v47 = vsub.f32 %v6901_v41, %v7120_v9  ;;  %v1147_v41 = vsub.f32 %v6973_v27, %v7120_v9 }
 0x257   : > { %v1189_v10 = vmul.f32 %v1157_v26, %v1153_v40  ;;  %v1158_v3 = vmul.f32 %v1157_v26, %v1122_v35  ;;  %v1159_v29 = vmul.f32 %v1157_v26, %v1123_v39  ;;  %v1160_v48 = vmul.f32 %v1157_v26, %v1124_v12 }
 0x258   : > { %v1161_v27 = vmul.f32 %v1157_v26, %v1125_v16  ;;  %v1162_v0 = vmul.f32 %v1157_v26, %v1126_v25  ;;  %v1163_v62 = vmul.f32 %v1157_v26, %v1127_v11  ;;  %v1164_v51 = vmul.f32 %v1157_v26, %v1128_v13 }
 0x259   : > { %v1165_v40 = vmul.f32 %v1157_v26, %v1129_v23  ;;  %v1166_v61 = vmul.f32 %v1157_v26, %v1130_v21  ;;  %v1167_v18 = vmul.f32 %v1157_v26, %v1131_v15  ;;  %v1168_v4 = vmul.f32 %v1157_v26, %v1132_v20 }
 0x25a   : > { %v1169_v7 = vmul.f32 %v1157_v26, %v1133_v22  ;;  %v1170_v55 = vmul.f32 %v1157_v26, %v1134_v24  ;;  %v1171_v5 = vmul.f32 %v1157_v26, %v1135_v28  ;;  %v1172_v8 = vmul.f32 %v1157_v26, %v1136_v30 }
 0x25b   : > { %v1173_v9 = vmul.f32 %v1157_v26, %v1137_v32  ;;  %v1174_v35 = vmul.f32 %v1157_v26, %v1138_v34  ;;  %v1175_v12 = vmul.f32 %v1157_v26, %v1139_v36  ;;  %v1176_v16 = vmul.f32 %v1157_v26, %v1140_v38 }
 0x25c   : > { %v1177_v25 = vmul.f32 %v1157_v26, %v1141_v47  ;;  %v1178_v39 = vmul.f32 %v1157_v26, %v1142_v42  ;;  %v1179_v11 = vmul.f32 %v1157_v26, %v1143_v44  ;;  %v1180_v23 = vmul.f32 %v1157_v26, %v1144_v50 }
 0x25d   : > { %v1181_v21 = vmul.f32 %v1157_v26, %v1145_v63  ;;  %v1182_v13 = vmul.f32 %v1157_v26, %v1146_v14  ;;  %v1183_v15 = vmul.f32 %v1157_v26, %v1147_v41  ;;  %v1184_v20 = vmul.f32 %v1157_v26, %v1148_v37 }
 0x25e   : > { %v1227_v22 = vmul.f32 %v7211_v33, %v1189_v10  ;;  %v1185_v1 = vmul.f32 %v1157_v26, %v1149_v56  ;;  %v1186_v2 = vmul.f32 %v1157_v26, %v1150_v6  ;;  %v1187_v60 = vmul.f32 %v1157_v26, %v1151_v31 }
 0x25f   : > { %v7214_v24 = vmul.f32 %v1157_v26, %v1152_v52  ;;  %v1196_v28 = vmul.f32 %v7211_v33, %v1158_v3  ;;  %v1197_v30 = vmul.f32 %v7211_v33, %v1159_v29  ;;  %v1198_v32 = vmul.f32 %v7211_v33, %v1160_v48  ;;  %v7231_v48 = vld [vmem:[%s10128_s3] ss:$0 sm:$0xff] }
 0x260   : > { %v1199_v34 = vmul.f32 %v7211_v33, %v1161_v27  ;;  %v1200_v36 = vmul.f32 %v7211_v33, %v1162_v0  ;;  %v1201_v38 = vmul.f32 %v7211_v33, %v1163_v62  ;;  %v1202_v47 = vmul.f32 %v7211_v33, %v1164_v51 }
 0x261   : > { %v1203_v10 = vmul.f32 %v7211_v33, %v1165_v40  ;;  %v1204_v42 = vmul.f32 %v7211_v33, %v1166_v61  ;;  %v1205_v26 = vmul.f32 %v7211_v33, %v1167_v18  ;;  %v1206_v44 = vmul.f32 %v7211_v33, %v1168_v4 }
 0x262   : > { %v1207_v29 = vmul.f32 %v7211_v33, %v1169_v7  ;;  %v1208_v0 = vmul.f32 %v7211_v33, %v1170_v55  ;;  %v1209_v62 = vmul.f32 %v7211_v33, %v1171_v5  ;;  %v1210_v50 = vmul.f32 %v7211_v33, %v1172_v8 }
 0x263   : > { %v1211_v63 = vmul.f32 %v7211_v33, %v1173_v9  ;;  %v1212_v61 = vmul.f32 %v7211_v33, %v1174_v35  ;;  %v1213_v18 = vmul.f32 %v7211_v33, %v1175_v12  ;;  %v1214_v14 = vmul.f32 %v7211_v33, %v1176_v16 }
 0x264   : > { %v1215_v7 = vmul.f32 %v7211_v33, %v1177_v25  ;;  %v1216_v41 = vmul.f32 %v7211_v33, %v1178_v39  ;;  %v1217_v37 = vmul.f32 %v7211_v33, %v1179_v11  ;;  %v1218_v56 = vmul.f32 %v7211_v33, %v1180_v23 }
 0x265   : > { %v1219_v5 = vmul.f32 %v7211_v33, %v1181_v21  ;;  %v1220_v6 = vmul.f32 %v7211_v33, %v1182_v13  ;;  %v1221_v31 = vmul.f32 %v7211_v33, %v1183_v15  ;;  %v1222_v52 = vmul.f32 %v7211_v33, %v1184_v20 }
 0x266   : > { %v7249_v3 = vadd.f32 %v7231_v48, %v1227_v22  ;;  %v1223_v27 = vmul.f32 %v7211_v33, %v1185_v1  ;;  %v7253_v51 = vmul.f32 %v7211_v33, %v1186_v2  ;;  %v7256_v40 = vmul.f32 %v7211_v33, %v1187_v60 }
 0x267   : > { %v1234_v4 = vadd.f32 %v7231_v48, %v1196_v28  ;;  %v1235_v55 = vadd.f32 %v7231_v48, %v1197_v30  ;;  %v1236_v8 = vadd.f32 %v7231_v48, %v1198_v32  ;;  %v1237_v9 = vadd.f32 %v7231_v48, %v1199_v34 }
 0x268   : > { %v1238_v35 = vadd.f32 %v7231_v48, %v1200_v36  ;;  %v1239_v12 = vadd.f32 %v7231_v48, %v1201_v38  ;;  %v1240_v1 = vadd.f32 %v7231_v48, %v1202_v47  ;;  %v1241_v2 = vadd.f32 %v7231_v48, %v1203_v10 }
 0x269   : > { %v1242_v16 = vadd.f32 %v7231_v48, %v1204_v42  ;;  %v1243_v60 = vadd.f32 %v7231_v48, %v1205_v26  ;;  %v1244_v25 = vadd.f32 %v7231_v48, %v1206_v44  ;;  %v1245_v39 = vadd.f32 %v7231_v48, %v1207_v29 }
 0x26a   : > { %v1246_v11 = vadd.f32 %v7231_v48, %v1208_v0  ;;  %v1247_v23 = vadd.f32 %v7231_v48, %v1209_v62  ;;  %v1248_v21 = vadd.f32 %v7231_v48, %v1210_v50  ;;  %v1249_v13 = vadd.f32 %v7231_v48, %v1211_v63 }
 0x26b   : > { %v1250_v15 = vadd.f32 %v7231_v48, %v1212_v61  ;;  %v1251_v20 = vadd.f32 %v7231_v48, %v1213_v18  ;;  %v7277_v22 = vadd.f32 %v7231_v48, %v1214_v14  ;;  %v7280_v28 = vadd.f32 %v7231_v48, %v1215_v7 }
 0x26c   : > { %v7283_v30 = vadd.f32 %v7231_v48, %v1216_v41  ;;  %v7286_v32 = vadd.f32 %v7231_v48, %v1217_v37  ;;  %v7289_v34 = vadd.f32 %v7231_v48, %v1218_v56  ;;  %v7292_v36 = vadd.f32 %v7231_v48, %v1219_v5 }
 0x26d   : > { %v7295_v38 = vadd.f32 %v7231_v48, %v1220_v6  ;;  %v7298_v47 = vadd.f32 %v7231_v48, %v1221_v31  ;;  %v7301_v10 = vadd.f32 %v7231_v48, %v1222_v52  ;;  %v7304_v42 = vadd.f32 %v7231_v48, %v1223_v27 }
 0x26e   : > { %v1266_v26 = vmax.f32 %v1234_v4, 0.0  ;;  %v1267_v44 = vmax.f32 %v1235_v55, 0.0  ;;  %v1268_v29 = vmax.f32 %v1236_v8, 0.0  ;;  %v1269_v0 = vmax.f32 %v1237_v9, 0.0 }
 0x26f   : > { %v1270_v62 = vmax.f32 %v1238_v35, 0.0  ;;  %v1271_v50 = vmax.f32 %v1239_v12, 0.0  ;;  %v1272_v63 = vmax.f32 %v1240_v1, 0.0  ;;  %v1273_v61 = vmax.f32 %v1241_v2, 0.0 }
 0x270   : > { %v1274_v18 = vmax.f32 %v1242_v16, 0.0  ;;  %v1275_v14 = vmax.f32 %v1243_v60, 0.0  ;;  %v1276_v7 = vmax.f32 %v1244_v25, 0.0  ;;  %v1277_v41 = vmax.f32 %v1245_v39, 0.0 }
 0x271   : > { %v1278_v37 = vmax.f32 %v1246_v11, 0.0  ;;  %v1279_v56 = vmax.f32 %v1247_v23, 0.0  ;;  %v1280_v5 = vmax.f32 %v1248_v21, 0.0  ;;  %v1281_v6 = vmax.f32 %v1249_v13, 0.0 }
 0x272   : > { %v1282_v31 = vmax.f32 %v1250_v15, 0.0  ;;  %v1283_v52 = vmax.f32 %v1251_v20, 0.0  ;;  %v1284_v27 = vmax.f32 %v7277_v22, 0.0  ;;  %v1285_v4 = vmax.f32 %v7280_v28, 0.0 }
 0x273   : > { %v1286_v55 = vmax.f32 %v7283_v30, 0.0  ;;  %v10310_v8 = vand.u32 15, %v7071_v46  ;;  %v1287_v35 = vmax.f32 %v7286_v32, 0.0  ;;  %v1364_v1 = vrot.slane %v1267_v44, 7 }
 0x274   : > { %v1366_v2 = vrot.slane %v1268_v29, 7  ;;  %v1297_v39 = vmax.f32 %v7249_v3, 0.0  ;;  %v1363_v11 = vrot.slane %v1266_v26, 7  ;;  %v1368_v46 = vrot.slane %v1269_v0, 7 }
 0x275   : > { %vm7311_vm3 = vcmp.ge.s32.totalorder %v10310_v8, 1  ;;  %v1370_v23 = vrot.slane %v1270_v62, 7  ;;  %v1372_v21 = vrot.slane %v1271_v50, 7  ;;  %v1374_v13 = vrot.slane %v1272_v63, 7 }
 0x276   : > { %v1376_v15 = vrot.slane %v1273_v61, 7  ;;  %v1378_v20 = vrot.slane %v1274_v18, 7  ;;  %v1380_v22 = vrot.slane %v1275_v14, 7  ;;  %v7322_v28 = vsel %vm1362_vm2, %v1364_v1, %v1366_v2 }
 0x277   : > { %10313 = vst [vmem:[#allocation14_spill] sm:$0xff] %v7322_v28  ;;  %v1382_v30 = vrot.slane %v1276_v7, 7  ;;  %v1384_v32 = vrot.slane %v1277_v41, 7  ;;  %v1386_v44 = vrot.slane %v1278_v37, 7  ;;  %v1388_v29 = vrot.slane %v1279_v56, 7 }
 0x278   : > { %v1390_v8 = vrot.slane %v1280_v5, 7  ;;  %v1392_v60 = vrot.slane %v1281_v6, 7  ;;  %v1394_v25 = vrot.slane %v1282_v31, 7  ;;  %v7325_v3 = vsel %vm1362_vm2, %v1366_v2, %v1368_v46 }
 0x279   : > { %10314 = vst [vmem:[#allocation15_spill] sm:$0xff] %v7325_v3  ;;  %v7328_v26 = vsel %vm1362_vm2, %v1368_v46, %v1370_v23  ;;  %v7331_v0 = vsel %vm1362_vm2, %v1370_v23, %v1372_v21  ;;  %v7333_v62 = vrot.slane %v1283_v52, 7  ;;  %v7336_v50 = vsel %vm1362_vm2, %v1372_v21, %v1374_v13 }
 0x27a   : > { %10315 = vst [vmem:[#allocation16_spill] sm:$0xff] %v7331_v0  ;;  %10316 = vst [vmem:[#allocation17_spill] sm:$0xff] %v7336_v50  ;;  %v7339_v63 = vsel %vm1362_vm2, %v1374_v13, %v1376_v15  ;;  %v7342_v61 = vsel %vm1362_vm2, %v1376_v15, %v1378_v20  ;;  %v7345_v18 = vsel %vm1362_vm2, %v1378_v20, %v1380_v22  ;;  %v7356_v37 = vrot.slane %v1297_v39, 7 }
 0x27b   : > { %10317 = vst [vmem:[#allocation18_spill] sm:$0xff] %v7339_v63  ;;  %10318 = vst [vmem:[#allocation19_spill] sm:$0xff] %v7342_v61  ;;  %v7348_v14 = vsel %vm1362_vm2, %v1380_v22, %v1382_v30  ;;  %v7351_v7 = vsel %vm1362_vm2, %v1382_v30, %v1384_v32  ;;  %v7354_v41 = vsel %vm1362_vm2, %v1384_v32, %v1386_v44  ;;  %v1398_v2 = vrot.slane %v1284_v27, 7 }
 0x27c   : > { %10319 = vst [vmem:[#allocation20_spill] sm:$0xff] %v7345_v18  ;;  %10320 = vst [vmem:[#allocation21_spill] sm:$0xff] %v7348_v14  ;;  %v7359_v56 = vsel %vm1362_vm2, %v1386_v44, %v1388_v29  ;;  %v7362_v5 = vsel %vm1362_vm2, %v1388_v29, %v1390_v8  ;;  %v7365_v6 = vsel %vm1362_vm2, %v1390_v8, %v1392_v60  ;;  %v7375_v39 = vsel %vm1362_vm2, 0.0, %v1363_v11 }
 0x27d   : > { %10321 = vst [vmem:[#allocation22_spill] sm:$0xff] %v7351_v7  ;;  %10322 = vst [vmem:[#allocation23_spill] sm:$0xff] %v7354_v41  ;;  %v7368_v31 = vsel %vm1362_vm2, %v1392_v60, %v1394_v25  ;;  %v7372_v52 = vsel %vm1362_vm2, %v1394_v25, %v7333_v62  ;;  %v7379_v46 = vsel %vm1362_vm2, %v7356_v37, 0.0  ;;  %v7381_v23 = vrot.slane %v1285_v4, 7 }
 0x27e   : > { %10323 = vst [vmem:[#allocation24_spill] sm:$0xff] %v7356_v37  ;;  %10324 = vst [vmem:[#allocation25_spill] sm:$0xff] %v7359_v56  ;;  %v7383_v21 = vrot.slane %v1286_v55, 7  ;;  %v7385_v13 = vrot.slane %v1287_v35, 7  ;;  %v3924_v60 = vsel %vm7311_vm3, %v7328_v26, 0.0  ;;  %v7394_v27 = vsel %vm1362_vm2, %v1363_v11, %v1364_v1 }
 0x27f   : > { %10325 = vst [vmem:[#allocation26_spill] sm:$0xff] %v7362_v5  ;;  %10326 = vst [vmem:[#allocation27_spill] sm:$0xff] %v7365_v6  ;;  %v7391_v25 = vpack.c.bf16 %v7331_v0, %v3924_v60  ;;  %v2023_v15 = vpack.c.bf16 %v7325_v3, %v7322_v28  ;;  %v2025_v4 = vpack.c.bf16 %v7339_v63, %v7336_v50  ;;  %v10332_v16 = vand.u32 15, %v7068_v45 }
 0x280   : > { %10327 = vst [vmem:[#allocation28_spill] sm:$0xff] %v7368_v31  ;;  %10328 = vst [vmem:[#allocation29_spill] sm:$0xff] %v7372_v52  ;;  %v2022_v55 = vpack.c.bf16 %v7394_v27, %v7375_v39  ;;  %v2026_v35 = vpack.c.bf16 %v7345_v18, %v7342_v61  ;;  %v2024_v20 = vpack.c.bf16 %v7331_v0, %v7328_v26  ;;  %v10333_v12 = vmov 0 }
 0x281   : > { %10329 = vst [vmem:[#allocation30_spill] sm:$0xff] %v7375_v39  ;;  %10330 = vst [vmem:[#allocation31_spill] sm:$0xff] %v7379_v46  ;;  %v2027_v22 = vpack.c.bf16 %v7351_v7, %v7348_v14  ;;  %v2058_v1 = vshll.u32 %v2023_v15, 16  ;;  %v2074_v11 = vshll.u32 %v2025_v4, 16  ;;  %v2078_v30 = vshrl.u32 %v2025_v4, 16 }
 0x282   : > { %10331 = vst [vmem:[#allocation32_spill] sm:$0xff] %v7391_v25  ;;  %v2062_v32 = vshrl.u32 %v2023_v15, 16  ;;  %v2050_v44 = vshll.u32 %v2022_v55, 16  ;;  %v2054_v29 = vshrl.u32 %v2022_v55, 16  ;;  %v2082_v8 = vshll.u32 %v2026_v35, 16 }
 0x283   : > { %v2086_v60 = vshrl.u32 %v2026_v35, 16  ;;  %vm7410_vm5 = vcmp.ge.s32.totalorder %v10332_v16, 1  ;;  %v2060_v25 = vrot.slane %v2058_v1, 1  ;;  %v7414_v46 = vrot.slane %v2074_v11, 1 }
 0x284   : > { %v10334_v12 = vsel %vm7410_vm5, 4294967295, %v10333_v12  ;;  %v2066_v37 = vshll.u32 %v2024_v20, 16  ;;  %v2090_v18 = vshll.u32 %v2027_v22, 16  ;;  %v2052_v7 = vrot.slane %v2050_v44, 1 }
 0x285   : > { %10335 = vst [vmem:[#allocation33_spill] sm:$0xff] %v10334_v12  ;;  %v2084_v14 = vrot.slane %v2082_v8, 1  ;;  %v2028_v15 = vpack.c.bf16 %v7359_v56, %v7354_v41  ;;  %v2094_v4 = vshrl.u32 %v2027_v22, 16  ;;  %v2080_v55 = vor.u32 %v2078_v30, %v7414_v46 }
 0x286   : > { %v2064_v35 = vor.u32 %v2062_v32, %v2060_v25  ;;  %v2068_v63 = vrot.slane %v2066_v37, 1  ;;  %v2092_v61 = vrot.slane %v2090_v18, 1  ;;  %v2053_v16 = vsel %vm10192_vm4, %v7078_v49, %v2052_v7 }
 0x287   : > { %v2056_v50 = vor.u32 %v2054_v29, %v2052_v7  ;;  %v2088_v1 = vor.u32 %v2086_v60, %v2084_v14  ;;  %v2098_v11 = vshll.u32 %v2028_v15, 16  ;;  %v10336_v59 = vmax.f32 %v7289_v34, 0.0  ;;  %6110 = vmatprep.mubr.msk.bf16.mxu0 %vm10199_vm0, %v2053_v16 }
 0x288   : > { %v7425_v44 = vsel %vm10192_vm4, %v2080_v55, %v2084_v14  ;;  %v7428_v22 = vsel %vm10192_vm4, %v2064_v35, %v2068_v63  ;;  %v2096_v30 = vor.u32 %v2094_v4, %v2092_v61  ;;  %v7443_v14 = vld [vmem:[%s10130_s5 + $0x10] sm:$0xff]   ;;  %v7452_v37 = vsel %vm1362_vm2, %v7333_v62, %v1398_v2 }
 0x289   : > { %v1406_v0 = vrot.slane %v10336_v59, 7  ;;  %10337 = vst [vmem:[#allocation34_spill] sm:$0xff] %v7425_v44  ;;  %10338 = vst [vmem:[#allocation35_spill] sm:$0xff] %v7428_v22  ;;  %v7431_v18 = vsel %vm10192_vm4, %v2056_v50, %v2060_v25  ;;  %6118 = vmatprep.mubr.msk.bf16.mxu1 %vm10199_vm0, %v7425_v44  ;;  %v7436_v7 = vsel %vm10192_vm4, %v2088_v1, %v2092_v61  ;;  %v2100_v34 = vrot.slane %v2098_v11, 1  ;;  %v7448_v50 = vld [vmem:[%s10130_s5 + $0x28] sm:$0xff]  }
 0x28a   : > { %10339 = vst [vmem:[#allocation36_spill] sm:$0xff] %v7431_v18  ;;  %10340 = vst [vmem:[#allocation37_spill] sm:$0xff] %v7436_v7  ;;  %v2029_v59 = vpack.c.bf16 %v7365_v6, %v7362_v5  ;;  %v7456_v61 = vsel %vm1362_vm2, %v1398_v2, %v7381_v23  ;;  %6111 = vmatmul.mubr.msk.bf16.vlgmr.msra.gmra.mxu0 %vm10199_vm0, %v7431_v18  ;;  %6119 = vmatmul.mubr.msk.bf16.vlgmr.msra.gmra.mxu1 %vm10199_vm0, %v7436_v7  ;;  %v2070_v25 = vshrl.u32 %v2024_v20, 16  ;;  %v10347_v20 = vmov 0 }
 0x28b   : > { %10341 = vst [vmem:[#allocation38_spill] sm:$0xff] %v7443_v14  ;;  %10342 = vst [vmem:[#allocation39_spill] sm:$0xff] %v7452_v37  ;;  %v2030_v32 = vpack.c.bf16 %v7372_v52, %v7368_v31  ;;  %v10344_v29 = vmax.f32 %v7292_v36, 0.0  ;;  %6114 = vmatprep.mubr.msk.bf16.mxu0 %vm10199_vm0, %v7428_v22  ;;  %6143 = vmatpush3.bf16.msra.mxu1 %v7059_v17  ;;  %v7470_v62 = vsel %vm10192_vm4, %v2096_v30, %v2100_v34  ;;  %v10407_v22 = vld [vmem:[#allocation10_spill] sm:$0xff]  ;;  %v10480_v9 = vmov 0 }
 0x28c   : > { %10343 = vst [vmem:[#allocation40_spill] sm:$0xff] %v7456_v61  ;;  %10345 = vst [vmem:[#allocation41_spill] sm:$0xff] %v7470_v62  ;;  %v2102_v2 = vshrl.u32 %v2028_v15, 16  ;;  %v2106_v60 = vshll.u32 %v2029_v59, 16  ;;  %v10346_v4 = vand.u32 15, %v7081_v53  ;;  %v7481_v36 = vsel %vm1362_vm2, %v7381_v23, %v7383_v21  ;;  %6122 = vmatprep.mubr.msk.bf16.mxu1 %vm10199_vm0, %v7470_v62  ;;  %6211 = vmatpush3.bf16.msra.mxu0 %v7065_v19 }
 0x28d   : > { %v1408_v8 = vrot.slane %v10344_v29, 7  ;;  %10350 = vst [vmem:[#allocation43_spill] sm:$0xff] %v7481_v36  ;;  %v7486_v17 = vsel %vm1362_vm2, %v7383_v21, %v7385_v13  ;;  %v2072_v15 = vor.u32 %v2070_v25, %v2068_v63  ;;  %v2114_v55 = vshll.u32 %v2030_v32, 16  ;;  %6176 = vmatprep.subr.bf16.mxu1 %v7443_v14  ;;  %6278 = vmatprep.subr.bf16.mxu0 %v7448_v50 }
 0x28e   : > { %vm7474_vm6 = vcmp.ge.s32.totalorder %v10346_v4, 1  ;;  %10351 = vst [vmem:[#allocation44_spill] sm:$0xff] %v7486_v17  ;;  %v2104_v53 = vor.u32 %v2102_v2, %v2100_v34  ;;  %v2108_v35 = vrot.slane %v2106_v60, 1  ;;  %v2110_v16 = vshrl.u32 %v2029_v59, 16 }
 0x28f   : > { %v10348_v20 = vsel %vm7474_vm6, 4294967295, %v10347_v20  ;;  %v2031_v1 = vpack.c.bf16 %v7456_v61, %v7452_v37  ;;  %v1262_v23 = vadd.f32 %v7231_v48, %v7253_v51  ;;  %v1292_v21 = vmax.f32 %v7301_v10, 0.0 }
 0x290   : > { %10349 = vst [vmem:[#allocation42_spill] sm:$0xff] %v10348_v20  ;;  %v1293_v63 = vmax.f32 %v7304_v42, 0.0  ;;  %v3096_v19 = vsel %vm7410_vm5, %v7375_v39, 0.0  ;;  %v7504_v11 = vsel %vm1362_vm2, %v7385_v13, %v1406_v0  ;;  %v7507_v30 = vsel %vm1362_vm2, %v1406_v0, %v1408_v8 }
 0x291   : > { %10352 = vst [vmem:[#allocation45_spill] sm:$0xff] %v7507_v30  ;;  %v2112_v34 = vor.u32 %v2110_v16, %v2108_v35  ;;  %v2122_v59 = vshll.u32 %v2031_v1, 16  ;;  %v1263_v51 = vadd.f32 %v7231_v48, %v7256_v40  ;;  %v10353_v10 = vmax.f32 %v7295_v38, 0.0 }
 0x292   : > { %v2116_v42 = vrot.slane %v2114_v55, 1  ;;  %v7515_v29 = vpack.c.bf16 %v7486_v17, %v7481_v36  ;;  %v10354_v2 = vmax.f32 %v7298_v47, 0.0  ;;  %v7521_v0 = vsel %vm10192_vm4, %v2072_v15, %v7414_v46 }
 0x293   : > { %v1410_v25 = vrot.slane %v10353_v10, 7  ;;  %10355 = vst [vmem:[#allocation46_spill] sm:$0xff] %v7521_v0  ;;  %v7524_v60 = vsel %vm10192_vm4, %v2104_v53, %v2108_v35  ;;  %v3128_v40 = vpack.c.bf16 %v7394_v27, %v3096_v19  ;;  %v1226_v38 = vmul.f32 %v7211_v33, %v7214_v24  ;;  %6115 = vmatmul.mubr.msk.bf16.gmra.mxu0 %vm10199_vm0, %v7521_v0  ;;  %v10399_v0 = vld [vmem:[#allocation20_spill] sm:$0xff] }
 0x294   : > { %v1412_v13 = vrot.slane %v10354_v2, 7  ;;  %10356 = vst [vmem:[#allocation47_spill] sm:$0xff] %v7524_v60  ;;  %6123 = vmatmul.mubr.msk.bf16.gmra.mxu1 %vm10199_vm0, %v7524_v60  ;;  %v7534_v47 = vsel %vm10192_vm4, %v2112_v34, %v2116_v42  ;;  %v2124_v4 = vrot.slane %v2122_v59, 1  ;;  %v10358_v46 = vand.u32 15, %v7084_v54 }
 0x295   : > { %10357 = vst [vmem:[#allocation48_spill] sm:$0xff] %v7534_v47  ;;  %v10359_v15 = vmov 0  ;;  %v2033_v55 = vpack.c.bf16 %v7507_v30, %v7504_v11  ;;  %v1414_v33 = vrot.slane %v1292_v21, 7  ;;  %v1416_v24 = vrot.slane %v1293_v63, 7  ;;  %6212 = vmatprep.mubr.msk.bf16.mxu0 %vm10199_vm0, %v3128_v40  ;;  %6126 = vmatprep.mubr.msk.bf16.mxu1 %vm10199_vm0, %v7534_v47 }
 0x296   : > { %vm7538_vm7 = vcmp.ge.s32.totalorder %v10358_v46, 1  ;;  %v2118_v53 = vshrl.u32 %v2030_v32, 16  ;;  %v10362_v35 = vand.u32 15, %v7087_v57  ;;  %v10363_v16 = vmov 0 }
 0x297   : > { %v10360_v15 = vsel %vm7538_vm7, 4294967295, %v10359_v15  ;;  %v1465_v54 = vadd.s32 24, %v7068_v45  ;;  %v1294_v19 = vmax.f32 %v1262_v23, 0.0  ;;  %v1295_v34 = vmax.f32 %v1263_v51, 0.0 }
 0x298   : > { %10361 = vst [vmem:[#allocation49_spill] sm:$0xff] %v10360_v15  ;;  %vm7549_vm8 = vcmp.ge.s32.totalorder %v10362_v35, 1  ;;  %v2126_v59 = vshrl.u32 %v2031_v1, 16  ;;  %v2130_v21 = vshll.u32 %v7515_v29, 16  ;;  %v7556_v63 = vsel %vm1362_vm2, %v1408_v8, %v1410_v25 }
 0x299   : > { %v10364_v16 = vsel %vm7549_vm8, 4294967295, %v10363_v16  ;;  %v7559_v10 = vsel %vm1362_vm2, %v1410_v25, %v1412_v13  ;;  %v3098_v57 = vsel %vm7311_vm3, %v7322_v28, 0.0  ;;  %v2120_v32 = vor.u32 %v2118_v53, %v2116_v42 }
 0x29a   : > { %10365 = vst [vmem:[#allocation50_spill] sm:$0xff] %v10364_v16  ;;  %10366 = vst [vmem:[#allocation51_spill] sm:$0xff] %v7559_v10  ;;  %v1264_v2 = vadd.f32 %v7231_v48, %v1226_v38  ;;  %v3100_v23 = vsel %vm7474_vm6, %v7328_v26, 0.0  ;;  %v2128_v1 = vor.u32 %v2126_v59, %v2124_v4  ;;  %v2138_v51 = vshll.u32 %v2033_v55, 16 }
 0x29b   : > { %v7569_v40 = vsel %vm1362_vm2, %v1412_v13, %v1414_v33  ;;  %v7572_v8 = vsel %vm1362_vm2, %v1414_v33, %v1416_v24  ;;  %v10369_v25 = vand.u32 15, %v7090_v58  ;;  %v10370_v46 = vmov 0 }
 0x29c   : > { %10367 = vst [vmem:[#allocation52_spill] sm:$0xff] %v7569_v40  ;;  %10368 = vst [vmem:[#allocation53_spill] sm:$0xff] %v7572_v8  ;;  %v1505_v48 = vand.u32 15, %v7145_v43  ;;  %v1467_v42 = vadd.s32 40, %v7068_v45  ;;  %v3129_v38 = vpack.c.bf16 %v7325_v3, %v3098_v57  ;;  %v2132_v53 = vrot.slane %v2130_v21, 1  ;;  %v7594_v43 = vld [vmem:[%s10130_s5 + $0x38] sm:$0xff]  }
 0x29d   : > { %vm7576_vm9 = vcmp.ge.s32.totalorder %v10369_v25, 1  ;;  %v7585_v13 = vpack.c.bf16 %v7559_v10, %v7556_v63  ;;  %v1519_v35 = vand.u32 15, %v1465_v54  ;;  %v1418_v33 = vrot.slane %v1294_v19, 7  ;;  %v10374_v25 = vld [vmem:[#allocation16_spill] sm:$0xff]  ;;  %10375 = vst [vmem:[#allocation56_spill] sm:$0xff] %v7594_v43 }
 0x29e   : > { %v10371_v46 = vsel %vm7576_vm9, 4294967295, %v10370_v46  ;;  %v1420_v59 = vrot.slane %v1295_v34, 7  ;;  %v7588_v58 = vsel %vm10192_vm4, %v2120_v32, %v2124_v4  ;;  %v3130_v12 = vpack.c.bf16 %v10374_v25, %v3100_v23  ;;  %6213 = vmatmul.mubr.msk.bf16.vlgmr.msra.gmra.mxu0 %vm10199_vm0, %v3129_v38  ;;  %v10377_v21 = vld [vmem:[#allocation4_spill] sm:$0xff] }
 0x29f   : > { %10372 = vst [vmem:[#allocation54_spill] sm:$0xff] %v10371_v46  ;;  %10373 = vst [vmem:[#allocation55_spill] sm:$0xff] %v7588_v58  ;;  %v1296_v49 = vmax.f32 %v1264_v2, 0.0  ;;  %6127 = vmatmul.mubr.msk.bf16.gmra.mxu1 %vm10199_vm0, %v7588_v58  ;;  %v7600_v54 = vsel %vm10192_vm4, %v2128_v1, %v2132_v53  ;;  %v2140_v19 = vrot.slane %v2138_v51, 1  ;;  %v7604_v4 = vpack.c.bf16 %v7572_v8, %v7569_v40 }
 0x2a0   : > { %10376 = vst [vmem:[#allocation57_spill] sm:$0xff] %v7600_v54  ;;  %6216 = vmatprep.mubr.msk.bf16.mxu0 %vm10199_vm0, %v3130_v12  ;;  %6130 = vmatprep.mubr.msk.bf16.mxu1 %vm10199_vm0, %v7600_v54  ;;  %v2134_v34 = vshrl.u32 %v7515_v29, 16  ;;  %v10378_v57 = vand.u32 15, %v10377_v21  ;;  %v10379_v32 = vmov 0  ;;  %v1533_v2 = vand.u32 15, %v1467_v42  ;;  %v10388_v54 = vld [vmem:[#allocation19_spill] sm:$0xff] }
 0x2a1   : > { %v7617_v23 = vadd.s32 56, %v7068_v45  ;;  %v7620_v1 = vadd.s32 72, %v7068_v45  ;;  %v2142_v12 = vshrl.u32 %v2033_v55, 16  ;;  %v2146_v51 = vshll.u32 %v7585_v13, 16  ;;  %6279 = vmatpush3.bf16.msra.mxu0 %v7448_v50 }
 0x2a2   : > { %vm7612_vm10 = vcmp.ge.s32.totalorder %v10378_v57, 1  ;;  %v7625_v29 = vadd.s32 88, %v7068_v45  ;;  %v7628_v38 = vadd.s32 104, %v7068_v45  ;;  %v7631_v21 = vsel %vm1362_vm2, %v1416_v24, %v1418_v33  ;;  %v10387_v57 = vld [vmem:[#allocation17_spill] sm:$0xff]  ;;  %6346 = vmatprep.subr.bf16.mxu0 %v7594_v43 }
 0x2a3   : > { %v10380_v32 = vsel %vm7612_vm10, 4294967295, %v10379_v32  ;;  %10382 = vst [vmem:[#allocation58_spill] sm:$0xff] %v7620_v1  ;;  %10385 = vst [vmem:[#allocation61_spill] sm:$0xff] %v7631_v21  ;;  %v7634_v42 = vsel %vm1362_vm2, %v1418_v33, %v1420_v59  ;;  %v3102_v55 = vsel %vm7538_vm7, %v10387_v57, 0.0  ;;  %v2136_v18 = vor.u32 %v2134_v34, %v2132_v53 }
 0x2a4   : > { %10381 = vst [vmem:[#allocation4_spill] sm:$0xff] %v10380_v32  ;;  %10383 = vst [vmem:[#allocation59_spill] sm:$0xff] %v7625_v29  ;;  %v1422_v50 = vrot.slane %v1296_v49, 7  ;;  %v3104_v58 = vsel %vm7549_vm8, %v10388_v54, 0.0  ;;  %v2144_v47 = vor.u32 %v2142_v12, %v2140_v19  ;;  %v2154_v60 = vshll.u32 %v7604_v4, 16  ;;  %v10394_v49 = vld [vmem:[#allocation18_spill] sm:$0xff] }
 0x2a5   : > { %10384 = vst [vmem:[#allocation60_spill] sm:$0xff] %v7628_v38  ;;  %10386 = vst [vmem:[#allocation62_spill] sm:$0xff] %v7634_v42  ;;  %vm7644_vm12 = vcmp.lt.s32.totalorder %v1505_v48, 15  ;;  %v10389_v24 = vmov 0  ;;  %vm7648_vm13 = vcmp.lt.s32.totalorder %v1519_v35, 15  ;;  %v3131_v62 = vpack.c.bf16 %v10394_v49, %v3102_v55  ;;  %v10402_v35 = vld [vmem:[#allocation5_spill] sm:$0xff] }
 0x2a6   : > { %v10390_v24 = vsel %vm7644_vm12, 4294967295, %v10389_v24  ;;  %v2148_v7 = vrot.slane %v2146_v51, 1  ;;  %v7657_v12 = vpack.c.bf16 %v7634_v42, %v7631_v21  ;;  %vm7659_vm14 = vcmp.lt.s32.totalorder %v1533_v2, 15  ;;  %v10401_v51 = vld [vmem:[#allocation21_spill] sm:$0xff] }
 0x2a7   : > { %10391 = vst [vmem:[#allocation63_spill] sm:$0xff] %v10390_v24  ;;  %v10395_v48 = vmov 0  ;;  %v7665_v44 = vsel %vm10192_vm4, %v2136_v18, %v2140_v19  ;;  %v3132_v53 = vpack.c.bf16 %v10399_v0, %v3104_v58  ;;  %v7670_v55 = vadd.s32 120, %v7068_v45  ;;  %6217 = vmatmul.mubr.msk.bf16.gmra.mxu0 %vm10199_vm0, %v3131_v62 }
 0x2a8   : > { %v10396_v48 = vsel %vm7659_vm14, 4294967295, %v10395_v48  ;;  %10398 = vst [vmem:[#allocation65_spill] sm:$0xff] %v7665_v44  ;;  %6131 = vmatmul.mubr.msk.bf16.gmra.mxu1 %vm10199_vm0, %v7665_v44  ;;  %v7676_v2 = vsel %vm10192_vm4, %v2144_v47, %v2148_v7  ;;  %v3106_v18 = vsel %vm7576_vm9, %v10401_v51, 0.0  ;;  %v2156_v19 = vrot.slane %v2154_v60, 1  ;;  %v10412_v44 = vld [vmem:[#allocation24_spill] sm:$0xff] }
 0x2a9   : > { %10397 = vst [vmem:[#allocation64_spill] sm:$0xff] %v10396_v48  ;;  %10400 = vst [vmem:[#allocation66_spill] sm:$0xff] %v7676_v2  ;;  %v10403_v58 = vand.u32 15, %v10402_v35  ;;  %v10404_v34 = vmov 0  ;;  %v10408_v43 = vand.u32 15, %v10407_v22  ;;  %v10409_v62 = vmov 0  ;;  %6220 = vmatprep.mubr.msk.bf16.mxu0 %vm10199_vm0, %v3132_v53  ;;  %6134 = vmatprep.mubr.msk.bf16.mxu1 %vm10199_vm0, %v7676_v2 }
 0x2aa   : > { %v7695_v47 = vsel %vm1362_vm2, %v1422_v50, %v10412_v44  ;;  %v7698_v38 = vsel %vm1362_vm2, %v1420_v59, %v1422_v50  ;;  %v2150_v22 = vshrl.u32 %v7585_v13, 16  ;;  %v10420_v44 = vld [vmem:[#allocation11_spill] sm:$0xff]  ;;  %v10422_v59 = vmov 0  ;;  %v10426_v51 = vld [vmem:[#allocation12_spill] sm:$0xff] }
 0x2ab   : > { %vm7683_vm15 = vcmp.ge.s32.totalorder %v10403_v58, 1  ;;  %vm7689_vm1 = vcmp.ge.s32.totalorder %v10408_v43, 1  ;;  %10413 = vst [vmem:[#allocation24_spill] sm:$0xff] %v7695_v47  ;;  %10414 = vst [vmem:[#allocation67_spill] sm:$0xff] %v7698_v38  ;;  %v10415_v43 = vld [vmem:[#allocation6_spill] sm:$0xff]  ;;  %v10417_v58 = vmov 0 }
 0x2ac   : > { %v10405_v34 = vsel %vm7683_vm15, 4294967295, %v10404_v34  ;;  %v10410_v62 = vsel %vm7689_vm1, 4294967295, %v10409_v62  ;;  %v10416_v35 = vand.u32 15, %v10415_v43  ;;  %v10421_v29 = vand.u32 15, %v10420_v44 }
 0x2ad   : > { %10406 = vst [vmem:[#allocation5_spill] sm:$0xff] %v10405_v34  ;;  %10411 = vst [vmem:[#allocation10_spill] sm:$0xff] %v10410_v62  ;;  %v2158_v53 = vshrl.u32 %v7604_v4, 16  ;;  %v2162_v60 = vshll.u32 %v7657_v12, 16  ;;  %v2706_v13 = vrot.slane %v7394_v27, 2  ;;  %v2152_v1 = vor.u32 %v2150_v22, %v2148_v7  ;;  %v10435_v22 = vld [vmem:[#allocation13_spill] sm:$0xff] }
 0x2ae   : > { %vm7707_vm4 = vcmp.ge.s32.totalorder %v10416_v35, 1  ;;  %vm7713_vm11 = vcmp.ge.s32.totalorder %v10421_v29, 1  ;;  %v10425_v35 = vld [vmem:[#allocation22_spill] sm:$0xff]  ;;  %v10427_v47 = vand.u32 15, %v10426_v51  ;;  %v10428_v29 = vmov 0 }
 0x2af   : > { %v10418_v58 = vsel %vm7707_vm4, 4294967295, %v10417_v58  ;;  %v10423_v59 = vsel %vm7713_vm11, 4294967295, %v10422_v59  ;;  %v3133_v2 = vpack.c.bf16 %v10425_v35, %v3106_v18  ;;  %v2714_v44 = vrot.slane %v10374_v25, 2 }
 0x2b0   : > { %10419 = vst [vmem:[#allocation6_spill] sm:$0xff] %v10418_v58  ;;  %10424 = vst [vmem:[#allocation11_spill] sm:$0xff] %v10423_v59  ;;  %vm7725_vm2 = vcmp.ge.s32.totalorder %v10427_v47, 1  ;;  %v7731_v50 = vadd.s32 136, %v7068_v45  ;;  %v3108_v4 = vsel %vm7612_vm10, %v7354_v41, 0.0  ;;  %v2160_v14 = vor.u32 %v2158_v53, %v2156_v19 }
 0x2b1   : > { %v10429_v29 = vsel %vm7725_vm2, 4294967295, %v10428_v29  ;;  %v10431_v43 = vrot.slane %v7375_v39, 2  ;;  %vm10432_vm0 = vcmask 1045504   ;;  %v10433_v51 = vrot.slane %v7322_v28, 2 }
 0x2b2   : > { %10430 = vst [vmem:[#allocation12_spill] sm:$0xff] %v10429_v29  ;;  %vm10434_vm5 = vmmov %vm10432_vm0  ;;  %v2037_v47 = vpack.c.bf16 %v7698_v38, %v7698_v38  ;;  %v10436_v35 = vand.u32 15, %v10435_v22  ;;  %v10437_v0 = vmov 0  ;;  %v10443_v22 = vmov 0  ;;  %v10503_v29 = vld [vmem:[#allocation38_spill] sm:$0xff] }
 0x2b3   : > { %v2707_v7 = vsel %vm10432_vm0, %v10431_v43, %v2706_v13  ;;  %v2709_v18 = vsel %vm10434_vm5, %v2706_v13, %v10433_v51  ;;  %v10440_v43 = vrot.slane %v7328_v26, 2  ;;  %v2164_v13 = vrot.slane %v2162_v60, 1  ;;  %v10441_v51 = vld [vmem:[#allocation7_spill] sm:$0xff] }
 0x2b4   : > { %vm7746_vm9 = vcmp.ge.s32.totalorder %v10436_v35, 1  ;;  %v2801_v53 = vsel %vm7648_vm13, %v2709_v18, 0.0  ;;  %v3625_v41 = vsel %vm7644_vm12, %v2709_v18, 0.0  ;;  %v10442_v38 = vand.u32 15, %v10441_v51 }
 0x2b5   : > { %v10438_v0 = vsel %vm7746_vm9, 4294967295, %v10437_v0  ;;  %v7757_v32 = vsel %vm10432_vm0, %v10440_v43, %v2714_v44  ;;  %v7765_v35 = vpack.c.bf16 %v2801_v53, %v2707_v7  ;;  %v7767_v49 = vpack.c.bf16 %v3625_v41, %v2707_v7  ;;  %v10450_v43 = vld [vmem:[#allocation8_spill] sm:$0xff] }
 0x2b6   : > { %10439 = vst [vmem:[#allocation13_spill] sm:$0xff] %v10438_v0  ;;  %vm7761_vm5 = vcmp.ge.s32.totalorder %v10442_v38, 1  ;;  %v10224_v25 = vrot.slane %v10387_v57, 2  ;;  %vm10448_vm10 = vsmask.f32 7424  ;;  %v3134_v24 = vpack.c.bf16 %v7359_v56, %v3108_v4 }
 0x2b7   : > { %v10444_v22 = vsel %vm7761_vm5, 4294967295, %v10443_v22  ;;  %10446 = vst [vmem:[#allocation68_spill] sm:$0xff] %v7765_v35  ;;  %10447 = vst [vmem:[#allocation69_spill] sm:$0xff] %v7767_v49  ;;  %v7771_v18 = vsel %vm10448_vm10, %v2152_v1, %v2156_v19  ;;  %v10451_v46 = vand.u32 15, %v10450_v43  ;;  %vm10454_vm12 = vcmask 130048   ;;  %v10458_v1 = vld [vmem:[#allocation9_spill] sm:$0xff] }
 0x2b8   : > { %10445 = vst [vmem:[#allocation7_spill] sm:$0xff] %v10444_v22  ;;  %10449 = vst [vmem:[#allocation70_spill] sm:$0xff] %v7771_v18  ;;  %6221 = vmatmul.mubr.msk.bf16.gmra.mxu0 %vm10454_vm12, %v3133_v2  ;;  %v10459_v19 = vand.u32 15, %v10458_v1  ;;  %v10460_v4 = vmov 0  ;;  %vm10463_vm6 = vcmask 1045504   ;;  %v7800_v2 = vadd.s32 152, %v7068_v45 }
 0x2b9   : > { %vm7776_vm0 = vcmp.ge.s32.totalorder %v10451_v46, 1  ;;  %vm10455_vm8 = vmmov %vm10454_vm12  ;;  %v7796_v46 = vsel %vm10463_vm6, %v2714_v44, %v10224_v25  ;;  %v2170_v53 = vshll.u32 %v2037_v47, 16  ;;  %v1996_v25 = vsel %vm7689_vm1, %v7504_v11, 0.0 }
 0x2ba   : > { %6135 = vmatmul.mubr.msk.bf16.gmra.mxu1 %vm10455_vm8, %v7771_v18  ;;  %vm10456_vm7 = vmmov %vm10448_vm10  ;;  %vm7789_vm10 = vcmp.ge.s32.totalorder %v10459_v19, 1  ;;  %6224 = vmatprep.mubr.msk.bf16.mxu0 %vm10455_vm8, %v3134_v24  ;;  %v3629_v51 = vsel %vm7659_vm14, %v7796_v46, 0.0  ;;  %v4442_v44 = vsel %vm7648_vm13, %v7796_v46, 0.0  ;;  %v1485_v24 = vadd.s32 184, %v7068_v45 }
 0x2bb   : > { %v7785_v41 = vsel %vm10456_vm7, %v2160_v14, %v2164_v13  ;;  %v10461_v4 = vsel %vm7789_vm10, 4294967295, %v10460_v4  ;;  %vm10464_vm7 = vmmov %vm10455_vm8  ;;  %v2166_v14 = vshrl.u32 %v7657_v12, 16  ;;  %v7813_v43 = vpack.c.bf16 %v3629_v51, %v7757_v32 }
 0x2bc   : > { %10457 = vst [vmem:[#allocation8_spill] sm:$0xff] %v7785_v41  ;;  %10462 = vst [vmem:[#allocation9_spill] sm:$0xff] %v10461_v4  ;;  %6138 = vmatprep.mubr.msk.bf16.mxu1 %vm10464_vm7, %v7785_v41  ;;  %v7816_v1 = vpack.c.bf16 %v4442_v44, %v7757_v32  ;;  %v1487_v19 = vadd.s32 200, %v7068_v45  ;;  %v3110_v12 = vsel %vm7683_vm15, %v7362_v5, 0.0  ;;  %v1489_v51 = vadd.s32 216, %v7068_v45 }
 0x2bd   : > { %10465 = vst [vmem:[#allocation71_spill] sm:$0xff] %v7813_v43  ;;  %v7823_v47 = vor.u32 %v2166_v14, %v2164_v13  ;;  %v3112_v44 = vsel %vm7707_vm4, %v7368_v31, 0.0  ;;  %v7833_v7 = vpack.c.bf16 %v7507_v30, %v1996_v25  ;;  %v1998_v38 = vsel %vm7713_vm11, %v7556_v63, 0.0  ;;  %vm10477_vm8 = vmmov %vm10464_vm7 }
 0x2be   : > { %10466 = vst [vmem:[#allocation72_spill] sm:$0xff] %v7816_v1  ;;  %v1491_v13 = vadd.s32 232, %v7068_v45  ;;  %v2172_v14 = vrot.slane %v2170_v53, 1  ;;  %v10468_v1 = vand.u32 15, %v7617_v23  ;;  %v10469_v41 = vmov 0 }
 0x2bf   : > { %10467 = vst [vmem:[#allocation73_spill] sm:$0xff] %v7833_v7  ;;  %v7846_v18 = vpack.c.bf16 %v7559_v10, %v1998_v38  ;;  %v10473_v35 = vmov 0.0   ;;  %v1493_v25 = vadd.s32 248, %v7068_v45  ;;  %v3135_v7 = vpack.c.bf16 %v7365_v6, %v3110_v12 }
 0x2c0   : > { %vm7841_vm6 = vcmp.lt.s32.totalorder %v10468_v1, 15  ;;  %v7849_v43 = vrot.slane %v10473_v35, 2  ;;  %v2000_v53 = vsel %vm7725_vm2, %v7569_v40, 0.0  ;;  %v1659_v48 = vand.u32 15, %v1485_v24  ;;  %v10497_v35 = vld [vmem:[#allocation16_spill] sm:$0xff] }
 0x2c1   : > { %v10470_v41 = vsel %vm7841_vm6, 4294967295, %v10469_v41  ;;  %10472 = vst [vmem:[#allocation75_spill] sm:$0xff] %v7846_v18  ;;  %v1673_v23 = vand.u32 15, %v1487_v19  ;;  %vm10475_vm12 = vsmask.f32 7424  ;;  %v3136_v49 = vpack.c.bf16 %v7372_v52, %v3112_v44  ;;  %6225 = vmatmul.mubr.msk.bf16.gmra.mxu0 %vm10477_vm8, %v3135_v7 }
 0x2c2   : > { %10471 = vst [vmem:[#allocation74_spill] sm:$0xff] %v10470_v41  ;;  %10474 = vst [vmem:[#allocation76_spill] sm:$0xff] %v7849_v43  ;;  %v2173_v1 = vsel %vm10475_vm12, %v7823_v47, %v2172_v14  ;;  %v7860_v38 = vpack.c.bf16 %v7572_v8, %v2000_v53  ;;  %v7863_v18 = vadd.s32 168, %v7068_v45  ;;  %v2002_v24 = vsel %vm7746_vm9, %v7631_v21, 0.0 }
 0x2c3   : > { %6139 = vmatmul.mubr.msk.bf16.gmra.mxu1 %vm10464_vm7, %v2173_v1  ;;  %v1687_v12 = vand.u32 15, %v1489_v51  ;;  %v1701_v14 = vand.u32 15, %v1491_v13  ;;  %v1974_v44 = vsel %vm7311_vm3, %v7375_v39, 0.0  ;;  %vm10478_vm12 = vmmov %vm10464_vm7  ;;  %v6653_v45 = vmov 0.0|0.0   ;;  %v10485_v13 = vld [vmem:[#allocation31_spill] sm:$0xff] }
 0x2c4   : > { %10476 = vst [vmem:[#allocation77_spill] sm:$0xff] %v7860_v38  ;;  %6228 = vmatprep.mubr.msk.bf16.mxu0 %vm10478_vm12, %v3136_v49  ;;  %6144 = vmatprep.mubr.bf16.mxu1 %v6653_v45  ;;  %v3114_v7 = vsel %vm7761_vm5, %v7452_v37, 0.0  ;;  %v7879_v53 = vpack.c.bf16 %v7634_v42, %v2002_v24  ;;  %v1715_v1 = vand.u32 15, %v1493_v25  ;;  %v3116_v51 = vsel %vm7776_vm0, %v7481_v36, 0.0 }
 0x2c5   : > { %vm7885_vm8 = vcmp.lt.s32.totalorder %v1659_v48, 15  ;;  %vm7889_vm3 = vcmp.lt.s32.totalorder %v1673_v23, 15  ;;  %v10483_v49 = vmov 0  ;;  %vm10486_vm7 = vnez %v10348_v20 }
 0x2c6   : > { %10479 = vst [vmem:[#allocation78_spill] sm:$0xff] %v7879_v53  ;;  %v10481_v9 = vsel %vm7885_vm8, 4294967295, %v10480_v9  ;;  %v10484_v49 = vsel %vm7889_vm3, 4294967295, %v10483_v49  ;;  %v1976_v25 = vsel %vm10486_vm7, %v7322_v28, 0.0  ;;  %v3118_v24 = vsel %vm7789_vm10, %v7504_v11, 0.0 }
 0x2c7   : > { %10482 = vst [vmem:[#allocation79_spill] sm:$0xff] %v10481_v9  ;;  %vm10487_vm12 = vnez %v10360_v15  ;;  %v3137_v19 = vpack.c.bf16 %v7456_v61, %v3114_v7  ;;  %v2005_v23 = vpack.c.bf16 %v7394_v27, %v1974_v44  ;;  %v3120_v45 = vsel %vm7689_vm1, %v7556_v63, 0.0  ;;  %v10491_v27 = vld [vmem:[#allocation54_spill] sm:$0xff]  ;;  %v10517_v9 = vld [vmem:[#allocation67_spill] sm:$0xff] }
 0x2c8   : > { %v1978_v48 = vsel %vm10487_vm12, %v7328_v26, 0.0  ;;  %vm10488_vm14 = vnez %v10364_v16  ;;  %vm7911_vm7 = vcmp.lt.s32.totalorder %v1687_v12, 15  ;;  %v10489_v53 = vmov 0  ;;  %v10499_v15 = vld [vmem:[#allocation18_spill] sm:$0xff] }
 0x2c9   : > { %v1980_v20 = vsel %vm10488_vm14, %v10387_v57, 0.0  ;;  %v10490_v53 = vsel %vm7911_vm7, 4294967295, %v10489_v53  ;;  %v3138_v39 = vpack.c.bf16 %v7486_v17, %v3116_v51  ;;  %v3122_v7 = vsel %vm7713_vm11, %v7569_v40, 0.0 }
 0x2ca   : > { %vm10492_vm12 = vnez %v10491_v27  ;;  %vm7923_vm1 = vcmp.lt.s32.totalorder %v1701_v14, 15  ;;  %v10493_v38 = vmov 0  ;;  %vm7927_vm14 = vcmp.lt.s32.totalorder %v1715_v1, 15  ;;  %v7940_v14 = vld [vmem:[%s10130_s5 + $0x20] sm:$0xff]  }
 0x2cb   : > { %v1982_v44 = vsel %vm10492_vm12, %v10388_v54, 0.0  ;;  %v10494_v38 = vsel %vm7923_vm1, 4294967295, %v10493_v38  ;;  %v10495_v12 = vmov 0  ;;  %v2006_v51 = vpack.c.bf16 %v7325_v3, %v1976_v25  ;;  %10498 = vst [vmem:[#allocation31_spill] sm:$0xff] %v7940_v14 }
 0x2cc   : > { %v10496_v12 = vsel %vm7927_vm14, 4294967295, %v10495_v12  ;;  %v3139_v16 = vpack.c.bf16 %v7507_v30, %v3118_v24  ;;  %v2007_v43 = vpack.c.bf16 %v10497_v35, %v1978_v48  ;;  %v3124_v27 = vsel %vm7725_vm2, %v7631_v21, 0.0  ;;  %v10502_v24 = vld [vmem:[#allocation20_spill] sm:$0xff] }
 0x2cd   : > { %v3140_v1 = vpack.c.bf16 %v7559_v10, %v3120_v45  ;;  %v2008_v59 = vpack.c.bf16 %v10499_v15, %v1980_v20  ;;  %v2750_v62 = vrot.slane %v7507_v30, 2  ;;  %v2752_v25 = vrot.slane %v7556_v63, 2 }
 0x2ce   : > { %vm10500_vm12 = vcmask 130048   ;;  %v7949_v35 = vpack.c.bf16 %v7572_v8, %v3122_v7  ;;  %v7952_v48 = vpack.c.bf16 %v10502_v24, %v1982_v44  ;;  %v2805_v45 = vsel %vm7841_vm6, %v7796_v46, 0.0  ;;  %v10509_v46 = vld [vmem:[#allocation24_spill] sm:$0xff] }
 0x2cf   : > { %6229 = vmatmul.mubr.msk.bf16.gmra.mxu0 %vm10500_vm12, %v3137_v19  ;;  %vm10501_vm11 = vmmov %vm10500_vm12  ;;  %v2754_v20 = vrot.slane %v7559_v10, 2  ;;  %v7961_v19 = vpack.c.bf16 %v7634_v42, %v3124_v27  ;;  %v2756_v41 = vrot.slane %v7569_v40, 2  ;;  %v3618_v10 = vrot.slane %v10509_v46, 2 }
 0x2d0   : > { %6145 = vmatmul.mubr.msk.bf16.vlgmr.msra.gmra.mxu1 %vm10501_vm11, %v2005_v23  ;;  %vm10504_vm2 = vmmov %vm10501_vm11  ;;  %v10505_v23 = vrot.slane %v7504_v11, 2  ;;  %vm10506_vm11 = vcmask 1045504   ;;  %v2764_v0 = vrot.slane %v10517_v9, 2  ;;  %v10522_v4 = vrot.slane %v7325_v3, 2 }
 0x2d1   : > { %6177 = vmatpush3.bf16.msra.mxu1 %v10503_v29  ;;  %6232 = vmatprep.mubr.msk.bf16.mxu0 %vm10504_vm2, %v3138_v39  ;;  %vm10507_vm12 = vmmov %vm10506_vm11  ;;  %v7979_v29 = vpack.c.bf16 %v2805_v45, %v7757_v32  ;;  %v3126_v32 = vsel %vm7746_vm9, %v10517_v9, 0.0  ;;  %v2760_v45 = vrot.slane %v7631_v21, 2 }
 0x2d2   : > { %v7966_v7 = vsel %vm10506_vm11, %v10505_v23, %v2750_v62  ;;  %v7969_v44 = vsel %vm10507_vm12, %v2750_v62, %v2752_v25  ;;  %vm10508_vm6 = vmmov %vm10504_vm2  ;;  %6244 = vmatprep.subr.bf16.mxu1 %v7940_v14  ;;  %v10512_v62 = vld [vmem:[#allocation21_spill] sm:$0xff]  ;;  %v10513_v23 = vld [vmem:[#allocation4_spill] sm:$0xff]  ;;  %v2758_v14 = vrot.slane %v7572_v8, 2  ;;  %v10521_v8 = vrot.slane %v7328_v26, 2 }
 0x2d3   : > { %6148 = vmatprep.mubr.msk.bf16.mxu1 %vm10508_vm6, %v2006_v51  ;;  %v3647_v39 = vsel %vm7885_vm8, %v7969_v44, 0.0  ;;  %10510 = vst [vmem:[#allocation16_spill] sm:$0xff] %v7979_v29  ;;  %vm10511_vm2 = vmmov %vm10506_vm11  ;;  %vm10514_vm11 = vnez %v10513_v23  ;;  %v2762_v23 = vrot.slane %v7634_v42, 2  ;;  %v10518_v29 = vld [vmem:[#allocation23_spill] sm:$0xff]  ;;  %v1988_v26 = vsel %vm7707_vm4, %v7362_v5, 0.0 }
 0x2d4   : > { %v7982_v27 = vsel %vm10511_vm2, %v2752_v25, %v2754_v20  ;;  %v1984_v40 = vsel %vm10514_vm11, %v10512_v62, 0.0  ;;  %v7988_v51 = vpack.c.bf16 %v3647_v39, %v7966_v7  ;;  %vm10516_vm6 = vmmov %vm10511_vm2  ;;  %v1986_v39 = vsel %vm7683_vm15, %v10518_v29, 0.0 }
 0x2d5   : > { %v7991_v30 = vsel %vm10516_vm6, %v2754_v20, %v2756_v41  ;;  %vm10520_vm12 = vmmov %vm10511_vm2  ;;  %v8017_v21 = vsel %vm10511_vm2, %v10522_v4, %v10521_v8  ;;  %v8067_v22 = vpack.c.bf16 %v10509_v46, %v3126_v32  ;;  %v2823_v33 = vsel %vm7889_vm3, %v7969_v44, 0.0 }
 0x2d6   : > { %10515 = vst [vmem:[#allocation38_spill] sm:$0xff] %v7988_v51  ;;  %v3649_v25 = vsel %vm7889_vm3, %v7991_v30, 0.0  ;;  %v8009_v51 = vsel %vm10520_vm12, %v2756_v41, %v2758_v14  ;;  %vm10523_vm6 = vmmov %vm10511_vm2 }
 0x2d7   : > { %v8006_v20 = vpack.c.bf16 %v3649_v25, %v7982_v27  ;;  %v8020_v42 = vsel %vm10523_vm6, %v2758_v14, %v2760_v45  ;;  %vm10524_vm9 = vmmov %vm10511_vm2  ;;  %v10525_v25 = vrot.slane %v10485_v13, 2  ;;  %v8040_v14 = vsel %vm10511_vm2, %v2764_v0, %v3618_v10 }
 0x2d8   : > { %v8023_v34 = vsel %vm10524_vm9, %v2760_v45, %v2762_v23  ;;  %vm10526_vm15 = vmmov %vm10511_vm2  ;;  %v3651_v8 = vsel %vm7911_vm7, %v8020_v42, 0.0  ;;  %vm10528_vm9 = vcmask 130048   ;;  %v1990_v45 = vsel %vm7761_vm5, %v7368_v31, 0.0 }
 0x2d9   : > { %10519 = vst [vmem:[#allocation24_spill] sm:$0xff] %v8006_v20  ;;  %v8028_v41 = vsel %vm10526_vm15, %v3618_v10, %v10525_v25  ;;  %vm10527_vm12 = vmmov %vm10511_vm2  ;;  %6233 = vmatmul.mubr.msk.bf16.gmra.mxu0 %vm10528_vm9, %v3139_v16  ;;  %v8048_v25 = vpack.c.bf16 %v3651_v8, %v8009_v51  ;;  %v10533_v16 = vld [vmem:[#allocation22_spill] sm:$0xff]  ;;  %v8086_v32 = vpack.c.bf16 %v7372_v52, %v1990_v45  ;;  %v2827_v45 = vsel %vm7923_vm1, %v8020_v42, 0.0 }
 0x2da   : > { %v8037_v4 = vsel %vm10527_vm12, %v2762_v23, %v2764_v0  ;;  %vm10529_vm6 = vmmov %vm10528_vm9  ;;  %v3655_v0 = vsel %vm7927_vm14, %v8028_v41, 0.0  ;;  %v2010_v10 = vpack.c.bf16 %v10533_v16, %v1984_v40  ;;  %v8076_v40 = vpack.c.bf16 %v7365_v6, %v1988_v26 }
 0x2db   : > { %6149 = vmatmul.mubr.msk.bf16.gmra.mxu1 %vm10529_vm6, %v2007_v43  ;;  %10530 = vst [vmem:[#allocation67_spill] sm:$0xff] %v8048_v25  ;;  %v3653_v58 = vsel %vm7923_vm1, %v8037_v4, 0.0  ;;  %vm10531_vm15 = vmmov %vm10529_vm6  ;;  %v1645_v43 = vand.u32 15, %v7863_v18  ;;  %v8064_v8 = vpack.c.bf16 %v3655_v0, %v8040_v14  ;;  %v8070_v25 = vpack.c.bf16 %v7359_v56, %v1986_v39 }
 0x2dc   : > { %6236 = vmatprep.mubr.msk.bf16.mxu0 %vm10531_vm15, %v3140_v1  ;;  %vm10532_vm12 = vmmov %vm10529_vm6  ;;  %v8061_v23 = vpack.c.bf16 %v3653_v58, %v8023_v34  ;;  %v10536_v18 = vrot.slane %v7325_v3, 2  ;;  %v10537_v58 = vrot.slane %v7322_v28, 2  ;;  %v1992_v39 = vsel %vm7776_vm0, %v7452_v37, 0.0 }
 0x2dd   : > { %6152 = vmatprep.mubr.msk.bf16.mxu1 %vm10532_vm12, %v2008_v59  ;;  %10535 = vst [vmem:[#allocation81_spill] sm:$0xff] %v8064_v8  ;;  %v3627_v59 = vsel %vm7648_vm13, %v8017_v21, 0.0  ;;  %v8095_v26 = vpack.c.bf16 %v2823_v33, %v7966_v7  ;;  %v2825_v0 = vsel %vm7911_vm7, %v7991_v30, 0.0  ;;  %v8110_v3 = vpack.c.bf16 %v2827_v45, %v8009_v51  ;;  %vm10547_vm9 = vmmov %vm10529_vm6 }
 0x2de   : > { %10534 = vst [vmem:[#allocation80_spill] sm:$0xff] %v8061_v23  ;;  %v8083_v1 = vsel %vm10511_vm2, %v10537_v58, %v10536_v18  ;;  %v2829_v18 = vsel %vm7927_vm14, %v8037_v4, 0.0  ;;  %v8107_v58 = vpack.c.bf16 %v2825_v0, %v7982_v27  ;;  %v8117_v28 = vpack.c.bf16 %v10509_v46, %v10517_v9  ;;  %vm10556_vm2 = vmmov %vm10529_vm6 }
 0x2df   : > { %10538 = vst [vmem:[#allocation82_spill] sm:$0xff] %v8095_v26  ;;  %10540 = vst [vmem:[#allocation84_spill] sm:$0xff] %v8110_v3  ;;  %v8113_v33 = vpack.c.bf16 %v2829_v18, %v8023_v34  ;;  %v8120_v26 = vpack.c.bf16 %v3627_v59, %v8083_v1  ;;  %v8123_v8 = vpack.c.bf16 %v7456_v61, %v1992_v39  ;;  %v2718_v23 = vrot.slane %v10499_v15, 2  ;;  %v10548_v39 = vld [vmem:[#allocation59_spill] sm:$0xff] }
 0x2e0   : > { %10539 = vst [vmem:[#allocation83_spill] sm:$0xff] %v8107_v58  ;;  %10542 = vst [vmem:[#allocation86_spill] sm:$0xff] %v8117_v28  ;;  %v2720_v0 = vrot.slane %v10388_v54, 2  ;;  %v10543_v58 = vld [vmem:[#allocation58_spill] sm:$0xff]  ;;  %v2722_v18 = vrot.slane %v10502_v24, 2  ;;  %v2726_v59 = vrot.slane %v10533_v16, 2 }
 0x2e1   : > { %10541 = vst [vmem:[#allocation85_spill] sm:$0xff] %v8113_v33  ;;  %v10544_v45 = vand.u32 15, %v10543_v58  ;;  %v2724_v33 = vrot.slane %v10512_v62, 2  ;;  %v3400_v20 = vshll.u32 %v8117_v28, 16  ;;  %6237 = vmatmul.mubr.msk.bf16.gmra.mxu0 %vm10547_vm9, %v7949_v35  ;;  %v10549_v58 = vand.u32 15, %v10548_v39  ;;  %v10552_v54 = vld [vmem:[#allocation60_spill] sm:$0xff]  ;;  %vm10557_vm9 = vmmov %vm10556_vm2 }
 0x2e2   : > { %v2728_v24 = vrot.slane %v10518_v29, 2  ;;  %v10553_v62 = vand.u32 15, %v10552_v54  ;;  %v2730_v15 = vrot.slane %v7359_v56, 2  ;;  %v2732_v35 = vrot.slane %v7362_v5, 2  ;;  %6240 = vmatprep.mubr.msk.bf16.mxu0 %vm10556_vm2, %v7961_v19  ;;  %v10640_v29 = vld [vmem:[#allocation73_spill] sm:$0xff] }
 0x2e3   : > { %vm8129_vm13 = vcmp.lt.s32.totalorder %v10544_v45, 15  ;;  %6153 = vmatmul.mubr.msk.bf16.gmra.mxu1 %vm10529_vm6, %v7952_v48  ;;  %vm8143_vm15 = vcmp.lt.s32.totalorder %v10549_v58, 15  ;;  %v2734_v48 = vrot.slane %v7365_v6, 2  ;;  %v10558_v39 = vand.u32 15, %v7670_v55 }
 0x2e4   : > { %vm8150_vm12 = vcmp.lt.s32.totalorder %v10553_v62, 15  ;;  %6156 = vmatprep.mubr.msk.bf16.mxu1 %vm10557_vm9, %v2010_v10  ;;  %v2736_v54 = vrot.slane %v7368_v31, 2  ;;  %v10561_v62 = vand.u32 15, %v7731_v50  ;;  %v2738_v6 = vrot.slane %v7372_v52, 2 }
 0x2e5   : > { %vm8162_vm6 = vcmp.lt.s32.totalorder %v10558_v39, 15  ;;  %v2740_v19 = vrot.slane %v7452_v37, 2  ;;  %v8175_v5 = vrot.slane %v3400_v20, 1  ;;  %v10565_v55 = vrot.slane %v10387_v57, 2  ;;  %v10586_v57 = vld [vmem:[#allocation45_spill] sm:$0xff] }
 0x2e6   : > { %vm8169_vm5 = vcmp.lt.s32.totalorder %v10561_v62, 15  ;;  %vm10566_vm2 = vcmask 1045504   ;;  %v10568_v50 = vand.u32 15, %v7800_v2  ;;  %v2742_v52 = vrot.slane %v7456_v61, 2 }
 0x2e7   : > { %10564 = vst [vmem:[#allocation58_spill] sm:$0xff] %v8175_v5  ;;  %v8180_v10 = vsel %vm10566_vm2, %v10565_v55, %v2718_v23  ;;  %vm10567_vm9 = vmmov %vm10566_vm2  ;;  %v2744_v37 = vrot.slane %v7481_v36, 2  ;;  %vm8193_vm11 = vcmp.lt.s32.totalorder %v1645_v43, 15  ;;  %vm10575_vm1 = vsmask.f32 7424 }
 0x2e8   : > { %v8183_v39 = vsel %vm10567_vm9, %v2718_v23, %v2720_v0  ;;  %vm8187_vm4 = vcmp.lt.s32.totalorder %v10568_v50, 15  ;;  %vm10573_vm14 = vmmov %vm10566_vm2  ;;  %v8201_v23 = vsel %vm10566_vm2, %v2722_v18, %v2724_v33  ;;  %v8209_v50 = vsel %vm10575_vm1, %v7823_v47, %v8175_v5  ;;  %v10588_v5 = vld [vmem:[#allocation52_spill] sm:$0xff] }
 0x2e9   : > { %v8198_v55 = vsel %vm10573_vm14, %v2720_v0, %v2722_v18  ;;  %vm10574_vm9 = vmmov %vm10566_vm2  ;;  %10576 = vst [vmem:[#allocation59_spill] sm:$0xff] %v8209_v50  ;;  %v2746_v18 = vrot.slane %v7486_v17, 2  ;;  %v10587_v50 = vld [vmem:[#allocation51_spill] sm:$0xff] }
 0x2ea   : > { %v8204_v2 = vsel %vm10574_vm9, %v2724_v33, %v2726_v59  ;;  %vm10577_vm7 = vmmov %vm10566_vm2  ;;  %v8225_v33 = vsel %vm10566_vm2, %v2734_v48, %v2736_v54  ;;  %v10592_v17 = vld [vmem:[#allocation11_spill] sm:$0xff] }
 0x2eb   : > { %v8212_v61 = vsel %vm10577_vm7, %v2726_v59, %v2728_v24  ;;  %vm10578_vm3 = vmmov %vm10566_vm2 }
 0x2ec   : > { %v8215_v43 = vsel %vm10578_vm3, %v2728_v24, %v2730_v15  ;;  %vm10579_vm8 = vmmov %vm10566_vm2  ;;  %v2811_v3 = vsel %vm8150_vm12, %v8212_v61, 0.0 }
 0x2ed   : > { %v8218_v0 = vsel %vm10579_vm8, %v2730_v15, %v2732_v35  ;;  %vm10580_vm14 = vmmov %vm10566_vm2 }
 0x2ee   : > { %v8222_v31 = vsel %vm10580_vm14, %v2732_v35, %v2734_v48  ;;  %vm10581_vm9 = vmmov %vm10566_vm2  ;;  %v3942_v35 = vsel %vm7776_vm0, %v7504_v11, 0.0  ;;  %v3944_v48 = vsel %vm7789_vm10, %v7556_v63, 0.0  ;;  %vm10593_vm14 = vnez %v10592_v17 }
 0x2ef   : > { %v8228_v47 = vsel %vm10581_vm9, %v2736_v54, %v2738_v6  ;;  %vm10582_vm1 = vmmov %vm10566_vm2  ;;  %v8246_v54 = vpack.c.bf16 %v10586_v57, %v3942_v35  ;;  %vm10594_vm0 = vcmask 130048   ;;  %v10597_v57 = vld [vmem:[#allocation53_spill] sm:$0xff]  ;;  %v2813_v45 = vsel %vm8162_vm6, %v8218_v0, 0.0 }
 0x2f0   : > { %v8231_v59 = vsel %vm10582_vm1, %v2738_v6, %v2740_v19  ;;  %vm10583_vm7 = vmmov %vm10582_vm1  ;;  %v8249_v6 = vpack.c.bf16 %v10587_v50, %v3944_v48  ;;  %6241 = vmatmul.mubr.msk.bf16.gmra.mxu0 %vm10594_vm0, %v8067_v22  ;;  %v10598_v50 = vld [vmem:[#allocation62_spill] sm:$0xff]  ;;  %v10601_v48 = vld [vmem:[#allocation69_spill] sm:$0xff]  ;;  %v10604_v22 = vrot.slane %v7504_v11, 2  ;;  %v2837_v16 = vpack.c.bf16 %v2813_v45, %v8215_v43 }
 0x2f1   : > { %v8234_v24 = vsel %vm10583_vm7, %v2740_v19, %v2742_v52  ;;  %vm10584_vm3 = vmmov %vm10582_vm1  ;;  %v10589_v19 = vld [vmem:[#allocation10_spill] sm:$0xff]  ;;  %v2817_v58 = vsel %vm8187_vm4, %v8231_v59, 0.0 }
 0x2f2   : > { %v8237_v15 = vsel %vm10584_vm3, %v2742_v52, %v2744_v37  ;;  %vm10590_vm8 = vnez %v10589_v19  ;;  %v10591_v52 = vld [vmem:[#allocation61_spill] sm:$0xff]  ;;  %vm10595_vm2 = vmmov %vm10594_vm0  ;;  %v10610_v11 = vld [vmem:[#allocation74_spill] sm:$0xff] }
 0x2f3   : > { %v3946_v28 = vsel %vm10590_vm8, %v10588_v5, 0.0  ;;  %v3948_v36 = vsel %vm10593_vm14, %v10591_v52, 0.0  ;;  %6157 = vmatmul.mubr.msk.bf16.gmra.mxu1 %vm10595_vm2, %v8070_v25  ;;  %vm10596_vm9 = vmmov %vm10582_vm1  ;;  %v10599_v5 = vld [vmem:[#allocation12_spill] sm:$0xff]  ;;  %vm10611_vm2 = vnez %v10610_v11  ;;  %v3635_v11 = vsel %vm8143_vm15, %v8212_v61, 0.0 }
 0x2f4   : > { %v8262_v63 = vsel %vm10596_vm9, %v2744_v37, %v2746_v18  ;;  %v8265_v60 = vpack.c.bf16 %v10597_v57, %v3946_v28  ;;  %v8268_v35 = vpack.c.bf16 %v10598_v50, %v3948_v36  ;;  %vm10600_vm1 = vnez %v10599_v5  ;;  %vm10602_vm7 = vmmov %vm10594_vm0  ;;  %v10606_v36 = vld [vmem:[#allocation63_spill] sm:$0xff] }
 0x2f5   : > { %v3950_v17 = vsel %vm10600_vm1, %v10517_v9, 0.0  ;;  %6280 = vmatprep.mubr.msk.bf16.mxu0 %vm10602_vm7, %v10601_v48  ;;  %vm10603_vm3 = vmmov %vm10594_vm0  ;;  %vm10607_vm14 = vnez %v10606_v36  ;;  %v10608_v9 = vld [vmem:[#allocation64_spill] sm:$0xff]  ;;  %v4450_v5 = vsel %vm8143_vm15, %v8218_v0, 0.0  ;;  %vm10619_vm1 = vnez %v10484_v49 }
 0x2f6   : > { %6160 = vmatprep.mubr.msk.bf16.mxu1 %vm10603_vm3, %v8076_v40  ;;  %vm10605_vm8 = vmmov %vm10596_vm9  ;;  %v8283_v28 = vpack.c.bf16 %v10509_v46, %v3950_v17  ;;  %v4440_v25 = vsel %vm10607_vm14, %v8017_v21, 0.0  ;;  %vm10609_vm0 = vnez %v10608_v9  ;;  %v4448_v46 = vsel %vm8129_vm13, %v8212_v61, 0.0  ;;  %v10625_v49 = vld [vmem:[#allocation76_spill] sm:$0xff] }
 0x2f7   : > { %v8280_v37 = vsel %vm10605_vm8, %v2746_v18, %v10604_v22  ;;  %v4444_v19 = vsel %vm10609_vm0, %v8183_v39, 0.0  ;;  %v8292_v52 = vpack.c.bf16 %v4440_v25, %v8083_v1  ;;  %v4446_v18 = vsel %vm10611_vm2, %v8201_v23, 0.0 }
 0x2f8   : > { %v8295_v40 = vpack.c.bf16 %v4444_v19, %v8180_v10  ;;  %v8304_v57 = vpack.c.bf16 %v4446_v18, %v8198_v55  ;;  %v8307_v50 = vpack.c.bf16 %v4448_v46, %v8204_v2  ;;  %v4452_v17 = vsel %vm8150_vm12, %v8225_v33, 0.0 }
 0x2f9   : > { %v8316_v48 = vpack.c.bf16 %v4450_v5, %v8215_v43  ;;  %v8319_v22 = vpack.c.bf16 %v4452_v17, %v8222_v31  ;;  %v4454_v25 = vsel %vm8162_vm6, %v8231_v59, 0.0  ;;  %v4456_v19 = vsel %vm8169_vm5, %v8237_v15, 0.0 }
 0x2fa   : > { %10612 = vst [vmem:[#allocation60_spill] sm:$0xff] %v8307_v50  ;;  %v8328_v18 = vpack.c.bf16 %v4454_v25, %v8228_v47  ;;  %v8331_v46 = vpack.c.bf16 %v4456_v19, %v8234_v24  ;;  %v4458_v5 = vsel %vm8187_vm4, %v8280_v37, 0.0  ;;  %v4460_v17 = vsel %vm8193_vm11, %v7969_v44, 0.0  ;;  %v10617_v25 = vld [vmem:[#allocation79_spill] sm:$0xff] }
 0x2fb   : > { %10613 = vst [vmem:[#allocation9_spill] sm:$0xff] %v8316_v48  ;;  %10614 = vst [vmem:[#allocation45_spill] sm:$0xff] %v8319_v22  ;;  %v8340_v22 = vpack.c.bf16 %v4458_v5, %v8262_v63  ;;  %v8343_v48 = vpack.c.bf16 %v4460_v17, %v7966_v7  ;;  %vm10618_vm9 = vnez %v10617_v25  ;;  %v4464_v19 = vsel %vm10619_vm1, %v8020_v42, 0.0 }
 0x2fc   : > { %10615 = vst [vmem:[#allocation51_spill] sm:$0xff] %v8328_v18  ;;  %10616 = vst [vmem:[#allocation52_spill] sm:$0xff] %v8331_v46  ;;  %v4462_v18 = vsel %vm10618_vm9, %v7991_v30, 0.0  ;;  %v8355_v50 = vpack.c.bf16 %v4464_v19, %v8009_v51  ;;  %vm10620_vm7 = vnez %v10490_v53  ;;  %vm10621_vm3 = vnez %v10494_v38  ;;  %v10629_v51 = vld [vmem:[#allocation71_spill] sm:$0xff] }
 0x2fd   : > { %v8352_v46 = vpack.c.bf16 %v4462_v18, %v7982_v27  ;;  %v4466_v44 = vsel %vm10620_vm7, %v8037_v4, 0.0  ;;  %v4468_v7 = vsel %vm10621_vm3, %v8028_v41, 0.0  ;;  %vm10622_vm8 = vcmask 130048   ;;  %v10633_v41 = vld [vmem:[#allocation56_spill] sm:$0xff] }
 0x2fe   : > { %6281 = vmatmul.mubr.msk.bf16.vlgmr.msra.gmra.mxu0 %vm10622_vm8, %v8120_v26  ;;  %vm10623_vm9 = vmmov %vm10622_vm8  ;;  %v8368_v30 = vpack.c.bf16 %v4466_v44, %v8023_v34  ;;  %v8371_v42 = vpack.c.bf16 %v4468_v7, %v8040_v14  ;;  %v10626_v53 = vrot.slane %v10485_v13, 2  ;;  %vm10627_vm1 = vcmask 1045504   ;;  %v10634_v14 = vld [vmem:[#allocation43_spill] sm:$0xff]  ;;  %v10636_v18 = vld [vmem:[#allocation44_spill] sm:$0xff] }
 0x2ff   : > { %6161 = vmatmul.mubr.msk.bf16.gmra.mxu1 %vm10623_vm9, %v8086_v32  ;;  %vm10628_vm7 = vnez %v10496_v12  ;;  %vm10630_vm3 = vmmov %vm10622_vm8  ;;  %6347 = vmatpush3.bf16.msra.mxu0 %v10633_v41  ;;  %v3631_v4 = vsel %vm10611_vm2, %v8183_v39, 0.0  ;;  %v1994_v32 = vsel %vm7789_vm10, %v10634_v14, 0.0  ;;  %v10635_v12 = vmov 0.0  }
 0x300   : > { %10624 = vst [vmem:[#allocation10_spill] sm:$0xff] %v8371_v42  ;;  %v4437_v27 = vsel %vm10627_vm1, %v10626_v53, %v10625_v49  ;;  %v4470_v38 = vsel %vm10628_vm7, %v10625_v49, 0.0  ;;  %6284 = vmatprep.mubr.msk.bf16.mxu0 %vm10630_vm3, %v10629_v51  ;;  %vm10631_vm9 = vmmov %vm10630_vm3  ;;  %6414 = vmatprep.subr.mxu0 %v10635_v12  ;;  %v3633_v26 = vsel %vm8129_vm13, %v8201_v23, 0.0  ;;  %v2015_v5 = vpack.c.bf16 %v10636_v18, %v1994_v32  ;;  %v10643_v53 = vld [vmem:[#allocation75_spill] sm:$0xff] }
 0x301   : > { %6164 = vmatprep.mubr.msk.bf16.mxu1 %vm10631_vm9, %v8123_v8  ;;  %v8384_v34 = vpack.c.bf16 %v4470_v38, %v4437_v27  ;;  %v3659_v8 = vpack.c.bf16 %v3631_v4, %v8180_v10  ;;  %v3660_v17 = vpack.c.bf16 %v3633_v26, %v8198_v55  ;;  %vm10637_vm8 = vmmov %vm10630_vm3  ;;  %v3637_v19 = vsel %vm8150_vm12, %v8218_v0, 0.0  ;;  %v10646_v27 = vld [vmem:[#allocation77_spill] sm:$0xff]  ;;  %v10648_v38 = vld [vmem:[#allocation30_spill] sm:$0xff] }
 0x302   : > { %vm10638_vm1 = vmmov %vm10630_vm3  ;;  %v3661_v44 = vpack.c.bf16 %v3635_v11, %v8204_v2  ;;  %v3662_v7 = vpack.c.bf16 %v3637_v19, %v8215_v43  ;;  %v10649_v51 = vrot.slane %v10648_v38, 2  ;;  %v3639_v4 = vsel %vm8162_vm6, %v8225_v33, 0.0  ;;  %v10658_v38 = vld [vmem:[#allocation31_spill] sm:$0xff]  ;;  %v10679_v0 = vld [vmem:[#allocation46_spill] sm:$0xff] }
 0x303   : > { %10632 = vst [vmem:[#allocation61_spill] sm:$0xff] %v8384_v34  ;;  %vm10639_vm2 = vmmov %vm10638_vm1  ;;  %v3641_v32 = vsel %vm8169_vm5, %v8231_v59, 0.0  ;;  %v3643_v36 = vsel %vm8187_vm4, %v8237_v15, 0.0  ;;  %v3645_v11 = vsel %vm8193_vm11, %v8280_v37, 0.0  ;;  %v2815_v61 = vsel %vm8169_vm5, %v8225_v33, 0.0  ;;  %v10682_v33 = vld [vmem:[#allocation34_spill] sm:$0xff] }
 0x304   : > { %vm10641_vm10 = vmmov %vm10638_vm1  ;;  %v3665_v19 = vpack.c.bf16 %v3643_v36, %v8234_v24  ;;  %v2819_v56 = vsel %vm8193_vm11, %v8237_v15, 0.0  ;;  %vm10685_vm4 = vnez %v10617_v25  ;;  %v10686_v59 = vld [vmem:[#allocation37_spill] sm:$0xff]  ;;  %v10693_v15 = vld [vmem:[#allocation47_spill] sm:$0xff] }
 0x305   : > { %vm10642_vm7 = vmmov %vm10638_vm1  ;;  %v2840_v43 = vpack.c.bf16 %v2819_v56, %v8234_v24  ;;  %v2821_v62 = vsel %vm10685_vm4, %v8280_v37, 0.0  ;;  %v10691_v24 = vld [vmem:[#allocation82_spill] sm:$0xff]  ;;  %v10697_v37 = vld [vmem:[#allocation48_spill] sm:$0xff] }
 0x306   : > { %6285 = vmatmul.mubr.msk.bf16.gmra.mxu0 %vm10637_vm8, %v3659_v8  ;;  %vm10644_vm3 = vmmov %vm10638_vm1  ;;  %v3663_v8 = vpack.c.bf16 %v3639_v4, %v8222_v31  ;;  %v2809_v4 = vsel %vm8143_vm15, %v8201_v23, 0.0  ;;  %v10674_v23 = vld [vmem:[#allocation81_spill] sm:$0xff]  ;;  %v2841_v20 = vpack.c.bf16 %v2821_v62, %v8262_v63  ;;  %v10701_v25 = vld [vmem:[#allocation55_spill] sm:$0xff] }
 0x307   : > { %6165 = vmatmul.mubr.msk.bf16.gmra.mxu1 %vm10638_vm1, %v2015_v5  ;;  %6288 = vmatprep.mubr.msk.bf16.mxu0 %vm10639_vm2, %v3660_v17  ;;  %vm10645_vm9 = vmmov %vm10638_vm1  ;;  %v3664_v5 = vpack.c.bf16 %v3641_v32, %v8228_v47  ;;  %v10668_v32 = vld [vmem:[#allocation67_spill] sm:$0xff]  ;;  %v8543_v36 = vld [vmem:[%s10130_s5 + $0x40] sm:$0xff]  }
 0x308   : > { %6168 = vmatprep.mubr.msk.bf16.mxu1 %vm10641_vm10, %v10640_v29  ;;  %vm10647_vm8 = vmmov %vm10638_vm1  ;;  %vm10650_vm1 = vcmask 1045504   ;;  %v10651_v29 = vld [vmem:[#allocation78_spill] sm:$0xff] }
 0x309   : > { %v2705_v41 = vsel %vm10650_vm1, %v10625_v49, %v10649_v51  ;;  %vm10652_vm10 = vmmov %vm10639_vm2  ;;  %v10661_v51 = vld [vmem:[#allocation38_spill] sm:$0xff] }
 0x30a   : > { %v2799_v26 = vsel %vm10607_vm14, %v2705_v41, 0.0  ;;  %vm10655_vm14 = vmmov %vm10639_vm2  ;;  %v10663_v41 = vld [vmem:[#allocation16_spill] sm:$0xff] }
 0x30b   : > { %v2830_v17 = vpack.c.bf16 %v2799_v26, %v10625_v49  ;;  %v2803_v49 = vsel %vm10609_vm0, %v8017_v21, 0.0  ;;  %vm10660_vm0 = vmmov %vm10639_vm2  ;;  %v2807_v21 = vsel %vm8129_vm13, %v8183_v39, 0.0  ;;  %v2836_v39 = vpack.c.bf16 %v2811_v3, %v8204_v2  ;;  %v10671_v26 = vld [vmem:[#allocation80_spill] sm:$0xff]  ;;  %v10677_v2 = vld [vmem:[#allocation35_spill] sm:$0xff] }
 0x30c   : > { %v2834_v9 = vpack.c.bf16 %v2807_v21, %v8180_v10  ;;  %vm10662_vm1 = vmmov %vm10660_vm0  ;;  %v2835_v10 = vpack.c.bf16 %v2809_v4, %v8198_v55  ;;  %v2838_v55 = vpack.c.bf16 %v2815_v61, %v8222_v31  ;;  %v2839_v31 = vpack.c.bf16 %v2817_v58, %v8228_v47  ;;  %v10689_v47 = vld [vmem:[#allocation41_spill] sm:$0xff]  ;;  %v10721_v21 = vld [vmem:[#allocation58_spill] sm:$0xff] }
 0x30d   : > { %vm10669_vm13 = vmmov %vm10660_vm0 }
 0x30e   : > { %6289 = vmatmul.mubr.msk.bf16.gmra.mxu0 %vm10642_vm7, %v3661_v44  ;;  %vm10653_vm7 = vmmov %vm10639_vm2  ;;  %v6571_v44 = vld [vmem:[%s10130_s5 + $0x30] sm:$0xff]  }
 0x30f   : > { %6169 = vmatmul.mubr.msk.bf16.gmra.mxu1 %vm10644_vm3, %v10643_v53  ;;  %6292 = vmatprep.mubr.msk.bf16.mxu0 %vm10645_vm9, %v3662_v7  ;;  %vm10654_vm3 = vmmov %vm10639_vm2  ;;  %v3666_v7 = vpack.c.bf16 %v3645_v11, %v8262_v63  ;;  %v10656_v53 = vld [vmem:[#allocation68_spill] sm:$0xff]  ;;  %v10708_v11 = vld [vmem:[#allocation65_spill] sm:$0xff] }
 0x310   : > { %6172 = vmatprep.mubr.msk.bf16.mxu1 %vm10647_vm8, %v10646_v27  ;;  %vm10657_vm9 = vmmov %vm10639_vm2  ;;  %v2832_v27 = vpack.c.bf16 %v2803_v49, %v8083_v1  ;;  %v10665_v1 = vld [vmem:[#allocation24_spill] sm:$0xff]  ;;  %v10711_v49 = vld [vmem:[#allocation66_spill] sm:$0xff] }
 0x311   : > { %vm10659_vm8 = vmmov %vm10639_vm2  ;;  %v10699_v63 = vld [vmem:[#allocation84_spill] sm:$0xff] }
 0x312   : > { %vm10675_vm15 = vmmov %vm10660_vm0 }
 0x313   : > { %vm10676_vm12 = vmmov %vm10660_vm0 }
 0x314   : > { %vm10680_vm5 = vmmov %vm10660_vm0 }
 0x315   : > { %vm10681_vm6 = vmmov %vm10660_vm0 }
 0x316   : > { %6293 = vmatmul.mubr.msk.bf16.gmra.mxu0 %vm10639_vm2, %v3663_v8  ;;  %vm10664_vm2 = vmmov %vm10660_vm0  ;;  %v10695_v8 = vld [vmem:[#allocation83_spill] sm:$0xff] }
 0x317   : > { %6173 = vmatmul.mubr.msk.bf16.gmra.mxu1 %vm10652_vm10, %v10651_v29  ;;  %6296 = vmatprep.mubr.msk.bf16.mxu0 %vm10653_vm7, %v3664_v5  ;;  %vm10666_vm10 = vmmov %vm10660_vm0  ;;  %v10703_v5 = vld [vmem:[#allocation85_spill] sm:$0xff]  ;;  %v10706_v29 = vld [vmem:[#allocation36_spill] sm:$0xff] }
 0x318   : > { %6178 = vmatprep.mubr.msk.bf16.mxu1 %vm10654_vm3, %v2830_v17  ;;  %vm10667_vm7 = vmmov %vm10660_vm0  ;;  %v10705_v17 = vld [vmem:[#allocation57_spill] sm:$0xff] }
 0x319   : > { %vm10670_vm3 = vmmov %vm10660_vm0 }
 0x31a   : > { %vm10687_vm11 = vmmov %vm10660_vm0 }
 0x31b   : > { %vm10713_vm4 = vmmov %vm10660_vm0 }
 0x31e   : > { %6297 = vmatmul.mubr.msk.bf16.gmra.mxu0 %vm10655_vm14, %v3665_v19  ;;  %vm10672_vm14 = vmmov %vm10660_vm0  ;;  %v4219_v19 = vpack.c.bf16 %v10635_v12, %v10485_v13 }
 0x31f   : > { %6179 = vmatmul.mubr.msk.bf16.vlgmr.msra.gmra.mxu1 %vm10657_vm9, %v10656_v53  ;;  %6300 = vmatprep.mubr.msk.bf16.mxu0 %vm10659_vm8, %v3666_v7  ;;  %vm10673_vm9 = vmmov %vm10660_vm0  ;;  %v10714_v7 = vld [vmem:[#allocation70_spill] sm:$0xff]  ;;  %v10717_v53 = vld [vmem:[#allocation8_spill] sm:$0xff] }
 0x320   : > { %6245 = vmatpush3.bf16.msra.mxu1 %v10658_v38  ;;  %6182 = vmatprep.mubr.msk.bf16.mxu1 %vm10660_vm0, %v2832_v27  ;;  %vm10678_vm8 = vmmov %vm10660_vm0  ;;  %v4224_v38 = vshll.u32 %v4219_v19, 16 }
 0x321   : > { %6312 = vmatprep.subr.bf16.mxu1 %v6571_v44 }
 0x326   : > { %6301 = vmatmul.mubr.msk.bf16.gmra.mxu0 %vm10662_vm1, %v10661_v51  ;;  %vm10683_vm1 = vmmov %vm10660_vm0  ;;  %v4226_v51 = vrot.slane %v4224_v38, 1 }
 0x327   : > { %6183 = vmatmul.mubr.msk.bf16.gmra.mxu1 %vm10664_vm2, %v10663_v41  ;;  %6304 = vmatprep.mubr.msk.bf16.mxu0 %vm10666_vm10, %v10665_v1  ;;  %vm10684_vm2 = vmmov %vm10660_vm0  ;;  %v10722_v1 = vld [vmem:[#allocation59_spill] sm:$0xff] }
 0x328   : > { %6186 = vmatprep.mubr.msk.bf16.mxu1 %vm10667_vm7, %v2834_v9  ;;  %vm10688_vm10 = vmmov %vm10660_vm0 }
 0x329   : > { %vm10690_vm7 = vmmov %vm10660_vm0 }
 0x32e   : > { %6305 = vmatmul.mubr.msk.bf16.gmra.mxu0 %vm10669_vm13, %v10668_v32  ;;  %vm10692_vm13 = vmmov %vm10660_vm0 }
 0x32f   : > { %6187 = vmatmul.mubr.msk.bf16.gmra.mxu1 %vm10670_vm3, %v2835_v10  ;;  %6308 = vmatprep.mubr.msk.bf16.mxu0 %vm10672_vm14, %v10671_v26  ;;  %vm10694_vm3 = vmmov %vm10660_vm0  ;;  %v4228_v10 = vshrl.u32 %v4219_v19, 16 }
 0x330   : > { %6190 = vmatprep.mubr.msk.bf16.mxu1 %vm10673_vm9, %v2836_v39  ;;  %vm10696_vm14 = vmmov %vm10660_vm0 }
 0x331   : > { %vm10698_vm9 = vmmov %vm10660_vm0  ;;  %v4230_v26 = vor.u32 %v4228_v10, %v4226_v51 }
 0x336   : > { %6309 = vmatmul.mubr.msk.bf16.gmra.mxu0 %vm10675_vm15, %v10674_v23  ;;  %vm10700_vm15 = vmmov %vm10660_vm0  ;;  %v10728_v23 = vld [vmem:[#allocation3_spill] sm:$0xff] }
 0x337   : > { %6191 = vmatmul.mubr.msk.bf16.gmra.mxu1 %vm10676_vm12, %v2837_v16  ;;  %6348 = vmatprep.mubr.msk.bf16.mxu0 %vm10678_vm8, %v10677_v2  ;;  %vm10702_vm12 = vmmov %vm10660_vm0 }
 0x338   : > { %6194 = vmatprep.mubr.msk.bf16.mxu1 %vm10660_vm0, %v2838_v55  ;;  %vm10704_vm8 = vmmov %vm10660_vm0 }
 0x33e   : > { %6349 = vmatmul.mubr.msk.bf16.vlgmr.msra.gmra.mxu0 %vm10680_vm5, %v10679_v0  ;;  %vm10707_vm5 = vmmov %vm10660_vm0 }
 0x33f   : > { %6195 = vmatmul.mubr.msk.bf16.gmra.mxu1 %vm10681_vm6, %v2839_v31  ;;  %6352 = vmatprep.mubr.msk.bf16.mxu0 %vm10683_vm1, %v10682_v33  ;;  %vm10709_vm6 = vmmov %vm10660_vm0 }
 0x340   : > { %6198 = vmatprep.mubr.msk.bf16.mxu1 %vm10684_vm2, %v2840_v43  ;;  %vm10710_vm1 = vmmov %vm10660_vm0 }
 0x341   : > { %vm10712_vm2 = vmmov %vm10660_vm0 }
 0x346   : > { %6353 = vmatmul.mubr.msk.bf16.gmra.mxu0 %vm10687_vm11, %v10686_v59  ;;  %vm10715_vm11 = vmmov %vm10660_vm0 }
 0x347   : > { %6199 = vmatmul.mubr.msk.bf16.gmra.mxu1 %vm10688_vm10, %v2841_v20  ;;  %6356 = vmatprep.mubr.msk.bf16.mxu0 %vm10690_vm7, %v10689_v47  ;;  %vm10716_vm10 = vmmov %vm10660_vm0 }
 0x348   : > { %6202 = vmatprep.mubr.msk.bf16.mxu1 %vm10692_vm13, %v10691_v24  ;;  %vm10718_vm7 = vmmov %vm10660_vm0 }
 0x349   : > { %vm10719_vm13 = vmmov %vm10660_vm0 }
 0x34a   : > { %v8568_v41 = vpop.f32.mrf.mxu0  ;;  %v8572_v4 = vpop.f32.mrf.mxu1 }
 0x34c   : > { %v8581_v39 = vpop.f32.mrf.mxu0  ;;  %v8583_v32 = vpop.f32.mrf.mxu1 }
 0x34e   : > { %6357 = vmatmul.mubr.msk.bf16.gmra.mxu0 %vm10694_vm3, %v10693_v15  ;;  %vm10723_vm3 = vmmov %vm10660_vm0  ;;  %v8585_v45 = vpop.f32.mrf.mxu0  ;;  %v8587_v61 = vpop.f32.mrf.mxu1 }
 0x34f   : > { %6203 = vmatmul.mubr.msk.bf16.gmra.mxu1 %vm10696_vm14, %v10695_v8  ;;  %6360 = vmatprep.mubr.msk.bf16.mxu0 %vm10698_vm9, %v10697_v37  ;;  %vm10724_vm14 = vmmov %vm10660_vm0  ;;  %vm10725_vm9 = vsmask.f32 7424 }
 0x350   : > { %6206 = vmatprep.mubr.msk.bf16.mxu1 %vm10700_vm15, %v10699_v63  ;;  %vm10726_vm15 = vmmov %vm10660_vm0  ;;  %v8589_v16 = vpop.f32.mrf.mxu0  ;;  %v8591_v55 = vpop.f32.mrf.mxu1 }
 0x353   : > { %v8595_v58 = vpop.f32.mrf.mxu0 }
 0x354   : > { %v8598_v56 = vpop.f32.mrf.mxu1 }
 0x355   : > { %v8606_v31 = vpop.f32.mrf.mxu0 }
 0x356   : > { %6361 = vmatmul.mubr.msk.bf16.gmra.mxu0 %vm10702_vm12, %v10701_v25  ;;  %vm10727_vm12 = vmmov %vm10660_vm0  ;;  %v8608_v43 = vpop.f32.mrf.mxu1 }
 0x357   : > { %6207 = vmatmul.mubr.msk.bf16.gmra.mxu1 %vm10704_vm8, %v10703_v5  ;;  %6364 = vmatprep.mubr.msk.bf16.mxu0 %vm10660_vm0, %v10705_v17  ;;  %vm10729_vm8 = vmmov %vm10725_vm9 }
 0x358   : > { %6246 = vmatprep.mubr.msk.bf16.mxu1 %vm10707_vm5, %v10706_v29  ;;  %vm10730_vm5 = vmmov %vm10660_vm0 }
 0x35e   : > { %6365 = vmatmul.mubr.msk.bf16.gmra.mxu0 %vm10709_vm6, %v10708_v11  ;;  %vm10731_vm6 = vmmov %vm10660_vm0 }
 0x35f   : > { %6247 = vmatmul.mubr.msk.bf16.vlgmr.msra.gmra.mxu1 %vm10710_vm1, %v10677_v2  ;;  %6368 = vmatprep.mubr.msk.bf16.mxu0 %vm10712_vm2, %v10711_v49  ;;  %v4231_v2 = vsel %vm10729_vm8, %v4230_v26, %v10728_v23  ;;  %vm10732_vm1 = vmmov 0   ;;  %vm10734_vm2 = vmmov %vm10660_vm0 }
 0x360   : > { %6313 = vmatpush3.bf16.msra.mxu1 %v6571_v44  ;;  %6250 = vmatprep.mubr.msk.bf16.mxu1 %vm10713_vm4, %v10679_v0  ;;  %v10720_v44 = vld [vmem:[#allocation86_spill] sm:$0xff]  ;;  %v8610_v0 = vpop.f32.mrf.mxu0  ;;  %vm10735_vm4 = vmmov %vm10660_vm0 }
 0x361   : > { %6380 = vmatprep.subr.bf16.mxu1 %v8543_v36  ;;  %v3404_v27 = vshrl.u32 %v10720_v44, 16 }
 0x362   : > { %v8614_v62 = vpop.f32.mrf.mxu0 }
 0x363   : > { %v8566_v9 = vor.u32 %v3404_v27, %v10721_v21  ;;  %v3395_v27 = vpack.c.bf16 %v10485_v13, %v10485_v13 }
 0x365   : > { %v4227_v3 = vsel %vm10725_vm9, %v8566_v9, %v4226_v51  ;;  %vm10757_vm9 = vmmov %vm10660_vm0 }
 0x366   : > { %6369 = vmatmul.mubr.msk.bf16.gmra.mxu0 %vm10715_vm11, %v10714_v7  ;;  %vm10740_vm11 = vmmov %vm10660_vm0 }
 0x367   : > { %6251 = vmatmul.mubr.msk.bf16.gmra.mxu1 %vm10716_vm10, %v10682_v33  ;;  %6372 = vmatprep.mubr.msk.bf16.mxu0 %vm10718_vm7, %v10717_v53  ;;  %v8612_v33 = vpop.f32.mrf.mxu1  ;;  %vm10741_vm10 = vmmov %vm10660_vm0 }
 0x368   : > { %6254 = vmatprep.mubr.msk.bf16.mxu1 %vm10719_vm13, %v10686_v59  ;;  %v8618_v59 = vpop.f32.mrf.mxu0  ;;  %vm10746_vm7 = vmmov %vm10660_vm0 }
 0x369   : > { %v8616_v20 = vpop.f32.mrf.mxu1  ;;  %10733 = vst [vmem:[#allocation11_spill] sm:$0xff] %v8618_v59  ;;  %vm10747_vm13 = vmmov %vm10660_vm0  ;;  %v10773_v59 = vld [vmem:[#allocation21_spill] sm:$0xff] }
 0x36a   : > { %v8626_v24 = vpop.f32.mrf.mxu0 }
 0x36b   : > { %10736 = vst [vmem:[#allocation53_spill] sm:$0xff] %v8626_v24 }
 0x36c   : > { %v8630_v8 = vpop.f32.mrf.mxu0 }
 0x36d   : > { %10737 = vst [vmem:[#allocation62_spill] sm:$0xff] %v8630_v8 }
 0x36e   : > { %6373 = vmatmul.mubr.msk.bf16.gmra.mxu0 %vm10723_vm3, %v10722_v1  ;;  %v8634_v63 = vpop.f32.mrf.mxu0 }
 0x36f   : > { %6255 = vmatmul.mubr.msk.bf16.gmra.mxu1 %vm10724_vm14, %v10689_v47  ;;  %6376 = vmatprep.mubr.msk.bf16.mxu0 %vm10726_vm15, %v4227_v3  ;;  %v8620_v47 = vpop.f32.mrf.mxu1  ;;  %10738 = vst [vmem:[#allocation12_spill] sm:$0xff] %v8634_v63  ;;  %vm10754_vm14 = vmmov %vm10729_vm8 }
 0x370   : > { %6258 = vmatprep.mubr.msk.bf16.mxu1 %vm10727_vm12, %v10693_v15  ;;  %v8638_v5 = vpop.f32.mrf.mxu0  ;;  %vm10758_vm15 = vmmov %vm10660_vm0 }
 0x371   : > { %v8628_v15 = vpop.f32.mrf.mxu1  ;;  %10739 = vst [vmem:[#allocation69_spill] sm:$0xff] %v8638_v5  ;;  %vm10768_vm8 = vmmov %vm10660_vm0 }
 0x376   : > { %6377 = vmatmul.mubr.msk.bf16.gmra.mxu0 %vm10660_vm0, %v4231_v2  ;;  %v10750_v2 = vld [vmem:[#allocation14_spill] sm:$0xff] }
 0x377   : > { %6259 = vmatmul.mubr.msk.bf16.gmra.mxu1 %vm10730_vm5, %v10697_v37  ;;  %6418 = vmatprep.mubr.msk.f32.mxu0 %vm10732_vm1, %v10635_v12  ;;  %v8632_v37 = vpop.f32.mrf.mxu1 }
 0x378   : > { %6262 = vmatprep.mubr.msk.bf16.mxu1 %vm10731_vm6, %v10701_v25 }
 0x379   : > { %v8636_v25 = vpop.f32.mrf.mxu1 }
 0x37b   : > { %v8640_v29 = vpop.f32.mrf.mxu1 }
 0x37f   : > { %6263 = vmatmul.mubr.msk.bf16.gmra.mxu1 %vm10734_vm2, %v10705_v17  ;;  %v8646_v17 = vpop.f32.mrf.mxu0  ;;  %vm10779_vm2 = vmmov %vm10660_vm0 }
 0x380   : > { %6266 = vmatprep.mubr.msk.bf16.mxu1 %vm10735_vm4, %v10708_v11  ;;  %10742 = vst [vmem:[#allocation63_spill] sm:$0xff] %v8646_v17  ;;  %v8648_v11 = vpop.f32.mrf.mxu1  ;;  %vm10780_vm4 = vmmov %vm10660_vm0 }
 0x381   : > { %v8650_v19 = vpop.f32.mrf.mxu0 }
 0x382   : > { %10743 = vst [vmem:[#allocation64_spill] sm:$0xff] %v8650_v19  ;;  %v8652_v44 = vpop.f32.mrf.mxu1 }
 0x383   : > { %v8656_v38 = vpop.f32.mrf.mxu0 }
 0x384   : > { %10744 = vst [vmem:[#allocation74_spill] sm:$0xff] %v8656_v38  ;;  %v8658_v21 = vpop.f32.mrf.mxu1  ;;  %v10751_v38 = vld [vmem:[#allocation33_spill] sm:$0xff] }
 0x385   : > { %v8660_v51 = vpop.f32.mrf.mxu0  ;;  %vm10752_vm3 = vnez %v10751_v38 }
 0x386   : > { %10745 = vst [vmem:[#allocation79_spill] sm:$0xff] %v8660_v51  ;;  %v3922_v51 = vsel %vm10752_vm3, %v10750_v2, 0.0 }
 0x387   : > { %6267 = vmatmul.mubr.msk.bf16.gmra.mxu1 %vm10740_vm11, %v10711_v49  ;;  %v8662_v49 = vpop.f32.mrf.mxu1  ;;  %v8668_v3 = vpop.f32.mrf.mxu0 }
 0x388   : > { %6270 = vmatprep.mubr.msk.bf16.mxu1 %vm10741_vm10, %v10714_v7  ;;  %v3408_v7 = vshll.u32 %v3395_v27, 16  ;;  %10748 = vst [vmem:[#allocation76_spill] sm:$0xff] %v8668_v3  ;;  %v10755_v27 = vld [vmem:[#allocation15_spill] sm:$0xff] }
 0x389   : > { %v8670_v10 = vpop.f32.mrf.mxu1  ;;  %v8672_v26 = vpop.f32.mrf.mxu0  ;;  %v3953_v3 = vpack.c.bf16 %v10755_v27, %v3922_v51 }
 0x38a   : > { %10749 = vst [vmem:[#allocation71_spill] sm:$0xff] %v8672_v26  ;;  %v3410_v19 = vrot.slane %v3408_v7, 1  ;;  %v10761_v26 = vld [vmem:[#allocation17_spill] sm:$0xff] }
 0x38b   : > { %v8674_v23 = vpop.f32.mrf.mxu1  ;;  %v8679_v17 = vpop.f32.mrf.mxu0 }
 0x38c   : > { %10753 = vst [vmem:[#allocation56_spill] sm:$0xff] %v8679_v17 }
 0x38d   : > { %v8686_v5 = vpop.f32.mrf.mxu0 }
 0x38e   : > { %10756 = vst [vmem:[#allocation43_spill] sm:$0xff] %v8686_v5  ;;  %v10765_v5 = vld [vmem:[#allocation18_spill] sm:$0xff] }
 0x38f   : > { %6271 = vmatmul.mubr.msk.bf16.gmra.mxu1 %vm10746_vm7, %v10717_v53  ;;  %v8681_v53 = vpop.f32.mrf.mxu1  ;;  %v8692_v38 = vpop.f32.mrf.mxu0  ;;  %vm10791_vm7 = vmmov %vm10660_vm0 }
 0x390   : > { %6274 = vmatprep.mubr.msk.bf16.mxu1 %vm10747_vm13, %v10722_v1  ;;  %v3411_v1 = vsel %vm10754_vm14, %v8566_v9, %v3410_v19  ;;  %10759 = vst [vmem:[#allocation44_spill] sm:$0xff] %v8692_v38  ;;  %v10762_v9 = vld [vmem:[#allocation42_spill] sm:$0xff]  ;;  %v10767_v38 = vld [vmem:[#allocation32_spill] sm:$0xff]  ;;  %vm10792_vm13 = vmmov %vm10660_vm0 }
 0x391   : > { %v8688_v63 = vpop.f32.mrf.mxu1  ;;  %v8696_v2 = vpop.f32.mrf.mxu0  ;;  %vm10763_vm12 = vnez %v10762_v9 }
 0x392   : > { %10760 = vst [vmem:[#allocation73_spill] sm:$0xff] %v8696_v2  ;;  %v3926_v19 = vsel %vm10763_vm12, %v10761_v26, 0.0 }
 0x393   : > { %v8694_v7 = vpop.f32.mrf.mxu1  ;;  %v8703_v51 = vpop.f32.mrf.mxu0 }
 0x394   : > { %10764 = vst [vmem:[#allocation75_spill] sm:$0xff] %v8703_v51 }
 0x395   : > { %v8698_v17 = vpop.f32.mrf.mxu1  ;;  %v8708_v8 = vpop.f32.mrf.mxu0 }
 0x396   : > { %10766 = vst [vmem:[#allocation77_spill] sm:$0xff] %v8708_v8 }
 0x397   : > { %6275 = vmatmul.mubr.msk.bf16.gmra.mxu1 %vm10757_vm9, %v3411_v1  ;;  %v8705_v27 = vpop.f32.mrf.mxu1  ;;  %v3955_v1 = vpack.c.bf16 %v10765_v5, %v3926_v19  ;;  %v8717_v9 = vpop.f32.mrf.mxu0  ;;  %v10770_v5 = vld [vmem:[#allocation19_spill] sm:$0xff]  ;;  %v10771_v19 = vld [vmem:[#allocation49_spill] sm:$0xff]  ;;  %vm10802_vm9 = vmmov %vm10660_vm0 }
 0x398   : > { %6314 = vmatprep.mubr.msk.bf16.mxu1 %vm10758_vm15, %v3953_v3  ;;  %10769 = vst [vmem:[#allocation30_spill] sm:$0xff] %v8717_v9  ;;  %vm10772_vm5 = vnez %v10771_v19  ;;  %vm10803_vm15 = vmmov %vm10660_vm0 }
 0x399   : > { %v6146_v3 = vpop.f32.mrf.mxu1  ;;  %v3928_v8 = vsel %vm10772_vm5, %v10770_v5, 0.0  ;;  %v8732_v42 = vpop.f32.mrf.mxu0  ;;  %vm10807_vm5 = vmmov %vm10660_vm0 }
 0x39a   : > { %v8713_v2 = vadd.f32 %v6146_v3, %v8568_v41  ;;  %10777 = vst [vmem:[#allocation78_spill] sm:$0xff] %v8732_v42 }
 0x39b   : > { %v2476_v26 = vpop.f32.mrf.mxu1 }
 0x39c   : > { %v8720_v51 = vadd.f32 %v2476_v26, %v8581_v39  ;;  %v10778_v26 = vld [vmem:[#allocation22_spill] sm:$0xff] }
 0x39d   : > { %v6147_v24 = vpop.f32.mrf.mxu1 }
 0x39e   : > { %v8729_v3 = vadd.f32 %v6147_v24, %v8585_v45 }
 0x39f   : > { %6315 = vmatmul.mubr.msk.bf16.vlgmr.msra.gmra.mxu1 %vm10768_vm8, %v10767_v38  ;;  %v10774_v38 = vld [vmem:[#allocation50_spill] sm:$0xff]  ;;  %vm10806_vm8 = vmmov %vm10660_vm0 }
 0x3a0   : > { %6381 = vmatpush3.bf16.msra.mxu1 %v8543_v36  ;;  %6318 = vmatprep.mubr.msk.bf16.mxu1 %vm10660_vm0, %v3955_v1  ;;  %vm10775_vm6 = vnez %v10774_v38  ;;  %v2479_v36 = vpop.f32.mrf.mxu1  ;;  %v10776_v1 = vld [vmem:[#allocation20_spill] sm:$0xff]  ;;  %v10783_v38 = vld [vmem:[#allocation54_spill] sm:$0xff] }
 0x3a1   : > { %v3930_v41 = vsel %vm10775_vm6, %v10773_v59, 0.0  ;;  %v3956_v34 = vpack.c.bf16 %v10776_v1, %v3928_v8  ;;  %v8735_v39 = vadd.f32 %v2479_v36, %v8589_v16  ;;  %v8743_v59 = vpop.f32.mrf.mxu0  ;;  %v10782_v8 = vld [vmem:[#allocation23_spill] sm:$0xff]  ;;  %vm10784_vm11 = vnez %v10783_v38  ;;  %v10786_v1 = vld [vmem:[#allocation4_spill] sm:$0xff]  ;;  %vm10808_vm6 = vmmov %vm10660_vm0 }
 0x3a2   : > { %v3957_v9 = vpack.c.bf16 %v10778_v26, %v3930_v41  ;;  %v6150_v19 = vpop.f32.mrf.mxu1  ;;  %10781 = vst [vmem:[#allocation68_spill] sm:$0xff] %v8743_v59  ;;  %v3932_v16 = vsel %vm10784_vm11, %v10782_v8, 0.0  ;;  %v10785_v41 = vld [vmem:[#allocation26_spill] sm:$0xff]  ;;  %vm10787_vm10 = vnez %v10786_v1  ;;  %v10795_v1 = vld [vmem:[#allocation5_spill] sm:$0xff] }
 0x3a3   : > { %v8740_v5 = vadd.f32 %v6150_v19, %v8595_v58  ;;  %v8758_v42 = vpop.f32.mrf.mxu0  ;;  %vm10796_vm3 = vnez %v10795_v1 }
 0x3a4   : > { %v2492_v45 = vpop.f32.mrf.mxu1  ;;  %10789 = vst [vmem:[#allocation31_spill] sm:$0xff] %v8758_v42 }
 0x3a5   : > { %v8746_v24 = vadd.f32 %v2492_v45, %v8606_v31  ;;  %v10790_v45 = vld [vmem:[#allocation27_spill] sm:$0xff] }
 0x3a6   : > { %v6151_v36 = vpop.f32.mrf.mxu1 }
 0x3a7   : > { %6319 = vmatmul.mubr.msk.bf16.gmra.mxu1 %vm10779_vm2, %v3956_v34  ;;  %v3934_v34 = vsel %vm10787_vm10, %v10785_v41, 0.0  ;;  %v8755_v58 = vadd.f32 %v6151_v36, %v8610_v0  ;;  %v8769_v36 = vpop.f32.mrf.mxu0  ;;  %v10794_v41 = vld [vmem:[#allocation28_spill] sm:$0xff]  ;;  %vm10809_vm2 = vmmov %vm10660_vm0 }
 0x3a8   : > { %6322 = vmatprep.mubr.msk.bf16.mxu1 %vm10780_vm4, %v3957_v9  ;;  %v2495_v26 = vpop.f32.mrf.mxu1  ;;  %v10788_v9 = vld [vmem:[#allocation25_spill] sm:$0xff]  ;;  %v3959_v59 = vpack.c.bf16 %v10790_v45, %v3934_v34  ;;  %10793 = vst [vmem:[#allocation38_spill] sm:$0xff] %v8769_v36  ;;  %v10797_v34 = vld [vmem:[#allocation39_spill] sm:$0xff]  ;;  %vm10810_vm4 = vmmov %vm10660_vm0 }
 0x3a9   : > { %v3958_v19 = vpack.c.bf16 %v10788_v9, %v3932_v16  ;;  %v8761_v31 = vadd.f32 %v2495_v26, %v8614_v62  ;;  %v3936_v62 = vsel %vm10796_vm3, %v10794_v41, 0.0  ;;  %v10798_v9 = vld [vmem:[#allocation6_spill] sm:$0xff]  ;;  %v8784_v42 = vpop.f32.mrf.mxu0  ;;  %vm10813_vm10 = vmmov %vm10660_vm0 }
 0x3aa   : > { %v6154_v38 = vpop.f32.mrf.mxu1  ;;  %vm10799_vm14 = vnez %v10798_v9  ;;  %vm10817_vm3 = vmmov %vm10660_vm0 }
 0x3ab   : > { %v8766_v8 = vadd.f32 %v6154_v38, %v8572_v4 }
 0x3ac   : > { %v2508_v0 = vpop.f32.mrf.mxu1 }
 0x3ad   : > { %v8772_v16 = vadd.f32 %v2508_v0, %v8583_v32  ;;  %v10801_v0 = vld [vmem:[#allocation40_spill] sm:$0xff] }
 0x3ae   : > { %v6155_v26 = vpop.f32.mrf.mxu1 }
 0x3af   : > { %6323 = vmatmul.mubr.msk.bf16.gmra.mxu1 %vm10791_vm7, %v3958_v19  ;;  %v3938_v19 = vsel %vm10799_vm14, %v10797_v34, 0.0  ;;  %v8781_v4 = vadd.f32 %v6155_v26, %v8587_v61  ;;  %v8795_v26 = vpop.f32.mrf.mxu0  ;;  %v10804_v34 = vld [vmem:[#allocation7_spill] sm:$0xff]  ;;  %vm10814_vm7 = vmmov %vm10660_vm0 }
 0x3b0   : > { %6326 = vmatprep.mubr.msk.bf16.mxu1 %vm10792_vm13, %v3959_v59  ;;  %v2511_v45 = vpop.f32.mrf.mxu1  ;;  %v10800_v59 = vld [vmem:[#allocation29_spill] sm:$0xff]  ;;  %v3961_v36 = vpack.c.bf16 %v10801_v0, %v3938_v19  ;;  %vm10805_vm12 = vnez %v10804_v34  ;;  %vm10816_vm13 = vmmov %vm10660_vm0 }
 0x3b1   : > { %v3960_v38 = vpack.c.bf16 %v10800_v59, %v3936_v62  ;;  %v8787_v32 = vadd.f32 %v2511_v45, %v8591_v55  ;;  %v3940_v55 = vsel %vm10805_vm12, %v10634_v14, 0.0  ;;  %v8807_v59 = vpop.f32.mrf.mxu0  ;;  %vm10818_vm14 = vmmov %vm10660_vm0 }
 0x3b2   : > { %vm10825_vm12 = vmmov %vm10660_vm0 }
 0x3b3   : > { %v6158_v1 = vpop.f32.mrf.mxu1 }
 0x3b4   : > { %v8792_v41 = vadd.f32 %v6158_v1, %v8598_v56  ;;  %v3962_v56 = vpack.c.bf16 %v10636_v18, %v3940_v55 }
 0x3b5   : > { %v2524_v61 = vpop.f32.mrf.mxu1 }
 0x3b6   : > { %v8798_v62 = vadd.f32 %v2524_v61, %v8608_v43 }
 0x3b7   : > { %6327 = vmatmul.mubr.msk.bf16.gmra.mxu1 %vm10802_vm9, %v3960_v38  ;;  %v6159_v9 = vpop.f32.mrf.mxu1  ;;  %vm10820_vm9 = vmmov %vm10660_vm0 }
 0x3b8   : > { %6330 = vmatprep.mubr.msk.bf16.mxu1 %vm10803_vm15, %v3961_v36  ;;  %v8804_v19 = vadd.f32 %v6159_v9, %v8612_v33  ;;  %v8818_v33 = vpop.f32.mrf.mxu0  ;;  %vm10823_vm15 = vmmov %vm10660_vm0 }
 0x3b9   : > { %v2527_v45 = vpop.f32.mrf.mxu1 }
 0x3ba   : > { %v8810_v36 = vadd.f32 %v2527_v45, %v8616_v20  ;;  %v8826_v61 = vpop.f32.mrf.mxu0 }
 0x3bc   : > { %v8838_v55 = vpop.f32.mrf.mxu0 }
 0x3bf   : > { %v6162_v38 = vpop.f32.mrf.mxu1  ;;  %6331 = vmatmul.mubr.msk.bf16.gmra.mxu1 %vm10806_vm8, %v3962_v56  ;;  %v8846_v56 = vpop.f32.mrf.mxu0  ;;  %vm10828_vm8 = vmmov %vm10660_vm0 }
 0x3c0   : > { %v8814_v43 = vadd.f32 %v6162_v38, %v8620_v47  ;;  %6334 = vmatprep.mubr.msk.bf16.mxu1 %vm10660_vm0, %v8246_v54 }
 0x3c1   : > { %v2540_v14 = vpop.f32.mrf.mxu1  ;;  %v8858_v38 = vpop.f32.mrf.mxu0 }
 0x3c2   : > { %v8821_v0 = vadd.f32 %v2540_v14, %v8628_v15  ;;  %v10811_v14 = vld [vmem:[#allocation13_spill] sm:$0xff] }
 0x3c3   : > { %v6163_v18 = vpop.f32.mrf.mxu1  ;;  %vm10812_vm11 = vnez %v10811_v14 }
 0x3c4   : > { %v8824_v1 = vadd.f32 %v6163_v18, %v8632_v37 }
 0x3c5   : > { %v2543_v20 = vpop.f32.mrf.mxu1 }
 0x3c6   : > { %v8829_v34 = vadd.f32 %v2543_v20, %v8636_v25 }
 0x3c7   : > { %v6166_v47 = vpop.f32.mrf.mxu1  ;;  %6335 = vmatmul.mubr.msk.bf16.gmra.mxu1 %vm10807_vm5, %v8249_v6  ;;  %vm10831_vm5 = vmmov %vm10660_vm0 }
 0x3c8   : > { %v8834_v54 = vadd.f32 %v6166_v47, %v8640_v29  ;;  %6338 = vmatprep.mubr.msk.bf16.mxu1 %vm10808_vm6, %v8265_v60  ;;  %v8870_v47 = vpop.f32.mrf.mxu0  ;;  %vm10832_vm6 = vmmov %vm10660_vm0 }
 0x3c9   : > { %v2556_v15 = vpop.f32.mrf.mxu1 }
 0x3ca   : > { %v8841_v37 = vadd.f32 %v2556_v15, %v8648_v11 }
 0x3cb   : > { %v6167_v9 = vpop.f32.mrf.mxu1 }
 0x3cc   : > { %v8844_v25 = vadd.f32 %v6167_v9, %v8652_v44 }
 0x3cd   : > { %v2559_v45 = vpop.f32.mrf.mxu1 }
 0x3ce   : > { %v8849_v6 = vadd.f32 %v2559_v45, %v8658_v21  ;;  %v3952_v21 = vsel %vm10812_vm11, %v10485_v13, 0.0  ;;  %vm10839_vm11 = vmmov %vm10660_vm0 }
 0x3cf   : > { %v6170_v29 = vpop.f32.mrf.mxu1  ;;  %6339 = vmatmul.mubr.msk.bf16.gmra.mxu1 %vm10809_vm2, %v8268_v35  ;;  %vm10835_vm2 = vmmov %vm10660_vm0 }
 0x3d0   : > { %v8854_v60 = vadd.f32 %v6170_v29, %v8662_v49  ;;  %6342 = vmatprep.mubr.msk.bf16.mxu1 %vm10810_vm4, %v8283_v28  ;;  %v3968_v49 = vpack.c.bf16 %v10635_v12, %v3952_v21  ;;  %v10815_v21 = vld [vmem:[#allocation72_spill] sm:$0xff]  ;;  %vm10836_vm4 = vmmov %vm10660_vm0 }
 0x3d1   : > { %v2572_v11 = vpop.f32.mrf.mxu1 }
 0x3d2   : > { %v8861_v44 = vadd.f32 %v2572_v11, %v8670_v10 }
 0x3d3   : > { %v6171_v18 = vpop.f32.mrf.mxu1 }
 0x3d4   : > { %v8867_v20 = vadd.f32 %v6171_v18, %v8674_v23  ;;  %v8881_v23 = vpop.f32.mrf.mxu0 }
 0x3d5   : > { %v2575_v35 = vpop.f32.mrf.mxu1 }
 0x3d6   : > { %v8873_v28 = vadd.f32 %v2575_v35, %v8681_v53  ;;  %v8889_v11 = vpop.f32.mrf.mxu0 }
 0x3d7   : > { %v6174_v15 = vpop.f32.mrf.mxu1  ;;  %6343 = vmatmul.mubr.msk.bf16.gmra.mxu1 %vm10813_vm10, %v3968_v49  ;;  %vm10841_vm10 = vmmov %vm10660_vm0 }
 0x3d8   : > { %v8877_v10 = vadd.f32 %v6174_v15, %v8688_v63  ;;  %6382 = vmatprep.mubr.msk.bf16.mxu1 %vm10814_vm7, %v8292_v52  ;;  %v8901_v18 = vpop.f32.mrf.mxu0  ;;  %vm10845_vm7 = vmmov %vm10660_vm0 }
 0x3d9   : > { %v2588_v13 = vpop.f32.mrf.mxu1 }
 0x3da   : > { %v8884_v9 = vadd.f32 %v2588_v13, %v8694_v7  ;;  %v8909_v15 = vpop.f32.mrf.mxu0 }
 0x3db   : > { %v6175_v45 = vpop.f32.mrf.mxu1 }
 0x3dc   : > { %v8887_v29 = vadd.f32 %v6175_v45, %v8698_v17  ;;  %v10819_v45 = vld [vmem:[#allocation60_spill] sm:$0xff] }
 0x3dd   : > { %v2591_v53 = vpop.f32.mrf.mxu1 }
 0x3de   : > { %v8892_v14 = vadd.f32 %v2591_v53, %v8705_v27  ;;  %v8921_v53 = vpop.f32.mrf.mxu0 }
 0x3df   : > { %v6180_v63 = vpop.f32.mrf.mxu1  ;;  %6383 = vmatmul.mubr.msk.bf16.vlgmr.msra.gmra.mxu1 %vm10816_vm13, %v10815_v21  ;;  %10821 = vst [vmem:[#allocation16_spill] sm:$0xff] %v8921_v53  ;;  %vm10903_vm13 = vmmov %vm10660_vm0 }
 0x3e0   : > { %v8897_v52 = vadd.f32 %v6180_v63, %v8713_v2  ;;  %6386 = vmatprep.mubr.msk.bf16.mxu1 %vm10817_vm3, %v8295_v40  ;;  %vm10904_vm3 = vmmov %vm10660_vm0 }
 0x3e1   : > { %v2937_v7 = vpop.f32.mrf.mxu1 }
 0x3e2   : > { %v8904_v17 = vadd.f32 %v2937_v7, %v8720_v51  ;;  %v8929_v7 = vpop.f32.mrf.mxu0 }
 0x3e3   : > { %v6181_v35 = vpop.f32.mrf.mxu1 }
 0x3e4   : > { %v8907_v27 = vadd.f32 %v6181_v35, %v8729_v3  ;;  %v10822_v35 = vld [vmem:[#allocation9_spill] sm:$0xff] }
 0x3e5   : > { %v2940_v49 = vpop.f32.mrf.mxu1 }
 0x3e6   : > { %v8912_v13 = vadd.f32 %v2940_v49, %v8735_v39 }
 0x3e7   : > { %v6184_v2 = vpop.f32.mrf.mxu1  ;;  %6387 = vmatmul.mubr.msk.bf16.gmra.mxu1 %vm10818_vm14, %v8304_v57  ;;  %vm10905_vm14 = vmmov %vm10660_vm0 }
 0x3e8   : > { %v8917_v40 = vadd.f32 %v6184_v2, %v8740_v5  ;;  %6390 = vmatprep.mubr.msk.bf16.mxu1 %vm10820_vm9, %v10819_v45  ;;  %v10824_v2 = vld [vmem:[#allocation45_spill] sm:$0xff]  ;;  %v8941_v45 = vpop.f32.mrf.mxu0  ;;  %vm10906_vm9 = vmmov %vm10660_vm0 }
 0x3e9   : > { %v2953_v51 = vpop.f32.mrf.mxu1  ;;  %10826 = vst [vmem:[#allocation24_spill] sm:$0xff] %v8941_v45  ;;  %v10829_v45 = vld [vmem:[#allocation52_spill] sm:$0xff] }
 0x3ea   : > { %v8924_v3 = vadd.f32 %v2953_v51, %v8746_v24 }
 0x3eb   : > { %v6185_v63 = vpop.f32.mrf.mxu1 }
 0x3ec   : > { %v8927_v39 = vadd.f32 %v6185_v63, %v8755_v58 }
 0x3ed   : > { %v2956_v21 = vpop.f32.mrf.mxu1 }
 0x3ee   : > { %v8932_v57 = vadd.f32 %v2956_v21, %v8761_v31  ;;  %v8949_v21 = vpop.f32.mrf.mxu0 }
 0x3ef   : > { %v6188_v5 = vpop.f32.mrf.mxu1  ;;  %6391 = vmatmul.mubr.msk.bf16.gmra.mxu1 %vm10823_vm15, %v10822_v35  ;;  %vm10907_vm15 = vmmov %vm10660_vm0 }
 0x3f0   : > { %v8937_v49 = vadd.f32 %v6188_v5, %v8766_v8  ;;  %6394 = vmatprep.mubr.msk.bf16.mxu1 %vm10825_vm12, %v10824_v2  ;;  %v10827_v5 = vld [vmem:[#allocation51_spill] sm:$0xff]  ;;  %vm10908_vm12 = vmmov %vm10660_vm0 }
 0x3f1   : > { %v2969_v24 = vpop.f32.mrf.mxu1 }
 0x3f2   : > { %v8944_v58 = vadd.f32 %v2969_v24, %v8772_v16  ;;  %v8961_v24 = vpop.f32.mrf.mxu0 }
 0x3f3   : > { %v6189_v51 = vpop.f32.mrf.mxu1  ;;  %10830 = vst [vmem:[#allocation67_spill] sm:$0xff] %v8961_v24 }
 0x3f4   : > { %v8947_v31 = vadd.f32 %v6189_v51, %v8781_v4  ;;  %v8969_v53 = vpop.f32.mrf.mxu0 }
 0x3f5   : > { %v2972_v63 = vpop.f32.mrf.mxu1 }
 0x3f6   : > { %v8952_v35 = vadd.f32 %v2972_v63, %v8787_v32 }
 0x3f7   : > { %v6192_v8 = vpop.f32.mrf.mxu1  ;;  %6395 = vmatmul.mubr.msk.bf16.gmra.mxu1 %vm10828_vm8, %v10827_v5  ;;  %vm10909_vm8 = vmmov %vm10660_vm0 }
 0x3f8   : > { %v8957_v2 = vadd.f32 %v6192_v8, %v8792_v41  ;;  %6398 = vmatprep.mubr.msk.bf16.mxu1 %vm10660_vm0, %v10829_v45  ;;  %v8981_v8 = vpop.f32.mrf.mxu0 }
 0x3f9   : > { %v2985_v16 = vpop.f32.mrf.mxu1  ;;  %10833 = vst [vmem:[#allocation80_spill] sm:$0xff] %v8981_v8 }
 0x3fa   : > { %v8964_v4 = vadd.f32 %v2985_v16, %v8798_v62 }
 0x3fb   : > { %v6193_v51 = vpop.f32.mrf.mxu1 }
 0x3fc   : > { %v8967_v32 = vadd.f32 %v6193_v51, %v8804_v19 }
 0x3fd   : > { %v2988_v63 = vpop.f32.mrf.mxu1 }
 0x3fe   : > { %v8972_v5 = vadd.f32 %v2988_v63, %v8810_v36  ;;  %v8989_v63 = vpop.f32.mrf.mxu0 }
 0x3ff   : > { %v6196_v41 = vpop.f32.mrf.mxu1  ;;  %6399 = vmatmul.mubr.msk.bf16.gmra.mxu1 %vm10831_vm5, %v8340_v22  ;;  %10834 = vst [vmem:[#allocation81_spill] sm:$0xff] %v8989_v63  ;;  %vm10914_vm5 = vmmov %vm10660_vm0 }
 0x400   : > { %v8977_v45 = vadd.f32 %v6196_v41, %v8814_v43  ;;  %6402 = vmatprep.mubr.msk.bf16.mxu1 %vm10832_vm6, %v8343_v48  ;;  %v9001_v41 = vpop.f32.mrf.mxu0  ;;  %vm10915_vm6 = vmmov %vm10660_vm0 }
 0x401   : > { %v3001_v62 = vpop.f32.mrf.mxu1  ;;  %10837 = vst [vmem:[#allocation35_spill] sm:$0xff] %v9001_v41 }
 0x402   : > { %v8984_v19 = vadd.f32 %v3001_v62, %v8821_v0 }
 0x403   : > { %v6197_v16 = vpop.f32.mrf.mxu1 }
 0x404   : > { %v8987_v36 = vadd.f32 %v6197_v16, %v8824_v1 }
 0x405   : > { %v3004_v51 = vpop.f32.mrf.mxu1 }
 0x406   : > { %v8992_v22 = vadd.f32 %v3004_v51, %v8829_v34  ;;  %v9009_v51 = vpop.f32.mrf.mxu0 }
 0x407   : > { %v6200_v43 = vpop.f32.mrf.mxu1  ;;  %6403 = vmatmul.mubr.msk.bf16.gmra.mxu1 %vm10835_vm2, %v8352_v46  ;;  %10838 = vst [vmem:[#allocation46_spill] sm:$0xff] %v9009_v51  ;;  %vm10916_vm2 = vmmov %vm10660_vm0 }
 0x408   : > { %v8997_v48 = vadd.f32 %v6200_v43, %v8834_v54  ;;  %6406 = vmatprep.mubr.msk.bf16.mxu1 %vm10836_vm4, %v8355_v50  ;;  %v10840_v43 = vld [vmem:[#allocation10_spill] sm:$0xff]  ;;  %vm10917_vm4 = vmmov %vm10660_vm0 }
 0x409   : > { %v3017_v0 = vpop.f32.mrf.mxu1 }
 0x40a   : > { %v9004_v1 = vadd.f32 %v3017_v0, %v8841_v37  ;;  %v9021_v0 = vpop.f32.mrf.mxu0 }
 0x40b   : > { %v6201_v62 = vpop.f32.mrf.mxu1  ;;  %10842 = vst [vmem:[#allocation34_spill] sm:$0xff] %v9021_v0 }
 0x40c   : > { %v9007_v34 = vadd.f32 %v6201_v62, %v8844_v25  ;;  %v9029_v41 = vpop.f32.mrf.mxu0 }
 0x40d   : > { %v3020_v16 = vpop.f32.mrf.mxu1  ;;  %10843 = vst [vmem:[#allocation37_spill] sm:$0xff] %v9029_v41 }
 0x40e   : > { %v9012_v46 = vadd.f32 %v3020_v16, %v8849_v6 }
 0x40f   : > { %v6204_v54 = vpop.f32.mrf.mxu1  ;;  %6407 = vmatmul.mubr.msk.bf16.gmra.mxu1 %vm10839_vm11, %v8368_v30  ;;  %vm10918_vm11 = vmmov %vm10660_vm0 }
 0x410   : > { %v9017_v50 = vadd.f32 %v6204_v54, %v8854_v60  ;;  %6410 = vmatprep.mubr.msk.bf16.mxu1 %vm10841_vm10, %v10840_v43  ;;  %v10844_v54 = vld [vmem:[#allocation61_spill] sm:$0xff]  ;;  %vm10919_vm10 = vmmov %vm10660_vm0 }
 0x411   : > { %v3033_v37 = vpop.f32.mrf.mxu1 }
 0x412   : > { %v9024_v25 = vadd.f32 %v3033_v37, %v8861_v44  ;;  %v9039_v44 = vpop.f32.mrf.mxu0 }
 0x413   : > { %v6205_v62 = vpop.f32.mrf.mxu1  ;;  %10846 = vst [vmem:[#allocation41_spill] sm:$0xff] %v9039_v44  ;;  %v10849_v44 = vld [vmem:[#allocation53_spill] sm:$0xff] }
 0x414   : > { %v9027_v6 = vadd.f32 %v6205_v62, %v8867_v20 }
 0x415   : > { %v3036_v16 = vpop.f32.mrf.mxu1 }
 0x416   : > { %v9032_v30 = vadd.f32 %v3036_v16, %v8873_v28  ;;  %v9047_v28 = vpop.f32.mrf.mxu0 }
 0x417   : > { %v6208_v60 = vpop.f32.mrf.mxu1  ;;  %6411 = vmatmul.mubr.msk.bf16.gmra.mxu1 %vm10845_vm7, %v10844_v54  ;;  %10847 = vst [vmem:[#allocation82_spill] sm:$0xff] %v9047_v28  ;;  %v10848_v54 = vld [vmem:[#allocation11_spill] sm:$0xff]  ;;  %vm10920_vm7 = vmmov %vm10660_vm0 }
 0x418   : > { %v9037_v43 = vadd.f32 %v6208_v60, %v8877_v10  ;;  %v3364_v10 = vadd.f32 %v10848_v54, %v8897_v52  ;;  %v9058_v41 = vpop.f32.mrf.mxu0 }
 0x419   : > { %v3049_v0 = vpop.f32.mrf.mxu1  ;;  %10850 = vst [vmem:[#allocation47_spill] sm:$0xff] %v9058_v41 }
 0x41a   : > { %v9042_v37 = vadd.f32 %v3049_v0, %v8884_v9  ;;  %v3362_v9 = vadd.f32 %v10849_v44, %v8904_v17  ;;  %v10853_v44 = vld [vmem:[#allocation69_spill] sm:$0xff] }
 0x41b   : > { %v6209_v20 = vpop.f32.mrf.mxu1 }
 0x41c   : > { %v9045_v62 = vadd.f32 %v6209_v20, %v8887_v29  ;;  %v10851_v20 = vld [vmem:[#allocation62_spill] sm:$0xff] }
 0x41d   : > { %v3052_v8 = vpop.f32.mrf.mxu1  ;;  %v3365_v51 = vadd.f32 %v10851_v20, %v8907_v27  ;;  %v10854_v27 = vld [vmem:[#allocation63_spill] sm:$0xff] }
 0x41e   : > { %v9050_v16 = vadd.f32 %v3052_v8, %v8892_v14  ;;  %v10852_v14 = vld [vmem:[#allocation12_spill] sm:$0xff] }
 0x41f   : > { %v6248_v60 = vpop.f32.mrf.mxu1  ;;  %v3363_v8 = vadd.f32 %v10852_v14, %v8912_v13 }
 0x420   : > { %v9054_v24 = vadd.f32 %v6248_v60, %v3364_v10  ;;  %v9069_v10 = vpop.f32.mrf.mxu0  ;;  %v3368_v60 = vadd.f32 %v10853_v44, %v8917_v40 }
 0x421   : > { %v3458_v0 = vpop.f32.mrf.mxu1 }
 0x422   : > { %v3585_v29 = vadd.f32 %v3458_v0, %v3362_v9  ;;  %v9079_v20 = vpop.f32.mrf.mxu0 }
 0x423   : > { %v6249_v28 = vpop.f32.mrf.mxu1  ;;  %10855 = vst [vmem:[#allocation83_spill] sm:$0xff] %v9079_v20 }
 0x424   : > { %v9062_v63 = vadd.f32 %v6249_v28, %v3365_v51  ;;  %v9067_v52 = vadd.f32 %v8901_v18, %v3585_v29  ;;  %v3366_v51 = vadd.f32 %v10854_v27, %v8924_v3  ;;  %v10856_v18 = vld [vmem:[#allocation64_spill] sm:$0xff]  ;;  %v10858_v3 = vld [vmem:[#allocation79_spill] sm:$0xff] }
 0x425   : > { %v3461_v54 = vpop.f32.mrf.mxu1  ;;  %v3369_v29 = vadd.f32 %v10856_v18, %v8927_v39  ;;  %v3372_v27 = vadd.f32 %v10858_v3, %v8937_v49 }
 0x426   : > { %v9071_v17 = vadd.f32 %v3461_v54, %v3363_v8  ;;  %v10857_v54 = vld [vmem:[#allocation74_spill] sm:$0xff] }
 0x427   : > { %v6252_v9 = vpop.f32.mrf.mxu1  ;;  %v3367_v40 = vadd.f32 %v10857_v54, %v8932_v57  ;;  %v10861_v57 = vld [vmem:[#allocation71_spill] sm:$0xff] }
 0x428   : > { %v9075_v0 = vadd.f32 %v6252_v9, %v3368_v60  ;;  %v9089_v60 = vpop.f32.mrf.mxu0  ;;  %v3373_v54 = vadd.f32 %v10861_v57, %v8947_v31 }
 0x429   : > { %v3474_v28 = vpop.f32.mrf.mxu1 }
 0x42a   : > { %v9081_v13 = vadd.f32 %v3474_v28, %v3366_v51  ;;  %v10859_v28 = vld [vmem:[#allocation76_spill] sm:$0xff] }
 0x42b   : > { %v6253_v14 = vpop.f32.mrf.mxu1  ;;  %v3370_v39 = vadd.f32 %v10859_v28, %v8944_v58  ;;  %v10864_v58 = vld [vmem:[#allocation43_spill] sm:$0xff] }
 0x42c   : > { %v9085_v8 = vadd.f32 %v6253_v14, %v3369_v29  ;;  %v9099_v29 = vpop.f32.mrf.mxu0  ;;  %v3376_v28 = vadd.f32 %v10864_v58, %v8957_v2 }
 0x42d   : > { %v3477_v44 = vpop.f32.mrf.mxu1  ;;  %10860 = vst [vmem:[#allocation48_spill] sm:$0xff] %v9099_v29 }
 0x42e   : > { %v9091_v9 = vadd.f32 %v3477_v44, %v3367_v40  ;;  %v10862_v44 = vld [vmem:[#allocation56_spill] sm:$0xff] }
 0x42f   : > { %v6256_v20 = vpop.f32.mrf.mxu1  ;;  %v3371_v49 = vadd.f32 %v10862_v44, %v8952_v35  ;;  %v10868_v44 = vld [vmem:[#allocation73_spill] sm:$0xff] }
 0x430   : > { %v9095_v51 = vadd.f32 %v6256_v20, %v3372_v27  ;;  %v9109_v20 = vpop.f32.mrf.mxu0 }
 0x431   : > { %v3490_v18 = vpop.f32.mrf.mxu1 }
 0x432   : > { %v9101_v14 = vadd.f32 %v3490_v18, %v3370_v39  ;;  %v10865_v18 = vld [vmem:[#allocation44_spill] sm:$0xff]  ;;  %v9122_v35 = vpop.f32.mrf.mxu0 }
 0x433   : > { %v6257_v41 = vpop.f32.mrf.mxu1  ;;  %v3374_v31 = vadd.f32 %v10865_v18, %v8964_v4  ;;  %10866 = vst [vmem:[#allocation55_spill] sm:$0xff] %v9122_v35  ;;  %v10869_v4 = vld [vmem:[#allocation75_spill] sm:$0xff] }
 0x434   : > { %v9105_v40 = vadd.f32 %v6257_v41, %v3373_v54  ;;  %v4738_v41 = vld [vmem:[%s10133_s8 + $0x8] sm:$0xff] }
 0x435   : > { %v3493_v3 = vpop.f32.mrf.mxu1  ;;  %6415 = vmatpush3.msra.mxu0 %v4738_v41 }
 0x436   : > { %v9111_v27 = vadd.f32 %v3493_v3, %v3371_v49  ;;  %v3377_v49 = vadd.f32 %v10868_v44, %v8967_v32  ;;  %6416 = vmatprep.subr.mxu0 %v10635_v12  ;;  %v3375_v3 = vadd.f32 %v10869_v4, %v8972_v5  ;;  %v10871_v32 = vld [vmem:[#allocation30_spill] sm:$0xff] }
 0x437   : > { %v6260_v29 = vpop.f32.mrf.mxu1  ;;  %v3378_v41 = vadd.f32 %v10871_v32, %v8984_v19  ;;  %v10873_v5 = vld [vmem:[#allocation78_spill] sm:$0xff]  ;;  %v10876_v19 = vld [vmem:[#allocation31_spill] sm:$0xff] }
 0x438   : > { %10863 = vst [vmem:[#allocation84_spill] sm:$0xff] %v9111_v27  ;;  %v9115_v39 = vadd.f32 %v6260_v29, %v3376_v28  ;;  %v9133_v28 = vpop.f32.mrf.mxu0  ;;  %v3381_v4 = vadd.f32 %v10873_v5, %v8987_v36  ;;  %v3384_v32 = vadd.f32 %v10876_v19, %v8997_v48  ;;  %v3383_v48 = vadd.f32 %v8795_v26, %v9012_v46 }
 0x439   : > { %v3506_v57 = vpop.f32.mrf.mxu1  ;;  %v3389_v26 = vadd.f32 %v8826_v61, %v9027_v6  ;;  %v3390_v61 = vadd.f32 %v8858_v38, %v9042_v37  ;;  %v3391_v38 = vadd.f32 %v8881_v23, %v9050_v16  ;;  %v3893_v23 = vadd.f32 %v8909_v15, %v9062_v63 }
 0x43a   : > { %v9124_v54 = vadd.f32 %v3506_v57, %v3374_v31  ;;  %v10870_v31 = vld [vmem:[#allocation77_spill] sm:$0xff]  ;;  %v3897_v15 = vadd.f32 %v8949_v21, %v9085_v8 }
 0x43b   : > { %v6261_v2 = vpop.f32.mrf.mxu1  ;;  %v3380_v57 = vadd.f32 %v10870_v31, %v8977_v45  ;;  %v10888_v8 = vld [vmem:[#allocation81_spill] sm:$0xff] }
 0x43c   : > { %10867 = vst [vmem:[#allocation85_spill] sm:$0xff] %v9124_v54  ;;  %v9129_v29 = vadd.f32 %v6261_v2, %v3377_v49  ;;  %v9143_v49 = vpop.f32.mrf.mxu0 }
 0x43d   : > { %v3509_v58 = vpop.f32.mrf.mxu1  ;;  %10872 = vst [vmem:[#allocation57_spill] sm:$0xff] %v9143_v49 }
 0x43e   : > { %v9135_v18 = vadd.f32 %v3509_v58, %v3375_v3  ;;  %v10874_v58 = vld [vmem:[#allocation68_spill] sm:$0xff] }
 0x43f   : > { %v6264_v35 = vpop.f32.mrf.mxu1  ;;  %v3379_v45 = vadd.f32 %v10874_v58, %v8992_v22  ;;  %v3385_v22 = vadd.f32 %v8784_v42, %v9007_v34  ;;  %v3386_v42 = vadd.f32 %v8818_v33, %v9024_v25  ;;  %v3392_v33 = vadd.f32 %v8846_v56, %v9037_v43 }
 0x440   : > { %v9139_v54 = vadd.f32 %v6264_v35, %v3380_v57  ;;  %v9153_v35 = vpop.f32.mrf.mxu0 }
 0x441   : > { %v3522_v44 = vpop.f32.mrf.mxu1 }
 0x442   : > { %v9145_v2 = vadd.f32 %v3522_v44, %v3378_v41  ;;  %v10877_v44 = vld [vmem:[#allocation38_spill] sm:$0xff] }
 0x443   : > { %v6265_v27 = vpop.f32.mrf.mxu1  ;;  %v3382_v36 = vadd.f32 %v10877_v44, %v9004_v1  ;;  %v3388_v1 = vadd.f32 %v8807_v59, %v9017_v50  ;;  %v3387_v59 = vadd.f32 %v8838_v55, %v9032_v30 }
 0x444   : > { %v9149_v3 = vadd.f32 %v6265_v27, %v3381_v4  ;;  %v9163_v27 = vpop.f32.mrf.mxu0 }
 0x445   : > { %v3525_v31 = vpop.f32.mrf.mxu1  ;;  %10878 = vst [vmem:[#allocation65_spill] sm:$0xff] %v9163_v27 }
 0x446   : > { %v9155_v57 = vadd.f32 %v3525_v31, %v3379_v45 }
 0x447   : > { %v6268_v49 = vpop.f32.mrf.mxu1 }
 0x448   : > { %10875 = vst [vmem:[#allocation36_spill] sm:$0xff] %v9155_v57  ;;  %v9159_v41 = vadd.f32 %v6268_v49, %v3384_v32  ;;  %v9173_v49 = vpop.f32.mrf.mxu0  ;;  %v6592_v57 = vld [vmem:[%s6730_s20 + $0x68] sm:$0xff] }
 0x449   : > { %v3538_v5 = vpop.f32.mrf.mxu1 }
 0x44a   : > { %v9165_v4 = vadd.f32 %v3538_v5, %v3382_v36  ;;  %v9183_v36 = vpop.f32.mrf.mxu0 }
 0x44b   : > { %v6269_v58 = vpop.f32.mrf.mxu1  ;;  %10881 = vst [vmem:[#allocation8_spill] sm:$0xff] %v9183_v36  ;;  %v6582_v36 = vld [vmem:[%s6730_s20 + $0x38] sm:$0xff] }
 0x44c   : > { %10879 = vst [vmem:[#allocation66_spill] sm:$0xff] %v9165_v4  ;;  %v9169_v45 = vadd.f32 %v6269_v58, %v3385_v22  ;;  %v9193_v58 = vpop.f32.mrf.mxu0 }
 0x44d   : > { %v3541_v31 = vpop.f32.mrf.mxu1 }
 0x44e   : > { %v9175_v19 = vadd.f32 %v3541_v31, %v3383_v48  ;;  %v9208_v55 = vpop.f32.mrf.mxu0 }
 0x44f   : > { %v6272_v32 = vpop.f32.mrf.mxu1  ;;  %10885 = vst [vmem:[#allocation3_spill] sm:$0xff] %v9208_v55  ;;  %v6581_v55 = vld [vmem:[%s6730_s20 + $0x30] sm:$0xff] }
 0x450   : > { %10880 = vst [vmem:[#allocation70_spill] sm:$0xff] %v9175_v19  ;;  %v9179_v44 = vadd.f32 %v6272_v32, %v3388_v1  ;;  %v9206_v1 = vld [vmem:[%s10133_s8] sm:$0xff]  ;;  %v3393_v32 = vadd.f32 %v8870_v47, %v9045_v62 }
 0x451   : > { %v3554_v34 = vpop.f32.mrf.mxu1  ;;  %10884 = vst [vmem:[#allocation59_spill] sm:$0xff] %v9206_v1  ;;  %6417 = vmatpush3.msra.mxu0 %v9206_v1 }
 0x452   : > { %v9185_v5 = vadd.f32 %v3554_v34, %v3386_v42  ;;  %6421 = vmatprep.subr.mxu0 %v10635_v12  ;;  %v9220_v42 = vpop.f32.mrf.mxu0  ;;  %v6580_v12 = vld [vmem:[%s6730_s20 + $0x8] sm:$0xff] }
 0x453   : > { %v6273_v46 = vpop.f32.mrf.mxu1 }
 0x454   : > { %10882 = vst [vmem:[#allocation86_spill] sm:$0xff] %v9185_v5  ;;  %v9189_v22 = vadd.f32 %v6273_v46, %v3389_v26  ;;  %v3892_v26 = vadd.f32 %v8889_v11, %v9054_v24  ;;  %v3896_v11 = vadd.f32 %v8929_v7, %v9075_v0  ;;  %v3900_v7 = vadd.f32 %v8969_v53, %v9095_v51  ;;  %v10889_v51 = vld [vmem:[#allocation46_spill] sm:$0xff] }
 0x455   : > { %v3557_v50 = vpop.f32.mrf.mxu1 }
 0x456   : > { %v9195_v48 = vadd.f32 %v3557_v50, %v3387_v59  ;;  %v9228_v59 = vpop.f32.mrf.mxu0 }
 0x457   : > { %v6276_v25 = vpop.f32.mrf.mxu1 }
 0x458   : > { %10883 = vst [vmem:[#allocation58_spill] sm:$0xff] %v9195_v48  ;;  %v9199_v31 = vadd.f32 %v6276_v25, %v3392_v33 }
 0x459   : > { %v3570_v6 = vpop.f32.mrf.mxu1 }
 0x45a   : > { %v9210_v30 = vadd.f32 %v3570_v6, %v3390_v61  ;;  %v9239_v61 = vpop.f32.mrf.mxu0 }
 0x45b   : > { %v6277_v56 = vpop.f32.mrf.mxu1 }
 0x45c   : > { %10886 = vst [vmem:[#allocation14_spill] sm:$0xff] %v9210_v30  ;;  %v9216_v43 = vadd.f32 %v6277_v56, %v3393_v32  ;;  %v1305_v30 = vunpack.c.l.bf16 %v6582_v36 }
 0x45d   : > { %v3573_v37 = vpop.f32.mrf.mxu1 }
 0x45e   : > { %v9222_v34 = vadd.f32 %v3573_v37, %v3391_v38 }
 0x45f   : > { %v6316_v46 = vpop.f32.mrf.mxu1 }
 0x460   : > { %10887 = vst [vmem:[#allocation33_spill] sm:$0xff] %v9222_v34  ;;  %v9226_v47 = vadd.f32 %v6316_v46, %v3892_v26  ;;  %v1304_v34 = vunpack.c.l.bf16 %v6581_v55  ;;  %v6585_v55 = vld [vmem:[%s6730_s20 + $0x50] sm:$0xff] }
 0x461   : > { %v4060_v62 = vpop.f32.mrf.mxu1  ;;  %v1308_v19 = vunpack.c.l.bf16 %v6585_v55  ;;  %v6589_v55 = vld [vmem:[%s6730_s20 + $0x70] sm:$0xff] }
 0x462   : > { %v9231_v50 = vadd.f32 %v4060_v62, %v9067_v52  ;;  %v9247_v52 = vpop.f32.mrf.mxu0  ;;  %v3901_v62 = vadd.f32 %v10888_v8, %v9105_v40  ;;  %v6579_v40 = vld [vmem:[%s6730_s20] sm:$0xff] }
 0x463   : > { %v6317_v16 = vpop.f32.mrf.mxu1  ;;  %v1298_v8 = vunpack.c.l.bf16 %v6579_v40 }
 0x464   : > { %v9235_v33 = vadd.f32 %v6317_v16, %v3893_v23  ;;  %v9255_v37 = vpop.f32.mrf.mxu0 }
 0x465   : > { %v9237_v25 = vpop.f32.mrf.mxu1 }
 0x466   : > { %v9263_v21 = vpop.f32.mrf.mxu0 }
 0x467   : > { %v6320_v24 = vpop.f32.mrf.mxu1 }
 0x468   : > { %v9243_v6 = vadd.f32 %v6320_v24, %v3896_v11  ;;  %v9271_v53 = vpop.f32.mrf.mxu0  ;;  %v3904_v24 = vadd.f32 %v10889_v51, %v9115_v39 }
 0x469   : > { %v9245_v32 = vpop.f32.mrf.mxu1 }
 0x46a   : > { %v9287_v5 = vpop.f32.mrf.mxu0 }
 0x46b   : > { %v6321_v63 = vpop.f32.mrf.mxu1 }
 0x46c   : > { %v9251_v56 = vadd.f32 %v6321_v63, %v3897_v15  ;;  %v6577_v63 = vld [vmem:[%s6730_s20 + $0x20] sm:$0xff] }
 0x46d   : > { %v9253_v38 = vpop.f32.mrf.mxu1 }
 0x46f   : > { %v6324_v0 = vpop.f32.mrf.mxu1 }
 0x470   : > { %v9259_v26 = vadd.f32 %v6324_v0, %v3900_v7  ;;  %v1302_v7 = vunpack.c.l.bf16 %v6577_v63  ;;  %v6578_v0 = vld [vmem:[%s6730_s20 + $0x28] sm:$0xff]  ;;  %v6583_v63 = vld [vmem:[%s6730_s20 + $0x10] sm:$0xff] }
 0x471   : > { %v9261_v46 = vpop.f32.mrf.mxu1  ;;  %v1303_v1 = vunpack.c.l.bf16 %v6578_v0  ;;  %v1300_v48 = vunpack.c.l.bf16 %v6583_v63  ;;  %v6584_v0 = vld [vmem:[%s6730_s20 + $0x18] sm:$0xff] }
 0x472   : > { %v1301_v40 = vunpack.c.l.bf16 %v6584_v0  ;;  %v6588_v0 = vld [vmem:[%s6730_s20 + $0x48] sm:$0xff] }
 0x473   : > { %v6325_v23 = vpop.f32.mrf.mxu1  ;;  %v6453_v39 = vpack.i.bf16 %v1303_v1, %v1302_v7  ;;  %v6586_v7 = vld [vmem:[%s6730_s20 + $0x58] sm:$0xff]  ;;  %v1307_v4 = vunpack.c.l.bf16 %v6588_v0 }
 0x474   : > { %v9267_v16 = vadd.f32 %v6325_v23, %v3901_v62  ;;  %v1299_v62 = vunpack.c.l.bf16 %v6580_v12  ;;  %v10890_v12 = vld [vmem:[#allocation37_spill] sm:$0xff]  ;;  %v6448_v1 = vpack.i.bf16 %v1301_v40, %v1300_v48 }
 0x475   : > { %v9269_v11 = vpop.f32.mrf.mxu1  ;;  %6454 = vrot.lane.b32.xlu1 %v6453_v39, %s6654_s27  ;;  %v6590_v48 = vld [vmem:[%s6730_s20 + $0x78] sm:$0xff] }
 0x476   : > { %v6443_v51 = vpack.i.bf16 %v1299_v62, %v1298_v8  ;;  %v1309_v8 = vunpack.c.l.bf16 %v6586_v7  ;;  %v6587_v62 = vld [vmem:[%s6730_s20 + $0x40] sm:$0xff]  ;;  %v1313_v40 = vunpack.c.l.bf16 %v6590_v48 }
 0x477   : > { %v6328_v15 = vpop.f32.mrf.mxu1  ;;  %v1306_v63 = vunpack.c.l.bf16 %v6587_v62 }
 0x478   : > { %v9279_v23 = vadd.f32 %v6328_v15, %v3904_v24  ;;  %v3905_v24 = vadd.f32 %v10890_v12, %v9129_v29  ;;  %v6458_v15 = vpack.i.bf16 %v1305_v30, %v1304_v34  ;;  %6444 = vrot.lane.b32.xlu0 %v6443_v51, %s6654_s27  ;;  %v9301_v34 = vpop.f32.mrf.mxu0  ;;  %v10892_v12 = vld [vmem:[#allocation82_spill] sm:$0xff]  ;;  %v1312_v51 = vunpack.c.l.bf16 %v6589_v55 }
 0x479   : > { %v9283_v27 = vpop.f32.mrf.mxu1  ;;  %v3908_v39 = vadd.f32 %v10892_v12, %v9139_v54  ;;  %v6468_v62 = vpack.i.bf16 %v1309_v8, %v1308_v19  ;;  %v6594_v8 = vld [vmem:[%s6730_s20 + $0x98] sm:$0xff] }
 0x47a   : > { %6459 = vrot.lane.b32.xlu1 %v6458_v15, %s6654_s27  ;;  %v9315_v55 = vpop.f32.mrf.mxu0  ;;  %v3909_v15 = vadd.f32 %v9069_v10, %v9149_v3  ;;  %v6478_v48 = vpack.i.bf16 %v1313_v40, %v1312_v51  ;;  %v3912_v40 = vadd.f32 %v9089_v60, %v9159_v41 }
 0x47b   : > { %v6329_v36 = vpop.f32.mrf.mxu1 }
 0x47c   : > { %v9297_v29 = vadd.f32 %v6329_v36, %v3905_v24  ;;  %6449 = vrot.lane.b32.xlu0 %v6448_v1, %s6654_s27  ;;  %v6463_v24 = vpack.i.bf16 %v1307_v4, %v1306_v63  ;;  %v6591_v36 = vld [vmem:[%s6730_s20 + $0x60] sm:$0xff]  ;;  %v6593_v1 = vld [vmem:[%s6730_s20 + $0x90] sm:$0xff]  ;;  %v1317_v63 = vunpack.c.l.bf16 %v6594_v8  ;;  %v9329_v51 = vpop.f32.mrf.mxu0 }
 0x47d   : > { %v9299_v30 = vpop.f32.mrf.mxu1  ;;  %v1310_v0 = vunpack.c.l.bf16 %v6591_v36  ;;  %v1316_v4 = vunpack.c.l.bf16 %v6593_v1  ;;  %v6596_v36 = vld [vmem:[%s6730_s20 + $0x88] sm:$0xff] }
 0x47e   : > { %10891 = vst [vmem:[#allocation15_spill] sm:$0xff] %v9297_v29  ;;  %v1311_v29 = vunpack.c.l.bf16 %v6592_v57  ;;  %6469 = vrot.lane.b32.xlu1 %v6468_v62, %s6654_s27  ;;  %v6597_v62 = vld [vmem:[%s6730_s20 + $0xb0] sm:$0xff] }
 0x47f   : > { %v6332_v7 = vpop.f32.mrf.mxu1  ;;  %v6488_v8 = vpack.i.bf16 %v1317_v63, %v1316_v4 }
 0x480   : > { %v9311_v54 = vadd.f32 %v6332_v7, %v3908_v39  ;;  %6464 = vrot.lane.b32.xlu0 %v6463_v24, %s6654_s27  ;;  %v6473_v57 = vpack.i.bf16 %v1311_v29, %v1310_v0  ;;  %v6595_v39 = vld [vmem:[%s6730_s20 + $0x80] sm:$0xff]  ;;  %v1320_v24 = vunpack.c.l.bf16 %v6597_v62  ;;  %v6598_v29 = vld [vmem:[%s6730_s20 + $0xb8] sm:$0xff]  ;;  %v9343_v62 = vpop.f32.mrf.mxu0 }
 0x481   : > { %v9313_v12 = vpop.f32.mrf.mxu1  ;;  %v1314_v7 = vunpack.c.l.bf16 %v6595_v39  ;;  %v1321_v0 = vunpack.c.l.bf16 %v6598_v29 }
 0x482   : > { %10893 = vst [vmem:[#allocation17_spill] sm:$0xff] %v9311_v54  ;;  %v1315_v54 = vunpack.c.l.bf16 %v6596_v36  ;;  %6479 = vrot.lane.b32.xlu1 %v6478_v48, %s6654_s27  ;;  %v6600_v36 = vld [vmem:[%s6730_s20 + $0xa8] sm:$0xff]  ;;  %v3913_v48 = vadd.f32 %v9109_v20, %v9169_v45 }
 0x483   : > { %v6333_v19 = vpop.f32.mrf.mxu1  ;;  %v6498_v29 = vpack.i.bf16 %v1321_v0, %v1320_v24  ;;  %v9357_v24 = vpop.f32.mrf.mxu0  ;;  %v3916_v0 = vadd.f32 %v9133_v28, %v9179_v44  ;;  %v3917_v44 = vadd.f32 %v9153_v35, %v9189_v22 }
 0x484   : > { %v9325_v10 = vadd.f32 %v6333_v19, %v3909_v15  ;;  %6474 = vrot.lane.b32.xlu0 %v6473_v57, %s6654_s27  ;;  %v6483_v15 = vpack.i.bf16 %v1315_v54, %v1314_v7  ;;  %v6599_v19 = vld [vmem:[%s6730_s20 + $0xa0] sm:$0xff]  ;;  %v6601_v57 = vld [vmem:[%s6730_s20 + $0xd0] sm:$0xff]  ;;  %v6602_v7 = vld [vmem:[%s6730_s20 + $0xd8] sm:$0xff] }
 0x485   : > { %v9327_v3 = vpop.f32.mrf.mxu1  ;;  %v1318_v39 = vunpack.c.l.bf16 %v6599_v19  ;;  %v1324_v54 = vunpack.c.l.bf16 %v6601_v57  ;;  %v9371_v28 = vpop.f32.mrf.mxu0 }
 0x486   : > { %10894 = vst [vmem:[#allocation42_spill] sm:$0xff] %v9325_v10  ;;  %v1319_v10 = vunpack.c.l.bf16 %v6600_v36  ;;  %6489 = vrot.lane.b32.xlu1 %v6488_v8, %s6654_s27  ;;  %v6604_v36 = vld [vmem:[%s6730_s20 + $0xc8] sm:$0xff]  ;;  %v6605_v8 = vld [vmem:[%s6730_s20 + $0xf0] sm:$0xff] }
 0x487   : > { %v6336_v1 = vpop.f32.mrf.mxu1 }
 0x488   : > { %v9339_v60 = vadd.f32 %v6336_v1, %v3912_v40  ;;  %6484 = vrot.lane.b32.xlu0 %v6483_v15, %s6654_s27  ;;  %v6493_v63 = vpack.i.bf16 %v1319_v10, %v1318_v39  ;;  %v1325_v40 = vunpack.c.l.bf16 %v6602_v7  ;;  %v6603_v1 = vld [vmem:[%s6730_s20 + $0xc0] sm:$0xff]  ;;  %v1328_v15 = vunpack.c.l.bf16 %v6605_v8  ;;  %v6606_v10 = vld [vmem:[%s6730_s20 + $0xf8] sm:$0xff] }
 0x489   : > { %v9341_v41 = vpop.f32.mrf.mxu1  ;;  %v1322_v19 = vunpack.c.l.bf16 %v6603_v1  ;;  %v1329_v39 = vunpack.c.l.bf16 %v6606_v10 }
 0x48a   : > { %10895 = vst [vmem:[#allocation18_spill] sm:$0xff] %v9339_v60  ;;  %10896 = vst [vmem:[#allocation32_spill] sm:$0xff] %v9341_v41  ;;  %v1323_v60 = vunpack.c.l.bf16 %v6604_v36  ;;  %6499 = vrot.lane.b32.xlu1 %v6498_v29, %s6654_s27  ;;  %v6508_v7 = vpack.i.bf16 %v1325_v40, %v1324_v54  ;;  %v6608_v36 = vld [vmem:[%s6730_s20 + $0xe8] sm:$0xff]  ;;  %v9381_v40 = vpop.f32.mrf.mxu0 }
 0x48b   : > { %v6337_v4 = vpop.f32.mrf.mxu1  ;;  %v6518_v29 = vpack.i.bf16 %v1329_v39, %v1328_v15 }
 0x48c   : > { %v9353_v20 = vadd.f32 %v6337_v4, %v3913_v48  ;;  %6494 = vrot.lane.b32.xlu0 %v6493_v63, %s6654_s27  ;;  %v6503_v1 = vpack.i.bf16 %v1323_v60, %v1322_v19  ;;  %v6607_v48 = vld [vmem:[%s6730_s20 + $0xe0] sm:$0xff]  ;;  %v3920_v19 = vadd.f32 %v9173_v49, %v9199_v31  ;;  %v9391_v15 = vpop.f32.mrf.mxu0  ;;  %v10899_v31 = vld [vmem:[#allocation16_spill] sm:$0xff] }
 0x48d   : > { %v9355_v45 = vpop.f32.mrf.mxu1  ;;  %v1326_v4 = vunpack.c.l.bf16 %v6607_v48 }
 0x48e   : > { %10897 = vst [vmem:[#allocation19_spill] sm:$0xff] %v9353_v20  ;;  %10898 = vst [vmem:[#allocation49_spill] sm:$0xff] %v9355_v45  ;;  %v1327_v20 = vunpack.c.l.bf16 %v6608_v36  ;;  %6509 = vrot.lane.b32.xlu1 %v6508_v7, %s6654_s27  ;;  %v9399_v49 = vpop.f32.mrf.mxu0  ;;  %v3891_v7 = vadd.f32 %v10899_v31, %v9071_v17  ;;  %v10900_v36 = vld [vmem:[#allocation24_spill] sm:$0xff] }
 0x48f   : > { %v6340_v57 = vpop.f32.mrf.mxu1  ;;  %v10902_v31 = vld [vmem:[#allocation80_spill] sm:$0xff] }
 0x490   : > { %v9367_v45 = vadd.f32 %v6340_v57, %v3916_v0  ;;  %6504 = vrot.lane.b32.xlu0 %v6503_v1, %s6654_s27  ;;  %v6513_v60 = vpack.i.bf16 %v1327_v20, %v1326_v4  ;;  %v3921_v20 = vadd.f32 %v9193_v58, %v9216_v43  ;;  %v4188_v48 = vadd.f32 %v9237_v25, %v3891_v7  ;;  %v9408_v43 = vpop.f32.mrf.mxu0 }
 0x491   : > { %v9369_v41 = vpop.f32.mrf.mxu1  ;;  %v4405_v4 = vadd.f32 %v9228_v59, %v9231_v50  ;;  %v4408_v25 = vadd.f32 %v9239_v61, %v9235_v33  ;;  %v3898_v33 = vadd.f32 %v10902_v31, %v9101_v14  ;;  %v4411_v14 = vadd.f32 %v9255_v37, %v9243_v6  ;;  %v10911_v31 = vld [vmem:[#allocation35_spill] sm:$0xff] }
 0x492   : > { %6519 = vrot.lane.b32.xlu1 %v6518_v29, %s6654_s27  ;;  %v4406_v59 = vadd.f32 %v9247_v52, %v4188_v48 }
 0x493   : > { %v6341_v8 = vpop.f32.mrf.mxu1 }
 0x494   : > { %v9377_v54 = vadd.f32 %v6341_v8, %v3917_v44  ;;  %6514 = vrot.lane.b32.xlu0 %v6513_v60, %s6654_s27  ;;  %v3894_v44 = vadd.f32 %v10900_v36, %v9081_v13  ;;  %v4407_v8 = vadd.f32 %v9220_v42, %v9226_v47  ;;  %v10901_v13 = vld [vmem:[#allocation67_spill] sm:$0xff]  ;;  %v4412_v36 = vadd.f32 %v9271_v53, %v9251_v56 }
 0x495   : > { %v9379_v63 = vpop.f32.mrf.mxu1  ;;  %v3895_v50 = vadd.f32 %v10901_v13, %v9091_v9 }
 0x496   : > { %v4191_v60 = vadd.f32 %v9245_v32, %v3894_v44 }
 0x497   : > { %v6344_v0 = vpop.f32.mrf.mxu1 }
 0x498   : > { %v9387_v35 = vadd.f32 %v6344_v0, %v3920_v19  ;;  %v4409_v52 = vadd.f32 %v9263_v21, %v4191_v60 }
 0x499   : > { %v9389_v22 = vpop.f32.mrf.mxu1 }
 0x49b   : > { %v6345_v10 = vpop.f32.mrf.mxu1 }
 0x49c   : > { %v9395_v39 = vadd.f32 %v6345_v10, %v3921_v20  ;;  %v9422_v20 = vpop.f32.mrf.mxu0  ;;  %v4192_v10 = vadd.f32 %v9253_v38, %v3895_v50 }
 0x49d   : > { %v9397_v57 = vpop.f32.mrf.mxu1 }
 0x49e   : > { %v9448_v44 = vpop.f32.mrf.mxu0  ;;  %v4410_v37 = vadd.f32 %v9287_v5, %v4192_v10 }
 0x49f   : > { %v6384_v1 = vpop.f32.mrf.mxu1 }
 0x4a0   : > { %v9415_v19 = vadd.f32 %v6384_v1, %v4407_v8  ;;  %v9469_v5 = vpop.f32.mrf.mxu0 }
 0x4a1   : > { %v4578_v58 = vpop.f32.mrf.mxu1 }
 0x4a2   : > { %v9412_v29 = vadd.f32 %v4578_v58, %v4405_v4  ;;  %v4812_v9 = vmul.f32 %v9415_v19, %v9415_v19  ;;  %v4744_v38 = vsel %vm10905_vm14, %v9415_v19, 0.0  ;;  %vm10925_vm14 = vmmov %vm10660_vm0 }
 0x4a3   : > { %v6385_v17 = vpop.f32.mrf.mxu1 }
 0x4a4   : > { %v4810_v42 = vmul.f32 %v9412_v29, %v9412_v29  ;;  %v9426_v47 = vadd.f32 %v6385_v17, %v4408_v25  ;;  %v4741_v7 = vsel %vm10903_vm13, %v9412_v29, 0.0  ;;  %v4195_v25 = vadd.f32 %v9261_v46, %v3898_v33  ;;  %v10913_v46 = vld [vmem:[#allocation34_spill] sm:$0xff]  ;;  %vm10923_vm13 = vmmov %vm10660_vm0 }
 0x4a5   : > { %v4581_v0 = vpop.f32.mrf.mxu1  ;;  %v4845_v56 = vsel %vm10908_vm12, %v4812_v9, 0.0  ;;  %vm10929_vm12 = vmmov %vm10660_vm0 }
 0x4a6   : > { %v9428_v32 = vadd.f32 %v4581_v0, %v4406_v59  ;;  %v4842_v58 = vsel %vm10906_vm9, %v4810_v42, 0.0  ;;  %v4813_v8 = vmul.f32 %v9426_v47, %v9426_v47  ;;  %v4746_v53 = vsel %vm10909_vm8, %v9426_v47, 0.0  ;;  %v10910_v42 = vld [vmem:[#allocation84_spill] sm:$0xff]  ;;  %vm10926_vm9 = vmmov %vm10660_vm0 }
 0x4a7   : > { %v6388_v61 = vpop.f32.mrf.mxu1  ;;  %vm10930_vm8 = vmmov %vm10660_vm0 }
 0x4a8   : > { %v4742_v1 = vsel %vm10904_vm3, %v9428_v32, 0.0  ;;  %v4811_v48 = vmul.f32 %v9428_v32, %v9428_v32  ;;  %v9461_v50 = vadd.f32 %v6388_v61, %v4411_v14  ;;  %v4847_v10 = vsel %vm10660_vm0, %v4813_v8, 0.0  ;;  %vm10924_vm3 = vmmov %vm10660_vm0 }
 0x4a9   : > { %v4743_v4 = vadd.f32 %v4742_v1, %v4741_v7  ;;  %v4594_v21 = vpop.f32.mrf.mxu1  ;;  %v10912_v7 = vld [vmem:[#allocation85_spill] sm:$0xff] }
 0x4aa   : > { %v4843_v60 = vsel %vm10907_vm15, %v4811_v48, 0.0  ;;  %v9454_v17 = vadd.f32 %v4594_v21, %v4409_v52  ;;  %v3899_v52 = vadd.f32 %v10911_v31, %v10910_v42  ;;  %v3902_v33 = vadd.f32 %v10913_v46, %v10912_v7  ;;  %vm10928_vm15 = vmmov %vm10660_vm0 }
 0x4ab   : > { %v4745_v59 = vadd.f32 %v4744_v38, %v4743_v4  ;;  %v4844_v13 = vadd.f32 %v4843_v60, %v4842_v58  ;;  %v6389_v6 = vpop.f32.mrf.mxu1 }
 0x4ac   : > { %v4814_v0 = vmul.f32 %v9454_v17, %v9454_v17  ;;  %v4748_v61 = vsel %vm10914_vm5, %v9454_v17, 0.0  ;;  %v9474_v9 = vadd.f32 %v6389_v6, %v4412_v36  ;;  %v4196_v14 = vadd.f32 %v9269_v11, %v3899_v52  ;;  %vm10935_vm5 = vmmov %vm10660_vm0 }
 0x4ad   : > { %v4846_v1 = vadd.f32 %v4845_v56, %v4844_v13  ;;  %v4747_v48 = vadd.f32 %v4746_v53, %v4745_v59  ;;  %v4597_v38 = vpop.f32.mrf.mxu1  ;;  %v4413_v13 = vadd.f32 %v9315_v55, %v4195_v25  ;;  %v4816_v59 = vmul.f32 %v9461_v50, %v9461_v50  ;;  %v9491_v25 = vpop.f32.mrf.mxu0 }
 0x4ae   : > { %v9476_v4 = vadd.f32 %v4597_v38, %v4410_v37  ;;  %v4849_v56 = vsel %vm10915_vm6, %v4814_v0, 0.0  ;;  %v4415_v11 = vadd.f32 %v9301_v34, %v9259_v26  ;;  %v4416_v55 = vadd.f32 %v9329_v51, %v9267_v16  ;;  %vm10936_vm6 = vmmov %vm10660_vm0 }
 0x4af   : > { %v4749_v21 = vadd.f32 %v4748_v61, %v4747_v48  ;;  %v4848_v58 = vadd.f32 %v4847_v10, %v4846_v1  ;;  %v6392_v60 = vpop.f32.mrf.mxu1  ;;  %v4752_v0 = vsel %vm10917_vm4, %v9461_v50, 0.0  ;;  %v4817_v42 = vmul.f32 %v9474_v9, %v9474_v9  ;;  %v10921_v10 = vld [vmem:[#allocation41_spill] sm:$0xff]  ;;  %vm10938_vm4 = vmmov %vm10660_vm0 }
 0x4b0   : > { %v4750_v8 = vsel %vm10916_vm2, %v9476_v4, 0.0  ;;  %v4815_v36 = vmul.f32 %v9476_v4, %v9476_v4  ;;  %v4199_v7 = vadd.f32 %v9283_v27, %v3902_v33  ;;  %v4414_v1 = vadd.f32 %v9343_v62, %v4196_v14  ;;  %v10922_v27 = vld [vmem:[#allocation47_spill] sm:$0xff]  ;;  %v9513_v62 = vpop.f32.mrf.mxu0  ;;  %vm10937_vm2 = vmmov %vm10660_vm0 }
 0x4b1   : > { %v4850_v6 = vadd.f32 %v4849_v56, %v4848_v58  ;;  %v4751_v37 = vadd.f32 %v4750_v8, %v4749_v21  ;;  %v4610_v53 = vpop.f32.mrf.mxu1  ;;  %v4853_v16 = vsel %vm10919_vm10, %v4816_v59, 0.0  ;;  %v4754_v51 = vsel %vm10920_vm7, %v9474_v9, 0.0  ;;  %vm10942_vm10 = vmmov %vm10660_vm0 }
 0x4b2   : > { %v4851_v31 = vsel %vm10918_vm11, %v4815_v36, 0.0  ;;  %v9498_v52 = vadd.f32 %v4610_v53, %v4413_v13  ;;  %v9505_v48 = vadd.f32 %v6392_v60, %v4415_v11  ;;  %v3903_v61 = vadd.f32 %v10921_v10, %v9135_v18  ;;  %vm10941_vm11 = vmmov %vm10660_vm0 }
 0x4b3   : > { %v4753_v46 = vadd.f32 %v4752_v0, %v4751_v37  ;;  %v4852_v26 = vadd.f32 %v4851_v31, %v4850_v6  ;;  %v6393_v34 = vpop.f32.mrf.mxu1  ;;  %v3906_v33 = vadd.f32 %v10922_v27, %v9145_v2  ;;  %v4855_v14 = vsel %vm10923_vm13, %v4817_v42, 0.0  ;;  %vm10944_vm7 = vmmov %vm10660_vm0 }
 0x4b4   : > { %v4818_v38 = vmul.f32 %v9498_v52, %v9498_v52  ;;  %v4756_v60 = vsel %vm10924_vm3, %v9498_v52, 0.0  ;;  %v9518_v59 = vadd.f32 %v6393_v34, %v4416_v55  ;;  %v4200_v8 = vadd.f32 %v9299_v30, %v3903_v61  ;;  %vm10945_vm13 = vmmov %vm10660_vm0 }
 0x4b5   : > { %v4854_v21 = vadd.f32 %v4853_v16, %v4852_v26  ;;  %v4755_v58 = vadd.f32 %v4754_v51, %v4753_v46  ;;  %v4613_v13 = vpop.f32.mrf.mxu1  ;;  %v4417_v2 = vadd.f32 %v9371_v28, %v4199_v7  ;;  %v4820_v37 = vmul.f32 %v9505_v48, %v9505_v48  ;;  %v10927_v46 = vld [vmem:[#allocation15_spill] sm:$0xff]  ;;  %v9535_v7 = vpop.f32.mrf.mxu0  ;;  %vm10950_vm3 = vmmov %vm10660_vm0 }
 0x4b6   : > { %v9520_v56 = vadd.f32 %v4613_v13, %v4414_v1  ;;  %v4857_v11 = vsel %vm10925_vm14, %v4818_v38, 0.0  ;;  %v4419_v30 = vadd.f32 %v9357_v24, %v9279_v23  ;;  %v4420_v28 = vadd.f32 %v9381_v40, %v10927_v46  ;;  %v10932_v13 = vld [vmem:[#allocation83_spill] sm:$0xff]  ;;  %vm10951_vm14 = vmmov %vm10660_vm0 }
 0x4b7   : > { %v4757_v18 = vadd.f32 %v4756_v60, %v4755_v58  ;;  %v4856_v36 = vadd.f32 %v4855_v14, %v4854_v21  ;;  %v6396_v6 = vpop.f32.mrf.mxu1  ;;  %v4760_v26 = vsel %vm10928_vm15, %v9505_v48, 0.0  ;;  %v4821_v34 = vmul.f32 %v9518_v59, %v9518_v59  ;;  %v10931_v58 = vld [vmem:[#allocation36_spill] sm:$0xff]  ;;  %v10933_v60 = vld [vmem:[#allocation66_spill] sm:$0xff]  ;;  %vm10954_vm15 = vmmov %vm10660_vm0 }
 0x4b8   : > { %v4758_v53 = vsel %vm10926_vm9, %v9520_v56, 0.0  ;;  %v4819_v55 = vmul.f32 %v9520_v56, %v9520_v56  ;;  %v4203_v51 = vadd.f32 %v9313_v12, %v3906_v33  ;;  %v4418_v10 = vadd.f32 %v9391_v15, %v4200_v8  ;;  %v10934_v12 = vld [vmem:[#allocation48_spill] sm:$0xff]  ;;  %v9557_v15 = vpop.f32.mrf.mxu0  ;;  %vm10953_vm9 = vmmov %vm10660_vm0 }
 0x4b9   : > { %v4858_v0 = vadd.f32 %v4857_v11, %v4856_v36  ;;  %v4759_v42 = vadd.f32 %v4758_v53, %v4757_v18  ;;  %v4626_v31 = vpop.f32.mrf.mxu1  ;;  %v4861_v40 = vsel %vm10930_vm8, %v4820_v37, 0.0  ;;  %v4762_v61 = vsel %vm10660_vm0, %v9518_v59, 0.0  ;;  %vm10958_vm8 = vmmov %vm10660_vm0 }
 0x4ba   : > { %v4859_v1 = vsel %vm10929_vm12, %v4819_v55, 0.0  ;;  %v9542_v16 = vadd.f32 %v4626_v31, %v4417_v2  ;;  %v9549_v27 = vadd.f32 %v6396_v6, %v4419_v30  ;;  %v3907_v14 = vadd.f32 %v10932_v13, %v10931_v58  ;;  %v10943_v58 = vld [vmem:[#allocation32_spill] sm:$0xff]  ;;  %vm10957_vm12 = vmmov %vm10660_vm0 }
 0x4bb   : > { %v4761_v38 = vadd.f32 %v4760_v26, %v4759_v42  ;;  %v4860_v23 = vadd.f32 %v4859_v1, %v4858_v0  ;;  %v6397_v24 = vpop.f32.mrf.mxu1  ;;  %v3910_v33 = vadd.f32 %v10934_v12, %v10933_v60  ;;  %v4863_v8 = vsel %vm10935_vm5, %v4821_v34, 0.0  ;;  %vm10959_vm5 = vmmov %vm10660_vm0 }
 0x4bc   : > { %v4822_v21 = vmul.f32 %v9542_v16, %v9542_v16  ;;  %v4764_v6 = vsel %vm10936_vm6, %v9542_v16, 0.0  ;;  %v9562_v37 = vadd.f32 %v6397_v24, %v4420_v28  ;;  %v4204_v53 = vadd.f32 %v9327_v3, %v3907_v14  ;;  %v10940_v24 = vld [vmem:[#allocation42_spill] sm:$0xff]  ;;  %vm10964_vm6 = vmmov %vm10660_vm0 }
 0x4bd   : > { %v4862_v18 = vadd.f32 %v4861_v40, %v4860_v23  ;;  %v4763_v36 = vadd.f32 %v4762_v61, %v4761_v38  ;;  %v4629_v2 = vpop.f32.mrf.mxu1  ;;  %v4421_v30 = vadd.f32 %v9408_v43, %v4203_v51  ;;  %v4824_v31 = vmul.f32 %v9549_v27, %v9549_v27  ;;  %v10939_v38 = vld [vmem:[#allocation17_spill] sm:$0xff]  ;;  %v9579_v51 = vpop.f32.mrf.mxu0 }
 0x4be   : > { %v9564_v11 = vadd.f32 %v4629_v2, %v4418_v10  ;;  %v4865_v46 = vsel %vm10937_vm2, %v4822_v21, 0.0  ;;  %v4423_v3 = vadd.f32 %v9399_v49, %v10939_v38  ;;  %v4424_v43 = vadd.f32 %v9422_v20, %v10940_v24  ;;  %vm10965_vm2 = vmmov %vm10660_vm0 }
 0x4bf   : > { %v4765_v55 = vadd.f32 %v4764_v6, %v4763_v36  ;;  %v4864_v0 = vadd.f32 %v4863_v8, %v4862_v18  ;;  %v6400_v42 = vpop.f32.mrf.mxu1  ;;  %v4768_v10 = vsel %vm10941_vm11, %v9549_v27, 0.0  ;;  %v4825_v40 = vmul.f32 %v9562_v37, %v9562_v37  ;;  %v10946_v8 = vld [vmem:[#allocation70_spill] sm:$0xff]  ;;  %v10947_v6 = vld [vmem:[#allocation55_spill] sm:$0xff]  ;;  %vm10967_vm11 = vmmov %vm10660_vm0 }
 0x4c0   : > { %v4766_v26 = vsel %vm10938_vm4, %v9564_v11, 0.0  ;;  %v4823_v28 = vmul.f32 %v9564_v11, %v9564_v11  ;;  %v4207_v13 = vadd.f32 %v10943_v58, %v3910_v33  ;;  %v4422_v12 = vadd.f32 %v9448_v44, %v4204_v53  ;;  %v10949_v33 = vld [vmem:[#allocation57_spill] sm:$0xff]  ;;  %v6375_v44 = vpop.f32.mrf.mxu0  ;;  %vm10966_vm4 = vmmov %vm10660_vm0 }
 0x4c1   : > { %v4866_v34 = vadd.f32 %v4865_v46, %v4864_v0  ;;  %v4767_v1 = vadd.f32 %v4766_v26, %v4765_v55  ;;  %v4642_v23 = vpop.f32.mrf.mxu1  ;;  %v4869_v20 = vsel %vm10944_vm7, %v4824_v31, 0.0  ;;  %v4770_v18 = vsel %vm10945_vm13, %v9562_v37, 0.0  ;;  %v10948_v0 = vld [vmem:[#allocation86_spill] sm:$0xff]  ;;  %vm10969_vm7 = vmmov %vm10660_vm0 }
 0x4c2   : > { %v4867_v61 = vsel %vm10942_vm10, %v4823_v28, 0.0  ;;  %v9586_v21 = vadd.f32 %v4642_v23, %v4421_v30  ;;  %v9593_v36 = vadd.f32 %v6400_v42, %v4423_v3  ;;  %v3911_v55 = vadd.f32 %v10947_v6, %v10946_v8  ;;  %vm10968_vm10 = vmmov %vm10660_vm0 }
 0x4c3   : > { %v4769_v14 = vadd.f32 %v4768_v10, %v4767_v1  ;;  %v4868_v49 = vadd.f32 %v4867_v61, %v4866_v34  ;;  %v6401_v60 = vpop.f32.mrf.mxu1  ;;  %v3914_v30 = vadd.f32 %v10949_v33, %v10948_v0  ;;  %v4871_v53 = vsel %vm10950_vm3, %v4825_v40, 0.0  ;;  %v10952_v1 = vld [vmem:[#allocation49_spill] sm:$0xff]  ;;  %vm10970_vm13 = vmmov %vm10660_vm0 }
 0x4c4   : > { %v4826_v2 = vmul.f32 %v9586_v21, %v9586_v21  ;;  %v4772_v31 = vsel %vm10951_vm14, %v9586_v21, 0.0  ;;  %v9604_v42 = vadd.f32 %v6401_v60, %v4424_v43  ;;  %v4208_v38 = vadd.f32 %v10952_v1, %v3911_v55  ;;  %v10955_v60 = vld [vmem:[#allocation18_spill] sm:$0xff]  ;;  %vm10971_vm3 = vmmov %vm10660_vm0 }
 0x4c5   : > { %v4870_v46 = vadd.f32 %v4869_v20, %v4868_v49  ;;  %v4771_v26 = vadd.f32 %v4770_v18, %v4769_v14  ;;  %v4645_v28 = vpop.f32.mrf.mxu1  ;;  %v4425_v10 = vadd.f32 %v9491_v25, %v4207_v13  ;;  %v4828_v61 = vmul.f32 %v9593_v36, %v9593_v36  ;;  %v10956_v18 = vld [vmem:[#allocation19_spill] sm:$0xff]  ;;  %v4377_v13 = vpop.f32.mrf.mxu0  ;;  %v10960_v1 = vld [vmem:[#allocation58_spill] sm:$0xff]  ;;  %vm10974_vm14 = vmmov %vm10660_vm0 }
 0x4c6   : > { %v9606_v34 = vadd.f32 %v4645_v28, %v4422_v12  ;;  %v4873_v58 = vsel %vm10953_vm9, %v4826_v2, 0.0  ;;  %v4427_v12 = vadd.f32 %v9469_v5, %v10955_v60  ;;  %v4428_v25 = vadd.f32 %v9513_v62, %v10956_v18  ;;  %vm10975_vm9 = vmmov %vm10660_vm0 }
 0x4c7   : > { %v4773_v3 = vadd.f32 %v4772_v31, %v4771_v26  ;;  %v4872_v23 = vadd.f32 %v4871_v53, %v4870_v46  ;;  %v6404_v24 = vpop.f32.mrf.mxu1  ;;  %v4776_v8 = vsel %vm10957_vm12, %v9593_v36, 0.0  ;;  %v4829_v2 = vmul.f32 %v9604_v42, %v9604_v42  ;;  %vm10977_vm12 = vmmov %vm10660_vm0 }
 0x4c8   : > { %v4774_v40 = vsel %vm10954_vm15, %v9606_v34, 0.0  ;;  %v4827_v43 = vmul.f32 %v9606_v34, %v9606_v34  ;;  %v4211_v0 = vadd.f32 %v9369_v41, %v3914_v30  ;;  %v4426_v26 = vadd.f32 %v9535_v7, %v4208_v38  ;;  %v10963_v41 = vld [vmem:[#allocation8_spill] sm:$0xff]  ;;  %v6378_v7 = vpop.f32.mrf.mxu0  ;;  %vm10976_vm15 = vmmov %vm10660_vm0 }
 0x4c9   : > { %v4874_v14 = vadd.f32 %v4873_v58, %v4872_v23  ;;  %v4775_v49 = vadd.f32 %v4774_v40, %v4773_v3  ;;  %v4658_v20 = vpop.f32.mrf.mxu1  ;;  %v4877_v62 = vsel %vm10660_vm0, %v4828_v61, 0.0  ;;  %v4778_v28 = vsel %vm10959_vm5, %v9604_v42, 0.0  ;;  %v10961_v3 = vld [vmem:[#allocation65_spill] sm:$0xff]  ;;  %vm10979_vm5 = vmmov %vm10660_vm0 }
 0x4ca   : > { %v4875_v6 = vsel %vm10958_vm8, %v4827_v43, 0.0  ;;  %v9626_v55 = vadd.f32 %v4658_v20, %v4425_v10  ;;  %v9633_v53 = vadd.f32 %v6404_v24, %v4427_v12  ;;  %v3915_v23 = vadd.f32 %v10961_v3, %v10960_v1  ;;  %v10962_v10 = vld [vmem:[#allocation14_spill] sm:$0xff]  ;;  %vm10978_vm8 = vmmov %vm10660_vm0 }
 0x4cb   : > { %v4777_v33 = vadd.f32 %v4776_v8, %v4775_v49  ;;  %v4876_v46 = vadd.f32 %v4875_v6, %v4874_v14  ;;  %v6405_v5 = vpop.f32.mrf.mxu1  ;;  %v3918_v30 = vadd.f32 %v10963_v41, %v10962_v10  ;;  %v4879_v38 = vsel %vm10964_vm6, %v4829_v2, 0.0  ;;  %vm10980_vm6 = vmmov %vm10660_vm0 }
 0x4cc   : > { %v4830_v31 = vmul.f32 %v9626_v55, %v9626_v55  ;;  %v4780_v61 = vsel %vm10965_vm2, %v9626_v55, 0.0  ;;  %v9644_v24 = vadd.f32 %v6405_v5, %v4428_v25  ;;  %v4212_v49 = vadd.f32 %v9379_v63, %v3915_v23  ;;  %vm10981_vm2 = vmmov %vm10660_vm0 }
 0x4cd   : > { %v4878_v58 = vadd.f32 %v4877_v62, %v4876_v46  ;;  %v4779_v40 = vadd.f32 %v4778_v28, %v4777_v33  ;;  %v4661_v43 = vpop.f32.mrf.mxu1  ;;  %v4429_v18 = vadd.f32 %v9579_v51, %v4211_v0  ;;  %v4832_v8 = vmul.f32 %v9633_v53, %v9633_v53  ;;  %v4390_v51 = vpop.f32.mrf.mxu0 }
 0x4ce   : > { %v9646_v14 = vadd.f32 %v4661_v43, %v4426_v26  ;;  %v4881_v6 = vsel %vm10966_vm4, %v4830_v31, 0.0  ;;  %v4431_v63 = vadd.f32 %v9557_v15, %v9367_v45  ;;  %v4432_v26 = vadd.f32 %v6375_v44, %v9377_v54  ;;  %vm10982_vm4 = vmmov %vm10660_vm0 }
 0x4cf   : > { %v4781_v60 = vadd.f32 %v4780_v61, %v4779_v40  ;;  %v4880_v12 = vadd.f32 %v4879_v38, %v4878_v58  ;;  %v6408_v20 = vpop.f32.mrf.mxu1  ;;  %v4784_v0 = vsel %vm10968_vm10, %v9633_v53, 0.0  ;;  %v4833_v62 = vmul.f32 %v9644_v24, %v9644_v24  ;;  %v10972_v58 = vld [vmem:[#allocation33_spill] sm:$0xff]  ;;  %v10973_v40 = vld [vmem:[#allocation3_spill] sm:$0xff]  ;;  %vm10984_vm10 = vmmov %vm10660_vm0 }
 0x4d0   : > { %v4782_v2 = vsel %vm10967_vm11, %v9646_v14, 0.0  ;;  %v4831_v25 = vmul.f32 %v9646_v14, %v9646_v14  ;;  %v4215_v1 = vadd.f32 %v9389_v22, %v3918_v30  ;;  %v4430_v45 = vadd.f32 %v4377_v13, %v4212_v49  ;;  %v6379_v30 = vpop.f32.mrf.mxu0  ;;  %vm10983_vm11 = vmmov %vm10660_vm0 }
 0x4d1   : > { %v4882_v33 = vadd.f32 %v4881_v6, %v4880_v12  ;;  %v4783_v46 = vadd.f32 %v4782_v2, %v4781_v60  ;;  %v4674_v5 = vpop.f32.mrf.mxu1  ;;  %v4885_v15 = vsel %vm10970_vm13, %v4832_v8, 0.0  ;;  %v4786_v54 = vsel %vm10971_vm3, %v9644_v24, 0.0  ;;  %vm10986_vm13 = vmmov %vm10660_vm0 }
 0x4d2   : > { %v4883_v28 = vsel %vm10969_vm7, %v4831_v25, 0.0  ;;  %v9665_v31 = vadd.f32 %v4674_v5, %v4429_v18  ;;  %v9671_v44 = vadd.f32 %v6408_v20, %v4431_v63  ;;  %v3919_v43 = vadd.f32 %v10973_v40, %v10972_v58  ;;  %vm10985_vm7 = vmmov %vm10660_vm0 }
 0x4d3   : > { %v4785_v3 = vadd.f32 %v4784_v0, %v4783_v46  ;;  %v4884_v23 = vadd.f32 %v4883_v28, %v4882_v33  ;;  %v6409_v10 = vpop.f32.mrf.mxu1  ;;  %v4887_v60 = vsel %vm10974_vm14, %v4833_v62, 0.0  ;;  %v4433_v2 = vadd.f32 %v4390_v51, %v4215_v1  ;;  %v4393_v62 = vpop.f32.mrf.mxu0  ;;  %vm10987_vm3 = vmmov %vm10660_vm0 }
 0x4d4   : > { %v4834_v41 = vmul.f32 %v9665_v31, %v9665_v31  ;;  %v4788_v13 = vsel %vm10975_vm9, %v9665_v31, 0.0  ;;  %v9680_v49 = vadd.f32 %v6409_v10, %v4432_v26  ;;  %v4216_v20 = vadd.f32 %v9397_v57, %v3919_v43  ;;  %vm10988_vm14 = vmmov %vm10660_vm0 }
 0x4d5   : > { %v4886_v38 = vadd.f32 %v4885_v15, %v4884_v23  ;;  %v4787_v61 = vadd.f32 %v4786_v54, %v4785_v3  ;;  %v4677_v22 = vpop.f32.mrf.mxu1  ;;  %v4836_v25 = vmul.f32 %v9671_v44, %v9671_v44  ;;  %v4435_v0 = vadd.f32 %v6378_v7, %v9387_v35  ;;  %vm10989_vm9 = vmmov %vm10660_vm0 }
 0x4d6   : > { %v9682_v12 = vadd.f32 %v4677_v22, %v4430_v45  ;;  %v4889_v33 = vsel %vm10976_vm15, %v4834_v41, 0.0  ;;  %v4792_v51 = vsel %vm10978_vm8, %v9671_v44, 0.0  ;;  %v4837_v28 = vmul.f32 %v9680_v49, %v9680_v49  ;;  %vm10990_vm15 = vmmov %vm10660_vm0 }
 0x4d7   : > { %v4789_v18 = vadd.f32 %v4788_v13, %v4787_v61  ;;  %v4888_v8 = vadd.f32 %v4887_v60, %v4886_v38  ;;  %v6412_v6 = vpop.f32.mrf.mxu1  ;;  %v4436_v45 = vadd.f32 %v6379_v30, %v9395_v39  ;;  %v4434_v54 = vadd.f32 %v4393_v62, %v4216_v20 }
 0x4d8   : > { %v4790_v46 = vsel %vm10977_vm12, %v9682_v12, 0.0  ;;  %v4835_v63 = vmul.f32 %v9682_v12, %v9682_v12  ;;  %v4893_v35 = vsel %vm10979_vm5, %v4836_v25, 0.0  ;;  %v4794_v7 = vsel %vm10980_vm6, %v9680_v49, 0.0  ;;  %vm10993_vm12 = vmmov %vm10660_vm0 }
 0x4d9   : > { %v4890_v5 = vadd.f32 %v4889_v33, %v4888_v8  ;;  %v4791_v26 = vadd.f32 %v4790_v46, %v4789_v18  ;;  %v4690_v57 = vpop.f32.mrf.mxu1  ;;  %v9704_v41 = vadd.f32 %v6412_v6, %v4435_v0  ;;  %v4895_v61 = vsel %vm10981_vm2, %v4837_v28, 0.0 }
 0x4da   : > { %v4891_v1 = vsel %vm10660_vm0, %v4835_v63, 0.0  ;;  %v9698_v3 = vadd.f32 %v4690_v57, %v4433_v2 }
 0x4db   : > { %v4793_v23 = vadd.f32 %v4792_v51, %v4791_v26  ;;  %v4892_v10 = vadd.f32 %v4891_v1, %v4890_v5  ;;  %v6413_v15 = vpop.f32.mrf.mxu1  ;;  %v4840_v20 = vmul.f32 %v9704_v41, %v9704_v41  ;;  %v4800_v33 = vsel %vm10985_vm7, %v9704_v41, 0.0 }
 0x4dc   : > { %v4838_v58 = vmul.f32 %v9698_v3, %v9698_v3  ;;  %v4796_v39 = vsel %vm10982_vm4, %v9698_v3, 0.0  ;;  %v9711_v22 = vadd.f32 %v6413_v15, %v4436_v45 }
 0x4dd   : > { %v4894_v40 = vadd.f32 %v4893_v35, %v4892_v10  ;;  %v4795_v43 = vadd.f32 %v4794_v7, %v4793_v23  ;;  %v4693_v38 = vpop.f32.mrf.mxu1  ;;  %v4901_v0 = vsel %vm10987_vm3, %v4840_v20, 0.0 }
 0x4de   : > { %v9713_v30 = vadd.f32 %v4693_v38, %v4434_v54  ;;  %v4897_v18 = vsel %vm10983_vm11, %v4838_v58, 0.0  ;;  %v4841_v46 = vmul.f32 %v9711_v22, %v9711_v22  ;;  %v4802_v57 = vsel %vm10988_vm14, %v9711_v22, 0.0 }
 0x4df   : > { %v4797_v60 = vadd.f32 %v4796_v39, %v4795_v43  ;;  %v4896_v13 = vadd.f32 %v4895_v61, %v4894_v40  ;;  %v6609_v61 = vld [vmem:[%s10133_s8 + $0x8] sm:$0xff]  ;;  %v10991_v39 = vmov 0.0  }
 0x4e0   : > { %v4798_v8 = vsel %vm10984_vm10, %v9713_v30, 0.0  ;;  %v4839_v6 = vmul.f32 %v9713_v30, %v9713_v30  ;;  %v4903_v28 = vsel %vm10989_vm9, %v4841_v46, 0.0 }
 0x4e1   : > { %v4898_v2 = vadd.f32 %v4897_v18, %v4896_v13  ;;  %v4799_v25 = vadd.f32 %v4798_v8, %v4797_v60  ;;  %v10992_v13 = vld [vmem:[#allocation59_spill] sm:$0xff] }
 0x4e2   : > { %v4899_v63 = vsel %vm10986_vm13, %v4839_v6, 0.0 }
 0x4e3   : > { %v4801_v5 = vadd.f32 %v4800_v33, %v4799_v25  ;;  %v4900_v26 = vadd.f32 %v4899_v63, %v4898_v2 }
 0x4e5   : > { %v4803_v62 = vadd.f32 %v4802_v57, %v4801_v5  ;;  %v4902_v51 = vadd.f32 %v4901_v0, %v4900_v26 }
 0x4e7   : > { %v4804_v1 = vrot.slane %v4803_v62, 4  ;;  %v4904_v23 = vadd.f32 %v4903_v28, %v4902_v51  ;;  %v9740_v20 = vpop.permute.xlu1 %6454 }
 0x4e9   : > { %v4805_v10 = vadd.f32 %v4804_v1, %v4803_v62  ;;  %v4905_v45 = vrot.slane %v4904_v23, 4 }
 0x4ea   : > { %v9742_v18 = vpop.permute.xlu0 %6444 }
 0x4eb   : > { %v4806_v15 = vrot.slane %v4805_v10, 2  ;;  %v4906_v54 = vadd.f32 %v4905_v45, %v4904_v23 }
 0x4ec   : > { %v9744_v8 = vpop.permute.xlu1 %6459 }
 0x4ed   : > { %v4807_v35 = vadd.f32 %v4806_v15, %v4805_v10  ;;  %v4907_v7 = vrot.slane %v4906_v54, 2 }
 0x4ee   : > { %v9746_v6 = vpop.permute.xlu0 %6449 }
 0x4ef   : > { %v4808_v58 = vrot.slane %v4807_v35, 1  ;;  %v4908_v40 = vadd.f32 %v4907_v7, %v4906_v54  ;;  %v10994_v7 = vld [vmem:[#allocation2_spill] sm:$0xff] }
 0x4f0   : > { %v9748_v2 = vpop.permute.xlu1 %6469 }
 0x4f1   : > { %v4809_v43 = vadd.f32 %v4808_v58, %v4807_v35  ;;  %v4909_v38 = vrot.slane %v4908_v40, 1 }
 0x4f2   : > { %v9750_v25 = vpop.permute.xlu0 %6464 }
 0x4f3   : > { %6419 = vmatmul.mubr.msk.f32.vlgmr.msra.gmra.mxu0 %vm10990_vm15, %v4809_v43  ;;  %v4910_v60 = vadd.f32 %v4909_v38, %v4908_v40 }
 0x4f4   : > { %6422 = vmatpush3.msra.mxu0 %v6609_v61  ;;  %6425 = vmatprep.mubr.msk.f32.mxu0 %vm10732_vm1, %v10991_v39  ;;  %v9752_v33 = vpop.permute.xlu1 %6479  ;;  %vm5531_vm1 = vcmask 125952  }
 0x4f5   : > { %6423 = vmatprep.subr.mxu0 %v10991_v39 }
 0x4f6   : > { %6424 = vmatpush3.msra.mxu0 %v10992_v13  ;;  %v9754_v46 = vpop.permute.xlu0 %6474 }
 0x4f7   : > { %6426 = vmatmul.mubr.msk.f32.vlgmr.msra.gmra.mxu0 %vm10993_vm12, %v4910_v60 }
 0x4f8   : > { %v9756_v63 = vpop.permute.xlu1 %6489 }
 0x4fa   : > { %v9758_v5 = vpop.permute.xlu0 %6484 }
 0x4fc   : > { %v9760_v62 = vpop.permute.xlu1 %6499 }
 0x4fe   : > { %v9762_v28 = vpop.permute.xlu0 %6494 }
 0x500   : > { %v9764_v15 = vpop.permute.xlu1 %6509 }
 0x502   : > { %v9766_v35 = vpop.permute.xlu0 %6504 }
 0x504   : > { %v9771_v40 = vpop.permute.xlu1 %6519 }
 0x506   : > { %v9773_v43 = vpop.permute.xlu0 %6514 }
 0x5b3   : > { %v4980_v26 = vpop.f32.mrf.mxu0 }
 0x5b4   : > { %v4984_v0 = vmul.f32 0.0009765625, %v4980_v26 }
 0x5b5   : > { %v6420_v57 = vpop.f32.mrf.mxu0 }
 0x5b6   : > { %v5059_v1 = vmul.f32 %v4984_v0, %v4984_v0  ;;  %v9769_v58 = vrot.slane %v4984_v0, %v10994_v7  ;;  %v9837_v57 = vld [vmem:[%s10131_s6] ss:$0 sm:$0xff] }
 0x5b7   : > { %v5054_v51 = vpop.f32.mrf.mxu0 }
 0x5b8   : > { %v5058_v23 = vmul.f32 0.0009765625, %v5054_v51  ;;  %v5067_v38 = vsub.f32 %v9412_v29, %v9769_v58  ;;  %v5068_v61 = vsub.f32 %v9428_v32, %v9769_v58  ;;  %v5071_v39 = vsub.f32 %v9454_v17, %v9769_v58 }
 0x5b9   : > { %v6427_v10 = vpop.f32.mrf.mxu0  ;;  %v5072_v60 = vsub.f32 %v9476_v4, %v9769_v58  ;;  %v5073_v13 = vsub.f32 %v9461_v50, %v9769_v58  ;;  %v5074_v26 = vsub.f32 %v9474_v9, %v9769_v58  ;;  %v5069_v0 = vsub.f32 %v9415_v19, %v9769_v58 }
 0x5ba   : > { %v5060_v45 = vsub.f32 %v5058_v23, %v5059_v1  ;;  %v5070_v29 = vsub.f32 %v9426_v47, %v9769_v58  ;;  %v9854_v1 = vld [vmem:[%s10132_s7] ss:$0 sm:$0xff] }
 0x5bc   : > { %v5061_v54 = vadd.f32 1e-05, %v5060_v45 }
 0x5be   : > { %6575 = vrsqrt.f32 %v5061_v54 }
 0x5cb   : > { %v6576_v54 = vpop.eup %6575 }
 0x5cc   : > { %v9826_v23 = vrot.slane %v6576_v54, %v10994_v7 }
 0x5ce   : > { %v5103_v10 = vmul.f32 %v9826_v23, %v5067_v38  ;;  %v5104_v47 = vmul.f32 %v9826_v23, %v5068_v61  ;;  %v5107_v51 = vmul.f32 %v9826_v23, %v5071_v39  ;;  %v5108_v19 = vmul.f32 %v9826_v23, %v5072_v60 }
 0x5cf   : > { %v5109_v7 = vmul.f32 %v9826_v23, %v5073_v13  ;;  %v5110_v54 = vmul.f32 %v9826_v23, %v5074_v26  ;;  %v5105_v45 = vmul.f32 %v9826_v23, %v5069_v0  ;;  %v5106_v38 = vmul.f32 %v9826_v23, %v5070_v29 }
 0x5d0   : > { %v5141_v61 = vmul.f32 %v9837_v57, %v5103_v10  ;;  %v5142_v39 = vmul.f32 %v9837_v57, %v5104_v47  ;;  %v5145_v60 = vmul.f32 %v9837_v57, %v5107_v51  ;;  %v5146_v9 = vmul.f32 %v9837_v57, %v5108_v19 }
 0x5d1   : > { %v5147_v50 = vmul.f32 %v9837_v57, %v5109_v7  ;;  %v5148_v4 = vmul.f32 %v9837_v57, %v5110_v54  ;;  %v5143_v13 = vmul.f32 %v9837_v57, %v5105_v45  ;;  %v5144_v26 = vmul.f32 %v9837_v57, %v5106_v38 }
 0x5d2   : > { %v5179_v0 = vadd.f32 %v9854_v1, %v5141_v61  ;;  %v5180_v29 = vadd.f32 %v9854_v1, %v5142_v39  ;;  %v5183_v10 = vadd.f32 %v9854_v1, %v5145_v60  ;;  %v5184_v47 = vadd.f32 %v9854_v1, %v5146_v9 }
 0x5d3   : > { %v5185_v51 = vadd.f32 %v9854_v1, %v5147_v50  ;;  %v5186_v19 = vadd.f32 %v9854_v1, %v5148_v4  ;;  %v5181_v7 = vadd.f32 %v9854_v1, %v5143_v13  ;;  %v5182_v54 = vadd.f32 %v9854_v1, %v5144_v26 }
 0x5d4   : > { %v6610_v45 = vadd.low.f32.bf16 %v5179_v0, %v9742_v18  ;;  %v6611_v38 = vadd.high.f32.bf16 %v5180_v29, %v9742_v18  ;;  %v6612_v61 = vadd.low.f32.bf16 %v5183_v10, %v9740_v20  ;;  %v6613_v39 = vadd.high.f32.bf16 %v5184_v47, %v9740_v20 }
 0x5d5   : > { %v6614_v60 = vadd.low.f32.bf16 %v5185_v51, %v9744_v8  ;;  %v6615_v9 = vadd.high.f32.bf16 %v5186_v19, %v9744_v8  ;;  %v6616_v50 = vadd.low.f32.bf16 %v5181_v7, %v9746_v6  ;;  %v6617_v4 = vadd.high.f32.bf16 %v5182_v54, %v9746_v6 }
 0x5d6   : > { %v5371_v13 = vmax.f32 %v6610_v45, 0.0  ;;  %v5372_v17 = vmax.f32 %v6611_v38, 0.0  ;;  %v5375_v26 = vmax.f32 %v6612_v61, 0.0  ;;  %v5376_v32 = vmax.f32 %v6613_v39, 0.0 }
 0x5d7   : > { %v5377_v20 = vmax.f32 %v6614_v60, 0.0  ;;  %v5378_v18 = vmax.f32 %v6615_v9, 0.0  ;;  %v5373_v8 = vmax.f32 %v6616_v50, 0.0  ;;  %v5374_v0 = vmax.f32 %v6617_v4, 0.0 }
 0x5d8   : > { %v5897_v29 = vpack.c.bf16 %v5371_v13, %v5371_v13  ;;  %v5898_v6 = vpack.c.bf16 %v5372_v17, %v5372_v17  ;;  %v5901_v10 = vpack.c.bf16 %v5375_v26, %v5375_v26  ;;  %v5902_v47 = vpack.c.bf16 %v5376_v32, %v5376_v32 }
 0x5d9   : > { %v5903_v51 = vpack.c.bf16 %v5377_v20, %v5377_v20  ;;  %v5904_v19 = vpack.c.bf16 %v5378_v18, %v5378_v18  ;;  %v5899_v7 = vpack.c.bf16 %v5373_v8, %v5373_v8  ;;  %v5900_v54 = vpack.c.bf16 %v5374_v0, %v5374_v0 }
 0x5da   : > { %5532 = vst.msk [vmem:[%s9888_s16] sm:$0xf] %vm5531_vm1, %v5897_v29  ;;  %5533 = vst.msk [vmem:[%s9888_s16 + $0x4] sm:$0xf] %vm5531_vm1, %v5898_v6  ;;  %v10995_v17 = vsub.f32 %v9505_v48, %v9769_v58  ;;  %v10996_v32 = vsub.f32 %v9518_v59, %v9769_v58  ;;  %v10997_v61 = vsub.f32 %v9498_v52, %v9769_v58 }
 0x5db   : > { %5536 = vst.msk [vmem:[%s9888_s16 + $0x10] sm:$0xf] %vm5531_vm1, %v5901_v10  ;;  %5537 = vst.msk [vmem:[%s9888_s16 + $0x14] sm:$0xf] %vm5531_vm1, %v5902_v47  ;;  %v10998_v60 = vsub.f32 %v9520_v56, %v9769_v58  ;;  %v10999_v48 = vsub.f32 %v9549_v27, %v9769_v58  ;;  %v11000_v59 = vsub.f32 %v9562_v37, %v9769_v58 }
 0x5dc   : > { %v5113_v45 = vmul.f32 %v9826_v23, %v10995_v17  ;;  %v5114_v38 = vmul.f32 %v9826_v23, %v10996_v32  ;;  %v5111_v39 = vmul.f32 %v9826_v23, %v10997_v61  ;;  %5538 = vst.msk [vmem:[%s9888_s16 + $0x18] sm:$0xf] %vm5531_vm1, %v5903_v51  ;;  %5539 = vst.msk [vmem:[%s9888_s16 + $0x1c] sm:$0xf] %vm5531_vm1, %v5904_v19 }
 0x5dd   : > { %v5112_v9 = vmul.f32 %v9826_v23, %v10998_v60  ;;  %5534 = vst.msk [vmem:[%s9888_s16 + $0x8] sm:$0xf] %vm5531_vm1, %v5899_v7  ;;  %5535 = vst.msk [vmem:[%s9888_s16 + $0xc] sm:$0xf] %vm5531_vm1, %v5900_v54  ;;  %v5117_v52 = vmul.f32 %v9826_v23, %v10999_v48  ;;  %v5118_v56 = vmul.f32 %v9826_v23, %v11000_v59 }
 0x5de   : > { %v11001_v50 = vsub.f32 %v9542_v16, %v9769_v58  ;;  %v11002_v13 = vsub.f32 %v9564_v11, %v9769_v58  ;;  %v5151_v20 = vmul.f32 %v9837_v57, %v5113_v45  ;;  %v5152_v27 = vmul.f32 %v9837_v57, %v5114_v38 }
 0x5df   : > { %v5149_v18 = vmul.f32 %v9837_v57, %v5111_v39  ;;  %v5150_v37 = vmul.f32 %v9837_v57, %v5112_v9  ;;  %v5155_v8 = vmul.f32 %v9837_v57, %v5117_v52  ;;  %v5156_v0 = vmul.f32 %v9837_v57, %v5118_v56 }
 0x5e0   : > { %v5115_v4 = vmul.f32 %v9826_v23, %v11001_v50  ;;  %v5116_v26 = vmul.f32 %v9826_v23, %v11002_v13  ;;  %v5189_v11 = vadd.f32 %v9854_v1, %v5151_v20  ;;  %v5190_v6 = vadd.f32 %v9854_v1, %v5152_v27 }
 0x5e1   : > { %v5187_v10 = vadd.f32 %v9854_v1, %v5149_v18  ;;  %v5188_v47 = vadd.f32 %v9854_v1, %v5150_v37  ;;  %v5193_v51 = vadd.f32 %v9854_v1, %v5155_v8  ;;  %v5194_v19 = vadd.f32 %v9854_v1, %v5156_v0 }
 0x5e2   : > { %v5153_v16 = vmul.f32 %v9837_v57, %v5115_v4  ;;  %v5154_v29 = vmul.f32 %v9837_v57, %v5116_v26  ;;  %v6618_v17 = vadd.low.f32.bf16 %v5189_v11, %v9748_v2  ;;  %v6619_v45 = vadd.high.f32.bf16 %v5190_v6, %v9748_v2 }
 0x5e3   : > { %v6620_v32 = vadd.low.f32.bf16 %v5187_v10, %v9750_v25  ;;  %v6621_v38 = vadd.high.f32.bf16 %v5188_v47, %v9750_v25  ;;  %v6622_v61 = vadd.low.f32.bf16 %v5193_v51, %v9752_v33  ;;  %v6623_v39 = vadd.high.f32.bf16 %v5194_v19, %v9752_v33 }
 0x5e4   : > { %v5191_v7 = vadd.f32 %v9854_v1, %v5153_v16  ;;  %v5192_v54 = vadd.f32 %v9854_v1, %v5154_v29  ;;  %v5381_v48 = vmax.f32 %v6618_v17, 0.0  ;;  %v5382_v52 = vmax.f32 %v6619_v45, 0.0 }
 0x5e5   : > { %v5379_v59 = vmax.f32 %v6620_v32, 0.0  ;;  %v5380_v56 = vmax.f32 %v6621_v38, 0.0  ;;  %v5385_v2 = vmax.f32 %v6622_v61, 0.0  ;;  %v5386_v50 = vmax.f32 %v6623_v39, 0.0 }
 0x5e6   : > { %v6624_v60 = vadd.low.f32.bf16 %v5191_v7, %v9754_v46  ;;  %v6625_v9 = vadd.high.f32.bf16 %v5192_v54, %v9754_v46  ;;  %v5907_v13 = vpack.c.bf16 %v5381_v48, %v5381_v48  ;;  %v5908_v26 = vpack.c.bf16 %v5382_v52, %v5382_v52 }
 0x5e7   : > { %v5905_v33 = vpack.c.bf16 %v5379_v59, %v5379_v59  ;;  %v5906_v20 = vpack.c.bf16 %v5380_v56, %v5380_v56  ;;  %v5911_v46 = vpack.c.bf16 %v5385_v2, %v5385_v2  ;;  %v5912_v27 = vpack.c.bf16 %v5386_v50, %v5386_v50 }
 0x5e8   : > { %v5383_v4 = vmax.f32 %v6624_v60, 0.0  ;;  %v5384_v25 = vmax.f32 %v6625_v9, 0.0  ;;  %5542 = vst.msk [vmem:[%s9888_s16 + $0x28] sm:$0xf] %vm5531_vm1, %v5907_v13  ;;  %5543 = vst.msk [vmem:[%s9888_s16 + $0x2c] sm:$0xf] %vm5531_vm1, %v5908_v26  ;;  %v11003_v8 = vsub.f32 %v9593_v36, %v9769_v58  ;;  %v11004_v16 = vsub.f32 %v9604_v42, %v9769_v58 }
 0x5e9   : > { %5540 = vst.msk [vmem:[%s9888_s16 + $0x20] sm:$0xf] %vm5531_vm1, %v5905_v33  ;;  %5541 = vst.msk [vmem:[%s9888_s16 + $0x24] sm:$0xf] %vm5531_vm1, %v5906_v20  ;;  %v11005_v11 = vsub.f32 %v9586_v21, %v9769_v58  ;;  %v11006_v10 = vsub.f32 %v9606_v34, %v9769_v58  ;;  %v11007_v36 = vsub.f32 %v9633_v53, %v9769_v58 }
 0x5ea   : > { %v5909_v18 = vpack.c.bf16 %v5383_v4, %v5383_v4  ;;  %v5910_v37 = vpack.c.bf16 %v5384_v25, %v5384_v25  ;;  %v5121_v0 = vmul.f32 %v9826_v23, %v11003_v8  ;;  %v5122_v29 = vmul.f32 %v9826_v23, %v11004_v16  ;;  %5546 = vst.msk [vmem:[%s9888_s16 + $0x38] sm:$0xf] %vm5531_vm1, %v5911_v46 }
 0x5eb   : > { %v5119_v6 = vmul.f32 %v9826_v23, %v11005_v11  ;;  %v5120_v47 = vmul.f32 %v9826_v23, %v11006_v10  ;;  %5547 = vst.msk [vmem:[%s9888_s16 + $0x3c] sm:$0xf] %vm5531_vm1, %v5912_v27  ;;  %v5125_v21 = vmul.f32 %v9826_v23, %v11007_v36  ;;  %v11008_v42 = vsub.f32 %v9644_v24, %v9769_v58 }
 0x5ec   : > { %5544 = vst.msk [vmem:[%s9888_s16 + $0x30] sm:$0xf] %vm5531_vm1, %v5909_v18  ;;  %5545 = vst.msk [vmem:[%s9888_s16 + $0x34] sm:$0xf] %vm5531_vm1, %v5910_v37  ;;  %v11009_v51 = vsub.f32 %v9626_v55, %v9769_v58  ;;  %v11010_v7 = vsub.f32 %v9646_v14, %v9769_v58  ;;  %v5159_v17 = vmul.f32 %v9837_v57, %v5121_v0 }
 0x5ed   : > { %v5126_v34 = vmul.f32 %v9826_v23, %v11008_v42  ;;  %v5160_v53 = vmul.f32 %v9837_v57, %v5122_v29  ;;  %v5157_v45 = vmul.f32 %v9837_v57, %v5119_v6  ;;  %v5158_v24 = vmul.f32 %v9837_v57, %v5120_v47 }
 0x5ee   : > { %v5123_v19 = vmul.f32 %v9826_v23, %v11009_v51  ;;  %v5124_v54 = vmul.f32 %v9826_v23, %v11010_v7  ;;  %v5163_v32 = vmul.f32 %v9837_v57, %v5125_v21  ;;  %v5197_v14 = vadd.f32 %v9854_v1, %v5159_v17 }
 0x5ef   : > { %v5164_v38 = vmul.f32 %v9837_v57, %v5126_v34  ;;  %v5198_v39 = vadd.f32 %v9854_v1, %v5160_v53  ;;  %v5195_v60 = vadd.f32 %v9854_v1, %v5157_v45  ;;  %v5196_v9 = vadd.f32 %v9854_v1, %v5158_v24 }
 0x5f0   : > { %v5161_v55 = vmul.f32 %v9837_v57, %v5123_v19  ;;  %v5162_v61 = vmul.f32 %v9837_v57, %v5124_v54  ;;  %v5201_v48 = vadd.f32 %v9854_v1, %v5163_v32  ;;  %v6626_v2 = vadd.low.f32.bf16 %v5197_v14, %v9756_v63 }
 0x5f1   : > { %v5202_v52 = vadd.f32 %v9854_v1, %v5164_v38  ;;  %v6627_v50 = vadd.high.f32.bf16 %v5198_v39, %v9756_v63  ;;  %v6628_v4 = vadd.low.f32.bf16 %v5195_v60, %v9758_v5  ;;  %v6629_v25 = vadd.high.f32.bf16 %v5196_v9, %v9758_v5 }
 0x5f2   : > { %v5199_v59 = vadd.f32 %v9854_v1, %v5161_v55  ;;  %v5200_v56 = vadd.f32 %v9854_v1, %v5162_v61  ;;  %v6630_v13 = vadd.low.f32.bf16 %v5201_v48, %v9760_v62  ;;  %v5389_v46 = vmax.f32 %v6626_v2, 0.0 }
 0x5f3   : > { %v6631_v26 = vadd.high.f32.bf16 %v5202_v52, %v9760_v62  ;;  %v5390_v27 = vmax.f32 %v6627_v50, 0.0  ;;  %v5387_v18 = vmax.f32 %v6628_v4, 0.0  ;;  %v5388_v37 = vmax.f32 %v6629_v25, 0.0 }
 0x5f4   : > { %v6632_v33 = vadd.low.f32.bf16 %v5199_v59, %v9762_v28  ;;  %v6633_v20 = vadd.high.f32.bf16 %v5200_v56, %v9762_v28  ;;  %v5393_v63 = vmax.f32 %v6630_v13, 0.0  ;;  %v5915_v16 = vpack.c.bf16 %v5389_v46, %v5389_v46 }
 0x5f5   : > { %v5394_v8 = vmax.f32 %v6631_v26, 0.0  ;;  %v5916_v29 = vpack.c.bf16 %v5390_v27, %v5390_v27  ;;  %v5913_v62 = vpack.c.bf16 %v5387_v18, %v5387_v18  ;;  %v5914_v11 = vpack.c.bf16 %v5388_v37, %v5388_v37 }
 0x5f6   : > { %v5391_v0 = vmax.f32 %v6632_v33, 0.0  ;;  %v5392_v5 = vmax.f32 %v6633_v20, 0.0  ;;  %v5919_v28 = vpack.c.bf16 %v5393_v63, %v5393_v63  ;;  %5550 = vst.msk [vmem:[%s9888_s16 + $0x48] sm:$0xf] %vm5531_vm1, %v5915_v16  ;;  %v11011_v36 = vsub.f32 %v9671_v44, %v9769_v58 }
 0x5f7   : > { %v5920_v6 = vpack.c.bf16 %v5394_v8, %v5394_v8  ;;  %5551 = vst.msk [vmem:[%s9888_s16 + $0x4c] sm:$0xf] %vm5531_vm1, %v5916_v29  ;;  %5548 = vst.msk [vmem:[%s9888_s16 + $0x40] sm:$0xf] %vm5531_vm1, %v5913_v62  ;;  %v11012_v42 = vsub.f32 %v9680_v49, %v9769_v58  ;;  %v11013_v51 = vsub.f32 %v9665_v31, %v9769_v58 }
 0x5f8   : > { %v5917_v10 = vpack.c.bf16 %v5391_v0, %v5391_v0  ;;  %v5918_v47 = vpack.c.bf16 %v5392_v5, %v5392_v5  ;;  %5549 = vst.msk [vmem:[%s9888_s16 + $0x44] sm:$0xf] %vm5531_vm1, %v5914_v11  ;;  %v5129_v21 = vmul.f32 %v9826_v23, %v11011_v36  ;;  %v11014_v7 = vsub.f32 %v9682_v12, %v9769_v58 }
 0x5f9   : > { %v5130_v34 = vmul.f32 %v9826_v23, %v11012_v42  ;;  %v5127_v19 = vmul.f32 %v9826_v23, %v11013_v51  ;;  %5554 = vst.msk [vmem:[%s9888_s16 + $0x58] sm:$0xf] %vm5531_vm1, %v5919_v28  ;;  %5555 = vst.msk [vmem:[%s9888_s16 + $0x5c] sm:$0xf] %vm5531_vm1, %v5920_v6  ;;  %v11015_v44 = vsub.f32 %v9704_v41, %v9769_v58 }
 0x5fa   : > { %v5128_v54 = vmul.f32 %v9826_v23, %v11014_v7  ;;  %5552 = vst.msk [vmem:[%s9888_s16 + $0x50] sm:$0xf] %vm5531_vm1, %v5917_v10  ;;  %5553 = vst.msk [vmem:[%s9888_s16 + $0x54] sm:$0xf] %vm5531_vm1, %v5918_v47  ;;  %v11016_v49 = vsub.f32 %v9711_v22, %v9769_v58  ;;  %v11017_v17 = vsub.f32 %v9698_v3, %v9769_v58 }
 0x5fb   : > { %v5133_v31 = vmul.f32 %v9826_v23, %v11015_v44  ;;  %v11018_v45 = vsub.f32 %v9713_v30, %v9769_v58  ;;  %v5167_v32 = vmul.f32 %v9837_v57, %v5129_v21  ;;  %v5168_v41 = vmul.f32 %v9837_v57, %v5130_v34 }
 0x5fc   : > { %v5134_v12 = vmul.f32 %v9826_v23, %v11016_v49  ;;  %v5131_v53 = vmul.f32 %v9826_v23, %v11017_v17  ;;  %v5165_v38 = vmul.f32 %v9837_v57, %v5127_v19  ;;  %v5166_v22 = vmul.f32 %v9837_v57, %v5128_v54 }
 0x5fd   : > { %v5132_v24 = vmul.f32 %v9826_v23, %v11018_v45  ;;  %v5171_v55 = vmul.f32 %v9837_v57, %v5133_v31  ;;  %v5205_v30 = vadd.f32 %v9854_v1, %v5167_v32  ;;  %v5206_v58 = vadd.f32 %v9854_v1, %v5168_v41 }
 0x5fe   : > { %v5172_v61 = vmul.f32 %v9837_v57, %v5134_v12  ;;  %v5169_v3 = vmul.f32 %v9837_v57, %v5131_v53  ;;  %v5203_v23 = vadd.f32 %v9854_v1, %v5165_v38  ;;  %v5204_v39 = vadd.f32 %v9854_v1, %v5166_v22 }
 0x5ff   : > { %v5170_v14 = vmul.f32 %v9837_v57, %v5132_v24  ;;  %v5209_v60 = vadd.f32 %v9854_v1, %v5171_v55  ;;  %v6634_v59 = vadd.low.f32.bf16 %v5205_v30, %v9764_v15  ;;  %v6635_v57 = vadd.high.f32.bf16 %v5206_v58, %v9764_v15 }
 0x600   : > { %v5210_v9 = vadd.f32 %v9854_v1, %v5172_v61  ;;  %v5207_v48 = vadd.f32 %v9854_v1, %v5169_v3  ;;  %v6636_v56 = vadd.low.f32.bf16 %v5203_v23, %v9766_v35  ;;  %v6637_v2 = vadd.high.f32.bf16 %v5204_v39, %v9766_v35 }
 0x601   : > { %v5208_v52 = vadd.f32 %v9854_v1, %v5170_v14  ;;  %v6638_v50 = vadd.low.f32.bf16 %v5209_v60, %v9771_v40  ;;  %v5397_v26 = vmax.f32 %v6634_v59, 0.0  ;;  %v5398_v33 = vmax.f32 %v6635_v57, 0.0 }
 0x602   : > { %v6639_v4 = vadd.high.f32.bf16 %v5210_v9, %v9771_v40  ;;  %v6640_v25 = vadd.low.f32.bf16 %v5207_v48, %v9773_v43  ;;  %v5395_v1 = vmax.f32 %v6636_v56, 0.0  ;;  %v5396_v20 = vmax.f32 %v6637_v2, 0.0 }
 0x603   : > { %v6641_v13 = vadd.high.f32.bf16 %v5208_v52, %v9773_v43  ;;  %v5401_v15 = vmax.f32 %v6638_v50, 0.0  ;;  %v5923_v40 = vpack.c.bf16 %v5397_v26, %v5397_v26  ;;  %v5924_v18 = vpack.c.bf16 %v5398_v33, %v5398_v33 }
 0x604   : > { %v5402_v46 = vmax.f32 %v6639_v4, 0.0  ;;  %v5399_v35 = vmax.f32 %v6640_v25, 0.0  ;;  %v5921_v37 = vpack.c.bf16 %v5395_v1, %v5395_v1  ;;  %v5922_v43 = vpack.c.bf16 %v5396_v20, %v5396_v20 }
 0x605   : > { %v5400_v27 = vmax.f32 %v6641_v13, 0.0  ;;  %v5927_v63 = vpack.c.bf16 %v5401_v15, %v5401_v15  ;;  %5558 = vst.msk [vmem:[%s9888_s16 + $0x68] sm:$0xf] %vm5531_vm1, %v5923_v40  ;;  %5559 = vst.msk [vmem:[%s9888_s16 + $0x6c] sm:$0xf] %vm5531_vm1, %v5924_v18 }
 0x606   : > { %v5928_v8 = vpack.c.bf16 %v5402_v46, %v5402_v46  ;;  %v5925_v0 = vpack.c.bf16 %v5399_v35, %v5399_v35  ;;  %5556 = vst.msk [vmem:[%s9888_s16 + $0x60] sm:$0xf] %vm5531_vm1, %v5921_v37  ;;  %5557 = vst.msk [vmem:[%s9888_s16 + $0x64] sm:$0xf] %vm5531_vm1, %v5922_v43 }
 0x607   : > { %v5926_v5 = vpack.c.bf16 %v5400_v27, %v5400_v27  ;;  %5562 = vst.msk [vmem:[%s9888_s16 + $0x78] sm:$0xf] %vm5531_vm1, %v5927_v63 }
 0x608   : > { %5563 = vst.msk [vmem:[%s9888_s16 + $0x7c] sm:$0xf] %vm5531_vm1, %v5928_v8  ;;  %5560 = vst.msk [vmem:[%s9888_s16 + $0x70] sm:$0xf] %vm5531_vm1, %v5925_v0 }
 0x609   : > { %5561 = vst.msk [vmem:[%s9888_s16 + $0x74] sm:$0xf] %vm5531_vm1, %v5926_v5 }
 0x60a PF: > { %s19_s30 = sadd.s32 1, %s6648_s30  }
 0x60b   : > { %p16_p4 = scmp.ge.s32.totalorder %s19_s30, 4  }
 0x60d   :  { %18 = sbr.rel (!%p16_p4) target bundleno = 1 (0x1), region = 94 }

// kernel: resnet_forward.7
= control target key start
LH: loop header
LB: loop body
LE: loop exit
PB: predicated region body
PF: predicated region fallthrough
CT: control target
= control target key end

     0   :  { %16 = vsyncpa [#allocation3], 0  ;;  %s3454_s0 = inlined_call_operand.vmem [shape: bf16[2,16,288], index: 0, kind: input, shape index: {}]   ;;  %s3455_s1 = inlined_call_operand.vmem [shape: bf16[288,128], index: 1, kind: input, shape index: {}]   ;;  %s3456_s2 = inlined_call_operand.vmem [shape: f32[1,1,128], index: 2, kind: input, shape index: {}]   ;;  %s3457_s3 = inlined_call_operand.vmem [shape: f32[1,1,128], index: 3, kind: input, shape index: {}]   ;;  %s3458_s4 = inlined_call_operand.vmem [shape: f32[128,128], index: 4, kind: input, shape index: {}]   ;;  %s3459_s5 = inlined_call_operand.vmem [shape: bf16[9,64,64], index: 5, kind: input, shape index: {}]   ;;  %s3460_s6 = inlined_call_operand.vmem [shape: f32[1,1,64], index: 6, kind: input, shape index: {}]   ;;  %s3461_s7 = inlined_call_operand.vmem [shape: f32[1,1,64], index: 7, kind: input, shape index: {}]   ;;  %s3462_s8 = inlined_call_operand.vmem [shape: f32[64,64], index: 8, kind: input, shape index: {}]   ;;  %s3463_s9 = inlined_call_operand.vmem [shape: f32[64,10], index: 9, kind: input, shape index: {}]   ;;  %s3464_s10 = inlined_call_operand.vmem [shape: f32[1,10], index: 10, kind: input, shape index: {}]   ;;  %s3465_s11 = inlined_call_operand.hbm [shape: f32[2,1,10], index: 11, kind: output, shape index: {}]  }
   0x1   :  { %18 = vsyncpa [#allocation3 + $0x1], 0  ;;  %s2826_s17 = smov 0   ;;  %s2828_s18 = smov 0  }
   0x2   :  { %s2830_s19 = smov 0   ;;  %s2832_s20 = smov 0  }
   0x3 LB: > { %3467 = sst [smem:[#allocation5_spill]] %s2755_s19  ;;  %s2847_s21 = sadd.s32 4294967295, %s2759_s20   ;;  %s2759_s20 = sphi %s2832_s20, %s3483_s20   ;;  %s2755_s19 = sphi %s2830_s19, %s3480_s19   ;;  %s2751_s18 = sphi %s2828_s18, %s3482_s18   ;;  %s2747_s17 = sphi %s2826_s17, %s3481_s17  }
   0x4   : > { %s2073_s22 = sadd.s32 4294967294, %s2759_s20   ;;  %s2851_s23 = sadd.s32 1, %s2759_s20  }
   0x5   : > { %s267_s24 = sadd.s32 1, %s2755_s19  ;;  %s264_s25 = ssub.s32 %s2759_s20, %s2851_s23 }
   0x6   : > { %p277_p0 = scmp.ne.s32.totalorder %s2755_s19, %s2751_s18  ;;  %p265_p1 = scmp.eq.s32.totalorder %s264_s25, 0 }
   0x7   : > { %p278_p2 = scmp.eq.s32.totalorder %s2847_s21, 1  ;;  %p283_p3 = scmp.ne.s32.totalorder %s2751_s18, %s2747_s17 }
   0x8   : > { %p284_p4 = scmp.eq.s32.totalorder %s2073_s22, 1  ;;  %p2076_p7 = scmp.ge.s32.totalorder %s2759_s20, 1 }
   0x9   : > { %s2862_s26 = scalar_select %p265_p1, %s2755_s19, %s267_s24  }
   0xa   : > { %p2864_p5 = por %p278_p2, %p277_p0  ;;  %p2868_p6 = por %p284_p4, %p283_p3 }
   0xb   : > { %3468 = sst [smem:[#allocation6_spill]] %s2862_s26  ;;  %p340_p8 = scmp.lt.s32.totalorder %s2759_s20, 3 }
   0xd   : > { %p341_p9 = pnand %p2076_p7, %p340_p8 }
   0xe   : > { %p379_p10 = scmp.lt.s32.totalorder (!%p341_p9), %s2847_s21, 1  ;;  %s2763_s30 = smov (!%p341_p9), 64  }
   0xf   : > { %344 = sbr.rel (%p341_p9) target bundleno = 1239 (0x4d7), region = 64  ;;  %s377_s25 = sand.u32 (!%p341_p9), 1, %s2751_s18  }
  0x10   : > { %s2006_s15 = scalar_lea.sflag (!%p341_p9), [#allocation3], %s377_s25 }
  0x14   : > { %v2637_v0 = vld [vmem:[%s3455_s1 + $0x78] sm:$0xff]   ;;  %v2761_v2 = vmov 0.0   ;;  %v2639_v3 = vld [vmem:[%s3455_s1 + $0x70] sm:$0xff]   ;;  %vm2762_vm0 = vmmov 0   ;;  %v2641_v5 = vld [vmem:[%s3455_s1 + $0x68] sm:$0xff]   ;;  %s380_s12 = scalar_select %p379_p10, %s2847_s21, 1 }
  0x15   : > { %v2638_v1 = vld [vmem:[%s3455_s1 + $0x38] sm:$0xff]   ;;  %2350 = vmatprep.subr.bf16.mxu1 %v2761_v2  ;;  %2219 = vmatprep.subr.bf16.mxu0 %v2637_v0  ;;  %v2640_v4 = vld [vmem:[%s3455_s1 + $0x30] sm:$0xff]   ;;  %v2642_v6 = vld [vmem:[%s3455_s1 + $0x28] sm:$0xff]   ;;  %vm548_vm1 = vcmask 261120   ;;  %vm846_vm2 = vcmask 1044480   ;;  %vm1068_vm3 = vcmask 1045504  }
  0x16   : > { %2354 = vmatprep.mubr.msk.bf16.mxu1 %vm2762_vm0, %v2761_v2  ;;  %2220 = vmatpush3.bf16.msra.mxu0 %v2638_v1  ;;  %v2643_v7 = vld [vmem:[%s3455_s1 + $0x60] sm:$0xff]   ;;  %v2645_v9 = vld [vmem:[%s3455_s1 + $0x58] sm:$0xff]   ;;  %s2593_s24 = smul.u32 24, %s380_s12  ;;  %v2649_v10 = vld [vmem:[%s3455_s1 + $0x88] sm:$0xff]   ;;  %vm947_vm6 = vcmask 523264   ;;  %vm1158_vm11 = vcmask 1043456  }
  0x17   : > { %2221 = vmatprep.subr.bf16.mxu0 %v2639_v3  ;;  %v2644_v8 = vld [vmem:[%s3455_s1 + $0x20] sm:$0xff]   ;;  %v2646_v11 = vld [vmem:[%s3455_s1 + $0x18] sm:$0xff]   ;;  %2351 = vmatpush3.bf16.msra.mxu1 %v2649_v10  ;;  %v2647_v13 = vld [vmem:[%s3455_s1 + $0x50] sm:$0xff]   ;;  %vm910_vm7 = vsmask.f32 7424  ;;  %vm1337_vm12 = vcmask 1041408  }
  0x18   : > { %2352 = vmatprep.subr.bf16.mxu1 %v2761_v2  ;;  %v2652_v12 = vld [vmem:[%s3455_s1 + $0x80] sm:$0xff]   ;;  %s383_s12 = scalar_lea.vmem %s3454_s0, %s2593_s24  ;;  %v2648_v14 = vld [vmem:[%s3455_s1 + $0x10] sm:$0xff]   ;;  %v2650_v16 = vld [vmem:[%s3455_s1 + $0x48] sm:$0xff]   ;;  %vm1257_vm10 = vsmask.f32 5376  ;;  %s378_s24 = scalar_lea.vmem [#allocation2], %s377_s25 }
  0x19   : > { %v2655_v15 = vld [vmem:[%s383_s12 + $0x8] ss:$12 sps:$4 sm:$0xff]   ;;  %v2658_v17 = vld [vmem:[%s383_s12 + $0x4] ss:$12 sps:$4 sm:$0xff]   ;;  %v649_v18 = vld [vmem:[%s3458_s4 + $0x78] sm:$0xff]  ;;  %vm2003_vm13 = vcmask 73728  }
  0x1a   : > { %2222 = vmatpush3.bf16.msra.mxu0 %v2640_v4  ;;  %v648_v19 = vld [vmem:[%s3458_s4 + $0x70] sm:$0xff]  ;;  %v2651_v20 = vld [vmem:[%s3455_s1 + $0x8] sm:$0xff]   ;;  %v2653_v21 = vld [vmem:[%s3455_s1 + $0x40] sm:$0xff]   ;;  %584 = vmatprep.mubr.bf16.mxu0 %v2658_v17 }
  0x1b   : > { %2223 = vmatprep.subr.bf16.mxu0 %v2641_v5  ;;  %2353 = vmatpush3.bf16.msra.mxu1 %v2652_v12  ;;  %v2654_v22 = vld [vmem:[%s3455_s1] sm:$0xff]   ;;  %v647_v24 = vld [vmem:[%s3458_s4 + $0x68] sm:$0xff]  ;;  %v645_v26 = vld [vmem:[%s3458_s4 + $0x58] sm:$0xff] }
  0x1c   : > { %2358 = vmatprep.subr.mxu1 %v2761_v2  ;;  %v2656_v23 = vld [vmem:[%s383_s12] ss:$12 sps:$4 sm:$0xff]   ;;  %v644_v27 = vld [vmem:[%s3458_s4 + $0x50] sm:$0xff]  ;;  %v641_v30 = vld [vmem:[%s3458_s4 + $0x38] sm:$0xff]  ;;  %s2018_s12 = sshll.u32 %s378_s24, 4  ;;  %s2019_s12 = int_to_ptr.vmem [resolvable:$true] %s2018_s12 }
  0x1d   : > { %v646_v25 = vld [vmem:[%s3458_s4 + $0x60] sm:$0xff]  ;;  %v643_v28 = vld [vmem:[%s3458_s4 + $0x48] sm:$0xff]  ;;  %v640_v31 = vld [vmem:[%s3458_s4 + $0x30] sm:$0xff]  ;;  %s2699_s16 = scalar_lea.vmem %s2019_s12, 16 }
  0x1e   : > { %2224 = vmatpush3.bf16.msra.mxu0 %v2642_v6  ;;  %2355 = vmatmul.mubr.msk.bf16.vlgmr.msra.gmra.mxu1 %vm548_vm1, %v2655_v15  ;;  %v642_v29 = vld [vmem:[%s3458_s4 + $0x40] sm:$0xff]  ;;  %v639_v32 = vld [vmem:[%s3458_s4 + $0x28] sm:$0xff]  ;;  %v637_v34 = vld [vmem:[%s3458_s4 + $0x18] sm:$0xff]  ;;  %p2700_p11 = scmp.ne.s32.totalorder %s2019_s12, %s2699_s16 }
  0x1f   : > { %2225 = vmatprep.subr.bf16.mxu0 %v2643_v7  ;;  %2359 = vmatpush3.msra.mxu1 %v649_v18  ;;  %v638_v33 = vld [vmem:[%s3458_s4 + $0x20] sm:$0xff]  ;;  %v636_v35 = vld [vmem:[%s3458_s4 + $0x10] sm:$0xff]  ;;  %v635_v36 = vld [vmem:[%s3458_s4 + $0x8] sm:$0xff] }
  0x20   : > { %2360 = vmatprep.subr.mxu1 %v2761_v2  ;;  %2390 = vmatprep.mubr.msk.f32.mxu1 %vm2762_vm0, %v2761_v2  ;;  %v634_v37 = vld [vmem:[%s3458_s4] sm:$0xff]  ;;  %v2659_v3 = vld [vmem:[%s3459_s5 + $0x58] sm:$0xff]   ;;  %v2661_v5 = vld [vmem:[%s3459_s5 + $0x50] sm:$0xff]   ;;  %p2701_p12 = pnand %p2700_p11, %p2864_p5 }
  0x21   : > { %2361 = vmatpush3.msra.mxu1 %v648_v19  ;;  %v2660_v4 = vld [vmem:[%s3459_s5 + $0x38] sm:$0xff]   ;;  %v2662_v6 = vld [vmem:[%s3459_s5 + $0x30] sm:$0xff]   ;;  %v2663_v7 = vld [vmem:[%s3459_s5 + $0x48] sm:$0xff]  }
  0x22   : > { %2226 = vmatpush3.bf16.msra.mxu0 %v2644_v8  ;;  %2362 = vmatprep.subr.mxu1 %v2761_v2  ;;  %v2664_v8 = vld [vmem:[%s3459_s5 + $0x28] sm:$0xff]   ;;  %v2666_v10 = vld [vmem:[%s3459_s5 + $0x20] sm:$0xff]   ;;  %p2702_p13 = pneg %p2701_p12 }
  0x23   : > { %2227 = vmatprep.subr.bf16.mxu0 %v2645_v9  ;;  %2363 = vmatpush3.msra.mxu1 %v647_v24  ;;  %v2665_v9 = vld [vmem:[%s3459_s5 + $0x40] sm:$0xff]  }
  0x24   : > { %2364 = vmatprep.subr.mxu1 %v2761_v2 }
  0x25   : > { %2365 = vmatpush3.msra.mxu1 %v646_v25 }
  0x26   : > { %2228 = vmatpush3.bf16.msra.mxu0 %v2646_v11  ;;  %2366 = vmatprep.subr.mxu1 %v2761_v2 }
  0x27   : > { %2229 = vmatprep.subr.bf16.mxu0 %v2647_v13  ;;  %2367 = vmatpush3.msra.mxu1 %v645_v26 }
  0x28   : > { %2368 = vmatprep.subr.mxu1 %v2761_v2 }
  0x29   : > { %2369 = vmatpush3.msra.mxu1 %v644_v27 }
  0x2a   : > { %2230 = vmatpush3.bf16.msra.mxu0 %v2648_v14  ;;  %2370 = vmatprep.subr.mxu1 %v2761_v2 }
  0x2b   : > { %2231 = vmatprep.subr.bf16.mxu0 %v2650_v16  ;;  %2371 = vmatpush3.msra.mxu1 %v643_v28 }
  0x2c   : > { %2372 = vmatprep.subr.mxu1 %v2761_v2 }
  0x2d   : > { %2373 = vmatpush3.msra.mxu1 %v642_v29 }
  0x2e   : > { %2232 = vmatpush3.bf16.msra.mxu0 %v2651_v20  ;;  %2374 = vmatprep.subr.mxu1 %v2761_v2 }
  0x2f   : > { %2233 = vmatprep.subr.bf16.mxu0 %v2653_v21  ;;  %2375 = vmatpush3.msra.mxu1 %v641_v30 }
  0x30   : > { %2376 = vmatprep.subr.mxu1 %v2761_v2 }
  0x31   : > { %2377 = vmatpush3.msra.mxu1 %v640_v31 }
  0x32   : > { %2234 = vmatpush3.bf16.msra.mxu0 %v2654_v22  ;;  %2378 = vmatprep.subr.mxu1 %v2761_v2 }
  0x33   : > { %2393 = vmatprep.subr.mxu0 %v2761_v2  ;;  %2379 = vmatpush3.msra.mxu1 %v639_v32 }
  0x34   : > { %2380 = vmatprep.subr.mxu1 %v2761_v2 }
  0x35   : > { %585 = vmatmul.mubr.bf16.vlgmr.msra.gmra.mxu0 %v2656_v23  ;;  %2381 = vmatpush3.msra.mxu1 %v638_v33 }
  0x36   : > { %2394 = vmatpush3.msra.mxu0 %v649_v18  ;;  %2425 = vmatprep.mubr.msk.f32.mxu0 %vm2762_vm0, %v2761_v2 }
  0x37   : > { %2395 = vmatprep.subr.mxu0 %v2761_v2  ;;  %2382 = vmatprep.subr.mxu1 %v2761_v2 }
  0x38   : > { %2396 = vmatpush3.msra.mxu0 %v648_v19  ;;  %2383 = vmatpush3.msra.mxu1 %v637_v34  ;;  %v814_v19 = vlaneseq }
  0x39   : > { %2397 = vmatprep.subr.mxu0 %v2761_v2  ;;  %2384 = vmatprep.subr.mxu1 %v2761_v2 }
  0x3a   : > { %2398 = vmatpush3.msra.mxu0 %v647_v24  ;;  %2385 = vmatpush3.msra.mxu1 %v636_v35  ;;  %v3069_v21 = vshrl.u32 %v814_v19, 7  ;;  %v2673_v19 = vld [vmem:[%s3459_s5 + $0x80] sm:$0xff]  }
  0x3b   : > { %2399 = vmatprep.subr.mxu0 %v2761_v2  ;;  %2386 = vmatprep.subr.mxu1 %v2761_v2 }
  0x3c   : > { %2400 = vmatpush3.msra.mxu0 %v646_v25  ;;  %2387 = vmatpush3.msra.mxu1 %v635_v36  ;;  %v3072_v22 = vsub.s32 0, %v3069_v21 }
  0x3d   : > { %2401 = vmatprep.subr.mxu0 %v2761_v2  ;;  %2388 = vmatprep.subr.mxu1 %v2761_v2 }
  0x3e   : > { %2402 = vmatpush3.msra.mxu0 %v645_v26  ;;  %2389 = vmatpush3.msra.mxu1 %v634_v37 }
  0x3f   : > { %2403 = vmatprep.subr.mxu0 %v2761_v2  ;;  %2428 = vmatprep.subr.bf16.mxu1 %v2761_v2 }
  0x40   : > { %2404 = vmatpush3.msra.mxu0 %v644_v27 }
  0x41   : > { %2405 = vmatprep.subr.mxu0 %v2761_v2 }
  0x42   : > { %2406 = vmatpush3.msra.mxu0 %v643_v28  ;;  %v2100_v28 = vld [vmem:[%s3456_s2] ss:$0 sm:$0xff] }
  0x43   : > { %2407 = vmatprep.subr.mxu0 %v2761_v2 }
  0x44   : > { %2408 = vmatpush3.msra.mxu0 %v642_v29 }
  0x45   : > { %2409 = vmatprep.subr.mxu0 %v2761_v2 }
  0x46   : > { %2410 = vmatpush3.msra.mxu0 %v641_v30 }
  0x47   : > { %2411 = vmatprep.subr.mxu0 %v2761_v2 }
  0x48   : > { %2412 = vmatpush3.msra.mxu0 %v640_v31  ;;  %v2101_v31 = vld [vmem:[%s3457_s3] ss:$0 sm:$0xff] }
  0x49   : > { %2413 = vmatprep.subr.mxu0 %v2761_v2 }
  0x4a   : > { %2414 = vmatpush3.msra.mxu0 %v639_v32 }
  0x4b   : > { %2415 = vmatprep.subr.mxu0 %v2761_v2 }
  0x4c   : > { %2416 = vmatpush3.msra.mxu0 %v638_v33 }
  0x4d   : > { %2417 = vmatprep.subr.mxu0 %v2761_v2 }
  0x4e   : > { %2418 = vmatpush3.msra.mxu0 %v637_v34 }
  0x4f   : > { %2419 = vmatprep.subr.mxu0 %v2761_v2 }
  0x50   : > { %2420 = vmatpush3.msra.mxu0 %v636_v35 }
  0x51   : > { %2421 = vmatprep.subr.mxu0 %v2761_v2 }
  0x52   : > { %2422 = vmatpush3.msra.mxu0 %v635_v36 }
  0x53   : > { %2423 = vmatprep.subr.mxu0 %v2761_v2 }
  0x54   : > { %2424 = vmatpush3.msra.mxu0 %v634_v37 }
  0x55   : > { %2452 = vmatprep.subr.bf16.mxu0 %v2761_v2 }
  0xde   : > { %v627_v38 = vpop.f32.mrf.mxu1 }
  0xe0   : > { %v2356_v39 = vpop.f32.mrf.mxu1 }
  0xe2   : > { %v630_v40 = vpop.f32.mrf.mxu1 }
  0xe4   : > { %v2357_v41 = vpop.f32.mrf.mxu1 }
  0xf5   : > { %v2235_v42 = vpop.f32.mrf.mxu0 }
  0xf7   : > { %v2236_v43 = vpop.f32.mrf.mxu0 }
  0xf8   : > { %v2237_v44 = vadd.f32 %v2236_v43, %v2235_v42 }
  0xf9   : > { %v2238_v45 = vpop.f32.mrf.mxu0 }
  0xfa   : > { %v3023_v47 = vadd.f32 %v2237_v44, %v627_v38  ;;  %v3085_v38 = vadd.s32 8, %v3069_v21  ;;  %v862_v44 = vand.u32 3, %v3069_v21 }
  0xfb   : > { %v2239_v46 = vpop.f32.mrf.mxu0 }
  0xfc   : > { %v2240_v48 = vadd.f32 %v2239_v46, %v2238_v45  ;;  %v659_v50 = vmul.f32 %v3023_v47, %v3023_v47  ;;  %v869_v46 = vand.u32 3, %v3085_v38  ;;  %vm3099_vm4 = vcmp.lt.s32.totalorder %v862_v44, 3 }
  0xfd   : > { %vm3155_vm8 = vcmp.ge.s32.totalorder %v862_v44, 1  ;;  %v2681_v44 = vld [vmem:[%s3459_s5 + $0xc0] sm:$0xff]  }
  0xfe   : > { %v3025_v49 = vadd.f32 %v2240_v48, %v630_v40  ;;  %vm3103_vm5 = vcmp.lt.s32.totalorder %v869_v46, 3  ;;  %vm3160_vm9 = vcmp.ge.s32.totalorder %v869_v46, 1 }
 0x100   : > { %v652_v51 = vadd.f32 %v3025_v49, %v3023_v47  ;;  %v660_v52 = vmul.f32 %v3025_v49, %v3025_v49 }
 0x102   : > { %v653_v53 = vrot.slane %v652_v51, 4  ;;  %v661_v54 = vadd.f32 %v660_v52, %v659_v50  ;;  %v2693_v50 = vld [vmem:[%s3459_s5 + $0xe8] sm:$0xff]  }
 0x104   : > { %v654_v55 = vadd.f32 %v653_v53, %v652_v51  ;;  %v662_v56 = vrot.slane %v661_v54, 4 }
 0x106   : > { %v655_v57 = vrot.slane %v654_v55, 2  ;;  %v663_v58 = vadd.f32 %v662_v56, %v661_v54 }
 0x108   : > { %v656_v59 = vadd.f32 %v655_v57, %v654_v55  ;;  %v664_v60 = vrot.slane %v663_v58, 2 }
 0x10a   : > { %v657_v61 = vrot.slane %v656_v59, 1  ;;  %v665_v62 = vadd.f32 %v664_v60, %v663_v58 }
 0x10c   : > { %v658_v63 = vadd.f32 %v657_v61, %v656_v59  ;;  %v666_v0 = vrot.slane %v665_v62, 1  ;;  %v2667_v59 = vld [vmem:[%s3459_s5 + $0x98] sm:$0xff]  }
 0x10e   : > { %2391 = vmatmul.mubr.f32.vlgmr.msra.gmra.mxu1 %v658_v63  ;;  %v667_v1 = vadd.f32 %v666_v0, %v665_v62 }
 0x10f   : > { %2436 = vmatprep.mubr.msk.bf16.mxu1 %vm2762_vm0, %v2761_v2  ;;  %2429 = vmatpush3.bf16.msra.mxu1 %v2660_v4  ;;  %v2669_v4 = vld [vmem:[%s3459_s5 + $0x90] sm:$0xff]  }
 0x110   : > { %2426 = vmatmul.mubr.f32.vlgmr.msra.gmra.mxu0 %v667_v1  ;;  %2430 = vmatprep.subr.bf16.mxu1 %v2761_v2  ;;  %v2668_v1 = vld [vmem:[%s3459_s5 + $0x18] sm:$0xff]  }
 0x111   : > { %2460 = vmatprep.mubr.msk.bf16.mxu0 %vm2762_vm0, %v2761_v2  ;;  %2453 = vmatpush3.bf16.msra.mxu0 %v2659_v3 }
 0x112   : > { %2454 = vmatprep.subr.bf16.mxu0 %v2761_v2 }
 0x113   : > { %2431 = vmatpush3.bf16.msra.mxu1 %v2662_v6 }
 0x114   : > { %2432 = vmatprep.subr.bf16.mxu1 %v2761_v2 }
 0x115   : > { %2455 = vmatpush3.bf16.msra.mxu0 %v2661_v5  ;;  %v2670_v5 = vld [vmem:[%s3459_s5 + $0x10] sm:$0xff]  }
 0x116   : > { %2456 = vmatprep.subr.bf16.mxu0 %v2761_v2 }
 0x117   : > { %2433 = vmatpush3.bf16.msra.mxu1 %v2664_v8  ;;  %v2671_v8 = vld [vmem:[%s3459_s5 + $0x88] sm:$0xff]  }
 0x118   : > { %2434 = vmatprep.subr.bf16.mxu1 %v2761_v2 }
 0x119   : > { %2457 = vmatpush3.bf16.msra.mxu0 %v2663_v7 }
 0x11a   : > { %2458 = vmatprep.subr.bf16.mxu0 %v2761_v2 }
 0x11b   : > { %2435 = vmatpush3.bf16.msra.mxu1 %v2666_v10  ;;  %v2672_v10 = vld [vmem:[%s3459_s5 + $0x8] sm:$0xff]  }
 0x11c   : > { %2440 = vmatprep.subr.bf16.mxu1 %v2761_v2 }
 0x11d   : > { %2459 = vmatpush3.bf16.msra.mxu0 %v2665_v9 }
 0x11e   : > { %2476 = vmatprep.subr.bf16.mxu0 %v2761_v2 }
 0x1ce   : > { %v734_v11 = vpop.f32.mrf.mxu1 }
 0x1cf   : > { %v738_v12 = vmul.f32 0.00390625, %v734_v11 }
 0x1d0   : > { %v2392_v13 = vpop.f32.mrf.mxu1  ;;  %v805_v14 = vpop.f32.mrf.mxu0 }
 0x1d1   : > { %v810_v15 = vmul.f32 %v738_v12, %v738_v12  ;;  %v809_v16 = vmul.f32 0.00390625, %v805_v14  ;;  %v817_v23 = vrot.slane %v738_v12, %v3072_v22 }
 0x1d2   : > { %v2427_v17 = vpop.f32.mrf.mxu0 }
 0x1d3   : > { %v811_v18 = vsub.f32 %v809_v16, %v810_v15  ;;  %v818_v25 = vsub.f32 %v3023_v47, %v817_v23  ;;  %v819_v26 = vsub.f32 %v3025_v49, %v817_v23  ;;  %v2764_v17 = vmov 0   ;;  %v2692_v49 = vld [vmem:[%s3459_s5 + $0xf0] sm:$0xff]  }
 0x1d5   : > { %v812_v20 = vadd.f32 1e-05, %v811_v18  ;;  %v1530_v18 = vrot.slane %v2764_v17, 1  ;;  %v1691_v17 = vld [vmem:[%s3462_s8 + $0x18] sm:$0xff] }
 0x1d7   : > { %2695 = vrsqrt.f32 %v812_v20  ;;  %v1688_v20 = vld [vmem:[%s3462_s8] sm:$0xff] }
 0x1e4   : > { %v2696_v24 = vpop.eup %2695 }
 0x1e5   : > { %v823_v27 = vrot.slane %v2696_v24, %v3072_v22  ;;  %v2674_v24 = vld [vmem:[%s3459_s5] sm:$0xff]  }
 0x1e7   : > { %v824_v29 = vmul.f32 %v823_v27, %v818_v25  ;;  %v825_v30 = vmul.f32 %v823_v27, %v819_v26 }
 0x1e9   : > { %v832_v32 = vmul.f32 %v2100_v28, %v824_v29  ;;  %v833_v33 = vmul.f32 %v2100_v28, %v825_v30  ;;  %v2675_v29 = vld [vmem:[%s3459_s5 + $0xd8] sm:$0xff]  }
 0x1eb   : > { %v840_v34 = vadd.f32 %v2101_v31, %v832_v32  ;;  %v841_v35 = vadd.f32 %v2101_v31, %v833_v33  ;;  %v2676_v32 = vld [vmem:[%s3459_s5 + $0x78] sm:$0xff]  }
 0x1ed   : > { %v843_v36 = vmax.f32 %v841_v35, 0.0  ;;  %1900 = vrot.lane.b32.xlu0 %v840_v34, %s2763_s30  ;;  %v842_v37 = vmax.f32 %v840_v34, 0.0  ;;  %v2677_v34 = vld [vmem:[%s3459_s5 + $0xd0] sm:$0xff]  }
 0x1ef   : > { %v848_v39 = vrot.slane %v843_v36, 3  ;;  %v847_v40 = vrot.slane %v842_v37, 3  ;;  %v2679_v36 = vld [vmem:[%s3459_s5 + $0xc8] sm:$0xff]  }
 0x1f1   : > { %v3087_v41 = vsel %vm846_vm2, %v848_v39, 0.0  ;;  %v3089_v42 = vsel %vm846_vm2, %v847_v40, %v848_v39  ;;  %v3091_v43 = vsel %vm846_vm2, 0.0, %v847_v40  ;;  %1902 = vrot.lane.b32.xlu0 %v841_v35, %s2763_s30  ;;  %v2678_v35 = vld [vmem:[%s3459_s5 + $0x70] sm:$0xff]   ;;  %v2680_v40 = vld [vmem:[%s3459_s5 + $0x68] sm:$0xff]   ;;  %s2216_s30 = sshll.u32 %s2847_s21, 4  ;;  %s2765_s21 = smov [#allocation2]  }
 0x1f2   : > { %v1072_v45 = vrot.slane %v3087_v41, 2  ;;  %v899_v47 = vpack.c.bf16 %v3089_v42, %v3091_v43  ;;  %v1069_v48 = vrot.slane %v3091_v43, 2  ;;  %v1070_v51 = vrot.slane %v3089_v42, 2  ;;  %s3419_s26 = scalar_lea.hbm %s3465_s11, %s2216_s30  ;;  %s2703_s22 = sshll.u32 %s2765_s21, 4  ;;  %s2704_s22 = int_to_ptr.vmem [resolvable:$false] %s2703_s22 }
 0x1f3   : > { %v900_v52 = vpack.c.bf16 %v3087_v41, %v3087_v41  ;;  %v1509_v7 = vpack.c.bf16 %v3087_v41, %v3089_v42  ;;  %v888_v28 = vsel %vm3155_vm8, %v3091_v43, 0.0  ;;  %v889_v30 = vsel %vm3160_vm9, %v3089_v42, 0.0  ;;  %s2705_s19 = scalar_lea.vmem %s2704_s22, 32  ;;  %p2706_p0 = scmp.lt.s32.totalorder %s2019_s12, %s2704_s22 }
 0x1f4   : > { %v914_v53 = vshll.u32 %v899_v47, 16  ;;  %v1071_v54 = vsel %vm1068_vm3, %v1069_v48, %v1070_v51  ;;  %v3114_v55 = vsel %vm1068_vm3, %v1070_v51, %v1072_v45  ;;  %v912_v60 = vshrl.u32 %v899_v47, 16  ;;  %v2682_v48 = vld [vmem:[%s3459_s5 + $0x60] sm:$0xff]   ;;  %p2707_p1 = scmp.lt.s32.totalorder %s2705_s19, %s2699_s16 }
 0x1f5   : > { %v919_v56 = vshll.u32 %v900_v52, 16  ;;  %v1076_v57 = vsel %vm3099_vm4, %v1071_v54, 0.0  ;;  %v1077_v58 = vsel %vm3103_vm5, %v3114_v55, 0.0  ;;  %v1261_v6 = vshrl.u32 %v900_v52, 16 }
 0x1f6   : > { %v916_v61 = vrot.slane %v914_v53, 1  ;;  %v1078_v62 = vpack.c.bf16 %v1077_v58, %v1076_v57  ;;  %v1523_v9 = vshll.u32 %v1509_v7, 16  ;;  %v1258_v11 = vrot.slane %v912_v60, 2  ;;  %v2684_v58 = vld [vmem:[%s3459_s5 + $0xb8] sm:$0xff]   ;;  %p2708_p2 = por %p2707_p1, %p2706_p0 }
 0x1f7   : > { %v921_v0 = vrot.slane %v919_v56, 1  ;;  %v1259_v12 = vrot.slane %v914_v53, 3  ;;  %v1263_v13 = vrot.slane %v1261_v6, 2  ;;  %v1264_v14 = vrot.slane %v919_v56, 3  ;;  %v2683_v53 = vld [vmem:[%s3459_s5 + $0x118] sm:$0xff]  }
 0x1f8   : > { %v917_v63 = vor.u32 %v916_v61, %v912_v60  ;;  %2461 = vmatmul.mubr.msk.bf16.vlgmr.msra.gmra.mxu0 %vm947_vm6, %v1078_v62  ;;  %v1521_v15 = vshrl.u32 %v1509_v7, 16  ;;  %v1525_v16 = vrot.slane %v1523_v9, 1  ;;  %v890_v33 = vpack.c.bf16 %v889_v30, %v888_v28  ;;  %v2685_v60 = vld [vmem:[%s3459_s5 + $0x110] sm:$0xff]   ;;  %v2690_v7 = vld [vmem:[%s3459_s5 + $0xa0] sm:$0xff]   ;;  %p2709_p3 = pnand %p2708_p2, %p2702_p13 }
 0x1f9   : > { %2477 = vmatpush3.bf16.msra.mxu0 %v2667_v59  ;;  %2484 = vmatprep.mubr.msk.bf16.mxu0 %vm2762_vm0, %v2761_v2  ;;  %v1260_v25 = vor.u32 %v1259_v12, %v1258_v11  ;;  %v1265_v26 = vor.u32 %v1264_v14, %v1263_v13  ;;  %v1162_v37 = vrot.slane %v3087_v41, 4  ;;  %v1159_v38 = vrot.slane %v3091_v43, 4  ;;  %v2686_v61 = vld [vmem:[%s3459_s5 + $0xb0] sm:$0xff]   ;;  %v2694_v12 = vld [vmem:[%s3459_s5 + $0xe0] sm:$0xff]   ;;  %v1695_v13 = vld [vmem:[%s3462_s8 + $0x38] sm:$0xff] }
 0x1fa   : > { %v922_v3 = vsel %vm910_vm7, %v917_v63, %v921_v0  ;;  %2478 = vmatprep.subr.bf16.mxu0 %v2761_v2  ;;  %v1526_v23 = vor.u32 %v1525_v16, %v1521_v15  ;;  %v1160_v39 = vrot.slane %v3089_v42, 4  ;;  %v1427_v51 = vsel %vm3155_vm8, %v3089_v42, 0.0  ;;  %v2687_v63 = vld [vmem:[%s3459_s5 + $0x108] sm:$0xff]   ;;  %v1694_v14 = vld [vmem:[%s3462_s8 + $0x30] sm:$0xff]  ;;  %v1692_v16 = vld [vmem:[%s3462_s8 + $0x20] sm:$0xff] }
 0x1fb   : > { %2437 = vmatmul.mubr.msk.bf16.vlgmr.msra.gmra.mxu1 %vm947_vm6, %v922_v3  ;;  %v1266_v31 = vsel %vm1257_vm10, %v1260_v25, %v1265_v26  ;;  %v1428_v52 = vsel %vm3160_vm9, %v3087_v41, 0.0  ;;  %v1603_v62 = vrot.slane %v2761_v2, 2  ;;  %v1341_v0 = vrot.slane %v3087_v41, 6  ;;  %v1693_v15 = vld [vmem:[%s3462_s8 + $0x28] sm:$0xff] }
 0x1fc   : > { %2441 = vmatpush3.bf16.msra.mxu1 %v2668_v1  ;;  %2448 = vmatprep.mubr.msk.bf16.mxu1 %vm2762_vm0, %v2761_v2  ;;  %v3169_v27 = vsel %vm910_vm7, %v1526_v23, %v1530_v18  ;;  %v1161_v46 = vsel %vm1158_vm11, %v1159_v38, %v1160_v39  ;;  %v1163_v47 = vsel %vm1158_vm11, %v1160_v39, %v1162_v37  ;;  %v1338_v1 = vrot.slane %v3091_v43, 6  ;;  %v2689_v43 = vld [vmem:[%s3459_s5 + $0x100] sm:$0xff]   ;;  %v1690_v18 = vld [vmem:[%s3462_s8 + $0x10] sm:$0xff] }
 0x1fd   : > { %2442 = vmatprep.subr.bf16.mxu1 %v2761_v2  ;;  %2479 = vmatpush3.bf16.msra.mxu0 %v2669_v4  ;;  %v1166_v54 = vsel %vm3155_vm8, %v1161_v46, 0.0  ;;  %v1167_v56 = vsel %vm3160_vm9, %v1163_v47, 0.0  ;;  %v1429_v57 = vpack.c.bf16 %v1428_v52, %v1427_v51  ;;  %v1339_v3 = vrot.slane %v3089_v42, 6  ;;  %v2688_v4 = vld [vmem:[%s3459_s5 + $0xa8] sm:$0xff]  }
 0x1fe   : > { %2480 = vmatprep.subr.bf16.mxu0 %v2761_v2  ;;  %v1168_v59 = vpack.c.bf16 %v1167_v56, %v1166_v54  ;;  %v1606_v41 = vsel %vm3099_vm4, %v3114_v55, 0.0  ;;  %v2691_v55 = vld [vmem:[%s3459_s5 + $0xf8] sm:$0xff]  }
 0x1ff   : > { %v1340_v42 = vsel %vm1337_vm12, %v1338_v1, %v1339_v3  ;;  %v1342_v6 = vsel %vm1337_vm12, %v1339_v3, %v1341_v0 }
 0x200   : > { %2443 = vmatpush3.bf16.msra.mxu1 %v2670_v5  ;;  %v1604_v5 = vsel %vm1068_vm3, %v1072_v45, %v1603_v62  ;;  %v1346_v9 = vsel %vm3103_vm5, %v1342_v6, 0.0 }
 0x201   : > { %2444 = vmatprep.subr.bf16.mxu1 %v2761_v2  ;;  %2481 = vmatpush3.bf16.msra.mxu0 %v2671_v8  ;;  %v1607_v45 = vsel %vm3103_vm5, %v1604_v5, 0.0  ;;  %v1345_v8 = vsel %vm3099_vm4, %v1340_v42, 0.0 }
 0x202   : > { %2482 = vmatprep.subr.bf16.mxu0 %v2761_v2  ;;  %v1347_v11 = vpack.c.bf16 %v1346_v9, %v1345_v8 }
 0x204   : > { %2445 = vmatpush3.bf16.msra.mxu1 %v2672_v10  ;;  %v1608_v10 = vpack.c.bf16 %v1607_v45, %v1606_v41 }
 0x205   : > { %2446 = vmatprep.subr.bf16.mxu1 %v2761_v2  ;;  %2483 = vmatpush3.bf16.msra.mxu0 %v2673_v19  ;;  %v1689_v19 = vld [vmem:[%s3462_s8 + $0x8] sm:$0xff] }
 0x206   : > { %2500 = vmatprep.subr.bf16.mxu0 %v2761_v2 }
 0x208   : > { %2447 = vmatpush3.bf16.msra.mxu1 %v2674_v24  ;;  %2485 = vmatmul.mubr.msk.bf16.vlgmr.msra.gmra.mxu0 %vm947_vm6, %v1266_v31 }
 0x209   : > { %2464 = vmatprep.subr.bf16.mxu1 %v2761_v2  ;;  %2501 = vmatpush3.bf16.msra.mxu0 %v2675_v29 }
 0x20a   : > { %2508 = vmatprep.mubr.msk.bf16.mxu0 %vm2762_vm0, %v2761_v2  ;;  %2502 = vmatprep.subr.bf16.mxu0 %v2761_v2 }
 0x20b   : > { %2449 = vmatmul.mubr.msk.bf16.vlgmr.msra.gmra.mxu1 %vm947_vm6, %v890_v33 }
 0x20c   : > { %2465 = vmatpush3.bf16.msra.mxu1 %v2676_v32  ;;  %2472 = vmatprep.mubr.msk.bf16.mxu1 %vm2762_vm0, %v2761_v2 }
 0x20d   : > { %2466 = vmatprep.subr.bf16.mxu1 %v2761_v2  ;;  %2503 = vmatpush3.bf16.msra.mxu0 %v2677_v34 }
 0x20e   : > { %2504 = vmatprep.subr.bf16.mxu0 %v2761_v2 }
 0x210   : > { %2467 = vmatpush3.bf16.msra.mxu1 %v2678_v35 }
 0x211   : > { %2468 = vmatprep.subr.bf16.mxu1 %v2761_v2  ;;  %2505 = vmatpush3.bf16.msra.mxu0 %v2679_v36 }
 0x212   : > { %2506 = vmatprep.subr.bf16.mxu0 %v2761_v2 }
 0x214   : > { %2469 = vmatpush3.bf16.msra.mxu1 %v2680_v40 }
 0x215   : > { %2470 = vmatprep.subr.bf16.mxu1 %v2761_v2  ;;  %2507 = vmatpush3.bf16.msra.mxu0 %v2681_v44 }
 0x216   : > { %2524 = vmatprep.subr.bf16.mxu0 %v2761_v2 }
 0x218   : > { %2471 = vmatpush3.bf16.msra.mxu1 %v2682_v48  ;;  %2509 = vmatmul.mubr.msk.bf16.vlgmr.msra.gmra.mxu0 %vm947_vm6, %v1429_v57 }
 0x219   : > { %2488 = vmatprep.subr.bf16.mxu1 %v2761_v2  ;;  %2525 = vmatpush3.bf16.msra.mxu0 %v2683_v53 }
 0x21a   : > { %2532 = vmatprep.mubr.msk.bf16.mxu0 %vm2762_vm0, %v2761_v2  ;;  %2526 = vmatprep.subr.bf16.mxu0 %v2761_v2 }
 0x21b   : > { %2473 = vmatmul.mubr.msk.bf16.vlgmr.msra.gmra.mxu1 %vm947_vm6, %v1168_v59 }
 0x21c   : > { %2489 = vmatpush3.bf16.msra.mxu1 %v2684_v58  ;;  %2496 = vmatprep.mubr.msk.bf16.mxu1 %vm2762_vm0, %v2761_v2 }
 0x21d   : > { %2490 = vmatprep.subr.bf16.mxu1 %v2761_v2  ;;  %2527 = vmatpush3.bf16.msra.mxu0 %v2685_v60 }
 0x21e   : > { %2528 = vmatprep.subr.bf16.mxu0 %v2761_v2 }
 0x220   : > { %2491 = vmatpush3.bf16.msra.mxu1 %v2686_v61 }
 0x221   : > { %2492 = vmatprep.subr.bf16.mxu1 %v2761_v2  ;;  %2529 = vmatpush3.bf16.msra.mxu0 %v2687_v63 }
 0x222   : > { %2530 = vmatprep.subr.bf16.mxu0 %v2761_v2 }
 0x224   : > { %2493 = vmatpush3.bf16.msra.mxu1 %v2688_v4 }
 0x225   : > { %2494 = vmatprep.subr.bf16.mxu1 %v2761_v2  ;;  %2531 = vmatpush3.bf16.msra.mxu0 %v2689_v43 }
 0x226   : > { %2555 = vmatprep.subr.mxu0 %v2761_v2 }
 0x228   : > { %2495 = vmatpush3.bf16.msra.mxu1 %v2690_v7  ;;  %2533 = vmatmul.mubr.msk.bf16.vlgmr.msra.gmra.mxu0 %vm947_vm6, %v1608_v10 }
 0x229   : > { %2512 = vmatprep.subr.bf16.mxu1 %v2761_v2  ;;  %2571 = vmatprep.mubr.msk.f32.mxu0 %vm2762_vm0, %v2761_v2 }
 0x22a   : > { %2556 = vmatpush3.msra.mxu0 %v1695_v13 }
 0x22b   : > { %2497 = vmatmul.mubr.msk.bf16.vlgmr.msra.gmra.mxu1 %vm947_vm6, %v1347_v11  ;;  %2557 = vmatprep.subr.mxu0 %v2761_v2 }
 0x22c   : > { %2513 = vmatpush3.bf16.msra.mxu1 %v2691_v55  ;;  %2520 = vmatprep.mubr.msk.bf16.mxu1 %vm2762_vm0, %v2761_v2 }
 0x22d   : > { %2514 = vmatprep.subr.bf16.mxu1 %v2761_v2  ;;  %2558 = vmatpush3.msra.mxu0 %v1694_v14 }
 0x22e   : > { %2559 = vmatprep.subr.mxu0 %v2761_v2 }
 0x22f   : > { %2560 = vmatpush3.msra.mxu0 %v1693_v15 }
 0x230   : > { %2515 = vmatpush3.bf16.msra.mxu1 %v2692_v49  ;;  %2561 = vmatprep.subr.mxu0 %v2761_v2 }
 0x231   : > { %2516 = vmatprep.subr.bf16.mxu1 %v2761_v2  ;;  %2562 = vmatpush3.msra.mxu0 %v1692_v16 }
 0x232   : > { %2563 = vmatprep.subr.mxu0 %v2761_v2 }
 0x233   : > { %2564 = vmatpush3.msra.mxu0 %v1691_v17 }
 0x234   : > { %2517 = vmatpush3.bf16.msra.mxu1 %v2693_v50  ;;  %2565 = vmatprep.subr.mxu0 %v2761_v2 }
 0x235   : > { %2518 = vmatprep.subr.bf16.mxu1 %v2761_v2  ;;  %2566 = vmatpush3.msra.mxu0 %v1690_v18 }
 0x236   : > { %2567 = vmatprep.subr.mxu0 %v2761_v2 }
 0x237   : > { %2568 = vmatpush3.msra.mxu0 %v1689_v19 }
 0x238   : > { %2519 = vmatpush3.bf16.msra.mxu1 %v2694_v12  ;;  %2569 = vmatprep.subr.mxu0 %v2761_v2 }
 0x239   : > { %2536 = vmatprep.subr.mxu1 %v2761_v2  ;;  %2570 = vmatpush3.msra.mxu0 %v1688_v20 }
 0x23b   : > { %2521 = vmatmul.mubr.msk.bf16.vlgmr.msra.gmra.mxu1 %vm947_vm6, %v3169_v27 }
 0x23c   : > { %2552 = vmatprep.mubr.msk.f32.mxu1 %vm2762_vm0, %v2761_v2  ;;  %2537 = vmatpush3.msra.mxu1 %v1695_v13 }
 0x23d   : > { %2538 = vmatprep.subr.mxu1 %v2761_v2 }
 0x23e   : > { %2539 = vmatpush3.msra.mxu1 %v1694_v14 }
 0x23f   : > { %2540 = vmatprep.subr.mxu1 %v2761_v2 }
 0x240   : > { %2541 = vmatpush3.msra.mxu1 %v1693_v15 }
 0x241   : > { %2542 = vmatprep.subr.mxu1 %v2761_v2 }
 0x242   : > { %2543 = vmatpush3.msra.mxu1 %v1692_v16 }
 0x243   : > { %2544 = vmatprep.subr.mxu1 %v2761_v2 }
 0x244   : > { %2545 = vmatpush3.msra.mxu1 %v1691_v17 }
 0x245   : > { %2546 = vmatprep.subr.mxu1 %v2761_v2 }
 0x246   : > { %2547 = vmatpush3.msra.mxu1 %v1690_v18 }
 0x247   : > { %2548 = vmatprep.subr.mxu1 %v2761_v2 }
 0x248   : > { %2549 = vmatpush3.msra.mxu1 %v1689_v19 }
 0x249   : > { %2550 = vmatprep.subr.mxu1 %v2761_v2 }
 0x24a   : > { %2551 = vmatpush3.msra.mxu1 %v1688_v20 }
 0x24b   : > { %2574 = vmatprep.subr.mxu1 %v2761_v2 }
 0x2b8   : > { %v1149_v21 = vpop.f32.mrf.mxu0 }
 0x2ba   : > { %v2462_v23 = vpop.f32.mrf.mxu0 }
 0x2bb   : > { %v985_v24 = vpop.f32.mrf.mxu1 }
 0x2bc   : > { %v1152_v25 = vpop.f32.mrf.mxu0 }
 0x2bd   : > { %v2438_v26 = vpop.f32.mrf.mxu1 }
 0x2be   : > { %v2463_v27 = vpop.f32.mrf.mxu0 }
 0x2bf   : > { %v988_v28 = vpop.f32.mrf.mxu1 }
 0x2c1   : > { %v2439_v29 = vpop.f32.mrf.mxu1 }
 0x2c8   : > { %v1328_v30 = vpop.f32.mrf.mxu0 }
 0x2ca   : > { %v2486_v31 = vpop.f32.mrf.mxu0 }
 0x2cb   : > { %v1053_v32 = vpop.f32.mrf.mxu1 }
 0x2cc   : > { %v1331_v33 = vpop.f32.mrf.mxu0  ;;  %v1054_v53 = vadd.f32 %v1053_v32, %v985_v24  ;;  %v1928_v32 = vld [vmem:[%s3463_s9 + $0x38] sm:$0xff] }
 0x2cd   : > { %v2450_v34 = vpop.f32.mrf.mxu1 }
 0x2ce   : > { %v2487_v35 = vpop.f32.mrf.mxu0  ;;  %v1156_v60 = vadd.f32 %v1149_v21, %v1054_v53  ;;  %v1926_v34 = vld [vmem:[%s3463_s9 + $0x28] sm:$0xff] }
 0x2cf   : > { %v1056_v36 = vpop.f32.mrf.mxu1  ;;  %v1925_v35 = vld [vmem:[%s3463_s9 + $0x20] sm:$0xff] }
 0x2d0   : > { %v1057_v59 = vadd.f32 %v1056_v36, %v988_v28  ;;  %v1924_v36 = vld [vmem:[%s3463_s9 + $0x18] sm:$0xff] }
 0x2d1   : > { %v2451_v37 = vpop.f32.mrf.mxu1 }
 0x2d2   : > { %v1157_v1 = vadd.f32 %v1152_v25, %v1057_v59  ;;  %v1923_v37 = vld [vmem:[%s3463_s9 + $0x10] sm:$0xff] }
 0x2d8   : > { %v1500_v38 = vpop.f32.mrf.mxu0 }
 0x2da   : > { %v2510_v39 = vpop.f32.mrf.mxu0 }
 0x2db   : > { %v1239_v40 = vpop.f32.mrf.mxu1  ;;  %v1921_v39 = vld [vmem:[%s3463_s9] sm:$0xff] }
 0x2dc   : > { %v1503_v44 = vpop.f32.mrf.mxu0  ;;  %v1246_v63 = vadd.f32 %v1239_v40, %v1156_v60  ;;  %v1901_v60 = vpop.permute.xlu0 %1900 }
 0x2dd   : > { %v2474_v46 = vpop.f32.mrf.mxu1 }
 0x2de   : > { %v2511_v47 = vpop.f32.mrf.mxu0  ;;  %v1335_v4 = vadd.f32 %v1328_v30, %v1246_v63 }
 0x2df   : > { %v1242_v48 = vpop.f32.mrf.mxu1 }
 0x2e0   : > { %v1247_v3 = vadd.f32 %v1242_v48, %v1157_v1 }
 0x2e1   : > { %v2475_v51 = vpop.f32.mrf.mxu1 }
 0x2e2   : > { %v1336_v43 = vadd.f32 %v1331_v33, %v1247_v3  ;;  %v1927_v33 = vld [vmem:[%s3463_s9 + $0x30] sm:$0xff] }
 0x2e8   : > { %v1679_v52 = vpop.f32.mrf.mxu0 }
 0x2ea   : > { %v2534_v54 = vpop.f32.mrf.mxu0 }
 0x2eb   : > { %v1418_v56 = vpop.f32.mrf.mxu1 }
 0x2ec   : > { %v1682_v57 = vpop.f32.mrf.mxu0  ;;  %v1425_v5 = vadd.f32 %v1418_v56, %v1335_v4 }
 0x2ed   : > { %v2498_v58 = vpop.f32.mrf.mxu1 }
 0x2ee   : > { %v2535_v61 = vpop.f32.mrf.mxu0  ;;  %v1507_v6 = vadd.f32 %v1500_v38, %v1425_v5  ;;  %v1922_v38 = vld [vmem:[%s3463_s9 + $0x8] sm:$0xff] }
 0x2ef   : > { %v1421_v62 = vpop.f32.mrf.mxu1  ;;  %v2213_v61 = vld [vmem:[%s3460_s6] ss:$0 sm:$0xff] }
 0x2f0   : > { %v1426_v42 = vadd.f32 %v1421_v62, %v1336_v43  ;;  %v1903_v43 = vpop.permute.xlu0 %1902 }
 0x2f1   : > { %v2499_v0 = vpop.f32.mrf.mxu1 }
 0x2f2   : > { %v1508_v9 = vadd.f32 %v1503_v44, %v1426_v42  ;;  %v2214_v0 = vld [vmem:[%s3461_s7] ss:$0 sm:$0xff] }
 0x2fb   : > { %v1593_v7 = vpop.f32.mrf.mxu1 }
 0x2fc   : > { %v1600_v41 = vadd.f32 %v1593_v7, %v1507_v6 }
 0x2fd   : > { %v2522_v45 = vpop.f32.mrf.mxu1 }
 0x2fe   : > { %v3349_v8 = vadd.f32 %v1679_v52, %v1600_v41 }
 0x2ff   : > { %v1596_v10 = vpop.f32.mrf.mxu1 }
 0x300   : > { %v1601_v55 = vadd.f32 %v1596_v10, %v1508_v9  ;;  %v1707_v49 = vmul.f32 %v3349_v8, %v3349_v8  ;;  %v1698_v12 = vsel %vm947_vm6, %v3349_v8, 0.0 }
 0x301   : > { %v2523_v11 = vpop.f32.mrf.mxu1 }
 0x302   : > { %v3353_v50 = vadd.f32 %v1682_v57, %v1601_v55  ;;  %v1709_v16 = vsel %vm947_vm6, %v1707_v49, 0.0 }
 0x304   : > { %v1699_v13 = vsel %vm947_vm6, %v3353_v50, 0.0  ;;  %v1708_v14 = vmul.f32 %v3353_v50, %v3353_v50 }
 0x305   : > { %v1700_v15 = vadd.f32 %v1699_v13, %v1698_v12  ;;  %v1929_v13 = vld [vmem:[%s3464_s10] sm:$0x1] }
 0x306   : > { %v1710_v17 = vsel %vm947_vm6, %v1708_v14, 0.0 }
 0x307   : > { %v1701_v18 = vrot.slane %v1700_v15, 4  ;;  %v1711_v19 = vadd.f32 %v1710_v17, %v1709_v16 }
 0x309   : > { %v1702_v20 = vadd.f32 %v1701_v18, %v1700_v15  ;;  %v1712_v21 = vrot.slane %v1711_v19, 4 }
 0x30b   : > { %v1703_v23 = vrot.slane %v1702_v20, 2  ;;  %v1713_v24 = vadd.f32 %v1712_v21, %v1711_v19 }
 0x30d   : > { %v1704_v25 = vadd.f32 %v1703_v23, %v1702_v20  ;;  %v1714_v26 = vrot.slane %v1713_v24, 2 }
 0x30f   : > { %v1705_v27 = vrot.slane %v1704_v25, 1  ;;  %v1715_v28 = vadd.f32 %v1714_v26, %v1713_v24 }
 0x311   : > { %v1706_v29 = vadd.f32 %v1705_v27, %v1704_v25  ;;  %v1716_v30 = vrot.slane %v1715_v28, 1 }
 0x313   : > { %2553 = vmatmul.mubr.msk.f32.vlgmr.msra.gmra.mxu1 %vm947_vm6, %v1706_v29  ;;  %v1717_v31 = vadd.f32 %v1716_v30, %v1715_v28 }
 0x314   : > { %2590 = vmatprep.mubr.msk.f32.mxu1 %vm2762_vm0, %v2761_v2  ;;  %2575 = vmatpush3.msra.mxu1 %v1928_v32 }
 0x315   : > { %2572 = vmatmul.mubr.msk.f32.vlgmr.msra.gmra.mxu0 %vm947_vm6, %v1717_v31  ;;  %2576 = vmatprep.subr.mxu1 %v2761_v2 }
 0x316   : > { %2577 = vmatpush3.msra.mxu1 %v1927_v33 }
 0x317   : > { %2578 = vmatprep.subr.mxu1 %v2761_v2 }
 0x318   : > { %2579 = vmatpush3.msra.mxu1 %v1926_v34 }
 0x319   : > { %2580 = vmatprep.subr.mxu1 %v2761_v2 }
 0x31a   : > { %2581 = vmatpush3.msra.mxu1 %v1925_v35 }
 0x31b   : > { %2582 = vmatprep.subr.mxu1 %v2761_v2 }
 0x31c   : > { %2583 = vmatpush3.msra.mxu1 %v1924_v36 }
 0x31d   : > { %2584 = vmatprep.subr.mxu1 %v2761_v2 }
 0x31e   : > { %2585 = vmatpush3.msra.mxu1 %v1923_v37 }
 0x31f   : > { %2586 = vmatprep.subr.mxu1 %v2761_v2 }
 0x320   : > { %2587 = vmatpush3.msra.mxu1 %v1922_v38 }
 0x321   : > { %2588 = vmatprep.subr.mxu1 %v2761_v2 }
 0x322   : > { %2589 = vmatpush3.msra.mxu1 %v1921_v39 }
 0x3d3   : > { %v1787_v40 = vpop.f32.mrf.mxu1 }
 0x3d4   : > { %v1791_v44 = vmul.f32 0.00390625, %v1787_v40 }
 0x3d5   : > { %v2554_v46 = vpop.f32.mrf.mxu1  ;;  %v1861_v47 = vpop.f32.mrf.mxu0 }
 0x3d6   : > { %v1866_v48 = vmul.f32 %v1791_v44, %v1791_v44  ;;  %v1865_v51 = vmul.f32 0.00390625, %v1861_v47  ;;  %v1873_v56 = vrot.slane %v1791_v44, %v3072_v22 }
 0x3d7   : > { %v2573_v52 = vpop.f32.mrf.mxu0 }
 0x3d8   : > { %v1867_v53 = vsub.f32 %v1865_v51, %v1866_v48  ;;  %v1874_v58 = vsub.f32 %v3349_v8, %v1873_v56  ;;  %v1875_v59 = vsub.f32 %v3353_v50, %v1873_v56 }
 0x3da   : > { %v1868_v54 = vadd.f32 1e-05, %v1867_v53 }
 0x3dc   : > { %2697 = vrsqrt.f32 %v1868_v54 }
 0x3e9   : > { %v2698_v57 = vpop.eup %2697 }
 0x3ea   : > { %v1879_v2 = vrot.slane %v2698_v57, %v3072_v22 }
 0x3ec   : > { %v1880_v62 = vmul.f32 %v1879_v2, %v1874_v58  ;;  %v1881_v63 = vmul.f32 %v1879_v2, %v1875_v59 }
 0x3ee   : > { %v1888_v1 = vmul.f32 %v2213_v61, %v1880_v62  ;;  %v1889_v3 = vmul.f32 %v2213_v61, %v1881_v63 }
 0x3f0   : > { %v1896_v4 = vadd.f32 %v2214_v0, %v1888_v1  ;;  %v1897_v5 = vadd.f32 %v2214_v0, %v1889_v3 }
 0x3f2   : > { %v1906_v42 = vadd.f32 %v1901_v60, %v1896_v4  ;;  %v1907_v6 = vadd.f32 %v1903_v43, %v1897_v5 }
 0x3f4   : > { %v1908_v22 = vmax.f32 %v1906_v42, 0.0  ;;  %v1909_v7 = vmax.f32 %v1907_v6, 0.0 }
 0x3f6   : > { %v1910_v41 = vsel %vm947_vm6, %v1908_v22, 0.0  ;;  %v1911_v45 = vsel %vm947_vm6, %v1909_v7, 0.0 }
 0x3f7   : > { %v1912_v8 = vadd.f32 %v1911_v45, %v1910_v41 }
 0x3f9   : > { %v1913_v9 = vrot.slane %v1912_v8, 4 }
 0x3fb   : > { %v1914_v10 = vadd.f32 %v1913_v9, %v1912_v8 }
 0x3fd   : > { %v1915_v55 = vrot.slane %v1914_v10, 2 }
 0x3ff   : > { %v1916_v11 = vadd.f32 %v1915_v55, %v1914_v10 }
 0x401   : > { %v1917_v49 = vrot.slane %v1916_v11, 1 }
 0x403   : > { %v1918_v50 = vadd.f32 %v1917_v49, %v1916_v11 }
 0x405   : > { %v1920_v12 = vmul.f32 0.0625, %v1918_v50 }
 0x407   : > { %2591 = vmatmul.mubr.msk.f32.vlgmr.msra.gmra.mxu1 %vm947_vm6, %v1920_v12 }
 0x4c7   : > { %v1999_v14 = vpop.f32.mrf.mxu1 }
 0x4c8   : > { %v2000_v15 = vadd.f32 %v1999_v14, %v1929_v13 }
 0x4c9   : > { %v2592_v16 = vpop.f32.mrf.mxu1 }
 0x4ca   : > { %2004 = vst.msk [vmem:[%s378_s24] sm:$0x1] %vm2003_vm13, %v2000_v15 }
 0x4cb   : > { %2712 = shalt.err (!%p2709_p3)
}
 0x4cc   : > { %s2713_s29 = scalar_lea.hbm %s3419_s26, 16  ;;  %s2717_s24 = scalar_lea.hbm %s3465_s11, 32 }
 0x4cd   : > { %p2714_p4 = scmp.ne.s32.totalorder %s3419_s26, %s2713_s29  ;;  %p2718_p9 = scmp.lt.s32.totalorder %s3419_s26, %s3465_s11 }
 0x4ce   : > { %p2719_p10 = scmp.lt.s32.totalorder %s2717_s24, %s2713_s29 }
 0x4cf   : > { %p2715_p7 = pnand %p2714_p4, %p2864_p5 }
 0x4d0   : > { %p2720_p11 = por %p2719_p10, %p2718_p9 }
 0x4d1   : > { %p2716_p8 = pneg %p2715_p7 }
 0x4d3   : > { %p2721_p12 = pnand %p2720_p11, %p2716_p8 }
 0x4d5   : > { %2724 = shalt.err (!%p2721_p12)
}
 0x4d6   : > { %2594 = dma.vmem_to_hbm [thread:$0]  (%p2864_p5), %s2019_s12, 16, %s3419_s26, %s2006_s15  }
 0x4d7 PF: > { %p2600_p13 = scmp.ge.s32.totalorder %s2759_s20, 2  ;;  %s2030_s16 = sand.u32 1, %s2747_s17  }
 0x4d8   : > { %s2031_s21 = scalar_lea.sflag [#allocation3], %s2030_s16 }
 0x4d9   : > { %p2597_p0 = pnand %p2600_p13, %p2868_p6 }
 0x4db   : > { %p2598_p1 = pneg %p2597_p0 }
 0x4dd   : > { %2742 = dma.done.wait (%p2598_p1), %s2031_s21, 16  }
 0x4de   : > { %2744 = vsyncadd (%p2598_p1), %s2031_s21, 4294967280  ;;  %s3479_s22 = sld [smem:[#allocation5_spill]]  ;;  %p21_p2 = scmp.ge.s32.totalorder %s2851_s23, 4  }
 0x4df   : > { %s3480_s19 = sld [smem:[#allocation6_spill]]  ;;  %s3481_s17 = smov %s2751_s18 }
 0x4e0   : > { %s3483_s20 = smov %s2851_s23  ;;  %23 = sbr.rel (!%p21_p2) target bundleno = 3 (0x3), region = 107 }
 0x4e4   : > { %s3482_s18 = smov %s3479_s22 }
 0x4e5   :  { %2035 = vsyncpa [#allocation3], 1 }
 0x4e6   :  { %2037 = vsyncpa [#allocation3 + $0x1], 1 }

</bundles_post_ra>
